<compile_context>
chip_gen: v7x
topology: tpu7x:2x2x1
jax: 0.10.0
libtpu: 0.0.40
codegen_flags: <defaults>
</compile_context>

<pallas_src>
import functools

import jax
import jax.numpy as jnp
from jax.experimental import pallas as pl
from jax.experimental.pallas import tpu as pltpu


# ----------------------------------------------------------------------------
# In-kernel math helpers
# ----------------------------------------------------------------------------
def _erf(x):
    # Abramowitz & Stegun 7.1.26 rational approximation of erf (max abs err
    # ~1.5e-7, float32-level).  Uses only exp/mul/add/where.
    a1, a2, a3, a4, a5 = (0.254829592, -0.284496736, 1.421413741,
                          -1.453152027, 1.061405429)
    p = 0.3275911
    ax = jnp.abs(x)
    t = 1.0 / (1.0 + p * ax)
    poly = ((((a5 * t + a4) * t + a3) * t + a2) * t + a1) * t
    y = 1.0 - poly * jnp.exp(-ax * ax)
    return jnp.where(x >= 0, y, -y)


def _gelu_exact(x):
    # PyTorch nn.GELU() default (exact / erf formulation).
    return 0.5 * x * (1.0 + _erf(x * 0.7071067811865475))


def _gn_gelu(y, gamma, beta, num_groups, eps):
    """GroupNorm (biased variance, eval semantics) + exact GELU.

    y: (N, C) f32; gamma/beta: (1, C).  Single pass over the data (sum and
    sum-of-squares), then one fused per-channel scale/shift apply.
    """
    n_rows, c = y.shape
    cpg = c // num_groups
    cnt = float(n_rows * cpg)

    s_c = jnp.sum(y, axis=0, keepdims=True)        # (1, C)
    ss_c = jnp.sum(y * y, axis=0, keepdims=True)   # (1, C)

    ones = jnp.ones((1, cpg), jnp.float32)
    scales, shifts = [], []
    for g in range(num_groups):
        lo, hi = g * cpg, (g + 1) * cpg
        mu = jnp.sum(s_c[:, lo:hi]) / cnt
        var = jnp.sum(ss_c[:, lo:hi]) / cnt - mu * mu
        inv = jax.lax.rsqrt(jnp.maximum(var, 0.0) + eps)
        scales.append(ones * inv)
        shifts.append(ones * (-mu * inv))
    scale = jnp.concatenate(scales, axis=1) * gamma           # (1, C)
    shift = jnp.concatenate(shifts, axis=1) * gamma + beta    # (1, C)
    return _gelu_exact(y * scale + shift)


def _conv_gn_gelu_stage(pad_ref, x_hwc, w_ref, b_ref, g_ref, bt_ref,
                        num_groups, eps):
    """3x3 conv (stride 1, pad 1) as ONE im2col matmul, then GroupNorm+GELU.

    pad_ref: VMEM scratch (h+2, w+2, c_in); x_hwc: (h, w, c_in) f32 value;
    w_ref: (9*c_in, c_out) im2col weights.  Returns (h*w, c_out) f32.
    """
    h, w_sp, c_in = x_hwc.shape

    # Zero-padded activation in VMEM scratch (padding stays on-chip).
    pad_ref[...] = jnp.zeros_like(pad_ref)
    pad_ref[1:h + 1, 1:w_sp + 1, :] = x_hwc

    # im2col: 9 shifted slices concatenated along lanes -> K = 9*c_in matmul.
    cols = []
    for dh in range(3):
        for dw in range(3):
            cols.append(
                pad_ref[dh:dh + h, dw:dw + w_sp, :].reshape(h * w_sp, c_in))
    patches = jnp.concatenate(cols, axis=1)                   # (h*w, 9*c_in)

    y = jnp.dot(patches, w_ref[...], preferred_element_type=jnp.float32)
    y = y + b_ref[...]                                        # (h*w, c_out)
    return _gn_gelu(y, g_ref[...], bt_ref[...], num_groups, eps)


# ----------------------------------------------------------------------------
# Fused EncoderBlockv2 kernel: all three stages + pixel-unshuffle per batch
# element, entirely in VMEM.
# ----------------------------------------------------------------------------
def _encoder_block_kernel(x_ref, sel_ref,
                          w1_ref, b1_ref, g1_ref, bt1_ref,
                          w2_ref, b2_ref, g2_ref, bt2_ref,
                          w3_ref, b3_ref, g3_ref, bt3_ref,
                          out_ref,
                          pad1_ref, pad2_ref, pad3_ref,
                          *, H, W, Cin, Cout, num_groups, eps):
    H2, W2 = H // 2, W // 2

    x = x_ref[0].astype(jnp.float32)                          # (H, W, Cin)

    # Stage 1 and Stage 2
    y1 = _conv_gn_gelu_stage(pad1_ref, x, w1_ref, b1_ref, g1_ref, bt1_ref,
                             num_groups, eps)                 # (H*W, Cout)
    y2 = _conv_gn_gelu_stage(pad2_ref, y1.reshape(H, W, Cout),
                             w2_ref, b2_ref, g2_ref, bt2_ref,
                             num_groups, eps)                 # (H*W, Cout)

    # Pixel unshuffle 'b c (h p1) (w p2) -> b (c p1 p2) h w' as a row-gather
    # matmul against a constant 0/1 selection matrix + lane concat.  Channel
    # order here is k*Cout + c with k = 2*p1 + p2; the matching input-channel
    # permutation of the stage-3 weights is folded in by the wrapper (exact).
    gathered = jnp.dot(sel_ref[...], y2,
                       preferred_element_type=jnp.float32)    # (4*H2*W2, Cout)
    n = H2 * W2
    z = jnp.concatenate(
        [gathered[k * n:(k + 1) * n, :] for k in range(4)], axis=1)
    # z: (H2*W2, 4*Cout)

    # Stage 3
    y3 = _conv_gn_gelu_stage(pad3_ref, z.reshape(H2, W2, 4 * Cout),
                             w3_ref, b3_ref, g3_ref, bt3_ref,
                             num_groups, eps)                 # (H2*W2, Cout)

    out_ref[...] = y3.reshape(1, H2, W2, Cout).astype(out_ref.dtype)


def encoder_block_v2(x_nchw, params, out_chs, eps=1e-5):
    """Fused EncoderBlockv2 forward (NCHW in, NCHW out), one pallas_call."""
    B, Cin, H, W = x_nchw.shape
    Cout = out_chs
    num_groups = out_chs // 4
    H2, W2 = H // 2, W // 2

    x_nhwc = jnp.transpose(x_nchw, (0, 2, 3, 1)).astype(jnp.float32)

    # Weights to im2col layout: (Cout, Cin_s, 3, 3) -> (9*Cin_s, Cout),
    # row = (kh*3 + kw)*Cin_s + cin (matches the patch-column order).
    def im2col_w(w):
        co, ci = w.shape[0], w.shape[1]
        return jnp.transpose(w, (2, 3, 1, 0)).reshape(9 * ci, co).astype(jnp.float32)

    w1 = im2col_w(params["w1"])
    w2 = im2col_w(params["w2"])
    # Permute conv3 input channels from einops '(c p1 p2)' to kernel order
    # '(p1 p2 c)' (= k*Cout + c), then to im2col layout.
    w3p = params["w3"].reshape(Cout, Cout, 2, 2, 3, 3)
    w3p = jnp.transpose(w3p, (0, 2, 3, 1, 4, 5)).reshape(Cout, 4 * Cout, 3, 3)
    w3 = im2col_w(w3p)

    def vec(v):
        return v.reshape(1, Cout).astype(jnp.float32)

    b1, g1, bt1 = vec(params["b1"]), vec(params["g1"]), vec(params["bt1"])
    b2, g2, bt2 = vec(params["b2"]), vec(params["g2"]), vec(params["bt2"])
    b3, g3, bt3 = vec(params["b3"]), vec(params["g3"]), vec(params["bt3"])

    # Constant row-selection matrix for the pixel-unshuffle: row
    # r = k*(H2*W2) + h2*W2 + w2 (k = 2*p1 + p2) picks source row
    # (2*h2 + p1)*W + (2*w2 + p2) of the flattened stage-2 output.
    r = jnp.arange(4 * H2 * W2)
    k = r // (H2 * W2)
    rem = r % (H2 * W2)
    h2 = rem // W2
    w2c = rem % W2
    p1 = k // 2
    p2 = k % 2
    src = (2 * h2 + p1) * W + (2 * w2c + p2)
    sel = jax.nn.one_hot(src, H * W, dtype=jnp.float32)       # (4*H2*W2, H*W)

    kernel = functools.partial(
        _encoder_block_kernel, H=H, W=W, Cin=Cin, Cout=Cout,
        num_groups=num_groups, eps=eps)

    def full_spec(shape):  # 2-D arrays broadcast across the batch grid
        return pl.BlockSpec(shape, lambda b: (0, 0))

    out_nhwc = pl.pallas_call(
        kernel,
        out_shape=jax.ShapeDtypeStruct((B, H2, W2, Cout), jnp.float32),
        grid=(B,),
        in_specs=[
            pl.BlockSpec((1, H, W, Cin), lambda b: (b, 0, 0, 0)),
            full_spec((4 * H2 * W2, H * W)),
            full_spec((9 * Cin, Cout)),
            full_spec((1, Cout)), full_spec((1, Cout)), full_spec((1, Cout)),
            full_spec((9 * Cout, Cout)),
            full_spec((1, Cout)), full_spec((1, Cout)), full_spec((1, Cout)),
            full_spec((9 * 4 * Cout, Cout)),
            full_spec((1, Cout)), full_spec((1, Cout)), full_spec((1, Cout)),
        ],
        out_specs=pl.BlockSpec((1, H2, W2, Cout), lambda b: (b, 0, 0, 0)),
        scratch_shapes=[
            pltpu.VMEM((H + 2, W + 2, Cin), jnp.float32),
            pltpu.VMEM((H + 2, W + 2, Cout), jnp.float32),
            pltpu.VMEM((H2 + 2, W2 + 2, 4 * Cout), jnp.float32),
        ],
        compiler_params=pltpu.CompilerParams(
            dimension_semantics=("parallel",)),
    )(x_nhwc, sel, w1, b1, g1, bt1, w2, b2, g2, bt2, w3, b3, g3, bt3)

    return jnp.transpose(out_nhwc, (0, 3, 1, 2))              # NHWC -> NCHW


# ----------------------------------------------------------------------------
# Pure-JAX/XLA reference (for a numerical self-check) and params
# ----------------------------------------------------------------------------
def _ref_forward(x_nchw, params, out_chs, eps=1e-5):
    def conv(x, w, b):
        y = jax.lax.conv_general_dilated(
            x, w, window_strides=(1, 1), padding=((1, 1), (1, 1)),
            dimension_numbers=("NCHW", "OIHW", "NCHW"))
        return y + b[None, :, None, None]

    def gn(x, gamma, beta, groups):
        B, C, H, W = x.shape
        xg = x.reshape(B, groups, (C // groups) * H * W)
        mu = jnp.mean(xg, axis=2, keepdims=True)
        var = jnp.mean((xg - mu) ** 2, axis=2, keepdims=True)
        xn = ((xg - mu) / jnp.sqrt(var + eps)).reshape(B, C, H, W)
        return xn * gamma[None, :, None, None] + beta[None, :, None, None]

    def gelu(x):
        return 0.5 * x * (1.0 + jax.lax.erf(x * 0.7071067811865475))

    groups = out_chs // 4
    x = gelu(gn(conv(x_nchw, params["w1"], params["b1"]),
                params["g1"], params["bt1"], groups))
    x = gelu(gn(conv(x, params["w2"], params["b2"]),
                params["g2"], params["bt2"], groups))
    B, C, H, W = x.shape
    x = x.reshape(B, C, H // 2, 2, W // 2, 2)
    x = jnp.transpose(x, (0, 1, 3, 5, 2, 4)).reshape(B, 4 * C, H // 2, W // 2)
    x = gelu(gn(conv(x, params["w3"], params["b3"]),
                params["g3"], params["bt3"], groups))
    return x


def init_params(key, in_chs, out_chs):
    ks = jax.random.split(key, 6)
    scale = 0.1
    return {
        # Conv2d weights in PyTorch layout (Cout, Cin, kh, kw)
        "w1": scale * jax.random.normal(ks[0], (out_chs, in_chs, 3, 3), jnp.float32),
        "b1": scale * jax.random.normal(ks[1], (out_chs,), jnp.float32),
        "w2": scale * jax.random.normal(ks[2], (out_chs, out_chs, 3, 3), jnp.float32),
        "b2": scale * jax.random.normal(ks[3], (out_chs,), jnp.float32),
        "w3": scale * jax.random.normal(ks[4], (out_chs, 4 * out_chs, 3, 3), jnp.float32),
        "b3": scale * jax.random.normal(ks[5], (out_chs,), jnp.float32),
        # GroupNorm affine params (PyTorch default init)
        "g1": jnp.ones((out_chs,), jnp.float32),
        "bt1": jnp.zeros((out_chs,), jnp.float32),
        "g2": jnp.ones((out_chs,), jnp.float32),
        "bt2": jnp.zeros((out_chs,), jnp.float32),
        "g3": jnp.ones((out_chs,), jnp.float32),
        "bt3": jnp.zeros((out_chs,), jnp.float32),
    }


if __name__ == "__main__":
    B, in_chs, out_chs, H, W = 2, 4, 8, 16, 16

    key = jax.random.PRNGKey(0)
    k_x, k_p = jax.random.split(key)
    x = jax.random.normal(k_x, (B, in_chs, H, W), jnp.float32)   # NCHW input
    params = init_params(k_p, in_chs, out_chs)

    out = encoder_block_v2(x, params, out_chs)
    out = jax.block_until_ready(out)

    expected_shape = (B, out_chs, H // 2, W // 2)
    assert out.shape == expected_shape, (out.shape, expected_shape)
    assert bool(jnp.all(jnp.isfinite(out)))

    # Numerical self-check vs a pure-JAX reference (loose tolerance: default
    # MXU matmul precision vs XLA conv, polynomial erf vs exact erf).
    ref = jax.block_until_ready(_ref_forward(x, params, out_chs))
    max_err = float(jnp.max(jnp.abs(out - ref)))
    assert max_err < 5e-2, f"max abs error vs reference: {max_err}"

    print("KERNEL_OK")
</pallas_src>

<mosaic_0001>
module attributes {stable_mosaic.version = 11 : i64} {
  func.func @_encoder_block_kernel(%arg0: i32, %arg1: memref<1x16x16x4xf32, #tpu.memory_space<vmem>>, %arg2: memref<256x256xf32, #tpu.memory_space<vmem>>, %arg3: memref<36x8xf32, #tpu.memory_space<vmem>>, %arg4: memref<1x8xf32, #tpu.memory_space<vmem>>, %arg5: memref<1x8xf32, #tpu.memory_space<vmem>>, %arg6: memref<1x8xf32, #tpu.memory_space<vmem>>, %arg7: memref<72x8xf32, #tpu.memory_space<vmem>>, %arg8: memref<1x8xf32, #tpu.memory_space<vmem>>, %arg9: memref<1x8xf32, #tpu.memory_space<vmem>>, %arg10: memref<1x8xf32, #tpu.memory_space<vmem>>, %arg11: memref<288x8xf32, #tpu.memory_space<vmem>>, %arg12: memref<1x8xf32, #tpu.memory_space<vmem>>, %arg13: memref<1x8xf32, #tpu.memory_space<vmem>>, %arg14: memref<1x8xf32, #tpu.memory_space<vmem>>, %arg15: memref<1x8x8x8xf32, #tpu.memory_space<vmem>>, %arg16: memref<18x18x4xf32, #tpu.memory_space<vmem>>, %arg17: memref<18x18x8xf32, #tpu.memory_space<vmem>>, %arg18: memref<10x10x32xf32, #tpu.memory_space<vmem>>) attributes {dimension_semantics = [#tpu.dimension_semantics<parallel>], iteration_bounds = array<i64: 2>, scalar_prefetch = 0 : i64, scratch_operands = 3 : i64, tpu.core_type = #tpu.core_type<tc>, window_params = [{transform_indices = @transform_0, window_bounds = array<i64: 1, 16, 16, 4>}, {pipeline_mode = #tpu.pipeline_mode<synchronous>, transform_indices = @transform_1, window_bounds = array<i64: 256, 256>}, {pipeline_mode = #tpu.pipeline_mode<synchronous>, transform_indices = @transform_2, window_bounds = array<i64: 36, 8>}, {pipeline_mode = #tpu.pipeline_mode<synchronous>, transform_indices = @transform_3, window_bounds = array<i64: 1, 8>}, {pipeline_mode = #tpu.pipeline_mode<synchronous>, transform_indices = @transform_4, window_bounds = array<i64: 1, 8>}, {pipeline_mode = #tpu.pipeline_mode<synchronous>, transform_indices = @transform_5, window_bounds = array<i64: 1, 8>}, {pipeline_mode = #tpu.pipeline_mode<synchronous>, transform_indices = @transform_6, window_bounds = array<i64: 72, 8>}, {pipeline_mode = #tpu.pipeline_mode<synchronous>, transform_indices = @transform_7, window_bounds = array<i64: 1, 8>}, {pipeline_mode = #tpu.pipeline_mode<synchronous>, transform_indices = @transform_8, window_bounds = array<i64: 1, 8>}, {pipeline_mode = #tpu.pipeline_mode<synchronous>, transform_indices = @transform_9, window_bounds = array<i64: 1, 8>}, {pipeline_mode = #tpu.pipeline_mode<synchronous>, transform_indices = @transform_10, window_bounds = array<i64: 288, 8>}, {pipeline_mode = #tpu.pipeline_mode<synchronous>, transform_indices = @transform_11, window_bounds = array<i64: 1, 8>}, {pipeline_mode = #tpu.pipeline_mode<synchronous>, transform_indices = @transform_12, window_bounds = array<i64: 1, 8>}, {pipeline_mode = #tpu.pipeline_mode<synchronous>, transform_indices = @transform_13, window_bounds = array<i64: 1, 8>}, {transform_indices = @transform_14, window_bounds = array<i64: 1, 8, 8, 8>}]} {
    %c0 = arith.constant 0 : index
    %c0_0 = arith.constant 0 : index
    %c0_1 = arith.constant 0 : index
    %c0_2 = arith.constant 0 : index
    %0 = vector.load %arg1[%c0, %c0_0, %c0_1, %c0_2] : memref<1x16x16x4xf32, #tpu.memory_space<vmem>>, vector<1x16x16x4xf32>
    %1 = vector.shape_cast %0 : vector<1x16x16x4xf32> to vector<16x16x4xf32>
    %cst = arith.constant 0.000000e+00 : f32
    %2 = vector.broadcast %cst : f32 to vector<18x18x4xf32>
    %c0_3 = arith.constant 0 : index
    %c0_4 = arith.constant 0 : index
    %c0_5 = arith.constant 0 : index
    %3 = vector.load %arg16[%c0_3, %c0_4, %c0_5] : memref<18x18x4xf32, #tpu.memory_space<vmem>>, vector<18x18x4xf32>
    tpu.vector_store %arg16[%c0_3, %c0_4, %c0_5], %2 {strides = array<i32>} : memref<18x18x4xf32, #tpu.memory_space<vmem>>, vector<18x18x4xf32>,
    %c1 = arith.constant 1 : index
    %c1_6 = arith.constant 1 : index
    %c0_7 = arith.constant 0 : index
    %4 = vector.load %arg16[%c1, %c1_6, %c0_7] : memref<18x18x4xf32, #tpu.memory_space<vmem>>, vector<16x16x4xf32>
    tpu.vector_store %arg16[%c1, %c1_6, %c0_7], %1 {strides = array<i32>} : memref<18x18x4xf32, #tpu.memory_space<vmem>>, vector<16x16x4xf32>,
    %c0_8 = arith.constant 0 : index
    %c0_9 = arith.constant 0 : index
    %c0_10 = arith.constant 0 : index
    %5 = vector.load %arg16[%c0_8, %c0_9, %c0_10] : memref<18x18x4xf32, #tpu.memory_space<vmem>>, vector<16x16x4xf32>
    %6 = vector.shape_cast %5 : vector<16x16x4xf32> to vector<256x4xf32>
    %c0_11 = arith.constant 0 : index
    %c1_12 = arith.constant 1 : index
    %c0_13 = arith.constant 0 : index
    %7 = vector.load %arg16[%c0_11, %c1_12, %c0_13] : memref<18x18x4xf32, #tpu.memory_space<vmem>>, vector<16x16x4xf32>
    %8 = vector.shape_cast %7 : vector<16x16x4xf32> to vector<256x4xf32>
    %c0_14 = arith.constant 0 : index
    %c2 = arith.constant 2 : index
    %c0_15 = arith.constant 0 : index
    %9 = vector.load %arg16[%c0_14, %c2, %c0_15] : memref<18x18x4xf32, #tpu.memory_space<vmem>>, vector<16x16x4xf32>
    %10 = vector.shape_cast %9 : vector<16x16x4xf32> to vector<256x4xf32>
    %c1_16 = arith.constant 1 : index
    %c0_17 = arith.constant 0 : index
    %c0_18 = arith.constant 0 : index
    %11 = vector.load %arg16[%c1_16, %c0_17, %c0_18] : memref<18x18x4xf32, #tpu.memory_space<vmem>>, vector<16x16x4xf32>
    %12 = vector.shape_cast %11 : vector<16x16x4xf32> to vector<256x4xf32>
    %c1_19 = arith.constant 1 : index
    %c1_20 = arith.constant 1 : index
    %c0_21 = arith.constant 0 : index
    %13 = vector.load %arg16[%c1_19, %c1_20, %c0_21] : memref<18x18x4xf32, #tpu.memory_space<vmem>>, vector<16x16x4xf32>
    %14 = vector.shape_cast %13 : vector<16x16x4xf32> to vector<256x4xf32>
    %c1_22 = arith.constant 1 : index
    %c2_23 = arith.constant 2 : index
    %c0_24 = arith.constant 0 : index
    %15 = vector.load %arg16[%c1_22, %c2_23, %c0_24] : memref<18x18x4xf32, #tpu.memory_space<vmem>>, vector<16x16x4xf32>
    %16 = vector.shape_cast %15 : vector<16x16x4xf32> to vector<256x4xf32>
    %c2_25 = arith.constant 2 : index
    %c0_26 = arith.constant 0 : index
    %c0_27 = arith.constant 0 : index
    %17 = vector.load %arg16[%c2_25, %c0_26, %c0_27] : memref<18x18x4xf32, #tpu.memory_space<vmem>>, vector<16x16x4xf32>
    %18 = vector.shape_cast %17 : vector<16x16x4xf32> to vector<256x4xf32>
    %c2_28 = arith.constant 2 : index
    %c1_29 = arith.constant 1 : index
    %c0_30 = arith.constant 0 : index
    %19 = vector.load %arg16[%c2_28, %c1_29, %c0_30] : memref<18x18x4xf32, #tpu.memory_space<vmem>>, vector<16x16x4xf32>
    %20 = vector.shape_cast %19 : vector<16x16x4xf32> to vector<256x4xf32>
    %c2_31 = arith.constant 2 : index
    %c2_32 = arith.constant 2 : index
    %c0_33 = arith.constant 0 : index
    %21 = vector.load %arg16[%c2_31, %c2_32, %c0_33] : memref<18x18x4xf32, #tpu.memory_space<vmem>>, vector<16x16x4xf32>
    %22 = vector.shape_cast %21 : vector<16x16x4xf32> to vector<256x4xf32>
    %23 = tpu.concatenate %6, %8, %10, %12, %14, %16, %18, %20, %22 in 1 : vector<256x4xf32>, vector<256x4xf32>, vector<256x4xf32>, vector<256x4xf32>, vector<256x4xf32>, vector<256x4xf32>, vector<256x4xf32>, vector<256x4xf32>, vector<256x4xf32> -> vector<256x36xf32>
    %c0_34 = arith.constant 0 : index
    %c0_35 = arith.constant 0 : index
    %24 = vector.load %arg3[%c0_34, %c0_35] : memref<36x8xf32, #tpu.memory_space<vmem>>, vector<36x8xf32>
    %cst_36 = arith.constant dense<0.000000e+00> : vector<256x8xf32>
    %25 = tpu.matmul %23, %24, %cst_36 {dimension_numbers = #tpu.dot_dimension_numbers<[1], [0], [0], [1], [0, 0, 1, 1], [], []>} : vector<256x36xf32>, vector<36x8xf32>, vector<256x8xf32> -> vector<256x8xf32>
    %c0_37 = arith.constant 0 : index
    %c0_38 = arith.constant 0 : index
    %26 = vector.load %arg4[%c0_37, %c0_38] : memref<1x8xf32, #tpu.memory_space<vmem>>, vector<1x8xf32>
    %27 = vector.broadcast %26 : vector<1x8xf32> to vector<256x8xf32>
    %28 = arith.addf %25, %27 : vector<256x8xf32>
    %c0_39 = arith.constant 0 : index
    %c0_40 = arith.constant 0 : index
    %29 = vector.load %arg5[%c0_39, %c0_40] : memref<1x8xf32, #tpu.memory_space<vmem>>, vector<1x8xf32>
    %c0_41 = arith.constant 0 : index
    %c0_42 = arith.constant 0 : index
    %30 = vector.load %arg6[%c0_41, %c0_42] : memref<1x8xf32, #tpu.memory_space<vmem>>, vector<1x8xf32>
    %cst_43 = arith.constant dense<0.000000e+00> : vector<8xf32>
    %31 = vector.multi_reduction <add>, %28, %cst_43 [0] : vector<256x8xf32> to vector<8xf32>
    %32 = vector.shape_cast %31 : vector<8xf32> to vector<1x8xf32>
    %33 = arith.mulf %28, %28 : vector<256x8xf32>
    %cst_44 = arith.constant dense<0.000000e+00> : vector<8xf32>
    %34 = vector.multi_reduction <add>, %33, %cst_44 [0] : vector<256x8xf32> to vector<8xf32>
    %35 = vector.shape_cast %34 : vector<8xf32> to vector<1x8xf32>
    %cst_45 = arith.constant 1.000000e+00 : f32
    %36 = vector.broadcast %cst_45 : f32 to vector<1x4xf32>
    %37 = vector.extract_strided_slice %32 {offsets = [0, 0], sizes = [1, 4], strides = [1, 1]} : vector<1x8xf32> to vector<1x4xf32>
    %38 = vector.shape_cast %37 : vector<1x4xf32> to vector<1x1x4xf32>
    %cst_46 = arith.constant dense<0.000000e+00> : vector<1xf32>
    %39 = vector.multi_reduction <add>, %38, %cst_46 [1, 2] : vector<1x1x4xf32> to vector<1xf32>
    %40 = vector.shape_cast %39 : vector<1xf32> to vector<1x1x1xf32>
    %41 = vector.extract %40[0, 0, 0] : f32 from vector<1x1x1xf32>
    %cst_47 = arith.constant 1.024000e+03 : f32
    %42 = arith.divf %41, %cst_47 : f32
    %43 = vector.extract_strided_slice %35 {offsets = [0, 0], sizes = [1, 4], strides = [1, 1]} : vector<1x8xf32> to vector<1x4xf32>
    %44 = vector.shape_cast %43 : vector<1x4xf32> to vector<1x1x4xf32>
    %cst_48 = arith.constant dense<0.000000e+00> : vector<1xf32>
    %45 = vector.multi_reduction <add>, %44, %cst_48 [1, 2] : vector<1x1x4xf32> to vector<1xf32>
    %46 = vector.shape_cast %45 : vector<1xf32> to vector<1x1x1xf32>
    %47 = vector.extract %46[0, 0, 0] : f32 from vector<1x1x1xf32>
    %cst_49 = arith.constant 1.024000e+03 : f32
    %48 = arith.divf %47, %cst_49 : f32
    %49 = arith.mulf %42, %42 : f32
    %50 = arith.subf %48, %49 : f32
    %cst_50 = arith.constant 0.000000e+00 : f32
    %51 = arith.maximumf %50, %cst_50 : f32
    %cst_51 = arith.constant 9.99999974E-6 : f32
    %52 = arith.addf %51, %cst_51 : f32
    %53 = math.rsqrt %52 : f32
    %54 = vector.broadcast %53 : f32 to vector<1x4xf32>
    %55 = arith.mulf %36, %54 : vector<1x4xf32>
    %cst_52 = arith.constant 0.000000e+00 : f32
    %56 = arith.subf %cst_52, %42 : f32
    %57 = arith.mulf %56, %53 : f32
    %58 = vector.broadcast %57 : f32 to vector<1x4xf32>
    %59 = arith.mulf %36, %58 : vector<1x4xf32>
    %60 = vector.extract_strided_slice %32 {offsets = [0, 4], sizes = [1, 4], strides = [1, 1]} : vector<1x8xf32> to vector<1x4xf32>
    %61 = vector.shape_cast %60 : vector<1x4xf32> to vector<1x1x4xf32>
    %cst_53 = arith.constant dense<0.000000e+00> : vector<1xf32>
    %62 = vector.multi_reduction <add>, %61, %cst_53 [1, 2] : vector<1x1x4xf32> to vector<1xf32>
    %63 = vector.shape_cast %62 : vector<1xf32> to vector<1x1x1xf32>
    %64 = vector.extract %63[0, 0, 0] : f32 from vector<1x1x1xf32>
    %cst_54 = arith.constant 1.024000e+03 : f32
    %65 = arith.divf %64, %cst_54 : f32
    %66 = vector.extract_strided_slice %35 {offsets = [0, 4], sizes = [1, 4], strides = [1, 1]} : vector<1x8xf32> to vector<1x4xf32>
    %67 = vector.shape_cast %66 : vector<1x4xf32> to vector<1x1x4xf32>
    %cst_55 = arith.constant dense<0.000000e+00> : vector<1xf32>
    %68 = vector.multi_reduction <add>, %67, %cst_55 [1, 2] : vector<1x1x4xf32> to vector<1xf32>
    %69 = vector.shape_cast %68 : vector<1xf32> to vector<1x1x1xf32>
    %70 = vector.extract %69[0, 0, 0] : f32 from vector<1x1x1xf32>
    %cst_56 = arith.constant 1.024000e+03 : f32
    %71 = arith.divf %70, %cst_56 : f32
    %72 = arith.mulf %65, %65 : f32
    %73 = arith.subf %71, %72 : f32
    %cst_57 = arith.constant 0.000000e+00 : f32
    %74 = arith.maximumf %73, %cst_57 : f32
    %cst_58 = arith.constant 9.99999974E-6 : f32
    %75 = arith.addf %74, %cst_58 : f32
    %76 = math.rsqrt %75 : f32
    %77 = vector.broadcast %76 : f32 to vector<1x4xf32>
    %78 = arith.mulf %36, %77 : vector<1x4xf32>
    %cst_59 = arith.constant 0.000000e+00 : f32
    %79 = arith.subf %cst_59, %65 : f32
    %80 = arith.mulf %79, %76 : f32
    %81 = vector.broadcast %80 : f32 to vector<1x4xf32>
    %82 = arith.mulf %36, %81 : vector<1x4xf32>
    %83 = tpu.concatenate %55, %78 in 1 : vector<1x4xf32>, vector<1x4xf32> -> vector<1x8xf32>
    %84 = arith.mulf %83, %29 : vector<1x8xf32>
    %85 = tpu.concatenate %59, %82 in 1 : vector<1x4xf32>, vector<1x4xf32> -> vector<1x8xf32>
    %86 = arith.mulf %85, %29 : vector<1x8xf32>
    %87 = arith.addf %86, %30 : vector<1x8xf32>
    %88 = vector.broadcast %84 : vector<1x8xf32> to vector<256x8xf32>
    %89 = arith.mulf %28, %88 : vector<256x8xf32>
    %90 = vector.broadcast %87 : vector<1x8xf32> to vector<256x8xf32>
    %91 = arith.addf %89, %90 : vector<256x8xf32>
    %cst_60 = arith.constant 5.000000e-01 : f32
    %92 = vector.broadcast %cst_60 : f32 to vector<256x8xf32>
    %93 = arith.mulf %92, %91 : vector<256x8xf32>
    %cst_61 = arith.constant 0.707106769 : f32
    %94 = vector.broadcast %cst_61 : f32 to vector<256x8xf32>
    %95 = arith.mulf %91, %94 : vector<256x8xf32>
    %96 = math.absf %95 : vector<256x8xf32>
    %cst_62 = arith.constant 0.327591091 : f32
    %97 = vector.broadcast %cst_62 : f32 to vector<256x8xf32>
    %98 = arith.mulf %97, %96 : vector<256x8xf32>
    %cst_63 = arith.constant 1.000000e+00 : f32
    %99 = vector.broadcast %cst_63 : f32 to vector<256x8xf32>
    %100 = arith.addf %99, %98 : vector<256x8xf32>
    %cst_64 = arith.constant 1.000000e+00 : f32
    %101 = vector.broadcast %cst_64 : f32 to vector<256x8xf32>
    %102 = arith.divf %101, %100 : vector<256x8xf32>
    %cst_65 = arith.constant 1.06140542 : f32
    %103 = vector.broadcast %cst_65 : f32 to vector<256x8xf32>
    %104 = arith.mulf %103, %102 : vector<256x8xf32>
    %cst_66 = arith.constant -1.45315206 : f32
    %105 = vector.broadcast %cst_66 : f32 to vector<256x8xf32>
    %106 = arith.addf %104, %105 : vector<256x8xf32>
    %107 = arith.mulf %106, %102 : vector<256x8xf32>
    %cst_67 = arith.constant 1.42141378 : f32
    %108 = vector.broadcast %cst_67 : f32 to vector<256x8xf32>
    %109 = arith.addf %107, %108 : vector<256x8xf32>
    %110 = arith.mulf %109, %102 : vector<256x8xf32>
    %cst_68 = arith.constant -0.284496725 : f32
    %111 = vector.broadcast %cst_68 : f32 to vector<256x8xf32>
    %112 = arith.addf %110, %111 : vector<256x8xf32>
    %113 = arith.mulf %112, %102 : vector<256x8xf32>
    %cst_69 = arith.constant 0.254829586 : f32
    %114 = vector.broadcast %cst_69 : f32 to vector<256x8xf32>
    %115 = arith.addf %113, %114 : vector<256x8xf32>
    %116 = arith.mulf %115, %102 : vector<256x8xf32>
    %cst_70 = arith.constant 0.000000e+00 : f32
    %117 = vector.broadcast %cst_70 : f32 to vector<256x8xf32>
    %118 = arith.subf %117, %96 : vector<256x8xf32>
    %119 = arith.mulf %118, %96 : vector<256x8xf32>
    %120 = math.exp %119 : vector<256x8xf32>
    %121 = arith.mulf %116, %120 : vector<256x8xf32>
    %cst_71 = arith.constant 1.000000e+00 : f32
    %122 = vector.broadcast %cst_71 : f32 to vector<256x8xf32>
    %123 = arith.subf %122, %121 : vector<256x8xf32>
    %cst_72 = arith.constant 0.000000e+00 : f32
    %124 = vector.broadcast %cst_72 : f32 to vector<256x8xf32>
    %125 = arith.cmpf oge, %95, %124 : vector<256x8xf32>
    %cst_73 = arith.constant 0.000000e+00 : f32
    %126 = vector.broadcast %cst_73 : f32 to vector<256x8xf32>
    %127 = arith.subf %126, %123 : vector<256x8xf32>
    %128 = arith.select %125, %123, %127 : vector<256x8xi1>, vector<256x8xf32>
    %cst_74 = arith.constant 1.000000e+00 : f32
    %129 = vector.broadcast %cst_74 : f32 to vector<256x8xf32>
    %130 = arith.addf %129, %128 : vector<256x8xf32>
    %131 = arith.mulf %93, %130 : vector<256x8xf32>
    %132 = vector.shape_cast %131 : vector<256x8xf32> to vector<16x16x8xf32>
    %cst_75 = arith.constant 0.000000e+00 : f32
    %133 = vector.broadcast %cst_75 : f32 to vector<18x18x8xf32>
    %c0_76 = arith.constant 0 : index
    %c0_77 = arith.constant 0 : index
    %c0_78 = arith.constant 0 : index
    %134 = vector.load %arg17[%c0_76, %c0_77, %c0_78] : memref<18x18x8xf32, #tpu.memory_space<vmem>>, vector<18x18x8xf32>
    tpu.vector_store %arg17[%c0_76, %c0_77, %c0_78], %133 {strides = array<i32>} : memref<18x18x8xf32, #tpu.memory_space<vmem>>, vector<18x18x8xf32>,
    %c1_79 = arith.constant 1 : index
    %c1_80 = arith.constant 1 : index
    %c0_81 = arith.constant 0 : index
    %135 = vector.load %arg17[%c1_79, %c1_80, %c0_81] : memref<18x18x8xf32, #tpu.memory_space<vmem>>, vector<16x16x8xf32>
    tpu.vector_store %arg17[%c1_79, %c1_80, %c0_81], %132 {strides = array<i32>} : memref<18x18x8xf32, #tpu.memory_space<vmem>>, vector<16x16x8xf32>,
    %c0_82 = arith.constant 0 : index
    %c0_83 = arith.constant 0 : index
    %c0_84 = arith.constant 0 : index
    %136 = vector.load %arg17[%c0_82, %c0_83, %c0_84] : memref<18x18x8xf32, #tpu.memory_space<vmem>>, vector<16x16x8xf32>
    %137 = vector.shape_cast %136 : vector<16x16x8xf32> to vector<256x8xf32>
    %c0_85 = arith.constant 0 : index
    %c1_86 = arith.constant 1 : index
    %c0_87 = arith.constant 0 : index
    %138 = vector.load %arg17[%c0_85, %c1_86, %c0_87] : memref<18x18x8xf32, #tpu.memory_space<vmem>>, vector<16x16x8xf32>
    %139 = vector.shape_cast %138 : vector<16x16x8xf32> to vector<256x8xf32>
    %c0_88 = arith.constant 0 : index
    %c2_89 = arith.constant 2 : index
    %c0_90 = arith.constant 0 : index
    %140 = vector.load %arg17[%c0_88, %c2_89, %c0_90] : memref<18x18x8xf32, #tpu.memory_space<vmem>>, vector<16x16x8xf32>
    %141 = vector.shape_cast %140 : vector<16x16x8xf32> to vector<256x8xf32>
    %c1_91 = arith.constant 1 : index
    %c0_92 = arith.constant 0 : index
    %c0_93 = arith.constant 0 : index
    %142 = vector.load %arg17[%c1_91, %c0_92, %c0_93] : memref<18x18x8xf32, #tpu.memory_space<vmem>>, vector<16x16x8xf32>
    %143 = vector.shape_cast %142 : vector<16x16x8xf32> to vector<256x8xf32>
    %c1_94 = arith.constant 1 : index
    %c1_95 = arith.constant 1 : index
    %c0_96 = arith.constant 0 : index
    %144 = vector.load %arg17[%c1_94, %c1_95, %c0_96] : memref<18x18x8xf32, #tpu.memory_space<vmem>>, vector<16x16x8xf32>
    %145 = vector.shape_cast %144 : vector<16x16x8xf32> to vector<256x8xf32>
    %c1_97 = arith.constant 1 : index
    %c2_98 = arith.constant 2 : index
    %c0_99 = arith.constant 0 : index
    %146 = vector.load %arg17[%c1_97, %c2_98, %c0_99] : memref<18x18x8xf32, #tpu.memory_space<vmem>>, vector<16x16x8xf32>
    %147 = vector.shape_cast %146 : vector<16x16x8xf32> to vector<256x8xf32>
    %c2_100 = arith.constant 2 : index
    %c0_101 = arith.constant 0 : index
    %c0_102 = arith.constant 0 : index
    %148 = vector.load %arg17[%c2_100, %c0_101, %c0_102] : memref<18x18x8xf32, #tpu.memory_space<vmem>>, vector<16x16x8xf32>
    %149 = vector.shape_cast %148 : vector<16x16x8xf32> to vector<256x8xf32>
    %c2_103 = arith.constant 2 : index
    %c1_104 = arith.constant 1 : index
    %c0_105 = arith.constant 0 : index
    %150 = vector.load %arg17[%c2_103, %c1_104, %c0_105] : memref<18x18x8xf32, #tpu.memory_space<vmem>>, vector<16x16x8xf32>
    %151 = vector.shape_cast %150 : vector<16x16x8xf32> to vector<256x8xf32>
    %c2_106 = arith.constant 2 : index
    %c2_107 = arith.constant 2 : index
    %c0_108 = arith.constant 0 : index
    %152 = vector.load %arg17[%c2_106, %c2_107, %c0_108] : memref<18x18x8xf32, #tpu.memory_space<vmem>>, vector<16x16x8xf32>
    %153 = vector.shape_cast %152 : vector<16x16x8xf32> to vector<256x8xf32>
    %154 = tpu.concatenate %137, %139, %141, %143, %145, %147, %149, %151, %153 in 1 : vector<256x8xf32>, vector<256x8xf32>, vector<256x8xf32>, vector<256x8xf32>, vector<256x8xf32>, vector<256x8xf32>, vector<256x8xf32>, vector<256x8xf32>, vector<256x8xf32> -> vector<256x72xf32>
    %c0_109 = arith.constant 0 : index
    %c0_110 = arith.constant 0 : index
    %155 = vector.load %arg7[%c0_109, %c0_110] : memref<72x8xf32, #tpu.memory_space<vmem>>, vector<72x8xf32>
    %cst_111 = arith.constant dense<0.000000e+00> : vector<256x8xf32>
    %156 = tpu.matmul %154, %155, %cst_111 {dimension_numbers = #tpu.dot_dimension_numbers<[1], [0], [0], [1], [0, 0, 1, 1], [], []>} : vector<256x72xf32>, vector<72x8xf32>, vector<256x8xf32> -> vector<256x8xf32>
    %c0_112 = arith.constant 0 : index
    %c0_113 = arith.constant 0 : index
    %157 = vector.load %arg8[%c0_112, %c0_113] : memref<1x8xf32, #tpu.memory_space<vmem>>, vector<1x8xf32>
    %158 = vector.broadcast %157 : vector<1x8xf32> to vector<256x8xf32>
    %159 = arith.addf %156, %158 : vector<256x8xf32>
    %c0_114 = arith.constant 0 : index
    %c0_115 = arith.constant 0 : index
    %160 = vector.load %arg9[%c0_114, %c0_115] : memref<1x8xf32, #tpu.memory_space<vmem>>, vector<1x8xf32>
    %c0_116 = arith.constant 0 : index
    %c0_117 = arith.constant 0 : index
    %161 = vector.load %arg10[%c0_116, %c0_117] : memref<1x8xf32, #tpu.memory_space<vmem>>, vector<1x8xf32>
    %cst_118 = arith.constant dense<0.000000e+00> : vector<8xf32>
    %162 = vector.multi_reduction <add>, %159, %cst_118 [0] : vector<256x8xf32> to vector<8xf32>
    %163 = vector.shape_cast %162 : vector<8xf32> to vector<1x8xf32>
    %164 = arith.mulf %159, %159 : vector<256x8xf32>
    %cst_119 = arith.constant dense<0.000000e+00> : vector<8xf32>
    %165 = vector.multi_reduction <add>, %164, %cst_119 [0] : vector<256x8xf32> to vector<8xf32>
    %166 = vector.shape_cast %165 : vector<8xf32> to vector<1x8xf32>
    %cst_120 = arith.constant 1.000000e+00 : f32
    %167 = vector.broadcast %cst_120 : f32 to vector<1x4xf32>
    %168 = vector.extract_strided_slice %163 {offsets = [0, 0], sizes = [1, 4], strides = [1, 1]} : vector<1x8xf32> to vector<1x4xf32>
    %169 = vector.shape_cast %168 : vector<1x4xf32> to vector<1x1x4xf32>
    %cst_121 = arith.constant dense<0.000000e+00> : vector<1xf32>
    %170 = vector.multi_reduction <add>, %169, %cst_121 [1, 2] : vector<1x1x4xf32> to vector<1xf32>
    %171 = vector.shape_cast %170 : vector<1xf32> to vector<1x1x1xf32>
    %172 = vector.extract %171[0, 0, 0] : f32 from vector<1x1x1xf32>
    %cst_122 = arith.constant 1.024000e+03 : f32
    %173 = arith.divf %172, %cst_122 : f32
    %174 = vector.extract_strided_slice %166 {offsets = [0, 0], sizes = [1, 4], strides = [1, 1]} : vector<1x8xf32> to vector<1x4xf32>
    %175 = vector.shape_cast %174 : vector<1x4xf32> to vector<1x1x4xf32>
    %cst_123 = arith.constant dense<0.000000e+00> : vector<1xf32>
    %176 = vector.multi_reduction <add>, %175, %cst_123 [1, 2] : vector<1x1x4xf32> to vector<1xf32>
    %177 = vector.shape_cast %176 : vector<1xf32> to vector<1x1x1xf32>
    %178 = vector.extract %177[0, 0, 0] : f32 from vector<1x1x1xf32>
    %cst_124 = arith.constant 1.024000e+03 : f32
    %179 = arith.divf %178, %cst_124 : f32
    %180 = arith.mulf %173, %173 : f32
    %181 = arith.subf %179, %180 : f32
    %cst_125 = arith.constant 0.000000e+00 : f32
    %182 = arith.maximumf %181, %cst_125 : f32
    %cst_126 = arith.constant 9.99999974E-6 : f32
    %183 = arith.addf %182, %cst_126 : f32
    %184 = math.rsqrt %183 : f32
    %185 = vector.broadcast %184 : f32 to vector<1x4xf32>
    %186 = arith.mulf %167, %185 : vector<1x4xf32>
    %cst_127 = arith.constant 0.000000e+00 : f32
    %187 = arith.subf %cst_127, %173 : f32
    %188 = arith.mulf %187, %184 : f32
    %189 = vector.broadcast %188 : f32 to vector<1x4xf32>
    %190 = arith.mulf %167, %189 : vector<1x4xf32>
    %191 = vector.extract_strided_slice %163 {offsets = [0, 4], sizes = [1, 4], strides = [1, 1]} : vector<1x8xf32> to vector<1x4xf32>
    %192 = vector.shape_cast %191 : vector<1x4xf32> to vector<1x1x4xf32>
    %cst_128 = arith.constant dense<0.000000e+00> : vector<1xf32>
    %193 = vector.multi_reduction <add>, %192, %cst_128 [1, 2] : vector<1x1x4xf32> to vector<1xf32>
    %194 = vector.shape_cast %193 : vector<1xf32> to vector<1x1x1xf32>
    %195 = vector.extract %194[0, 0, 0] : f32 from vector<1x1x1xf32>
    %cst_129 = arith.constant 1.024000e+03 : f32
    %196 = arith.divf %195, %cst_129 : f32
    %197 = vector.extract_strided_slice %166 {offsets = [0, 4], sizes = [1, 4], strides = [1, 1]} : vector<1x8xf32> to vector<1x4xf32>
    %198 = vector.shape_cast %197 : vector<1x4xf32> to vector<1x1x4xf32>
    %cst_130 = arith.constant dense<0.000000e+00> : vector<1xf32>
    %199 = vector.multi_reduction <add>, %198, %cst_130 [1, 2] : vector<1x1x4xf32> to vector<1xf32>
    %200 = vector.shape_cast %199 : vector<1xf32> to vector<1x1x1xf32>
    %201 = vector.extract %200[0, 0, 0] : f32 from vector<1x1x1xf32>
    %cst_131 = arith.constant 1.024000e+03 : f32
    %202 = arith.divf %201, %cst_131 : f32
    %203 = arith.mulf %196, %196 : f32
    %204 = arith.subf %202, %203 : f32
    %cst_132 = arith.constant 0.000000e+00 : f32
    %205 = arith.maximumf %204, %cst_132 : f32
    %cst_133 = arith.constant 9.99999974E-6 : f32
    %206 = arith.addf %205, %cst_133 : f32
    %207 = math.rsqrt %206 : f32
    %208 = vector.broadcast %207 : f32 to vector<1x4xf32>
    %209 = arith.mulf %167, %208 : vector<1x4xf32>
    %cst_134 = arith.constant 0.000000e+00 : f32
    %210 = arith.subf %cst_134, %196 : f32
    %211 = arith.mulf %210, %207 : f32
    %212 = vector.broadcast %211 : f32 to vector<1x4xf32>
    %213 = arith.mulf %167, %212 : vector<1x4xf32>
    %214 = tpu.concatenate %186, %209 in 1 : vector<1x4xf32>, vector<1x4xf32> -> vector<1x8xf32>
    %215 = arith.mulf %214, %160 : vector<1x8xf32>
    %216 = tpu.concatenate %190, %213 in 1 : vector<1x4xf32>, vector<1x4xf32> -> vector<1x8xf32>
    %217 = arith.mulf %216, %160 : vector<1x8xf32>
    %218 = arith.addf %217, %161 : vector<1x8xf32>
    %219 = vector.broadcast %215 : vector<1x8xf32> to vector<256x8xf32>
    %220 = arith.mulf %159, %219 : vector<256x8xf32>
    %221 = vector.broadcast %218 : vector<1x8xf32> to vector<256x8xf32>
    %222 = arith.addf %220, %221 : vector<256x8xf32>
    %cst_135 = arith.constant 5.000000e-01 : f32
    %223 = vector.broadcast %cst_135 : f32 to vector<256x8xf32>
    %224 = arith.mulf %223, %222 : vector<256x8xf32>
    %cst_136 = arith.constant 0.707106769 : f32
    %225 = vector.broadcast %cst_136 : f32 to vector<256x8xf32>
    %226 = arith.mulf %222, %225 : vector<256x8xf32>
    %227 = math.absf %226 : vector<256x8xf32>
    %cst_137 = arith.constant 0.327591091 : f32
    %228 = vector.broadcast %cst_137 : f32 to vector<256x8xf32>
    %229 = arith.mulf %228, %227 : vector<256x8xf32>
    %cst_138 = arith.constant 1.000000e+00 : f32
    %230 = vector.broadcast %cst_138 : f32 to vector<256x8xf32>
    %231 = arith.addf %230, %229 : vector<256x8xf32>
    %cst_139 = arith.constant 1.000000e+00 : f32
    %232 = vector.broadcast %cst_139 : f32 to vector<256x8xf32>
    %233 = arith.divf %232, %231 : vector<256x8xf32>
    %cst_140 = arith.constant 1.06140542 : f32
    %234 = vector.broadcast %cst_140 : f32 to vector<256x8xf32>
    %235 = arith.mulf %234, %233 : vector<256x8xf32>
    %cst_141 = arith.constant -1.45315206 : f32
    %236 = vector.broadcast %cst_141 : f32 to vector<256x8xf32>
    %237 = arith.addf %235, %236 : vector<256x8xf32>
    %238 = arith.mulf %237, %233 : vector<256x8xf32>
    %cst_142 = arith.constant 1.42141378 : f32
    %239 = vector.broadcast %cst_142 : f32 to vector<256x8xf32>
    %240 = arith.addf %238, %239 : vector<256x8xf32>
    %241 = arith.mulf %240, %233 : vector<256x8xf32>
    %cst_143 = arith.constant -0.284496725 : f32
    %242 = vector.broadcast %cst_143 : f32 to vector<256x8xf32>
    %243 = arith.addf %241, %242 : vector<256x8xf32>
    %244 = arith.mulf %243, %233 : vector<256x8xf32>
    %cst_144 = arith.constant 0.254829586 : f32
    %245 = vector.broadcast %cst_144 : f32 to vector<256x8xf32>
    %246 = arith.addf %244, %245 : vector<256x8xf32>
    %247 = arith.mulf %246, %233 : vector<256x8xf32>
    %cst_145 = arith.constant 0.000000e+00 : f32
    %248 = vector.broadcast %cst_145 : f32 to vector<256x8xf32>
    %249 = arith.subf %248, %227 : vector<256x8xf32>
    %250 = arith.mulf %249, %227 : vector<256x8xf32>
    %251 = math.exp %250 : vector<256x8xf32>
    %252 = arith.mulf %247, %251 : vector<256x8xf32>
    %cst_146 = arith.constant 1.000000e+00 : f32
    %253 = vector.broadcast %cst_146 : f32 to vector<256x8xf32>
    %254 = arith.subf %253, %252 : vector<256x8xf32>
    %cst_147 = arith.constant 0.000000e+00 : f32
    %255 = vector.broadcast %cst_147 : f32 to vector<256x8xf32>
    %256 = arith.cmpf oge, %226, %255 : vector<256x8xf32>
    %cst_148 = arith.constant 0.000000e+00 : f32
    %257 = vector.broadcast %cst_148 : f32 to vector<256x8xf32>
    %258 = arith.subf %257, %254 : vector<256x8xf32>
    %259 = arith.select %256, %254, %258 : vector<256x8xi1>, vector<256x8xf32>
    %cst_149 = arith.constant 1.000000e+00 : f32
    %260 = vector.broadcast %cst_149 : f32 to vector<256x8xf32>
    %261 = arith.addf %260, %259 : vector<256x8xf32>
    %262 = arith.mulf %224, %261 : vector<256x8xf32>
    %c0_150 = arith.constant 0 : index
    %c0_151 = arith.constant 0 : index
    %263 = vector.load %arg2[%c0_150, %c0_151] : memref<256x256xf32, #tpu.memory_space<vmem>>, vector<256x256xf32>
    %cst_152 = arith.constant dense<0.000000e+00> : vector<256x8xf32>
    %264 = tpu.matmul %263, %262, %cst_152 {dimension_numbers = #tpu.dot_dimension_numbers<[1], [0], [0], [1], [0, 0, 1, 1], [], []>} : vector<256x256xf32>, vector<256x8xf32>, vector<256x8xf32> -> vector<256x8xf32>
    %265 = vector.extract_strided_slice %264 {offsets = [0, 0], sizes = [64, 8], strides = [1, 1]} : vector<256x8xf32> to vector<64x8xf32>
    %266 = vector.extract_strided_slice %264 {offsets = [64, 0], sizes = [64, 8], strides = [1, 1]} : vector<256x8xf32> to vector<64x8xf32>
    %267 = vector.extract_strided_slice %264 {offsets = [128, 0], sizes = [64, 8], strides = [1, 1]} : vector<256x8xf32> to vector<64x8xf32>
    %268 = vector.extract_strided_slice %264 {offsets = [192, 0], sizes = [64, 8], strides = [1, 1]} : vector<256x8xf32> to vector<64x8xf32>
    %269 = tpu.concatenate %265, %266, %267, %268 in 1 : vector<64x8xf32>, vector<64x8xf32>, vector<64x8xf32>, vector<64x8xf32> -> vector<64x32xf32>
    %270 = vector.shape_cast %269 : vector<64x32xf32> to vector<8x8x32xf32>
    %cst_153 = arith.constant 0.000000e+00 : f32
    %271 = vector.broadcast %cst_153 : f32 to vector<10x10x32xf32>
    %c0_154 = arith.constant 0 : index
    %c0_155 = arith.constant 0 : index
    %c0_156 = arith.constant 0 : index
    %272 = vector.load %arg18[%c0_154, %c0_155, %c0_156] : memref<10x10x32xf32, #tpu.memory_space<vmem>>, vector<10x10x32xf32>
    tpu.vector_store %arg18[%c0_154, %c0_155, %c0_156], %271 {strides = array<i32>} : memref<10x10x32xf32, #tpu.memory_space<vmem>>, vector<10x10x32xf32>,
    %c1_157 = arith.constant 1 : index
    %c1_158 = arith.constant 1 : index
    %c0_159 = arith.constant 0 : index
    %273 = vector.load %arg18[%c1_157, %c1_158, %c0_159] : memref<10x10x32xf32, #tpu.memory_space<vmem>>, vector<8x8x32xf32>
    tpu.vector_store %arg18[%c1_157, %c1_158, %c0_159], %270 {strides = array<i32>} : memref<10x10x32xf32, #tpu.memory_space<vmem>>, vector<8x8x32xf32>,
    %c0_160 = arith.constant 0 : index
    %c0_161 = arith.constant 0 : index
    %c0_162 = arith.constant 0 : index
    %274 = vector.load %arg18[%c0_160, %c0_161, %c0_162] : memref<10x10x32xf32, #tpu.memory_space<vmem>>, vector<8x8x32xf32>
    %275 = vector.shape_cast %274 : vector<8x8x32xf32> to vector<64x32xf32>
    %c0_163 = arith.constant 0 : index
    %c1_164 = arith.constant 1 : index
    %c0_165 = arith.constant 0 : index
    %276 = vector.load %arg18[%c0_163, %c1_164, %c0_165] : memref<10x10x32xf32, #tpu.memory_space<vmem>>, vector<8x8x32xf32>
    %277 = vector.shape_cast %276 : vector<8x8x32xf32> to vector<64x32xf32>
    %c0_166 = arith.constant 0 : index
    %c2_167 = arith.constant 2 : index
    %c0_168 = arith.constant 0 : index
    %278 = vector.load %arg18[%c0_166, %c2_167, %c0_168] : memref<10x10x32xf32, #tpu.memory_space<vmem>>, vector<8x8x32xf32>
    %279 = vector.shape_cast %278 : vector<8x8x32xf32> to vector<64x32xf32>
    %c1_169 = arith.constant 1 : index
    %c0_170 = arith.constant 0 : index
    %c0_171 = arith.constant 0 : index
    %280 = vector.load %arg18[%c1_169, %c0_170, %c0_171] : memref<10x10x32xf32, #tpu.memory_space<vmem>>, vector<8x8x32xf32>
    %281 = vector.shape_cast %280 : vector<8x8x32xf32> to vector<64x32xf32>
    %c1_172 = arith.constant 1 : index
    %c1_173 = arith.constant 1 : index
    %c0_174 = arith.constant 0 : index
    %282 = vector.load %arg18[%c1_172, %c1_173, %c0_174] : memref<10x10x32xf32, #tpu.memory_space<vmem>>, vector<8x8x32xf32>
    %283 = vector.shape_cast %282 : vector<8x8x32xf32> to vector<64x32xf32>
    %c1_175 = arith.constant 1 : index
    %c2_176 = arith.constant 2 : index
    %c0_177 = arith.constant 0 : index
    %284 = vector.load %arg18[%c1_175, %c2_176, %c0_177] : memref<10x10x32xf32, #tpu.memory_space<vmem>>, vector<8x8x32xf32>
    %285 = vector.shape_cast %284 : vector<8x8x32xf32> to vector<64x32xf32>
    %c2_178 = arith.constant 2 : index
    %c0_179 = arith.constant 0 : index
    %c0_180 = arith.constant 0 : index
    %286 = vector.load %arg18[%c2_178, %c0_179, %c0_180] : memref<10x10x32xf32, #tpu.memory_space<vmem>>, vector<8x8x32xf32>
    %287 = vector.shape_cast %286 : vector<8x8x32xf32> to vector<64x32xf32>
    %c2_181 = arith.constant 2 : index
    %c1_182 = arith.constant 1 : index
    %c0_183 = arith.constant 0 : index
    %288 = vector.load %arg18[%c2_181, %c1_182, %c0_183] : memref<10x10x32xf32, #tpu.memory_space<vmem>>, vector<8x8x32xf32>
    %289 = vector.shape_cast %288 : vector<8x8x32xf32> to vector<64x32xf32>
    %c2_184 = arith.constant 2 : index
    %c2_185 = arith.constant 2 : index
    %c0_186 = arith.constant 0 : index
    %290 = vector.load %arg18[%c2_184, %c2_185, %c0_186] : memref<10x10x32xf32, #tpu.memory_space<vmem>>, vector<8x8x32xf32>
    %291 = vector.shape_cast %290 : vector<8x8x32xf32> to vector<64x32xf32>
    %292 = tpu.concatenate %275, %277, %279, %281, %283, %285, %287, %289, %291 in 1 : vector<64x32xf32>, vector<64x32xf32>, vector<64x32xf32>, vector<64x32xf32>, vector<64x32xf32>, vector<64x32xf32>, vector<64x32xf32>, vector<64x32xf32>, vector<64x32xf32> -> vector<64x288xf32>
    %c0_187 = arith.constant 0 : index
    %c0_188 = arith.constant 0 : index
    %293 = vector.load %arg11[%c0_187, %c0_188] : memref<288x8xf32, #tpu.memory_space<vmem>>, vector<288x8xf32>
    %cst_189 = arith.constant dense<0.000000e+00> : vector<64x8xf32>
    %294 = tpu.matmul %292, %293, %cst_189 {dimension_numbers = #tpu.dot_dimension_numbers<[1], [0], [0], [1], [0, 0, 1, 1], [], []>} : vector<64x288xf32>, vector<288x8xf32>, vector<64x8xf32> -> vector<64x8xf32>
    %c0_190 = arith.constant 0 : index
    %c0_191 = arith.constant 0 : index
    %295 = vector.load %arg12[%c0_190, %c0_191] : memref<1x8xf32, #tpu.memory_space<vmem>>, vector<1x8xf32>
    %296 = vector.broadcast %295 : vector<1x8xf32> to vector<64x8xf32>
    %297 = arith.addf %294, %296 : vector<64x8xf32>
    %c0_192 = arith.constant 0 : index
    %c0_193 = arith.constant 0 : index
    %298 = vector.load %arg13[%c0_192, %c0_193] : memref<1x8xf32, #tpu.memory_space<vmem>>, vector<1x8xf32>
    %c0_194 = arith.constant 0 : index
    %c0_195 = arith.constant 0 : index
    %299 = vector.load %arg14[%c0_194, %c0_195] : memref<1x8xf32, #tpu.memory_space<vmem>>, vector<1x8xf32>
    %cst_196 = arith.constant dense<0.000000e+00> : vector<8xf32>
    %300 = vector.multi_reduction <add>, %297, %cst_196 [0] : vector<64x8xf32> to vector<8xf32>
    %301 = vector.shape_cast %300 : vector<8xf32> to vector<1x8xf32>
    %302 = arith.mulf %297, %297 : vector<64x8xf32>
    %cst_197 = arith.constant dense<0.000000e+00> : vector<8xf32>
    %303 = vector.multi_reduction <add>, %302, %cst_197 [0] : vector<64x8xf32> to vector<8xf32>
    %304 = vector.shape_cast %303 : vector<8xf32> to vector<1x8xf32>
    %cst_198 = arith.constant 1.000000e+00 : f32
    %305 = vector.broadcast %cst_198 : f32 to vector<1x4xf32>
    %306 = vector.extract_strided_slice %301 {offsets = [0, 0], sizes = [1, 4], strides = [1, 1]} : vector<1x8xf32> to vector<1x4xf32>
    %307 = vector.shape_cast %306 : vector<1x4xf32> to vector<1x1x4xf32>
    %cst_199 = arith.constant dense<0.000000e+00> : vector<1xf32>
    %308 = vector.multi_reduction <add>, %307, %cst_199 [1, 2] : vector<1x1x4xf32> to vector<1xf32>
    %309 = vector.shape_cast %308 : vector<1xf32> to vector<1x1x1xf32>
    %310 = vector.extract %309[0, 0, 0] : f32 from vector<1x1x1xf32>
    %cst_200 = arith.constant 2.560000e+02 : f32
    %311 = arith.divf %310, %cst_200 : f32
    %312 = vector.extract_strided_slice %304 {offsets = [0, 0], sizes = [1, 4], strides = [1, 1]} : vector<1x8xf32> to vector<1x4xf32>
    %313 = vector.shape_cast %312 : vector<1x4xf32> to vector<1x1x4xf32>
    %cst_201 = arith.constant dense<0.000000e+00> : vector<1xf32>
    %314 = vector.multi_reduction <add>, %313, %cst_201 [1, 2] : vector<1x1x4xf32> to vector<1xf32>
    %315 = vector.shape_cast %314 : vector<1xf32> to vector<1x1x1xf32>
    %316 = vector.extract %315[0, 0, 0] : f32 from vector<1x1x1xf32>
    %cst_202 = arith.constant 2.560000e+02 : f32
    %317 = arith.divf %316, %cst_202 : f32
    %318 = arith.mulf %311, %311 : f32
    %319 = arith.subf %317, %318 : f32
    %cst_203 = arith.constant 0.000000e+00 : f32
    %320 = arith.maximumf %319, %cst_203 : f32
    %cst_204 = arith.constant 9.99999974E-6 : f32
    %321 = arith.addf %320, %cst_204 : f32
    %322 = math.rsqrt %321 : f32
    %323 = vector.broadcast %322 : f32 to vector<1x4xf32>
    %324 = arith.mulf %305, %323 : vector<1x4xf32>
    %cst_205 = arith.constant 0.000000e+00 : f32
    %325 = arith.subf %cst_205, %311 : f32
    %326 = arith.mulf %325, %322 : f32
    %327 = vector.broadcast %326 : f32 to vector<1x4xf32>
    %328 = arith.mulf %305, %327 : vector<1x4xf32>
    %329 = vector.extract_strided_slice %301 {offsets = [0, 4], sizes = [1, 4], strides = [1, 1]} : vector<1x8xf32> to vector<1x4xf32>
    %330 = vector.shape_cast %329 : vector<1x4xf32> to vector<1x1x4xf32>
    %cst_206 = arith.constant dense<0.000000e+00> : vector<1xf32>
    %331 = vector.multi_reduction <add>, %330, %cst_206 [1, 2] : vector<1x1x4xf32> to vector<1xf32>
    %332 = vector.shape_cast %331 : vector<1xf32> to vector<1x1x1xf32>
    %333 = vector.extract %332[0, 0, 0] : f32 from vector<1x1x1xf32>
    %cst_207 = arith.constant 2.560000e+02 : f32
    %334 = arith.divf %333, %cst_207 : f32
    %335 = vector.extract_strided_slice %304 {offsets = [0, 4], sizes = [1, 4], strides = [1, 1]} : vector<1x8xf32> to vector<1x4xf32>
    %336 = vector.shape_cast %335 : vector<1x4xf32> to vector<1x1x4xf32>
    %cst_208 = arith.constant dense<0.000000e+00> : vector<1xf32>
    %337 = vector.multi_reduction <add>, %336, %cst_208 [1, 2] : vector<1x1x4xf32> to vector<1xf32>
    %338 = vector.shape_cast %337 : vector<1xf32> to vector<1x1x1xf32>
    %339 = vector.extract %338[0, 0, 0] : f32 from vector<1x1x1xf32>
    %cst_209 = arith.constant 2.560000e+02 : f32
    %340 = arith.divf %339, %cst_209 : f32
    %341 = arith.mulf %334, %334 : f32
    %342 = arith.subf %340, %341 : f32
    %cst_210 = arith.constant 0.000000e+00 : f32
    %343 = arith.maximumf %342, %cst_210 : f32
    %cst_211 = arith.constant 9.99999974E-6 : f32
    %344 = arith.addf %343, %cst_211 : f32
    %345 = math.rsqrt %344 : f32
    %346 = vector.broadcast %345 : f32 to vector<1x4xf32>
    %347 = arith.mulf %305, %346 : vector<1x4xf32>
    %cst_212 = arith.constant 0.000000e+00 : f32
    %348 = arith.subf %cst_212, %334 : f32
    %349 = arith.mulf %348, %345 : f32
    %350 = vector.broadcast %349 : f32 to vector<1x4xf32>
    %351 = arith.mulf %305, %350 : vector<1x4xf32>
    %352 = tpu.concatenate %324, %347 in 1 : vector<1x4xf32>, vector<1x4xf32> -> vector<1x8xf32>
    %353 = arith.mulf %352, %298 : vector<1x8xf32>
    %354 = tpu.concatenate %328, %351 in 1 : vector<1x4xf32>, vector<1x4xf32> -> vector<1x8xf32>
    %355 = arith.mulf %354, %298 : vector<1x8xf32>
    %356 = arith.addf %355, %299 : vector<1x8xf32>
    %357 = vector.broadcast %353 : vector<1x8xf32> to vector<64x8xf32>
    %358 = arith.mulf %297, %357 : vector<64x8xf32>
    %359 = vector.broadcast %356 : vector<1x8xf32> to vector<64x8xf32>
    %360 = arith.addf %358, %359 : vector<64x8xf32>
    %cst_213 = arith.constant 5.000000e-01 : f32
    %361 = vector.broadcast %cst_213 : f32 to vector<64x8xf32>
    %362 = arith.mulf %361, %360 : vector<64x8xf32>
    %cst_214 = arith.constant 0.707106769 : f32
    %363 = vector.broadcast %cst_214 : f32 to vector<64x8xf32>
    %364 = arith.mulf %360, %363 : vector<64x8xf32>
    %365 = math.absf %364 : vector<64x8xf32>
    %cst_215 = arith.constant 0.327591091 : f32
    %366 = vector.broadcast %cst_215 : f32 to vector<64x8xf32>
    %367 = arith.mulf %366, %365 : vector<64x8xf32>
    %cst_216 = arith.constant 1.000000e+00 : f32
    %368 = vector.broadcast %cst_216 : f32 to vector<64x8xf32>
    %369 = arith.addf %368, %367 : vector<64x8xf32>
    %cst_217 = arith.constant 1.000000e+00 : f32
    %370 = vector.broadcast %cst_217 : f32 to vector<64x8xf32>
    %371 = arith.divf %370, %369 : vector<64x8xf32>
    %cst_218 = arith.constant 1.06140542 : f32
    %372 = vector.broadcast %cst_218 : f32 to vector<64x8xf32>
    %373 = arith.mulf %372, %371 : vector<64x8xf32>
    %cst_219 = arith.constant -1.45315206 : f32
    %374 = vector.broadcast %cst_219 : f32 to vector<64x8xf32>
    %375 = arith.addf %373, %374 : vector<64x8xf32>
    %376 = arith.mulf %375, %371 : vector<64x8xf32>
    %cst_220 = arith.constant 1.42141378 : f32
    %377 = vector.broadcast %cst_220 : f32 to vector<64x8xf32>
    %378 = arith.addf %376, %377 : vector<64x8xf32>
    %379 = arith.mulf %378, %371 : vector<64x8xf32>
    %cst_221 = arith.constant -0.284496725 : f32
    %380 = vector.broadcast %cst_221 : f32 to vector<64x8xf32>
    %381 = arith.addf %379, %380 : vector<64x8xf32>
    %382 = arith.mulf %381, %371 : vector<64x8xf32>
    %cst_222 = arith.constant 0.254829586 : f32
    %383 = vector.broadcast %cst_222 : f32 to vector<64x8xf32>
    %384 = arith.addf %382, %383 : vector<64x8xf32>
    %385 = arith.mulf %384, %371 : vector<64x8xf32>
    %cst_223 = arith.constant 0.000000e+00 : f32
    %386 = vector.broadcast %cst_223 : f32 to vector<64x8xf32>
    %387 = arith.subf %386, %365 : vector<64x8xf32>
    %388 = arith.mulf %387, %365 : vector<64x8xf32>
    %389 = math.exp %388 : vector<64x8xf32>
    %390 = arith.mulf %385, %389 : vector<64x8xf32>
    %cst_224 = arith.constant 1.000000e+00 : f32
    %391 = vector.broadcast %cst_224 : f32 to vector<64x8xf32>
    %392 = arith.subf %391, %390 : vector<64x8xf32>
    %cst_225 = arith.constant 0.000000e+00 : f32
    %393 = vector.broadcast %cst_225 : f32 to vector<64x8xf32>
    %394 = arith.cmpf oge, %364, %393 : vector<64x8xf32>
    %cst_226 = arith.constant 0.000000e+00 : f32
    %395 = vector.broadcast %cst_226 : f32 to vector<64x8xf32>
    %396 = arith.subf %395, %392 : vector<64x8xf32>
    %397 = arith.select %394, %392, %396 : vector<64x8xi1>, vector<64x8xf32>
    %cst_227 = arith.constant 1.000000e+00 : f32
    %398 = vector.broadcast %cst_227 : f32 to vector<64x8xf32>
    %399 = arith.addf %398, %397 : vector<64x8xf32>
    %400 = arith.mulf %362, %399 : vector<64x8xf32>
    %401 = vector.shape_cast %400 : vector<64x8xf32> to vector<1x8x8x8xf32>
    %c0_228 = arith.constant 0 : index
    %c0_229 = arith.constant 0 : index
    %c0_230 = arith.constant 0 : index
    %c0_231 = arith.constant 0 : index
    %402 = vector.load %arg15[%c0_228, %c0_229, %c0_230, %c0_231] : memref<1x8x8x8xf32, #tpu.memory_space<vmem>>, vector<1x8x8x8xf32>
    tpu.vector_store %arg15[%c0_228, %c0_229, %c0_230, %c0_231], %401 {strides = array<i32>} : memref<1x8x8x8xf32, #tpu.memory_space<vmem>>, vector<1x8x8x8xf32>,
    return
  }
  func.func @transform_0(%arg0: i32) -> (i32, i32, i32, i32) {
    %c0_i32 = arith.constant 0 : i32
    %c0_i32_0 = arith.constant 0 : i32
    %c0_i32_1 = arith.constant 0 : i32
    %c0_i32_2 = arith.constant 0 : i32
    return %arg0, %c0_i32, %c0_i32_0, %c0_i32_1 : i32, i32, i32, i32
  }
  func.func @transform_1(%arg0: i32) -> (i32, i32) {
    %c0_i32 = arith.constant 0 : i32
    %c0_i32_0 = arith.constant 0 : i32
    %c0_i32_1 = arith.constant 0 : i32
    return %c0_i32, %c0_i32_0 : i32, i32
  }
  func.func @transform_2(%arg0: i32) -> (i32, i32) {
    %c0_i32 = arith.constant 0 : i32
    %c0_i32_0 = arith.constant 0 : i32
    %c0_i32_1 = arith.constant 0 : i32
    return %c0_i32, %c0_i32_0 : i32, i32
  }
  func.func @transform_3(%arg0: i32) -> (i32, i32) {
    %c0_i32 = arith.constant 0 : i32
    %c0_i32_0 = arith.constant 0 : i32
    %c0_i32_1 = arith.constant 0 : i32
    return %c0_i32, %c0_i32_0 : i32, i32
  }
  func.func @transform_4(%arg0: i32) -> (i32, i32) {
    %c0_i32 = arith.constant 0 : i32
    %c0_i32_0 = arith.constant 0 : i32
    %c0_i32_1 = arith.constant 0 : i32
    return %c0_i32, %c0_i32_0 : i32, i32
  }
  func.func @transform_5(%arg0: i32) -> (i32, i32) {
    %c0_i32 = arith.constant 0 : i32
    %c0_i32_0 = arith.constant 0 : i32
    %c0_i32_1 = arith.constant 0 : i32
    return %c0_i32, %c0_i32_0 : i32, i32
  }
  func.func @transform_6(%arg0: i32) -> (i32, i32) {
    %c0_i32 = arith.constant 0 : i32
    %c0_i32_0 = arith.constant 0 : i32
    %c0_i32_1 = arith.constant 0 : i32
    return %c0_i32, %c0_i32_0 : i32, i32
  }
  func.func @transform_7(%arg0: i32) -> (i32, i32) {
    %c0_i32 = arith.constant 0 : i32
    %c0_i32_0 = arith.constant 0 : i32
    %c0_i32_1 = arith.constant 0 : i32
    return %c0_i32, %c0_i32_0 : i32, i32
  }
  func.func @transform_8(%arg0: i32) -> (i32, i32) {
    %c0_i32 = arith.constant 0 : i32
    %c0_i32_0 = arith.constant 0 : i32
    %c0_i32_1 = arith.constant 0 : i32
    return %c0_i32, %c0_i32_0 : i32, i32
  }
  func.func @transform_9(%arg0: i32) -> (i32, i32) {
    %c0_i32 = arith.constant 0 : i32
    %c0_i32_0 = arith.constant 0 : i32
    %c0_i32_1 = arith.constant 0 : i32
    return %c0_i32, %c0_i32_0 : i32, i32
  }
  func.func @transform_10(%arg0: i32) -> (i32, i32) {
    %c0_i32 = arith.constant 0 : i32
    %c0_i32_0 = arith.constant 0 : i32
    %c0_i32_1 = arith.constant 0 : i32
    return %c0_i32, %c0_i32_0 : i32, i32
  }
  func.func @transform_11(%arg0: i32) -> (i32, i32) {
    %c0_i32 = arith.constant 0 : i32
    %c0_i32_0 = arith.constant 0 : i32
    %c0_i32_1 = arith.constant 0 : i32
    return %c0_i32, %c0_i32_0 : i32, i32
  }
  func.func @transform_12(%arg0: i32) -> (i32, i32) {
    %c0_i32 = arith.constant 0 : i32
    %c0_i32_0 = arith.constant 0 : i32
    %c0_i32_1 = arith.constant 0 : i32
    return %c0_i32, %c0_i32_0 : i32, i32
  }
  func.func @transform_13(%arg0: i32) -> (i32, i32) {
    %c0_i32 = arith.constant 0 : i32
    %c0_i32_0 = arith.constant 0 : i32
    %c0_i32_1 = arith.constant 0 : i32
    return %c0_i32, %c0_i32_0 : i32, i32
  }
  func.func @transform_14(%arg0: i32) -> (i32, i32, i32, i32) {
    %c0_i32 = arith.constant 0 : i32
    %c0_i32_0 = arith.constant 0 : i32
    %c0_i32_1 = arith.constant 0 : i32
    %c0_i32_2 = arith.constant 0 : i32
    return %arg0, %c0_i32, %c0_i32_0, %c0_i32_1 : i32, i32, i32, i32
  }
}

</mosaic_0001>

<bundles_post_ra>
// kernel: tpu_custom_call.1
= control target key start
LH: loop header
LB: loop body
LE: loop exit
PB: predicated region body
PF: predicated region fallthrough
CT: control target
= control target key end

     0   :  { %s16077_s0 = inlined_call_operand.vmem [shape: f32[2,16,16,4], index: 0, kind: input, shape index: {}]   ;;  %s16078_s1 = inlined_call_operand.vmem [shape: f32[256,256], index: 1, kind: input, shape index: {}]   ;;  %s16079_s2 = inlined_call_operand.vmem [shape: f32[36,8], index: 2, kind: input, shape index: {}]   ;;  %s16080_s3 = inlined_call_operand.vmem [shape: f32[1,8], index: 3, kind: input, shape index: {}]   ;;  %s16081_s4 = inlined_call_operand.vmem [shape: f32[1,8], index: 4, kind: input, shape index: {}]   ;;  %s16082_s5 = inlined_call_operand.vmem [shape: f32[1,8], index: 5, kind: input, shape index: {}]   ;;  %s16083_s6 = inlined_call_operand.vmem [shape: f32[72,8], index: 6, kind: input, shape index: {}]   ;;  %s16084_s7 = inlined_call_operand.vmem [shape: f32[1,8], index: 7, kind: input, shape index: {}]   ;;  %s16085_s8 = inlined_call_operand.vmem [shape: f32[1,8], index: 8, kind: input, shape index: {}]   ;;  %s16086_s9 = inlined_call_operand.vmem [shape: f32[1,8], index: 9, kind: input, shape index: {}]   ;;  %s16087_s10 = inlined_call_operand.vmem [shape: f32[288,8], index: 10, kind: input, shape index: {}]   ;;  %s16088_s11 = inlined_call_operand.vmem [shape: f32[1,8], index: 11, kind: input, shape index: {}]   ;;  %s16089_s12 = inlined_call_operand.vmem [shape: f32[1,8], index: 12, kind: input, shape index: {}]   ;;  %s16090_s13 = inlined_call_operand.vmem [shape: f32[1,8], index: 13, kind: input, shape index: {}]   ;;  %s16091_s14 = inlined_call_operand.hbm [shape: f32[2,8,8,8], index: 14, kind: output, shape index: {}]  }
   0x1   :  { %16384 = sst [smem:[#allocation123_spill]] %s16077_s0 }
   0x2   :  { %16385 = sst [smem:[#allocation124_spill]] %s16079_s2 }
   0x3   :  { %16386 = sst [smem:[#allocation125_spill]] %s16080_s3 }
   0x4   :  { %16387 = sst [smem:[#allocation126_spill]] %s16081_s4 }
   0x5   :  { %16388 = sst [smem:[#allocation127_spill]] %s16082_s5 }
   0x6   :  { %16389 = sst [smem:[#allocation128_spill]] %s16083_s6 }
   0x7   :  { %16390 = sst [smem:[#allocation129_spill]] %s16084_s7 }
   0x8   :  { %16391 = sst [smem:[#allocation130_spill]] %s16091_s14 }
   0x9   :  { %19 = vsyncpa [#allocation6], 0 }
   0xa   :  { %21 = vsyncpa [#allocation6 + $0x1], 0  ;;  %s9579_s29 = smov 0   ;;  %s9581_s30 = smov 0  }
   0xb   :  { %s9583_s15 = smov 0   ;;  %s9585_s16 = smov 0  }
   0xc LB: > { %16392 = sst [smem:[#allocation8_spill]] %s9471_s29  ;;  %s9600_s17 = sadd.s32 4294967295, %s9483_s16   ;;  %s9483_s16 = sphi %s9585_s16, %s17445_s16   ;;  %s9479_s15 = sphi %s9583_s15, %s17447_s15   ;;  %s9475_s30 = sphi %s9581_s30, %s17449_s30   ;;  %s9471_s29 = sphi %s9579_s29, %s17448_s29  }
   0xd   : > { %16393 = sst [smem:[#allocation9_spill]] %s9479_s15  ;;  %s8384_s18 = sadd.s32 4294967294, %s9483_s16  }
   0xe   : > { %16394 = sst [smem:[#allocation10_spill]] %s9483_s16  ;;  %s9604_s19 = sadd.s32 1, %s9483_s16  }
   0xf   : > { %16395 = sst [smem:[#allocation11_spill]] %s9604_s19  ;;  %s333_s20 = sadd.s32 1, %s9479_s15 }
  0x10   : > { %s330_s21 = ssub.s32 %s9483_s16, %s9604_s19  ;;  %p343_p0 = scmp.ne.s32.totalorder %s9479_s15, %s9475_s30 }
  0x11   : > { %p331_p1 = scmp.eq.s32.totalorder %s330_s21, 0  ;;  %p344_p2 = scmp.eq.s32.totalorder %s9600_s17, 1 }
  0x12   : > { %p349_p3 = scmp.ne.s32.totalorder %s9475_s30, %s9471_s29  ;;  %p350_p4 = scmp.eq.s32.totalorder %s8384_s18, 1 }
  0x13   : > { %s9615_s22 = scalar_select %p331_p1, %s9479_s15, %s333_s20  }
  0x14   : > { %p9617_p5 = por %p344_p2, %p343_p0  ;;  %p9621_p6 = por %p350_p4, %p349_p3 }
  0x15   : > { %16396 = sst [smem:[#allocation12_spill]] %s9615_s22  ;;  %p8387_p7 = scmp.ge.s32.totalorder %s9483_s16, 1 }
  0x16   : > { %s16398_s24 = scalar_select %p9621_p6, 1, 0 }
  0x17   : > { %p415_p8 = scmp.lt.s32.totalorder %s9483_s16, 3 }
  0x18   : > { %16399 = sst [smem:[#allocation13_spill]] %s16398_s24 }
  0x19   : > { %p416_p9 = pnand %p8387_p7, %p415_p8 }
  0x1b   : > { %419 = sbr.rel (%p416_p9) target bundleno = 4460 (0x116c), region = 76 }
  0x22   : > { %vm16238_vm0 = vcmask 31744   ;;  %vm501_vm1 = vcmask 25600   ;;  %vm16244_vm2 = vcmask 64512   ;;  %v16115_v0 = vmov 0.0   ;;  %p461_p10 = scmp.lt.s32.totalorder %s9600_s17, 1  ;;  %s16400_s0 = sld [smem:[#allocation123_spill]] }
  0x23   : > { %499 = vst.msk [vmem:[#allocation2] sm:$0xff] %vm16238_vm0, %v16115_v0  ;;  %500 = vst.msk [vmem:[#allocation2 + $0x8] sm:$0xff] %vm16238_vm0, %v16115_v0  ;;  %s16098_s20 = smov 8   ;;  %s16100_s21 = smov 4   ;;  %vm16240_vm3 = vcmask 261120   ;;  %vm2272_vm4 = vcmask 1043456  }
  0x24   : > { %503 = vst.msk [vmem:[#allocation2 + $0x18] sm:$0xff] %vm16238_vm0, %v16115_v0  ;;  %504 = vst.msk [vmem:[#allocation2 + $0x20] sm:$0xff] %vm16238_vm0, %v16115_v0  ;;  %s462_s25 = scalar_select %p461_p10, %s9600_s17, 1  ;;  %vm1965_vm5 = vcmask 97280   ;;  %vm16243_vm6 = vcmask 130048   ;;  %vm2031_vm7 = vcmask 162816  }
  0x25   : > { %506 = vst.msk [vmem:[#allocation2 + $0x30] sm:$0xff] %vm16238_vm0, %v16115_v0  ;;  %507 = vst.msk [vmem:[#allocation2 + $0x38] sm:$0xff] %vm16238_vm0, %v16115_v0  ;;  %s16096_s27 = smov 20   ;;  %s16401_s2 = sld [smem:[#allocation124_spill]]  ;;  %vm16242_vm8 = vcmask 195584   ;;  %vm2097_vm9 = vcmask 228352  }
  0x26   : > { %509 = vst.msk [vmem:[#allocation2 + $0x48] sm:$0xff] %vm16238_vm0, %v16115_v0  ;;  %510 = vst.msk [vmem:[#allocation2 + $0x50] sm:$0xff] %vm16238_vm0, %v16115_v0  ;;  %s8472_s26 = sshll.u32 %s462_s25, 8  ;;  %s16092_s25 = smov 12   ;;  %vm2175_vm10 = vcmask 293888   ;;  %vm3699_vm11 = vcmask 58368  }
  0x27   : > { %512 = vst.msk [vmem:[#allocation2 + $0x60] sm:$0xff] %vm16238_vm0, %v16115_v0  ;;  %513 = vst.msk [vmem:[#allocation2 + $0x68] sm:$0xff] %vm16238_vm0, %v16115_v0  ;;  %s16105_s22 = smov 32   ;;  %s16404_s15 = smov 4   ;;  %vm16239_vm12 = vcmask 24576  }
  0x28   : > { %515 = vst.msk [vmem:[#allocation2 + $0x78] sm:$0xff] %vm16238_vm0, %v16115_v0  ;;  %516 = vst.msk [vmem:[#allocation2 + $0x80] sm:$0xff] %vm16238_vm0, %v16115_v0  ;;  %s9814_s18 = scalar_lea.vmem %s16400_s0, %s8472_s26  ;;  %s16094_s26 = smov 16  }
  0x29   : > { %518 = vst.msk [vmem:[#allocation2 + $0x90] sm:$0xff] %vm16238_vm0, %v16115_v0  ;;  %519 = vst.msk [vmem:[#allocation2 + $0x98] sm:$0xff] %vm16238_vm0, %v16115_v0  ;;  %v466_v1 = vld [vmem:[%s9814_s18] sm:$0xff]  ;;  %v467_v2 = vld [vmem:[%s9814_s18 + $0x8] sm:$0xff]  ;;  %s16402_s0 = smov 12   ;;  %s16407_s3 = sld [smem:[#allocation125_spill]] }
  0x2a   : > { %521 = vst.msk [vmem:[#allocation2 + $0xa8] sm:$0xff] %vm16238_vm0, %v16115_v0  ;;  %522 = vst.msk [vmem:[#allocation2 + $0xb0] sm:$0xff] %vm16238_vm0, %v16115_v0  ;;  %v468_v3 = vld [vmem:[%s9814_s18 + $0x10] sm:$0xff]  ;;  %v651_v4 = vld [vmem:[#allocation2 + $0x2] sm:$0xff]  ;;  %s16408_s4 = sld [smem:[#allocation126_spill]]  ;;  %s16410_s5 = sld [smem:[#allocation127_spill]] }
  0x2b   : > { %524 = vst.msk [vmem:[#allocation2 + $0xc0] sm:$0xff] %vm16238_vm0, %v16115_v0  ;;  %525 = vst.msk [vmem:[#allocation2 + $0xc8] sm:$0xff] %vm16238_vm0, %v16115_v0  ;;  %v619_v5 = vld [vmem:[#allocation2 + $0x1] sm:$0xff]  ;;  %1036 = vrot.lane.b32.xlu1 %v651_v4, %s16098_s20  ;;  %v469_v8 = vld [vmem:[%s9814_s18 + $0x18] sm:$0xff]  ;;  %s16600_s14 = smov 24   ;;  %s16898_s6 = sld [smem:[#allocation128_spill]] }
  0x2c   : > { %527 = vst.msk [vmem:[#allocation2 + $0xd8] sm:$0xff] %vm16238_vm0, %v16115_v0  ;;  %528 = vst.msk [vmem:[#allocation2 + $0xe0] sm:$0xff] %vm16238_vm0, %v16115_v0  ;;  %908 = vrot.lane.b32.xlu0 %v619_v5, %s16100_s21  ;;  %v470_v9 = vld [vmem:[%s9814_s18 + $0x20] sm:$0xff]  ;;  %v471_v10 = vld [vmem:[%s9814_s18 + $0x28] sm:$0xff]  ;;  %s17048_s7 = sld [smem:[#allocation129_spill]] }
  0x2d   : > { %530 = vst.msk [vmem:[#allocation2 + $0xf0] sm:$0xff] %vm16238_vm0, %v16115_v0  ;;  %531 = vst.msk [vmem:[#allocation2 + $0xf8] sm:$0xff] %vm16238_vm0, %v16115_v0  ;;  %v472_v11 = vld [vmem:[%s9814_s18 + $0x30] sm:$0xff]  ;;  %v473_v12 = vld [vmem:[%s9814_s18 + $0x38] sm:$0xff] }
  0x2e   : > { %533 = vst.msk [vmem:[#allocation2 + $0x108] sm:$0xff] %vm16238_vm0, %v16115_v0  ;;  %534 = vst.msk [vmem:[#allocation2 + $0x110] sm:$0xff] %vm16238_vm0, %v16115_v0  ;;  %v474_v13 = vld [vmem:[%s9814_s18 + $0x40] sm:$0xff]  ;;  %v475_v14 = vld [vmem:[%s9814_s18 + $0x48] sm:$0xff] }
  0x2f   : > { %536 = vst.msk [vmem:[#allocation2 + $0x120] sm:$0xff] %vm16238_vm0, %v16115_v0  ;;  %537 = vst.msk [vmem:[#allocation2 + $0x128] sm:$0xff] %vm16238_vm0, %v16115_v0  ;;  %v476_v20 = vld [vmem:[%s9814_s18 + $0x50] sm:$0xff]  ;;  %v2163_v23 = vld [vmem:[%s16401_s2] sm:$0xff] }
  0x30   : > { %539 = vst.msk [vmem:[#allocation2 + $0x138] sm:$0xff] %vm16238_vm0, %v16115_v0  ;;  %540 = vst.msk [vmem:[#allocation2 + $0x140] sm:$0xff] %vm16238_vm0, %v16115_v0  ;;  %v2164_v24 = vld [vmem:[%s16401_s2 + $0x8] sm:$0xff]  ;;  %v477_v26 = vld [vmem:[%s9814_s18 + $0x58] sm:$0xff] }
  0x31   : > { %542 = vst.msk [vmem:[#allocation2 + $0x150] sm:$0xff] %vm16238_vm0, %v16115_v0  ;;  %543 = vst.msk [vmem:[#allocation2 + $0x158] sm:$0xff] %vm16238_vm0, %v16115_v0  ;;  %v8764_v25 = vpack.c.bf16 %v2164_v24, %v2163_v23  ;;  %v2165_v27 = vld [vmem:[%s16401_s2 + $0x10] sm:$0xff]  ;;  %v2166_v28 = vld [vmem:[%s16401_s2 + $0x18] sm:$0xff] }
  0x32   : > { %545 = vst.msk [vmem:[#allocation2 + $0x168] sm:$0xff] %vm16238_vm0, %v16115_v0  ;;  %546 = vst.msk [vmem:[#allocation2 + $0x170] sm:$0xff] %vm16238_vm0, %v16115_v0  ;;  %v8768_v31 = vpack.c.bf16 %v2166_v28, %v2165_v27  ;;  %v2167_v32 = vld [vmem:[%s16401_s2 + $0x20] sm:$0xf]  ;;  %v479_v38 = vld [vmem:[%s9814_s18 + $0x68] sm:$0xff] }
  0x33   : > { %548 = vst.msk [vmem:[#allocation2 + $0x180] sm:$0xff] %vm16238_vm0, %v16115_v0  ;;  %549 = vst.msk [vmem:[#allocation2 + $0x188] sm:$0xff] %vm16238_vm0, %v16115_v0  ;;  %8765 = vmatprep.subr.bf16.mxu0 %v8764_v25  ;;  %v478_v36 = vld [vmem:[%s9814_s18 + $0x60] sm:$0xff]  ;;  %v480_v44 = vld [vmem:[%s9814_s18 + $0x70] sm:$0xff] }
  0x34   : > { %551 = vst.msk [vmem:[#allocation2 + $0x198] sm:$0xff] %vm16238_vm0, %v16115_v0  ;;  %552 = vst.msk [vmem:[#allocation2 + $0x1a0] sm:$0xff] %vm16238_vm0, %v16115_v0  ;;  %8767 = vmatpush3.bf16.msra.mxu0 %v8764_v25  ;;  %v481_v46 = vld [vmem:[%s9814_s18 + $0x78] sm:$0xff]  ;;  %v482_v52 = vld [vmem:[%s9814_s18 + $0x80] sm:$0xff] }
  0x35   : > { %502 = vst.msk [vmem:[#allocation2 + $0x10] sm:$0x3] %vm501_vm1, %v16115_v0  ;;  %505 = vst.msk [vmem:[#allocation2 + $0x28] sm:$0x3] %vm501_vm1, %v16115_v0  ;;  %8769 = vmatprep.subr.bf16.mxu0 %v8768_v31  ;;  %v483_v58 = vld [vmem:[%s9814_s18 + $0x88] sm:$0xff] }
  0x36   : > { %508 = vst.msk [vmem:[#allocation2 + $0x40] sm:$0x3] %vm501_vm1, %v16115_v0  ;;  %511 = vst.msk [vmem:[#allocation2 + $0x58] sm:$0x3] %vm501_vm1, %v16115_v0 }
  0x37   : > { %514 = vst.msk [vmem:[#allocation2 + $0x70] sm:$0x3] %vm501_vm1, %v16115_v0  ;;  %517 = vst.msk [vmem:[#allocation2 + $0x88] sm:$0x3] %vm501_vm1, %v16115_v0 }
  0x38   : > { %520 = vst.msk [vmem:[#allocation2 + $0xa0] sm:$0x3] %vm501_vm1, %v16115_v0  ;;  %523 = vst.msk [vmem:[#allocation2 + $0xb8] sm:$0x3] %vm501_vm1, %v16115_v0  ;;  %8771 = vmatpush3.bf16.msra.mxu0 %v8768_v31 }
  0x39   : > { %526 = vst.msk [vmem:[#allocation2 + $0xd0] sm:$0x3] %vm501_vm1, %v16115_v0  ;;  %529 = vst.msk [vmem:[#allocation2 + $0xe8] sm:$0x3] %vm501_vm1, %v16115_v0  ;;  %8628 = vmatprep.subr.msk.mxu0 %vm2272_vm4, %v2167_v32 }
  0x3a   : > { %532 = vst.msk [vmem:[#allocation2 + $0x100] sm:$0x3] %vm501_vm1, %v16115_v0  ;;  %535 = vst.msk [vmem:[#allocation2 + $0x118] sm:$0x3] %vm501_vm1, %v16115_v0 }
  0x3b   : > { %538 = vst.msk [vmem:[#allocation2 + $0x130] sm:$0x3] %vm501_vm1, %v16115_v0  ;;  %541 = vst.msk [vmem:[#allocation2 + $0x148] sm:$0x3] %vm501_vm1, %v16115_v0 }
  0x3c   : > { %544 = vst.msk [vmem:[#allocation2 + $0x160] sm:$0x3] %vm501_vm1, %v16115_v0  ;;  %547 = vst.msk [vmem:[#allocation2 + $0x178] sm:$0x3] %vm501_vm1, %v16115_v0  ;;  %v652_v6 = vld [vmem:[#allocation2 + $0xa] sm:$0xff]  ;;  %8629 = vmatpush3.msk.msra.mxu0 %vm2272_vm4, %v2167_v32 }
  0x3d   : > { %550 = vst.msk [vmem:[#allocation2 + $0x190] sm:$0x3] %vm501_vm1, %v16115_v0  ;;  %553 = vst.msk [vmem:[#allocation2 + $0x1a8] sm:$0x3] %vm501_vm1, %v16115_v0  ;;  %v620_v7 = vld [vmem:[#allocation2 + $0x9] sm:$0xff]  ;;  %1038 = vrot.lane.b32.xlu1 %v652_v6, %s16098_s20 }
  0x3e   : > { %3697 = vst.msk [vmem:[#allocation3] sm:$0xff] %vm16244_vm2, %v16115_v0  ;;  %3698 = vst.msk [vmem:[#allocation3 + $0x8] sm:$0xff] %vm16244_vm2, %v16115_v0  ;;  %910 = vrot.lane.b32.xlu0 %v620_v7, %s16100_s21 }
  0x3f   : > { %3701 = vst.msk [vmem:[#allocation3 + $0x18] sm:$0xff] %vm16244_vm2, %v16115_v0  ;;  %3702 = vst.msk [vmem:[#allocation3 + $0x20] sm:$0xff] %vm16244_vm2, %v16115_v0 }
  0x40   : > { %3704 = vst.msk [vmem:[#allocation3 + $0x30] sm:$0xff] %vm16244_vm2, %v16115_v0  ;;  %3705 = vst.msk [vmem:[#allocation3 + $0x38] sm:$0xff] %vm16244_vm2, %v16115_v0 }
  0x41   : > { %3707 = vst.msk [vmem:[#allocation3 + $0x48] sm:$0xff] %vm16244_vm2, %v16115_v0  ;;  %3708 = vst.msk [vmem:[#allocation3 + $0x50] sm:$0xff] %vm16244_vm2, %v16115_v0 }
  0x42   : > { %3710 = vst.msk [vmem:[#allocation3 + $0x60] sm:$0xff] %vm16244_vm2, %v16115_v0  ;;  %3711 = vst.msk [vmem:[#allocation3 + $0x68] sm:$0xff] %vm16244_vm2, %v16115_v0 }
  0x43   : > { %3713 = vst.msk [vmem:[#allocation3 + $0x78] sm:$0xff] %vm16244_vm2, %v16115_v0  ;;  %3714 = vst.msk [vmem:[#allocation3 + $0x80] sm:$0xff] %vm16244_vm2, %v16115_v0 }
  0x44   : > { %3716 = vst.msk [vmem:[#allocation3 + $0x90] sm:$0xff] %vm16244_vm2, %v16115_v0  ;;  %3717 = vst.msk [vmem:[#allocation3 + $0x98] sm:$0xff] %vm16244_vm2, %v16115_v0 }
  0x45   : > { %3719 = vst.msk [vmem:[#allocation3 + $0xa8] sm:$0xff] %vm16244_vm2, %v16115_v0  ;;  %3720 = vst.msk [vmem:[#allocation3 + $0xb0] sm:$0xff] %vm16244_vm2, %v16115_v0 }
  0x46   : > { %3722 = vst.msk [vmem:[#allocation3 + $0xc0] sm:$0xff] %vm16244_vm2, %v16115_v0  ;;  %3723 = vst.msk [vmem:[#allocation3 + $0xc8] sm:$0xff] %vm16244_vm2, %v16115_v0 }
  0x47   : > { %3725 = vst.msk [vmem:[#allocation3 + $0xd8] sm:$0xff] %vm16244_vm2, %v16115_v0  ;;  %3726 = vst.msk [vmem:[#allocation3 + $0xe0] sm:$0xff] %vm16244_vm2, %v16115_v0 }
  0x48   : > { %3728 = vst.msk [vmem:[#allocation3 + $0xf0] sm:$0xff] %vm16244_vm2, %v16115_v0  ;;  %3729 = vst.msk [vmem:[#allocation3 + $0xf8] sm:$0xff] %vm16244_vm2, %v16115_v0 }
  0x49   : > { %3731 = vst.msk [vmem:[#allocation3 + $0x108] sm:$0xff] %vm16244_vm2, %v16115_v0  ;;  %3732 = vst.msk [vmem:[#allocation3 + $0x110] sm:$0xff] %vm16244_vm2, %v16115_v0 }
  0x4a   : > { %3734 = vst.msk [vmem:[#allocation3 + $0x120] sm:$0xff] %vm16244_vm2, %v16115_v0  ;;  %3735 = vst.msk [vmem:[#allocation3 + $0x128] sm:$0xff] %vm16244_vm2, %v16115_v0 }
  0x4b   : > { %3737 = vst.msk [vmem:[#allocation3 + $0x138] sm:$0xff] %vm16244_vm2, %v16115_v0  ;;  %3738 = vst.msk [vmem:[#allocation3 + $0x140] sm:$0xff] %vm16244_vm2, %v16115_v0 }
  0x4c   : > { %3740 = vst.msk [vmem:[#allocation3 + $0x150] sm:$0xff] %vm16244_vm2, %v16115_v0  ;;  %3741 = vst.msk [vmem:[#allocation3 + $0x158] sm:$0xff] %vm16244_vm2, %v16115_v0 }
  0x4d   : > { %3743 = vst.msk [vmem:[#allocation3 + $0x168] sm:$0xff] %vm16244_vm2, %v16115_v0  ;;  %3744 = vst.msk [vmem:[#allocation3 + $0x170] sm:$0xff] %vm16244_vm2, %v16115_v0 }
  0x4e   : > { %3746 = vst.msk [vmem:[#allocation3 + $0x180] sm:$0xff] %vm16244_vm2, %v16115_v0  ;;  %3747 = vst.msk [vmem:[#allocation3 + $0x188] sm:$0xff] %vm16244_vm2, %v16115_v0 }
  0x4f   : > { %3749 = vst.msk [vmem:[#allocation3 + $0x198] sm:$0xff] %vm16244_vm2, %v16115_v0  ;;  %3750 = vst.msk [vmem:[#allocation3 + $0x1a0] sm:$0xff] %vm16244_vm2, %v16115_v0 }
  0x50   : > { %555 = vst.msk [vmem:[#allocation2 + $0x19] sm:$0xff] %vm16238_vm0, %v466_v1  ;;  %556 = vst.msk [vmem:[#allocation2 + $0x21] sm:$0xff] %vm16238_vm0, %v467_v2 }
  0x51   : > { %557 = vst.msk [vmem:[#allocation2 + $0x31] sm:$0xff] %vm16238_vm0, %v468_v3  ;;  %558 = vst.msk [vmem:[#allocation2 + $0x39] sm:$0xff] %vm16238_vm0, %v469_v8 }
  0x52   : > { %559 = vst.msk [vmem:[#allocation2 + $0x49] sm:$0xff] %vm16238_vm0, %v470_v9  ;;  %560 = vst.msk [vmem:[#allocation2 + $0x51] sm:$0xff] %vm16238_vm0, %v471_v10 }
  0x53   : > { %561 = vst.msk [vmem:[#allocation2 + $0x61] sm:$0xff] %vm16238_vm0, %v472_v11  ;;  %562 = vst.msk [vmem:[#allocation2 + $0x69] sm:$0xff] %vm16238_vm0, %v473_v12 }
  0x54   : > { %563 = vst.msk [vmem:[#allocation2 + $0x79] sm:$0xff] %vm16238_vm0, %v474_v13  ;;  %564 = vst.msk [vmem:[#allocation2 + $0x81] sm:$0xff] %vm16238_vm0, %v475_v14  ;;  %v587_v13 = vld [vmem:[#allocation2] sm:$0xff]  ;;  %v484_v14 = vld [vmem:[%s9814_s18 + $0x90] sm:$0xff] }
  0x55   : > { %565 = vst.msk [vmem:[#allocation2 + $0x91] sm:$0xff] %vm16238_vm0, %v476_v20  ;;  %566 = vst.msk [vmem:[#allocation2 + $0x99] sm:$0xff] %vm16238_vm0, %v477_v26  ;;  %v588_v26 = vld [vmem:[#allocation2 + $0x8] sm:$0xff] }
  0x56   : > { %7300 = vst.msk [vmem:[#allocation4] sm:$0xff] %vm16240_vm3, %v16115_v0  ;;  %7303 = vst.msk [vmem:[#allocation4 + $0x10] sm:$0xff] %vm16240_vm3, %v16115_v0 }
  0x57   : > { %v9840_v15 = vld [vmem:[#allocation2 + $0x20] sm:$0xff]  ;;  %v9842_v16 = vld [vmem:[#allocation2 + $0x18] sm:$0xff]  ;;  %7305 = vst.msk [vmem:[#allocation4 + $0x20] sm:$0xff] %vm16240_vm3, %v16115_v0  ;;  %7307 = vst.msk [vmem:[#allocation4 + $0x30] sm:$0xff] %vm16240_vm3, %v16115_v0 }
  0x58   : > { %1166 = vrot.lane.b32.xlu1 %v9840_v15, %s16092_s25  ;;  %1164 = vrot.lane.b32.xlu0 %v9842_v16, %s16092_s25  ;;  %v715_v17 = vld [vmem:[#allocation2 + $0x19] sm:$0xff]  ;;  %v716_v18 = vld [vmem:[#allocation2 + $0x21] sm:$0xff]  ;;  %v9856_v22 = vld [vmem:[#allocation2 + $0x30] sm:$0xff]  ;;  %7309 = vst.msk [vmem:[#allocation4 + $0x40] sm:$0xff] %vm16240_vm3, %v16115_v0  ;;  %s16406_s25 = smov 8  }
  0x59   : > { %v747_v19 = vld [vmem:[#allocation2 + $0x1a] sm:$0xff]  ;;  %v748_v21 = vld [vmem:[#allocation2 + $0x22] sm:$0xff]  ;;  %7311 = vst.msk [vmem:[#allocation4 + $0x50] sm:$0xff] %vm16240_vm3, %v16115_v0  ;;  %7313 = vst.msk [vmem:[#allocation4 + $0x60] sm:$0xff] %vm16240_vm3, %v16115_v0 }
  0x5a   : > { %7315 = vst.msk [vmem:[#allocation4 + $0x70] sm:$0xff] %vm16240_vm3, %v16115_v0  ;;  %7317 = vst.msk [vmem:[#allocation4 + $0x80] sm:$0xff] %vm16240_vm3, %v16115_v0  ;;  %v9898_v29 = vld [vmem:[#allocation2 + $0x38] sm:$0xff]  ;;  %v9919_v37 = vld [vmem:[#allocation2 + $0x48] sm:$0xff] }
  0x5b   : > { %7319 = vst.msk [vmem:[#allocation4 + $0x90] sm:$0xff] %vm16240_vm3, %v16115_v0  ;;  %v812_v30 = vld [vmem:[#allocation2 + $0x31] sm:$0xff]  ;;  %v813_v33 = vld [vmem:[#allocation2 + $0x39] sm:$0xff]  ;;  %v814_v40 = vld [vmem:[#allocation2 + $0x49] sm:$0xff] }
  0x5c   : > { %1292 = vrot.lane.b32.xlu0 %v715_v17, %s16094_s26  ;;  %912 = vrot.lane.b32.xlu1 %v715_v17, %s16100_s21  ;;  %v844_v34 = vld [vmem:[#allocation2 + $0x32] sm:$0xff]  ;;  %v845_v35 = vld [vmem:[#allocation2 + $0x3a] sm:$0xff]  ;;  %567 = vst.msk [vmem:[#allocation2 + $0xa9] sm:$0xff] %vm16238_vm0, %v478_v36  ;;  %568 = vst.msk [vmem:[#allocation2 + $0xb1] sm:$0xff] %vm16238_vm0, %v479_v38 }
  0x5d   : > { %v9929_v39 = vld [vmem:[#allocation2 + $0x50] sm:$0xff]  ;;  %569 = vst.msk [vmem:[#allocation2 + $0xc1] sm:$0xff] %vm16238_vm0, %v480_v44  ;;  %v9947_v45 = vld [vmem:[#allocation2 + $0x60] sm:$0xff]  ;;  %570 = vst.msk [vmem:[#allocation2 + $0xc9] sm:$0xff] %vm16238_vm0, %v481_v46 }
  0x5e   : > { %v815_v41 = vld [vmem:[#allocation2 + $0x51] sm:$0xff]  ;;  %v9957_v47 = vld [vmem:[#allocation2 + $0x68] sm:$0xff]  ;;  %571 = vst.msk [vmem:[#allocation2 + $0xd9] sm:$0xff] %vm16238_vm0, %v482_v52  ;;  %572 = vst.msk [vmem:[#allocation2 + $0xe1] sm:$0xff] %vm16238_vm0, %v483_v58 }
  0x5f   : > { %v846_v42 = vld [vmem:[#allocation2 + $0x4a] sm:$0xff]  ;;  %v847_v43 = vld [vmem:[#allocation2 + $0x52] sm:$0xff]  ;;  %v816_v48 = vld [vmem:[#allocation2 + $0x61] sm:$0xff]  ;;  %573 = vst.msk [vmem:[#allocation2 + $0xf1] sm:$0xff] %vm16238_vm0, %v484_v14 }
  0x60   : > { %1294 = vrot.lane.b32.xlu0 %v716_v18, %s16094_s26  ;;  %1420 = vrot.lane.b32.xlu1 %v747_v19, %s16096_s27  ;;  %s16107_s26 = smov 24   ;;  %v817_v49 = vld [vmem:[#allocation2 + $0x69] sm:$0xff]  ;;  %v9975_v55 = vld [vmem:[#allocation2 + $0x78] sm:$0xff]  ;;  %v9989_v61 = vld [vmem:[#allocation2 + $0x80] sm:$0xff]  ;;  %3703 = vst.msk [vmem:[#allocation3 + $0x28] sm:$0x3] %vm3699_vm11, %v16115_v0 }
  0x61   : > { %v848_v50 = vld [vmem:[#allocation2 + $0x62] sm:$0xff]  ;;  %v849_v51 = vld [vmem:[#allocation2 + $0x6a] sm:$0xff]  ;;  %v818_v62 = vld [vmem:[#allocation2 + $0x79] sm:$0xff]  ;;  %3700 = vst.msk [vmem:[#allocation3 + $0x10] sm:$0x3] %vm3699_vm11, %v16115_v0 }
  0x62   : > { %v819_v4 = vld [vmem:[#allocation2 + $0x81] sm:$0xff]  ;;  %3706 = vst.msk [vmem:[#allocation3 + $0x40] sm:$0x3] %vm3699_vm11, %v16115_v0  ;;  %3709 = vst.msk [vmem:[#allocation3 + $0x58] sm:$0x3] %vm3699_vm11, %v16115_v0 }
  0x63   : > { %v850_v5 = vld [vmem:[#allocation2 + $0x7a] sm:$0xff]  ;;  %v851_v10 = vld [vmem:[#allocation2 + $0x82] sm:$0xff]  ;;  %3712 = vst.msk [vmem:[#allocation3 + $0x70] sm:$0x3] %vm3699_vm11, %v16115_v0  ;;  %3715 = vst.msk [vmem:[#allocation3 + $0x88] sm:$0x3] %vm3699_vm11, %v16115_v0 }
  0x64   : > { %914 = vrot.lane.b32.xlu0 %v716_v18, %s16100_s21  ;;  %1040 = vrot.lane.b32.xlu1 %v747_v19, %s16098_s20  ;;  %s16405_s21 = smov 20   ;;  %3718 = vst.msk [vmem:[#allocation3 + $0xa0] sm:$0x3] %vm3699_vm11, %v16115_v0  ;;  %3721 = vst.msk [vmem:[#allocation3 + $0xb8] sm:$0x3] %vm3699_vm11, %v16115_v0 }
  0x65   : > { %3724 = vst.msk [vmem:[#allocation3 + $0xd0] sm:$0x3] %vm3699_vm11, %v16115_v0  ;;  %3727 = vst.msk [vmem:[#allocation3 + $0xe8] sm:$0x3] %vm3699_vm11, %v16115_v0 }
  0x66   : > { %3730 = vst.msk [vmem:[#allocation3 + $0x100] sm:$0x3] %vm3699_vm11, %v16115_v0  ;;  %3733 = vst.msk [vmem:[#allocation3 + $0x118] sm:$0x3] %vm3699_vm11, %v16115_v0 }
  0x67   : > { %3736 = vst.msk [vmem:[#allocation3 + $0x130] sm:$0x3] %vm3699_vm11, %v16115_v0  ;;  %3739 = vst.msk [vmem:[#allocation3 + $0x148] sm:$0x3] %vm3699_vm11, %v16115_v0 }
  0x68   : > { %1422 = vrot.lane.b32.xlu0 %v748_v21, %s16096_s27  ;;  %1548 = vrot.lane.b32.xlu1 %v9856_v22, %s16107_s26  ;;  %s16403_s27 = smov 16   ;;  %3742 = vst.msk [vmem:[#allocation3 + $0x160] sm:$0x3] %vm3699_vm11, %v16115_v0  ;;  %3745 = vst.msk [vmem:[#allocation3 + $0x178] sm:$0x3] %vm3699_vm11, %v16115_v0 }
  0x69   : > { %3748 = vst.msk [vmem:[#allocation3 + $0x190] sm:$0x3] %vm3699_vm11, %v16115_v0  ;;  %3751 = vst.msk [vmem:[#allocation3 + $0x1a8] sm:$0x3] %vm3699_vm11, %v16115_v0 }
  0x6c   : > { %1042 = vrot.lane.b32.xlu0 %v748_v21, %s16098_s20  ;;  %1168 = vrot.lane.b32.xlu1 %v9856_v22, %s16402_s0  ;;  %s9492_s20 = smov 28   ;;  %v10019_v21 = vld [vmem:[#allocation2 + $0x90] sm:$0xff] }
  0x70   : > { %1550 = vrot.lane.b32.xlu0 %v9898_v29, %s16107_s26  ;;  %1676 = vrot.lane.b32.xlu1 %v812_v30, %s9492_s20 }
  0x74   : > { %1170 = vrot.lane.b32.xlu0 %v9898_v29, %s16402_s0  ;;  %1296 = vrot.lane.b32.xlu1 %v812_v30, %s16403_s27 }
  0x78   : > { %1678 = vrot.lane.b32.xlu0 %v813_v33, %s9492_s20  ;;  %1804 = vrot.lane.b32.xlu1 %v844_v34, %s16105_s22 }
  0x7c   : > { %916 = vrot.lane.b32.xlu0 %v812_v30, %s16404_s15  ;;  %1298 = vrot.lane.b32.xlu1 %v813_v33, %s16403_s27  ;;  %v485_v30 = vld [vmem:[%s9814_s18 + $0x98] sm:$0xff] }
  0x7d   : > { %574 = vst.msk [vmem:[#allocation2 + $0xf9] sm:$0xff] %vm16238_vm0, %v485_v30 }
  0x80   : > { %1424 = vrot.lane.b32.xlu0 %v844_v34, %s16405_s21  ;;  %1806 = vrot.lane.b32.xlu1 %v845_v35, %s16105_s22 }
  0x84   : > { %918 = vrot.lane.b32.xlu0 %v813_v33, %s16404_s15  ;;  %1044 = vrot.lane.b32.xlu1 %v844_v34, %s16406_s25 }
  0x88   : > { %1426 = vrot.lane.b32.xlu0 %v845_v35, %s16405_s21  ;;  %1552 = vrot.lane.b32.xlu1 %v9919_v37, %s16107_s26 }
  0x8c   : > { %1046 = vrot.lane.b32.xlu0 %v845_v35, %s16406_s25  ;;  %1172 = vrot.lane.b32.xlu1 %v9919_v37, %s16402_s0 }
  0x90   : > { %1554 = vrot.lane.b32.xlu0 %v9929_v39, %s16107_s26  ;;  %1680 = vrot.lane.b32.xlu1 %v814_v40, %s9492_s20 }
  0x94   : > { %1174 = vrot.lane.b32.xlu0 %v9929_v39, %s16402_s0  ;;  %1300 = vrot.lane.b32.xlu1 %v814_v40, %s16403_s27 }
  0x98   : > { %1682 = vrot.lane.b32.xlu0 %v815_v41, %s9492_s20  ;;  %1808 = vrot.lane.b32.xlu1 %v846_v42, %s16105_s22 }
  0x9c   : > { %920 = vrot.lane.b32.xlu0 %v814_v40, %s16404_s15  ;;  %1302 = vrot.lane.b32.xlu1 %v815_v41, %s16403_s27  ;;  %v10043_v40 = vld [vmem:[#allocation2 + $0x98] sm:$0xff] }
  0x9d   : > { %v1037_v53 = vpop.permute.xlu1 %1036 }
  0x9e   : > { %v909_v54 = vpop.permute.xlu0 %908 }
  0x9f   : > { %v1900_v17 = vsel %vm16238_vm0, %v587_v13, %v909_v54  ;;  %v821_v54 = vld [vmem:[#allocation2 + $0x99] sm:$0xff] }
  0xa0   : > { %1428 = vrot.lane.b32.xlu0 %v846_v42, %s16405_s21  ;;  %1810 = vrot.lane.b32.xlu1 %v847_v43, %s16105_s22  ;;  %v1933_v20 = vsel %vm16244_vm2, %v1900_v17, %v1037_v53 }
  0xa4   : > { %922 = vrot.lane.b32.xlu0 %v815_v41, %s16404_s15  ;;  %1048 = vrot.lane.b32.xlu1 %v846_v42, %s16406_s25  ;;  %v820_v41 = vld [vmem:[#allocation2 + $0x91] sm:$0xff] }
  0xa8   : > { %1430 = vrot.lane.b32.xlu0 %v847_v43, %s16405_s21  ;;  %1556 = vrot.lane.b32.xlu1 %v9947_v45, %s16107_s26 }
  0xac   : > { %1050 = vrot.lane.b32.xlu0 %v847_v43, %s16406_s25  ;;  %1176 = vrot.lane.b32.xlu1 %v9947_v45, %s16402_s0 }
  0xaf   : > { %v9977_v56 = vpop.permute.xlu1 %1038 }
  0xb0   : > { %1558 = vrot.lane.b32.xlu0 %v9957_v47, %s16107_s26  ;;  %1684 = vrot.lane.b32.xlu1 %v816_v48, %s9492_s20  ;;  %v911_v57 = vpop.permute.xlu0 %910 }
  0xb1   : > { %v1901_v32 = vsel %vm16238_vm0, %v588_v26, %v911_v57 }
  0xb2   : > { %v1934_v38 = vsel %vm16244_vm2, %v1901_v32, %v9977_v56  ;;  %v852_v56 = vld [vmem:[#allocation2 + $0x92] sm:$0xff] }
  0xb4   : > { %1178 = vrot.lane.b32.xlu0 %v9957_v47, %s16402_s0  ;;  %1304 = vrot.lane.b32.xlu1 %v816_v48, %s16403_s27 }
  0xb8   : > { %1686 = vrot.lane.b32.xlu0 %v817_v49, %s9492_s20  ;;  %1812 = vrot.lane.b32.xlu1 %v848_v50, %s16105_s22 }
  0xbc   : > { %924 = vrot.lane.b32.xlu0 %v816_v48, %s16404_s15  ;;  %1306 = vrot.lane.b32.xlu1 %v817_v49, %s16403_s27 }
  0xc0   : > { %1432 = vrot.lane.b32.xlu0 %v848_v50, %s16405_s21  ;;  %1814 = vrot.lane.b32.xlu1 %v849_v51, %s16105_s22 }
  0xc4   : > { %926 = vrot.lane.b32.xlu0 %v817_v49, %s16404_s15  ;;  %1052 = vrot.lane.b32.xlu1 %v848_v50, %s16406_s25 }
  0xc8   : > { %1434 = vrot.lane.b32.xlu0 %v849_v51, %s16405_s21  ;;  %1560 = vrot.lane.b32.xlu1 %v9975_v55, %s16107_s26 }
  0xca   : > { %v9984_v59 = vpop.permute.xlu1 %1166  ;;  %v1165_v60 = vpop.permute.xlu0 %1164 }
  0xcb   : > { %v1966_v23 = vsel %vm1965_vm5, %v1933_v20, %v1165_v60  ;;  %v1967_v42 = vsel %vm1965_vm5, %v1934_v38, %v9984_v59  ;;  %v854_v38 = vld [vmem:[#allocation2 + $0xaa] sm:$0xff] }
  0xcc   : > { %1054 = vrot.lane.b32.xlu0 %v849_v51, %s16406_s25  ;;  %1180 = vrot.lane.b32.xlu1 %v9975_v55, %s16402_s0 }
  0xce   : > { %v1293_v63 = vpop.permute.xlu0 %1292  ;;  %v9991_v1 = vpop.permute.xlu1 %912 }
  0xcf   : > { %v1999_v27 = vsel %vm16243_vm6, %v1966_v23, %v1293_v63 }
  0xd0   : > { %1562 = vrot.lane.b32.xlu0 %v9989_v61, %s16107_s26  ;;  %1688 = vrot.lane.b32.xlu1 %v818_v62, %s9492_s20 }
  0xd2   : > { %v1295_v2 = vpop.permute.xlu0 %1294  ;;  %v1421_v3 = vpop.permute.xlu1 %1420 }
  0xd3   : > { %v2032_v28 = vsel %vm2031_vm7, %v1999_v27, %v1421_v3  ;;  %v2000_v46 = vsel %vm16243_vm6, %v1967_v42, %v1295_v2  ;;  %v486_v3 = vld [vmem:[%s9814_s18 + $0xa0] sm:$0xff]  ;;  %v10110_v27 = vld [vmem:[#allocation2 + $0xb0] sm:$0xff] }
  0xd4   : > { %1182 = vrot.lane.b32.xlu0 %v9989_v61, %s16402_s0  ;;  %1308 = vrot.lane.b32.xlu1 %v818_v62, %s16403_s27  ;;  %575 = vst.msk [vmem:[#allocation2 + $0x109] sm:$0xff] %vm16238_vm0, %v486_v3 }
  0xd6   : > { %v9999_v6 = vpop.permute.xlu0 %914  ;;  %v10001_v7 = vpop.permute.xlu1 %1040 }
  0xd8   : > { %1690 = vrot.lane.b32.xlu0 %v819_v4, %s9492_s20  ;;  %1816 = vrot.lane.b32.xlu1 %v850_v5, %s16105_s22 }
  0xda   : > { %v1423_v8 = vpop.permute.xlu0 %1422  ;;  %v1549_v9 = vpop.permute.xlu1 %1548 }
  0xdb   : > { %v2065_v31 = vsel %vm16242_vm8, %v2032_v28, %v1549_v9  ;;  %v2033_v48 = vsel %vm2031_vm7, %v2000_v46, %v1423_v8  ;;  %v1902_v8 = vsel %vm16238_vm0, %v9842_v16, %v9991_v1  ;;  %v487_v1 = vld [vmem:[%s9814_s18 + $0xa8] sm:$0xff] }
  0xdc   : > { %928 = vrot.lane.b32.xlu0 %v818_v62, %s16404_s15  ;;  %1310 = vrot.lane.b32.xlu1 %v819_v4, %s16403_s27  ;;  %v853_v62 = vld [vmem:[#allocation2 + $0x9a] sm:$0xff]  ;;  %v1935_v9 = vsel %vm16244_vm2, %v1902_v8, %v10001_v7  ;;  %576 = vst.msk [vmem:[#allocation2 + $0x111] sm:$0xff] %vm16238_vm0, %v487_v1  ;;  %v822_v28 = vld [vmem:[#allocation2 + $0xa9] sm:$0xff] }
  0xde   : > { %v10007_v11 = vpop.permute.xlu0 %1042  ;;  %v10009_v12 = vpop.permute.xlu1 %1168 }
  0xdf   : > { %v1968_v13 = vsel %vm1965_vm5, %v1935_v9, %v10009_v12 }
  0xe0   : > { %1436 = vrot.lane.b32.xlu0 %v850_v5, %s16405_s21  ;;  %1818 = vrot.lane.b32.xlu1 %v851_v10, %s16105_s22 }
  0xe2   : > { %v1551_v18 = vpop.permute.xlu0 %1550  ;;  %v1677_v19 = vpop.permute.xlu1 %1676 }
  0xe3   : > { %v2098_v33 = vsel %vm2097_vm9, %v2065_v31, %v1677_v19  ;;  %v2066_v49 = vsel %vm16242_vm8, %v2033_v48, %v1551_v18  ;;  %v855_v48 = vld [vmem:[#allocation2 + $0xb2] sm:$0xff] }
  0xe4   : > { %930 = vrot.lane.b32.xlu0 %v819_v4, %s16404_s15  ;;  %1056 = vrot.lane.b32.xlu1 %v850_v5, %s16406_s25 }
  0xe6   : > { %v10022_v24 = vpop.permute.xlu0 %1170  ;;  %v10024_v25 = vpop.permute.xlu1 %1296 }
  0xe7   : > { %v2001_v18 = vsel %vm16243_vm6, %v1968_v13, %v10024_v25  ;;  %v1903_v25 = vsel %vm16238_vm0, %v9840_v15, %v9999_v6 }
  0xe8   : > { %1438 = vrot.lane.b32.xlu0 %v851_v10, %s16405_s21  ;;  %1564 = vrot.lane.b32.xlu1 %v10019_v21, %s16107_s26  ;;  %v1936_v26 = vsel %vm16244_vm2, %v1903_v25, %v10007_v11  ;;  %v825_v25 = vld [vmem:[#allocation2 + $0xc9] sm:$0xff] }
  0xe9   : > { %v1969_v30 = vsel %vm1965_vm5, %v1936_v26, %v10022_v24  ;;  %v856_v26 = vld [vmem:[#allocation2 + $0xc2] sm:$0xff] }
  0xea   : > { %v1679_v34 = vpop.permute.xlu0 %1678  ;;  %v1805_v35 = vpop.permute.xlu1 %1804 }
  0xeb   : > { %v2131_v36 = vsel %vm16240_vm3, %v2098_v33, %v1805_v35  ;;  %v2099_v50 = vsel %vm2097_vm9, %v2066_v49, %v1679_v34 }
  0xec   : > { %1058 = vrot.lane.b32.xlu0 %v851_v10, %s16406_s25  ;;  %1184 = vrot.lane.b32.xlu1 %v10019_v21, %s16402_s0  ;;  %v10084_v10 = vld [vmem:[#allocation2 + $0xa8] sm:$0xff] }
  0xed   : > { %8630 = vmatprep.mubr.msk.f32.mxu0 %vm2175_vm10, %v2131_v36  ;;  %v823_v36 = vld [vmem:[#allocation2 + $0xb1] sm:$0xff] }
  0xee   : > { %v10047_v43 = vpop.permute.xlu0 %916  ;;  %v1299_v44 = vpop.permute.xlu1 %1298 }
  0xef   : > { %v2002_v15 = vsel %vm16243_vm6, %v1969_v30, %v1299_v44 }
  0xf0   : > { %1566 = vrot.lane.b32.xlu0 %v10043_v40, %s16107_s26  ;;  %1692 = vrot.lane.b32.xlu1 %v820_v41, %s9492_s20 }
  0xf2   : > { %v1425_v51 = vpop.permute.xlu0 %1424  ;;  %v1807_v52 = vpop.permute.xlu1 %1806 }
  0xf3   : > { %v2132_v53 = vsel %vm16240_vm3, %v2099_v50, %v1807_v52  ;;  %v2034_v16 = vsel %vm2031_vm7, %v2001_v18, %v1425_v51  ;;  %v488_v51 = vld [vmem:[%s9814_s18 + $0xb0] sm:$0xff]  ;;  %v10176_v18 = vld [vmem:[#allocation2 + $0xc8] sm:$0xff] }
  0xf4   : > { %1186 = vrot.lane.b32.xlu0 %v10043_v40, %s16402_s0  ;;  %1312 = vrot.lane.b32.xlu1 %v820_v41, %s16403_s27  ;;  %577 = vst.msk [vmem:[#allocation2 + $0x121] sm:$0xff] %vm16238_vm0, %v488_v51 }
  0xf5   : > { %8631 = vmatmul.mubr.msk.f32.vlgmr.msra.gmra.mrb[0].mxu0 %vm2175_vm10, %v2132_v53 }
  0xf6   : > { %v10061_v57 = vpop.permute.xlu0 %918  ;;  %v10063_v58 = vpop.permute.xlu1 %1044 }
  0xf7   : > { %v1905_v13 = vsel %vm16238_vm0, %v9898_v29, %v10061_v57 }
  0xf8   : > { %1694 = vrot.lane.b32.xlu0 %v821_v54, %s9492_s20  ;;  %1820 = vrot.lane.b32.xlu1 %v852_v56, %s16105_s22 }
  0xfa   : > { %v1427_v59 = vpop.permute.xlu0 %1426  ;;  %v1553_v60 = vpop.permute.xlu1 %1552 }
  0xfb   : > { %v2067_v7 = vsel %vm16242_vm8, %v2034_v16, %v1553_v60  ;;  %v2035_v6 = vsel %vm2031_vm7, %v2002_v15, %v1427_v59  ;;  %v10151_v59 = vld [vmem:[#allocation2 + $0xc0] sm:$0xff] }
  0xfc   : > { %932 = vrot.lane.b32.xlu0 %v820_v41, %s16404_s15  ;;  %1314 = vrot.lane.b32.xlu1 %v821_v54, %s16403_s27  ;;  %v824_v16 = vld [vmem:[#allocation2 + $0xc1] sm:$0xff] }
  0xfe   : > { %v10069_v63 = vpop.permute.xlu0 %1046  ;;  %v10071_v2 = vpop.permute.xlu1 %1172 }
 0x100   : > { %1440 = vrot.lane.b32.xlu0 %v852_v56, %s16405_s21  ;;  %1822 = vrot.lane.b32.xlu1 %v853_v62, %s16105_s22 }
 0x102   : > { %v1555_v4 = vpop.permute.xlu0 %1554  ;;  %v1681_v5 = vpop.permute.xlu1 %1680 }
 0x103   : > { %v2100_v12 = vsel %vm2097_vm9, %v2067_v7, %v1681_v5  ;;  %v2068_v11 = vsel %vm16242_vm8, %v2035_v6, %v1555_v4  ;;  %v857_v6 = vld [vmem:[#allocation2 + $0xca] sm:$0xff] }
 0x104   : > { %934 = vrot.lane.b32.xlu0 %v821_v54, %s16404_s15  ;;  %1060 = vrot.lane.b32.xlu1 %v852_v56, %s16406_s25  ;;  %v1904_v54 = vsel %vm16238_vm0, %v9856_v22, %v10047_v43  ;;  %v489_v22 = vld [vmem:[%s9814_s18 + $0xb8] sm:$0xff] }
 0x105   : > { %v1937_v56 = vsel %vm16244_vm2, %v1904_v54, %v10063_v58  ;;  %578 = vst.msk [vmem:[#allocation2 + $0x129] sm:$0xff] %vm16238_vm0, %v489_v22 }
 0x106   : > { %v10088_v14 = vpop.permute.xlu0 %1174  ;;  %v1301_v17 = vpop.permute.xlu1 %1300  ;;  %v1970_v60 = vsel %vm1965_vm5, %v1937_v56, %v10071_v2 }
 0x107   : > { %v2003_v4 = vsel %vm16243_vm6, %v1970_v60, %v1301_v17  ;;  %v1938_v17 = vsel %vm16244_vm2, %v1905_v13, %v10069_v63  ;;  %v827_v13 = vld [vmem:[#allocation2 + $0xe1] sm:$0xff] }
 0x108   : > { %1442 = vrot.lane.b32.xlu0 %v853_v62, %s16405_s21  ;;  %1568 = vrot.lane.b32.xlu1 %v10084_v10, %s16107_s26  ;;  %v1971_v1 = vsel %vm1965_vm5, %v1938_v17, %v10088_v14  ;;  %v858_v17 = vld [vmem:[#allocation2 + $0xda] sm:$0xff] }
 0x10a   : > { %v1683_v19 = vpop.permute.xlu0 %1682  ;;  %v1809_v20 = vpop.permute.xlu1 %1808 }
 0x10b   : > { %v2133_v23 = vsel %vm16240_vm3, %v2100_v12, %v1809_v20  ;;  %v2101_v33 = vsel %vm2097_vm9, %v2068_v11, %v1683_v19 }
 0x10c   : > { %1062 = vrot.lane.b32.xlu0 %v853_v62, %s16406_s25  ;;  %1188 = vrot.lane.b32.xlu1 %v10084_v10, %s16402_s0 }
 0x10d   : > { %8633 = vmatprep.mubr.msk.f32.mxu0 %vm2175_vm10, %v2133_v23 }
 0x10e   : > { %v10114_v31 = vpop.permute.xlu0 %920  ;;  %v1303_v32 = vpop.permute.xlu1 %1302 }
 0x10f   : > { %v2004_v29 = vsel %vm16243_vm6, %v1971_v1, %v1303_v32 }
 0x110   : > { %1570 = vrot.lane.b32.xlu0 %v10110_v27, %s16107_s26  ;;  %1696 = vrot.lane.b32.xlu1 %v822_v28, %s9492_s20 }
 0x112   : > { %v1429_v34 = vpop.permute.xlu0 %1428  ;;  %v1811_v35 = vpop.permute.xlu1 %1810 }
 0x113   : > { %v2134_v24 = vsel %vm16240_vm3, %v2101_v33, %v1811_v35  ;;  %v2036_v5 = vsel %vm2031_vm7, %v2003_v4, %v1429_v34  ;;  %v490_v34 = vld [vmem:[%s9814_s18 + $0xc0] sm:$0xff] }
 0x114   : > { %1190 = vrot.lane.b32.xlu0 %v10110_v27, %s16402_s0  ;;  %1316 = vrot.lane.b32.xlu1 %v822_v28, %s16403_s27  ;;  %579 = vst.msk [vmem:[#allocation2 + $0x139] sm:$0xff] %vm16238_vm0, %v490_v34  ;;  %v10248_v4 = vld [vmem:[#allocation2 + $0xe0] sm:$0xff] }
 0x115   : > { %8634 = vmatmul.mubr.msk.f32.gmra.mrb[2].mxu0 %vm2175_vm10, %v2134_v24 }
 0x116   : > { %v10128_v41 = vpop.permute.xlu0 %922  ;;  %v10130_v42 = vpop.permute.xlu1 %1048 }
 0x117   : > { %v1907_v60 = vsel %vm16238_vm0, %v9929_v39, %v10128_v41 }
 0x118   : > { %1698 = vrot.lane.b32.xlu0 %v823_v36, %s9492_s20  ;;  %1824 = vrot.lane.b32.xlu1 %v854_v38, %s16105_s22 }
 0x11a   : > { %v1431_v44 = vpop.permute.xlu0 %1430  ;;  %v1557_v46 = vpop.permute.xlu1 %1556 }
 0x11b   : > { %v2069_v43 = vsel %vm16242_vm8, %v2036_v5, %v1557_v46  ;;  %v2037_v57 = vsel %vm2031_vm7, %v2004_v29, %v1431_v44  ;;  %v10221_v44 = vld [vmem:[#allocation2 + $0xd8] sm:$0xff] }
 0x11c   : > { %936 = vrot.lane.b32.xlu0 %v822_v28, %s16404_s15  ;;  %1318 = vrot.lane.b32.xlu1 %v823_v36, %s16403_s27  ;;  %v826_v5 = vld [vmem:[#allocation2 + $0xd9] sm:$0xff] }
 0x11e   : > { %v10136_v49 = vpop.permute.xlu0 %1050  ;;  %v10138_v50 = vpop.permute.xlu1 %1176 }
 0x120   : > { %1444 = vrot.lane.b32.xlu0 %v854_v38, %s16405_s21  ;;  %1826 = vrot.lane.b32.xlu1 %v855_v48, %s16105_s22 }
 0x122   : > { %v1559_v52 = vpop.permute.xlu0 %1558  ;;  %v1685_v53 = vpop.permute.xlu1 %1684 }
 0x123   : > { %v2102_v58 = vsel %vm2097_vm9, %v2069_v43, %v1685_v53  ;;  %v2070_v63 = vsel %vm16242_vm8, %v2037_v57, %v1559_v52  ;;  %v859_v57 = vld [vmem:[#allocation2 + $0xe2] sm:$0xff] }
 0x124   : > { %938 = vrot.lane.b32.xlu0 %v823_v36, %s16404_s15  ;;  %1064 = vrot.lane.b32.xlu1 %v854_v38, %s16406_s25  ;;  %v1906_v36 = vsel %vm16238_vm0, %v9919_v37, %v10114_v31  ;;  %v491_v31 = vld [vmem:[%s9814_s18 + $0xc8] sm:$0xff] }
 0x125   : > { %v1939_v38 = vsel %vm16244_vm2, %v1906_v36, %v10130_v42  ;;  %580 = vst.msk [vmem:[#allocation2 + $0x141] sm:$0xff] %vm16238_vm0, %v491_v31 }
 0x126   : > { %v10155_v62 = vpop.permute.xlu0 %1178  ;;  %v1305_v3 = vpop.permute.xlu1 %1304  ;;  %v1972_v46 = vsel %vm1965_vm5, %v1939_v38, %v10138_v50 }
 0x127   : > { %v2005_v52 = vsel %vm16243_vm6, %v1972_v46, %v1305_v3  ;;  %v1940_v3 = vsel %vm16244_vm2, %v1907_v60, %v10136_v49  ;;  %v829_v60 = vld [vmem:[#allocation2 + $0xf9] sm:$0xff] }
 0x128   : > { %1446 = vrot.lane.b32.xlu0 %v855_v48, %s16405_s21  ;;  %1572 = vrot.lane.b32.xlu1 %v10151_v59, %s16107_s26  ;;  %v1973_v22 = vsel %vm1965_vm5, %v1940_v3, %v10155_v62  ;;  %v860_v3 = vld [vmem:[#allocation2 + $0xf2] sm:$0xff] }
 0x12a   : > { %v1687_v2 = vpop.permute.xlu0 %1686  ;;  %v1813_v8 = vpop.permute.xlu1 %1812 }
 0x12b   : > { %v2135_v9 = vsel %vm16240_vm3, %v2102_v58, %v1813_v8  ;;  %v2103_v19 = vsel %vm2097_vm9, %v2070_v63, %v1687_v2 }
 0x12c   : > { %1066 = vrot.lane.b32.xlu0 %v855_v48, %s16406_s25  ;;  %1192 = vrot.lane.b32.xlu1 %v10151_v59, %s16402_s0 }
 0x12d   : > { %8636 = vmatprep.mubr.msk.f32.mxu0 %vm2175_vm10, %v2135_v9 }
 0x12e   : > { %v10180_v7 = vpop.permute.xlu0 %924  ;;  %v10182_v12 = vpop.permute.xlu1 %1306 }
 0x12f   : > { %v2006_v41 = vsel %vm16243_vm6, %v1973_v22, %v10182_v12 }
 0x130   : > { %1574 = vrot.lane.b32.xlu0 %v10176_v18, %s16107_s26  ;;  %1700 = vrot.lane.b32.xlu1 %v824_v16, %s9492_s20 }
 0x132   : > { %v1433_v20 = vpop.permute.xlu0 %1432  ;;  %v1815_v23 = vpop.permute.xlu1 %1814 }
 0x133   : > { %v2136_v14 = vsel %vm16240_vm3, %v2103_v19, %v1815_v23  ;;  %v2038_v37 = vsel %vm2031_vm7, %v2005_v52, %v1433_v20  ;;  %v492_v20 = vld [vmem:[%s9814_s18 + $0xd0] sm:$0xff]  ;;  %v10355_v52 = vld [vmem:[#allocation2 + $0xf8] sm:$0xff] }
 0x134   : > { %1194 = vrot.lane.b32.xlu0 %v10176_v18, %s16402_s0  ;;  %1320 = vrot.lane.b32.xlu1 %v824_v16, %s16403_s27  ;;  %581 = vst.msk [vmem:[#allocation2 + $0x151] sm:$0xff] %vm16238_vm0, %v492_v20 }
 0x135   : > { %8637 = vmatmul.mubr.msk.f32.gmra.mrb[4].mxu0 %vm2175_vm10, %v2136_v14 }
 0x136   : > { %v10196_v28 = vpop.permute.xlu0 %926  ;;  %v10198_v30 = vpop.permute.xlu1 %1052 }
 0x137   : > { %v1909_v46 = vsel %vm16238_vm0, %v9957_v47, %v10196_v28 }
 0x138   : > { %1702 = vrot.lane.b32.xlu0 %v825_v25, %s9492_s20  ;;  %1828 = vrot.lane.b32.xlu1 %v856_v26, %s16105_s22 }
 0x13a   : > { %v10202_v32 = vpop.permute.xlu0 %1434  ;;  %v1561_v15 = vpop.permute.xlu1 %1560 }
 0x13b   : > { %v2071_v42 = vsel %vm16242_vm8, %v2038_v37, %v1561_v15  ;;  %v2039_v49 = vsel %vm2031_vm7, %v2006_v41, %v10202_v32  ;;  %v10329_v32 = vld [vmem:[#allocation2 + $0xf0] sm:$0xff] }
 0x13c   : > { %940 = vrot.lane.b32.xlu0 %v824_v16, %s16404_s15  ;;  %1322 = vrot.lane.b32.xlu1 %v825_v25, %s16403_s27  ;;  %v828_v37 = vld [vmem:[#allocation2 + $0xf1] sm:$0xff] }
 0x13e   : > { %v10206_v11 = vpop.permute.xlu0 %1054  ;;  %v10208_v33 = vpop.permute.xlu1 %1180 }
 0x140   : > { %1448 = vrot.lane.b32.xlu0 %v856_v26, %s16405_s21  ;;  %1830 = vrot.lane.b32.xlu1 %v857_v6, %s16105_s22 }
 0x142   : > { %v1563_v35 = vpop.permute.xlu0 %1562  ;;  %v1689_v24 = vpop.permute.xlu1 %1688 }
 0x143   : > { %v2104_v50 = vsel %vm2097_vm9, %v2071_v42, %v1689_v24  ;;  %v2072_v62 = vsel %vm16242_vm8, %v2039_v49, %v1563_v35  ;;  %v861_v49 = vld [vmem:[#allocation2 + $0xfa] sm:$0xff] }
 0x144   : > { %942 = vrot.lane.b32.xlu0 %v825_v25, %s16404_s15  ;;  %1068 = vrot.lane.b32.xlu1 %v856_v26, %s16406_s25  ;;  %v1908_v25 = vsel %vm16238_vm0, %v9947_v45, %v10180_v7  ;;  %v493_v7 = vld [vmem:[%s9814_s18 + $0xd8] sm:$0xff] }
 0x145   : > { %v1941_v26 = vsel %vm16244_vm2, %v1908_v25, %v10198_v30  ;;  %582 = vst.msk [vmem:[#allocation2 + $0x159] sm:$0xff] %vm16238_vm0, %v493_v7 }
 0x146   : > { %v10225_v48 = vpop.permute.xlu0 %1182  ;;  %v10227_v51 = vpop.permute.xlu1 %1308  ;;  %v1974_v15 = vsel %vm1965_vm5, %v1941_v26, %v10208_v33 }
 0x147   : > { %v2007_v35 = vsel %vm16243_vm6, %v1974_v15, %v10227_v51  ;;  %v1942_v51 = vsel %vm16244_vm2, %v1909_v46, %v10206_v11  ;;  %v831_v46 = vld [vmem:[#allocation2 + $0x111] sm:$0xff] }
 0x148   : > { %1450 = vrot.lane.b32.xlu0 %v857_v6, %s16405_s21  ;;  %1576 = vrot.lane.b32.xlu1 %v10221_v44, %s16107_s26  ;;  %v1975_v31 = vsel %vm1965_vm5, %v1942_v51, %v10225_v48  ;;  %v862_v51 = vld [vmem:[#allocation2 + $0x10a] sm:$0xff] }
 0x14a   : > { %v1691_v53 = vpop.permute.xlu0 %1690  ;;  %v1817_v54 = vpop.permute.xlu1 %1816 }
 0x14b   : > { %v2137_v56 = vsel %vm16240_vm3, %v2104_v50, %v1817_v54  ;;  %v2105_v58 = vsel %vm2097_vm9, %v2072_v62, %v1691_v53 }
 0x14c   : > { %1070 = vrot.lane.b32.xlu0 %v857_v6, %s16406_s25  ;;  %1196 = vrot.lane.b32.xlu1 %v10221_v44, %s16402_s0 }
 0x14d   : > { %8639 = vmatprep.mubr.msk.f32.mxu0 %vm2175_vm10, %v2137_v56 }
 0x14e   : > { %v10252_v43 = vpop.permute.xlu0 %928  ;;  %v10254_v39 = vpop.permute.xlu1 %1310 }
 0x14f   : > { %v2008_v47 = vsel %vm16243_vm6, %v1975_v31, %v10254_v39 }
 0x150   : > { %1578 = vrot.lane.b32.xlu0 %v10248_v4, %s16107_s26  ;;  %1704 = vrot.lane.b32.xlu1 %v826_v5, %s9492_s20 }
 0x152   : > { %v1437_v2 = vpop.permute.xlu0 %1436  ;;  %v1819_v8 = vpop.permute.xlu1 %1818 }
 0x153   : > { %v2138_v9 = vsel %vm16240_vm3, %v2105_v58, %v1819_v8  ;;  %v2040_v45 = vsel %vm2031_vm7, %v2007_v35, %v1437_v2  ;;  %v494_v2 = vld [vmem:[%s9814_s18 + $0xe0] sm:$0xff]  ;;  %v10422_v35 = vld [vmem:[#allocation2 + $0x110] sm:$0xff] }
 0x154   : > { %1198 = vrot.lane.b32.xlu0 %v10248_v4, %s16402_s0  ;;  %1324 = vrot.lane.b32.xlu1 %v826_v5, %s16403_s27  ;;  %583 = vst.msk [vmem:[#allocation2 + $0x169] sm:$0xff] %vm16238_vm0, %v494_v2 }
 0x155   : > { %8640 = vmatmul.mubr.msk.f32.gmra.mrb[6].mxu0 %vm2175_vm10, %v2138_v9 }
 0x156   : > { %v10306_v16 = vpop.permute.xlu0 %930  ;;  %v10308_v1 = vpop.permute.xlu1 %1056 }
 0x157   : > { %v1911_v15 = vsel %vm16238_vm0, %v9989_v61, %v10306_v16 }
 0x158   : > { %1706 = vrot.lane.b32.xlu0 %v827_v13, %s9492_s20  ;;  %1832 = vrot.lane.b32.xlu1 %v858_v17, %s16105_s22 }
 0x15a   : > { %v1439_v12 = vpop.permute.xlu0 %1438  ;;  %v1565_v29 = vpop.permute.xlu1 %1564 }
 0x15b   : > { %v2073_v30 = vsel %vm16242_vm8, %v2040_v45, %v1565_v29  ;;  %v2041_v28 = vsel %vm2031_vm7, %v2008_v47, %v1439_v12  ;;  %v10397_v12 = vld [vmem:[#allocation2 + $0x108] sm:$0xff] }
 0x15c   : > { %944 = vrot.lane.b32.xlu0 %v826_v5, %s16404_s15  ;;  %1326 = vrot.lane.b32.xlu1 %v827_v13, %s16403_s27  ;;  %v830_v45 = vld [vmem:[#allocation2 + $0x109] sm:$0xff] }
 0x15e   : > { %v10314_v63 = vpop.permute.xlu0 %1058  ;;  %v10316_v19 = vpop.permute.xlu1 %1184 }
 0x160   : > { %1452 = vrot.lane.b32.xlu0 %v858_v17, %s16405_s21  ;;  %1834 = vrot.lane.b32.xlu1 %v859_v57, %s16105_s22 }
 0x162   : > { %v1567_v23 = vpop.permute.xlu0 %1566  ;;  %v1693_v14 = vpop.permute.xlu1 %1692 }
 0x163   : > { %v2106_v33 = vsel %vm2097_vm9, %v2073_v30, %v1693_v14  ;;  %v2074_v11 = vsel %vm16242_vm8, %v2041_v28, %v1567_v23  ;;  %v863_v28 = vld [vmem:[#allocation2 + $0x112] sm:$0xff] }
 0x164   : > { %946 = vrot.lane.b32.xlu0 %v827_v13, %s16404_s15  ;;  %1072 = vrot.lane.b32.xlu1 %v858_v17, %s16406_s25  ;;  %v1910_v13 = vsel %vm16238_vm0, %v9975_v55, %v10252_v43  ;;  %v495_v55 = vld [vmem:[%s9814_s18 + $0xe8] sm:$0xff] }
 0x165   : > { %v1943_v17 = vsel %vm16244_vm2, %v1910_v13, %v10308_v1  ;;  %584 = vst.msk [vmem:[#allocation2 + $0x171] sm:$0xff] %vm16238_vm0, %v495_v55 }
 0x166   : > { %v10333_v6 = vpop.permute.xlu0 %1186  ;;  %v1313_v34 = vpop.permute.xlu1 %1312  ;;  %v1976_v29 = vsel %vm1965_vm5, %v1943_v17, %v10316_v19 }
 0x167   : > { %v2009_v23 = vsel %vm16243_vm6, %v1976_v29, %v1313_v34  ;;  %v1944_v34 = vsel %vm16244_vm2, %v1911_v15, %v10314_v63  ;;  %v833_v15 = vld [vmem:[#allocation2 + $0x129] sm:$0xff] }
 0x168   : > { %1454 = vrot.lane.b32.xlu0 %v859_v57, %s16405_s21  ;;  %1580 = vrot.lane.b32.xlu1 %v10329_v32, %s16107_s26  ;;  %v1977_v7 = vsel %vm1965_vm5, %v1944_v34, %v10333_v6  ;;  %v864_v34 = vld [vmem:[#allocation2 + $0x122] sm:$0xff] }
 0x16a   : > { %v1695_v24 = vpop.permute.xlu0 %1694  ;;  %v1821_v36 = vpop.permute.xlu1 %1820 }
 0x16b   : > { %v2139_v38 = vsel %vm16240_vm3, %v2106_v33, %v1821_v36  ;;  %v2107_v53 = vsel %vm2097_vm9, %v2074_v11, %v1695_v24 }
 0x16c   : > { %1074 = vrot.lane.b32.xlu0 %v859_v57, %s16406_s25  ;;  %1200 = vrot.lane.b32.xlu1 %v10329_v32, %s16402_s0 }
 0x16d   : > { %8642 = vmatprep.mubr.msk.f32.mxu0 %vm2175_vm10, %v2139_v38 }
 0x16e   : > { %v10359_v42 = vpop.permute.xlu0 %932  ;;  %v1315_v50 = vpop.permute.xlu1 %1314 }
 0x16f   : > { %v2010_v61 = vsel %vm16243_vm6, %v1977_v7, %v1315_v50 }
 0x170   : > { %1582 = vrot.lane.b32.xlu0 %v10355_v52, %s16107_s26  ;;  %1708 = vrot.lane.b32.xlu1 %v828_v37, %s9492_s20 }
 0x172   : > { %v1441_v54 = vpop.permute.xlu0 %1440  ;;  %v1823_v56 = vpop.permute.xlu1 %1822 }
 0x173   : > { %v2140_v48 = vsel %vm16240_vm3, %v2107_v53, %v1823_v56  ;;  %v2042_v14 = vsel %vm2031_vm7, %v2009_v23, %v1441_v54  ;;  %v496_v54 = vld [vmem:[%s9814_s18 + $0xf0] sm:$0xff]  ;;  %v10488_v23 = vld [vmem:[#allocation2 + $0x128] sm:$0xff] }
 0x174   : > { %1202 = vrot.lane.b32.xlu0 %v10355_v52, %s16402_s0  ;;  %1328 = vrot.lane.b32.xlu1 %v828_v37, %s16403_s27  ;;  %585 = vst.msk [vmem:[#allocation2 + $0x181] sm:$0xff] %vm16238_vm0, %v496_v54 }
 0x175   : > { %8643 = vmatmul.mubr.msk.f32.gmra.mrb[8].mxu0 %vm2175_vm10, %v2140_v48 }
 0x176   : > { %v10374_v5 = vpop.permute.xlu0 %934  ;;  %v10376_v22 = vpop.permute.xlu1 %1060 }
 0x177   : > { %v1913_v29 = vsel %vm16238_vm0, %v10043_v40, %v10374_v5 }
 0x178   : > { %1710 = vrot.lane.b32.xlu0 %v829_v60, %s9492_s20  ;;  %1836 = vrot.lane.b32.xlu1 %v860_v3, %s16105_s22 }
 0x17a   : > { %v1443_v39 = vpop.permute.xlu0 %1442  ;;  %v1569_v41 = vpop.permute.xlu1 %1568 }
 0x17b   : > { %v2075_v43 = vsel %vm16242_vm8, %v2042_v14, %v1569_v41  ;;  %v2043_v16 = vsel %vm2031_vm7, %v2010_v61, %v1443_v39  ;;  %v10463_v39 = vld [vmem:[#allocation2 + $0x120] sm:$0xff] }
 0x17c   : > { %948 = vrot.lane.b32.xlu0 %v828_v37, %s16404_s15  ;;  %1330 = vrot.lane.b32.xlu1 %v829_v60, %s16403_s27  ;;  %v832_v14 = vld [vmem:[#allocation2 + $0x121] sm:$0xff] }
 0x17e   : > { %v10382_v62 = vpop.permute.xlu0 %1062  ;;  %v10384_v58 = vpop.permute.xlu1 %1188 }
 0x180   : > { %1456 = vrot.lane.b32.xlu0 %v860_v3, %s16405_s21  ;;  %1838 = vrot.lane.b32.xlu1 %v861_v49, %s16105_s22 }
 0x182   : > { %v1571_v8 = vpop.permute.xlu0 %1570  ;;  %v1697_v9 = vpop.permute.xlu1 %1696 }
 0x183   : > { %v2108_v1 = vsel %vm2097_vm9, %v2075_v43, %v1697_v9  ;;  %v2076_v63 = vsel %vm16242_vm8, %v2043_v16, %v1571_v8  ;;  %v865_v16 = vld [vmem:[#allocation2 + $0x12a] sm:$0xff] }
 0x184   : > { %950 = vrot.lane.b32.xlu0 %v829_v60, %s16404_s15  ;;  %1076 = vrot.lane.b32.xlu1 %v860_v3, %s16406_s25  ;;  %v1912_v60 = vsel %vm16238_vm0, %v10019_v21, %v10359_v42  ;;  %v497_v21 = vld [vmem:[%s9814_s18 + $0xf8] sm:$0xff] }
 0x185   : > { %v1945_v3 = vsel %vm16244_vm2, %v1912_v60, %v10376_v22  ;;  %586 = vst.msk [vmem:[#allocation2 + $0x189] sm:$0xff] %vm16238_vm0, %v497_v21 }
 0x186   : > { %v10401_v57 = vpop.permute.xlu0 %1190  ;;  %v1317_v20 = vpop.permute.xlu1 %1316  ;;  %v1978_v41 = vsel %vm1965_vm5, %v1945_v3, %v10384_v58 }
 0x187   : > { %v2011_v8 = vsel %vm16243_vm6, %v1978_v41, %v1317_v20  ;;  %v1946_v20 = vsel %vm16244_vm2, %v1913_v29, %v10382_v62  ;;  %v835_v29 = vld [vmem:[#allocation2 + $0x141] sm:$0xff] }
 0x188   : > { %1458 = vrot.lane.b32.xlu0 %v861_v49, %s16405_s21  ;;  %1584 = vrot.lane.b32.xlu1 %v10397_v12, %s16107_s26  ;;  %v1979_v55 = vsel %vm1965_vm5, %v1946_v20, %v10401_v57  ;;  %v866_v20 = vld [vmem:[#allocation2 + $0x13a] sm:$0xff] }
 0x18a   : > { %v1699_v19 = vpop.permute.xlu0 %1698  ;;  %v1825_v25 = vpop.permute.xlu1 %1824 }
 0x18b   : > { %v2141_v26 = vsel %vm16240_vm3, %v2108_v1, %v1825_v25  ;;  %v2109_v24 = vsel %vm2097_vm9, %v2076_v63, %v1699_v19 }
 0x18c   : > { %1078 = vrot.lane.b32.xlu0 %v861_v49, %s16406_s25  ;;  %1204 = vrot.lane.b32.xlu1 %v10397_v12, %s16402_s0 }
 0x18d   : > { %8645 = vmatprep.mubr.msk.f32.mxu0 %vm2175_vm10, %v2141_v26 }
 0x18e   : > { %v10426_v30 = vpop.permute.xlu0 %936  ;;  %v1319_v33 = vpop.permute.xlu1 %1318 }
 0x18f   : > { %v2012_v40 = vsel %vm16243_vm6, %v1979_v55, %v1319_v33 }
 0x190   : > { %1586 = vrot.lane.b32.xlu0 %v10422_v35, %s16107_s26  ;;  %1712 = vrot.lane.b32.xlu1 %v830_v45, %s9492_s20 }
 0x192   : > { %v1445_v36 = vpop.permute.xlu0 %1444  ;;  %v1827_v38 = vpop.permute.xlu1 %1826 }
 0x193   : > { %v2142_v6 = vsel %vm16240_vm3, %v2109_v24, %v1827_v38  ;;  %v2044_v9 = vsel %vm2031_vm7, %v2011_v8, %v1445_v36  ;;  %v10554_v8 = vld [vmem:[#allocation2 + $0x140] sm:$0xff] }
 0x194   : > { %1206 = vrot.lane.b32.xlu0 %v10422_v35, %s16402_s0  ;;  %1332 = vrot.lane.b32.xlu1 %v830_v45, %s16403_s27 }
 0x195   : > { %8646 = vmatmul.mubr.msk.f32.gmra.mrb[10].mxu0 %vm2175_vm10, %v2142_v6  ;;  %v1914_v6 = vsel %vm16238_vm0, %v10084_v10, %v10426_v30 }
 0x196   : > { %v10440_v37 = vpop.permute.xlu0 %938  ;;  %v10442_v31 = vpop.permute.xlu1 %1064 }
 0x197   : > { %v1915_v41 = vsel %vm16238_vm0, %v10110_v27, %v10440_v37 }
 0x198   : > { %1714 = vrot.lane.b32.xlu0 %v831_v46, %s9492_s20  ;;  %1840 = vrot.lane.b32.xlu1 %v862_v51, %s16105_s22 }
 0x19a   : > { %v1447_v50 = vpop.permute.xlu0 %1446  ;;  %v1573_v47 = vpop.permute.xlu1 %1572 }
 0x19b   : > { %v2077_v42 = vsel %vm16242_vm8, %v2044_v9, %v1573_v47  ;;  %v2045_v5 = vsel %vm2031_vm7, %v2012_v40, %v1447_v50  ;;  %v834_v9 = vld [vmem:[#allocation2 + $0x139] sm:$0xff] }
 0x19c   : > { %952 = vrot.lane.b32.xlu0 %v830_v45, %s16404_s15  ;;  %1334 = vrot.lane.b32.xlu1 %v831_v46, %s16403_s27 }
 0x19e   : > { %v10448_v11 = vpop.permute.xlu0 %1066  ;;  %v10450_v53 = vpop.permute.xlu1 %1192 }
 0x1a0   : > { %1460 = vrot.lane.b32.xlu0 %v862_v51, %s16405_s21  ;;  %1842 = vrot.lane.b32.xlu1 %v863_v28, %s16105_s22 }
 0x1a2   : > { %v1575_v56 = vpop.permute.xlu0 %1574  ;;  %v1701_v48 = vpop.permute.xlu1 %1700 }
 0x1a3   : > { %v2110_v22 = vsel %vm2097_vm9, %v2077_v42, %v1701_v48  ;;  %v2078_v62 = vsel %vm16242_vm8, %v2045_v5, %v1575_v56  ;;  %v867_v5 = vld [vmem:[#allocation2 + $0x142] sm:$0xff] }
 0x1a4   : > { %954 = vrot.lane.b32.xlu0 %v831_v46, %s16404_s15  ;;  %1080 = vrot.lane.b32.xlu1 %v862_v51, %s16406_s25  ;;  %v1947_v46 = vsel %vm16244_vm2, %v1914_v6, %v10442_v31  ;;  %v10527_v51 = vld [vmem:[#allocation2 + $0x138] sm:$0xff] }
 0x1a5   : > { %v1980_v50 = vsel %vm1965_vm5, %v1947_v46, %v10450_v53 }
 0x1a6   : > { %v10467_v49 = vpop.permute.xlu0 %1194  ;;  %v1321_v2 = vpop.permute.xlu1 %1320 }
 0x1a7   : > { %v2013_v54 = vsel %vm16243_vm6, %v1980_v50, %v1321_v2  ;;  %v1948_v2 = vsel %vm16244_vm2, %v1915_v41, %v10448_v11 }
 0x1a8   : > { %1462 = vrot.lane.b32.xlu0 %v863_v28, %s16405_s21  ;;  %1588 = vrot.lane.b32.xlu1 %v10463_v39, %s16107_s26  ;;  %v1981_v21 = vsel %vm1965_vm5, %v1948_v2, %v10467_v49 }
 0x1aa   : > { %v1703_v58 = vpop.permute.xlu0 %1702  ;;  %v1829_v13 = vpop.permute.xlu1 %1828 }
 0x1ab   : > { %v2143_v17 = vsel %vm16240_vm3, %v2110_v22, %v1829_v13  ;;  %v2111_v19 = vsel %vm2097_vm9, %v2078_v62, %v1703_v58 }
 0x1ac   : > { %1082 = vrot.lane.b32.xlu0 %v863_v28, %s16406_s25  ;;  %1208 = vrot.lane.b32.xlu1 %v10463_v39, %s16402_s0 }
 0x1ad   : > { %8648 = vmatprep.mubr.msk.f32.mxu0 %vm2175_vm10, %v2143_v17 }
 0x1ae   : > { %v10492_v43 = vpop.permute.xlu0 %940  ;;  %v1323_v1 = vpop.permute.xlu1 %1322 }
 0x1af   : > { %v2014_v27 = vsel %vm16243_vm6, %v1981_v21, %v1323_v1  ;;  %v868_v21 = vld [vmem:[#allocation2 + $0x152] sm:$0xff] }
 0x1b0   : > { %1590 = vrot.lane.b32.xlu0 %v10488_v23, %s16107_s26  ;;  %1716 = vrot.lane.b32.xlu1 %v832_v14, %s9492_s20 }
 0x1b2   : > { %v1449_v25 = vpop.permute.xlu0 %1448  ;;  %v1831_v26 = vpop.permute.xlu1 %1830 }
 0x1b3   : > { %v2144_v57 = vsel %vm16240_vm3, %v2111_v19, %v1831_v26  ;;  %v2046_v56 = vsel %vm2031_vm7, %v2013_v54, %v1449_v25 }
 0x1b4   : > { %1210 = vrot.lane.b32.xlu0 %v10488_v23, %s16402_s0  ;;  %1336 = vrot.lane.b32.xlu1 %v832_v14, %s16403_s27 }
 0x1b5   : > { %8649 = vmatmul.mubr.msk.f32.gmra.mrb[12].mxu0 %vm2175_vm10, %v2144_v57  ;;  %v1916_v57 = vsel %vm16238_vm0, %v10151_v59, %v10492_v43 }
 0x1b6   : > { %v10506_v45 = vpop.permute.xlu0 %942  ;;  %v10508_v7 = vpop.permute.xlu1 %1068 }
 0x1b8   : > { %1718 = vrot.lane.b32.xlu0 %v833_v15, %s9492_s20  ;;  %1844 = vrot.lane.b32.xlu1 %v864_v34, %s16105_s22 }
 0x1ba   : > { %v1451_v33 = vpop.permute.xlu0 %1450  ;;  %v1577_v61 = vpop.permute.xlu1 %1576 }
 0x1bb   : > { %v2079_v30 = vsel %vm16242_vm8, %v2046_v56, %v1577_v61  ;;  %v2047_v37 = vsel %vm2031_vm7, %v2014_v27, %v1451_v33  ;;  %v10620_v56 = vld [vmem:[#allocation2 + $0x158] sm:$0xff] }
 0x1bc   : > { %956 = vrot.lane.b32.xlu0 %v832_v14, %s16404_s15  ;;  %1338 = vrot.lane.b32.xlu1 %v833_v15, %s16403_s27 }
 0x1be   : > { %v10514_v63 = vpop.permute.xlu0 %1070  ;;  %v10516_v24 = vpop.permute.xlu1 %1196 }
 0x1c0   : > { %1464 = vrot.lane.b32.xlu0 %v864_v34, %s16405_s21  ;;  %1846 = vrot.lane.b32.xlu1 %v865_v16, %s16105_s22 }
 0x1c2   : > { %v1579_v36 = vpop.permute.xlu0 %1578  ;;  %v1705_v38 = vpop.permute.xlu1 %1704 }
 0x1c3   : > { %v2112_v53 = vsel %vm2097_vm9, %v2079_v30, %v1705_v38  ;;  %v2080_v11 = vsel %vm16242_vm8, %v2047_v37, %v1579_v36  ;;  %v836_v30 = vld [vmem:[#allocation2 + $0x151] sm:$0xff] }
 0x1c4   : > { %958 = vrot.lane.b32.xlu0 %v833_v15, %s16404_s15  ;;  %1084 = vrot.lane.b32.xlu1 %v864_v34, %s16406_s25  ;;  %v1949_v15 = vsel %vm16244_vm2, %v1916_v57, %v10508_v7  ;;  %v10593_v34 = vld [vmem:[#allocation2 + $0x150] sm:$0xff] }
 0x1c5   : > { %v1982_v33 = vsel %vm1965_vm5, %v1949_v15, %v10516_v24 }
 0x1c6   : > { %v10531_v47 = vpop.permute.xlu0 %1198  ;;  %v1325_v28 = vpop.permute.xlu1 %1324 }
 0x1c7   : > { %v2015_v36 = vsel %vm16243_vm6, %v1982_v33, %v1325_v28  ;;  %v1917_v28 = vsel %vm16238_vm0, %v10176_v18, %v10506_v45 }
 0x1c8   : > { %v10535_v10 = vpop.f32.mrb[0].mxu0  ;;  %1466 = vrot.lane.b32.xlu0 %v865_v16, %s16405_s21  ;;  %1592 = vrot.lane.b32.xlu1 %v10527_v51, %s16107_s26  ;;  %v1950_v54 = vsel %vm16244_vm2, %v1917_v28, %v10514_v63 }
 0x1c9   : > { %v10541_v31 = vpop.f32.mrb[1].mxu0 }
 0x1ca   : > { %v1707_v48 = vpop.permute.xlu0 %1706  ;;  %v1833_v60 = vpop.permute.xlu1 %1832 }
 0x1cb   : > { %v2145_v3 = vsel %vm16240_vm3, %v2112_v53, %v1833_v60  ;;  %v2113_v58 = vsel %vm2097_vm9, %v2080_v11, %v1707_v48  ;;  %v1983_v53 = vsel %vm1965_vm5, %v1950_v54, %v10531_v47 }
 0x1cc   : > { %1086 = vrot.lane.b32.xlu0 %v865_v16, %s16406_s25  ;;  %1212 = vrot.lane.b32.xlu1 %v10527_v51, %s16402_s0 }
 0x1cd   : > { %8651 = vmatprep.mubr.msk.f32.mxu0 %vm2175_vm10, %v2145_v3 }
 0x1ce   : > { %v10558_v42 = vpop.permute.xlu0 %944  ;;  %v1327_v22 = vpop.permute.xlu1 %1326 }
 0x1cf   : > { %v2016_v18 = vsel %vm16243_vm6, %v1983_v53, %v1327_v22 }
 0x1d0   : > { %1594 = vrot.lane.b32.xlu0 %v10554_v8, %s16107_s26  ;;  %1720 = vrot.lane.b32.xlu1 %v834_v9, %s9492_s20 }
 0x1d2   : > { %v1453_v13 = vpop.permute.xlu0 %1452  ;;  %v1835_v17 = vpop.permute.xlu1 %1834 }
 0x1d3   : > { %v2146_v49 = vsel %vm16240_vm3, %v2113_v58, %v1835_v17  ;;  %v2048_v38 = vsel %vm2031_vm7, %v2015_v36, %v1453_v13  ;;  %v869_v58 = vld [vmem:[#allocation2 + $0x15a] sm:$0xff] }
 0x1d4   : > { %1214 = vrot.lane.b32.xlu0 %v10554_v8, %s16402_s0  ;;  %1340 = vrot.lane.b32.xlu1 %v834_v9, %s16403_s27 }
 0x1d5   : > { %8652 = vmatmul.mubr.msk.f32.gmra.mrb[14].mxu0 %vm2175_vm10, %v2146_v49 }
 0x1d6   : > { %v10572_v14 = vpop.permute.xlu0 %946  ;;  %v10574_v55 = vpop.permute.xlu1 %1072 }
 0x1d8   : > { %1722 = vrot.lane.b32.xlu0 %v835_v29, %s9492_s20  ;;  %1848 = vrot.lane.b32.xlu1 %v866_v20, %s16105_s22 }
 0x1da   : > { %v1455_v1 = vpop.permute.xlu0 %1454  ;;  %v1581_v40 = vpop.permute.xlu1 %1580 }
 0x1db   : > { %v2081_v43 = vsel %vm16242_vm8, %v2048_v38, %v1581_v40  ;;  %v2049_v45 = vsel %vm2031_vm7, %v2016_v18, %v1455_v1  ;;  %v10659_v40 = vld [vmem:[#allocation2 + $0x168] sm:$0xff] }
 0x1dc   : > { %960 = vrot.lane.b32.xlu0 %v834_v9, %s16404_s15  ;;  %1342 = vrot.lane.b32.xlu1 %v835_v29, %s16403_s27  ;;  %v837_v9 = vld [vmem:[#allocation2 + $0x159] sm:$0xff]  ;;  %v870_v18 = vld [vmem:[#allocation2 + $0x16a] sm:$0xff] }
 0x1de   : > { %v10580_v62 = vpop.permute.xlu0 %1074  ;;  %v10582_v19 = vpop.permute.xlu1 %1200 }
 0x1e0   : > { %1468 = vrot.lane.b32.xlu0 %v866_v20, %s16405_s21  ;;  %1850 = vrot.lane.b32.xlu1 %v867_v5, %s16105_s22 }
 0x1e2   : > { %v1583_v25 = vpop.permute.xlu0 %1582  ;;  %v1709_v26 = vpop.permute.xlu1 %1708 }
 0x1e3   : > { %v2114_v24 = vsel %vm2097_vm9, %v2081_v43, %v1709_v26  ;;  %v2082_v63 = vsel %vm16242_vm8, %v2049_v45, %v1583_v25 }
 0x1e4   : > { %962 = vrot.lane.b32.xlu0 %v835_v29, %s16404_s15  ;;  %1088 = vrot.lane.b32.xlu1 %v866_v20, %s16406_s25  ;;  %v1918_v20 = vsel %vm16238_vm0, %v10221_v44, %v10558_v42 }
 0x1e5   : > { %v1951_v1 = vsel %vm16244_vm2, %v1918_v20, %v10574_v55 }
 0x1e6   : > { %v10597_v61 = vpop.permute.xlu0 %1202  ;;  %v1329_v16 = vpop.permute.xlu1 %1328 }
 0x1e8   : > { %v10601_v59 = vpop.f32.mrb[2].mxu0  ;;  %1470 = vrot.lane.b32.xlu0 %v867_v5, %s16405_s21  ;;  %1596 = vrot.lane.b32.xlu1 %v10593_v34, %s16107_s26 }
 0x1e9   : > { %v10607_v7 = vpop.f32.mrb[3].mxu0 }
 0x1ea   : > { %v1711_v6 = vpop.permute.xlu0 %1710  ;;  %v1837_v46 = vpop.permute.xlu1 %1836 }
 0x1eb   : > { %v2147_v50 = vsel %vm16240_vm3, %v2114_v24, %v1837_v46  ;;  %v2115_v3 = vsel %vm2097_vm9, %v2082_v63, %v1711_v6  ;;  %v10686_v24 = vld [vmem:[#allocation2 + $0x170] sm:$0xff] }
 0x1ec   : > { %1090 = vrot.lane.b32.xlu0 %v867_v5, %s16406_s25  ;;  %1216 = vrot.lane.b32.xlu1 %v10593_v34, %s16402_s0  ;;  %v1984_v5 = vsel %vm1965_vm5, %v1951_v1, %v10582_v19  ;;  %v838_v6 = vld [vmem:[#allocation2 + $0x169] sm:$0xff] }
 0x1ed   : > { %8654 = vmatprep.mubr.msk.f32.mxu0 %vm2175_vm10, %v2147_v50  ;;  %v2017_v57 = vsel %vm16243_vm6, %v1984_v5, %v1329_v16  ;;  %v1919_v16 = vsel %vm16238_vm0, %v10248_v4, %v10572_v14 }
 0x1ee   : > { %v10624_v48 = vpop.permute.xlu0 %948  ;;  %v1331_v60 = vpop.permute.xlu1 %1330  ;;  %v1952_v43 = vsel %vm16244_vm2, %v1919_v16, %v10580_v62 }
 0x1ef   : > { %v1985_v46 = vsel %vm1965_vm5, %v1952_v43, %v10597_v61 }
 0x1f0   : > { %1598 = vrot.lane.b32.xlu0 %v10620_v56, %s16107_s26  ;;  %1724 = vrot.lane.b32.xlu1 %v836_v30, %s9492_s20  ;;  %v2018_v4 = vsel %vm16243_vm6, %v1985_v46, %v1331_v60  ;;  %v839_v60 = vld [vmem:[#allocation2 + $0x171] sm:$0xff] }
 0x1f2   : > { %v1457_v41 = vpop.permute.xlu0 %1456  ;;  %v1839_v2 = vpop.permute.xlu1 %1838 }
 0x1f3   : > { %v2148_v47 = vsel %vm16240_vm3, %v2115_v3, %v1839_v2  ;;  %v2050_v15 = vsel %vm2031_vm7, %v2017_v57, %v1457_v41  ;;  %v871_v2 = vld [vmem:[#allocation2 + $0x172] sm:$0xff] }
 0x1f4   : > { %1218 = vrot.lane.b32.xlu0 %v10620_v56, %s16402_s0  ;;  %1344 = vrot.lane.b32.xlu1 %v836_v30, %s16403_s27 }
 0x1f5   : > { %8655 = vmatmul.mubr.msk.f32.gmra.mrb[16].mxu0 %vm2175_vm10, %v2148_v47 }
 0x1f6   : > { %v10638_v22 = vpop.permute.xlu0 %950  ;;  %v10640_v27 = vpop.permute.xlu1 %1076 }
 0x1f8   : > { %1726 = vrot.lane.b32.xlu0 %v837_v9, %s9492_s20  ;;  %1852 = vrot.lane.b32.xlu1 %v868_v21, %s16105_s22 }
 0x1fa   : > { %v1459_v37 = vpop.permute.xlu0 %1458  ;;  %v1585_v11 = vpop.permute.xlu1 %1584 }
 0x1fb   : > { %v2083_v42 = vsel %vm16242_vm8, %v2050_v15, %v1585_v11  ;;  %v2051_v14 = vsel %vm2031_vm7, %v2018_v4, %v1459_v37  ;;  %v1920_v11 = vsel %vm16238_vm0, %v10329_v32, %v10624_v48 }
 0x1fc   : > { %964 = vrot.lane.b32.xlu0 %v836_v30, %s16404_s15  ;;  %1346 = vrot.lane.b32.xlu1 %v837_v9, %s16403_s27 }
 0x1fe   : > { %v10646_v13 = vpop.permute.xlu0 %1078  ;;  %v10648_v17 = vpop.permute.xlu1 %1204 }
 0x200   : > { %1472 = vrot.lane.b32.xlu0 %v868_v21, %s16405_s21  ;;  %1854 = vrot.lane.b32.xlu1 %v869_v58, %s16105_s22 }
 0x202   : > { %v1587_v49 = vpop.permute.xlu0 %1586  ;;  %v1713_v29 = vpop.permute.xlu1 %1712 }
 0x203   : > { %v2116_v19 = vsel %vm2097_vm9, %v2083_v42, %v1713_v29  ;;  %v2084_v62 = vsel %vm16242_vm8, %v2051_v14, %v1587_v49  ;;  %v808_v49 = vld [vmem:[#allocation2 + $0x180] sm:$0xff] }
 0x204   : > { %966 = vrot.lane.b32.xlu0 %v837_v9, %s16404_s15  ;;  %1092 = vrot.lane.b32.xlu1 %v868_v21, %s16406_s25 }
 0x206   : > { %v10663_v25 = vpop.permute.xlu0 %1206  ;;  %v1333_v26 = vpop.permute.xlu1 %1332 }
 0x208   : > { %v10667_v44 = vpop.f32.mrb[4].mxu0  ;;  %1474 = vrot.lane.b32.xlu0 %v869_v58, %s16405_s21  ;;  %1600 = vrot.lane.b32.xlu1 %v10659_v40, %s16107_s26 }
 0x209   : > { %v10673_v55 = vpop.f32.mrb[5].mxu0 }
 0x20a   : > { %v1715_v33 = vpop.permute.xlu0 %1714  ;;  %v1841_v36 = vpop.permute.xlu1 %1840 }
 0x20b   : > { %v2149_v38 = vsel %vm16240_vm3, %v2116_v19, %v1841_v36  ;;  %v2117_v54 = vsel %vm2097_vm9, %v2084_v62, %v1715_v33  ;;  %v809_v36 = vld [vmem:[#allocation2 + $0x188] sm:$0xff] }
 0x20c   : > { %1094 = vrot.lane.b32.xlu0 %v869_v58, %s16406_s25  ;;  %1220 = vrot.lane.b32.xlu1 %v10659_v40, %s16402_s0  ;;  %v1953_v58 = vsel %vm16244_vm2, %v1920_v11, %v10640_v27  ;;  %v872_v62 = vld [vmem:[#allocation2 + $0x182] sm:$0xff] }
 0x20d   : > { %8657 = vmatprep.mubr.msk.f32.mxu0 %vm2175_vm10, %v2149_v38  ;;  %v1986_v29 = vsel %vm1965_vm5, %v1953_v58, %v10648_v17  ;;  %v840_v38 = vld [vmem:[#allocation2 + $0x181] sm:$0xff] }
 0x20e   : > { %v10690_v50 = vpop.permute.xlu0 %952  ;;  %v1335_v28 = vpop.permute.xlu1 %1334  ;;  %v2019_v5 = vsel %vm16243_vm6, %v1986_v29, %v1333_v26  ;;  %v1921_v26 = vsel %vm16238_vm0, %v10355_v52, %v10638_v22  ;;  %v843_v29 = vld [vmem:[#allocation2 + $0x1a1] sm:$0xff] }
 0x20f   : > { %v1954_v33 = vsel %vm16244_vm2, %v1921_v26, %v10646_v13  ;;  %v1922_v11 = vsel %vm16238_vm0, %v10397_v12, %v10690_v50 }
 0x210   : > { %1602 = vrot.lane.b32.xlu0 %v10686_v24, %s16107_s26  ;;  %1728 = vrot.lane.b32.xlu1 %v838_v6, %s9492_s20  ;;  %v1987_v16 = vsel %vm1965_vm5, %v1954_v33, %v10663_v25 }
 0x211   : > { %v2020_v52 = vsel %vm16243_vm6, %v1987_v16, %v1335_v28  ;;  %v841_v28 = vld [vmem:[#allocation2 + $0x189] sm:$0xff] }
 0x212   : > { %v1461_v30 = vpop.permute.xlu0 %1460  ;;  %v1843_v53 = vpop.permute.xlu1 %1842 }
 0x213   : > { %v2150_v61 = vsel %vm16240_vm3, %v2117_v54, %v1843_v53  ;;  %v2052_v57 = vsel %vm2031_vm7, %v2019_v5, %v1461_v30 }
 0x214   : > { %1222 = vrot.lane.b32.xlu0 %v10686_v24, %s16402_s0  ;;  %1348 = vrot.lane.b32.xlu1 %v838_v6, %s16403_s27 }
 0x215   : > { %8658 = vmatmul.mubr.msk.f32.gmra.mrb[18].mxu0 %vm2175_vm10, %v2150_v61 }
 0x216   : > { %v10704_v45 = vpop.permute.xlu0 %954  ;;  %v10706_v63 = vpop.permute.xlu1 %1080 }
 0x217   : > { %v1955_v58 = vsel %vm16244_vm2, %v1922_v11, %v10706_v63 }
 0x218   : > { %1730 = vrot.lane.b32.xlu0 %v839_v60, %s9492_s20  ;;  %1856 = vrot.lane.b32.xlu1 %v870_v18, %s16105_s22 }
 0x21a   : > { %v1463_v3 = vpop.permute.xlu0 %1462  ;;  %v1589_v41 = vpop.permute.xlu1 %1588 }
 0x21b   : > { %v2085_v48 = vsel %vm16242_vm8, %v2052_v57, %v1589_v41  ;;  %v2053_v22 = vsel %vm2031_vm7, %v2020_v52, %v1463_v3  ;;  %v810_v41 = vld [vmem:[#allocation2 + $0x198] sm:$0xff] }
 0x21c   : > { %968 = vrot.lane.b32.xlu0 %v838_v6, %s16404_s15  ;;  %1350 = vrot.lane.b32.xlu1 %v839_v60, %s16403_s27 }
 0x21e   : > { %v10712_v47 = vpop.permute.xlu0 %1082  ;;  %v10714_v9 = vpop.permute.xlu1 %1208 }
 0x21f   : > { %v1988_v5 = vsel %vm1965_vm5, %v1955_v58, %v10714_v9 }
 0x220   : > { %1476 = vrot.lane.b32.xlu0 %v870_v18, %s16405_s21  ;;  %1858 = vrot.lane.b32.xlu1 %v871_v2, %s16105_s22 }
 0x222   : > { %v1591_v21 = vpop.permute.xlu0 %1590  ;;  %v1717_v37 = vpop.permute.xlu1 %1716 }
 0x223   : > { %v2118_v17 = vsel %vm2097_vm9, %v2085_v48, %v1717_v37  ;;  %v2086_v13 = vsel %vm16242_vm8, %v2053_v22, %v1591_v21 }
 0x224   : > { %970 = vrot.lane.b32.xlu0 %v839_v60, %s16404_s15  ;;  %1096 = vrot.lane.b32.xlu1 %v870_v18, %s16406_s25  ;;  %v873_v60 = vld [vmem:[#allocation2 + $0x18a] sm:$0xff] }
 0x226   : > { %v10727_v20 = vpop.permute.xlu0 %1210  ;;  %v10729_v1 = vpop.permute.xlu1 %1336 }
 0x228   : > { %v10733_v32 = vpop.f32.mrb[6].mxu0  ;;  %1478 = vrot.lane.b32.xlu0 %v871_v2, %s16405_s21  ;;  %1604 = vrot.lane.b32.xlu1 %v808_v49, %s16107_s26 }
 0x229   : > { %v10738_v27 = vpop.f32.mrb[7].mxu0 }
 0x22a   : > { %v1719_v15 = vpop.permute.xlu0 %1718  ;;  %v1845_v42 = vpop.permute.xlu1 %1844 }
 0x22b   : > { %v2151_v19 = vsel %vm16240_vm3, %v2118_v17, %v1845_v42  ;;  %v2119_v46 = vsel %vm2097_vm9, %v2086_v13, %v1719_v15  ;;  %v2021_v17 = vsel %vm16243_vm6, %v1988_v5, %v10729_v1  ;;  %v874_v42 = vld [vmem:[#allocation2 + $0x19a] sm:$0xff] }
 0x22c   : > { %1098 = vrot.lane.b32.xlu0 %v871_v2, %s16406_s25  ;;  %1224 = vrot.lane.b32.xlu1 %v808_v49, %s16402_s0  ;;  %v811_v2 = vld [vmem:[#allocation2 + $0x1a0] sm:$0xff] }
 0x22d   : > { %8660 = vmatprep.mubr.msk.f32.mxu0 %vm2175_vm10, %v2151_v19  ;;  %v842_v49 = vld [vmem:[#allocation2 + $0x199] sm:$0xff]  ;;  %v875_v19 = vld [vmem:[#allocation2 + $0x1a2] sm:$0xff] }
 0x22e   : > { %v10752_v43 = vpop.permute.xlu0 %956  ;;  %v10754_v6 = vpop.permute.xlu1 %1338 }
 0x230   : > { %1606 = vrot.lane.b32.xlu0 %v809_v36, %s16107_s26  ;;  %1732 = vrot.lane.b32.xlu1 %v840_v38, %s9492_s20 }
 0x232   : > { %v1465_v4 = vpop.permute.xlu0 %1464  ;;  %v1847_v14 = vpop.permute.xlu1 %1846 }
 0x233   : > { %v2152_v25 = vsel %vm16240_vm3, %v2119_v46, %v1847_v14  ;;  %v2054_v15 = vsel %vm2031_vm7, %v2021_v17, %v1465_v4 }
 0x234   : > { %1226 = vrot.lane.b32.xlu0 %v809_v36, %s16402_s0  ;;  %1352 = vrot.lane.b32.xlu1 %v840_v38, %s16403_s27  ;;  %v1923_v36 = vsel %vm16238_vm0, %v10422_v35, %v10704_v45  ;;  %s16103_s0 = smov 124  }
 0x235   : > { %8661 = vmatmul.mubr.msk.f32.gmra.mrb[20].mxu0 %vm2175_vm10, %v2152_v25  ;;  %v1956_v38 = vsel %vm16244_vm2, %v1923_v36, %v10712_v47 }
 0x236   : > { %v10766_v54 = vpop.permute.xlu0 %958  ;;  %v10768_v30 = vpop.permute.xlu1 %1084  ;;  %v1989_v16 = vsel %vm1965_vm5, %v1956_v38, %v10727_v20 }
 0x237   : > { %v2022_v13 = vsel %vm16243_vm6, %v1989_v16, %v10754_v6 }
 0x238   : > { %1734 = vrot.lane.b32.xlu0 %v841_v28, %s9492_s20  ;;  %1860 = vrot.lane.b32.xlu1 %v872_v62, %s16105_s22 }
 0x23a   : > { %v1467_v53 = vpop.permute.xlu0 %1466  ;;  %v1593_v61 = vpop.permute.xlu1 %1592 }
 0x23b   : > { %v2087_v50 = vsel %vm16242_vm8, %v2054_v15, %v1593_v61  ;;  %v2055_v46 = vsel %vm2031_vm7, %v2022_v13, %v1467_v53  ;;  %v1924_v53 = vsel %vm16238_vm0, %v10463_v39, %v10752_v43 }
 0x23c   : > { %1354 = vrot.lane.b32.xlu0 %v841_v28, %s16403_s27  ;;  %1480 = vrot.lane.b32.xlu1 %v872_v62, %s16405_s21 }
 0x23e   : > { %v10774_v18 = vpop.permute.xlu0 %1086  ;;  %v1213_v3 = vpop.permute.xlu1 %1212 }
 0x240   : > { %1862 = vrot.lane.b32.xlu0 %v873_v60, %s16105_s22  ;;  %1482 = vrot.lane.b32.xlu1 %v873_v60, %s16405_s21 }
 0x242   : > { %v1595_v21 = vpop.permute.xlu0 %1594  ;;  %v1721_v37 = vpop.permute.xlu1 %1720 }
 0x243   : > { %v2120_v9 = vsel %vm2097_vm9, %v2087_v50, %v1721_v37  ;;  %v2088_v35 = vsel %vm16242_vm8, %v2055_v46, %v1595_v21 }
 0x244   : > { %1608 = vrot.lane.b32.xlu0 %v810_v41, %s16107_s26  ;;  %1610 = vrot.lane.b32.xlu1 %v811_v2, %s16107_s26  ;;  %v1957_v2 = vsel %vm16244_vm2, %v1924_v53, %v10768_v30 }
 0x245   : > { %v1990_v21 = vsel %vm1965_vm5, %v1957_v2, %v1213_v3  ;;  %v1925_v3 = vsel %vm16238_vm0, %v10488_v23, %v10766_v54 }
 0x246   : > { %v1215_v57 = vpop.permute.xlu0 %1214  ;;  %v1341_v48 = vpop.permute.xlu1 %1340 }
 0x247   : > { %v2023_v58 = vsel %vm16243_vm6, %v1990_v21, %v1341_v48  ;;  %v1958_v48 = vsel %vm16244_vm2, %v1925_v3, %v10774_v18 }
 0x248   : > { %v10790_v12 = vpop.f32.mrb[8].mxu0  ;;  %1736 = vrot.lane.b32.xlu0 %v842_v49, %s9492_s20  ;;  %1738 = vrot.lane.b32.xlu1 %v843_v29, %s9492_s20  ;;  %v1991_v50 = vsel %vm1965_vm5, %v1958_v48, %v1215_v57 }
 0x249   : > { %v10795_v63 = vpop.f32.mrb[9].mxu0 }
 0x24a   : > { %v1723_v26 = vpop.permute.xlu0 %1722  ;;  %v1849_v33 = vpop.permute.xlu1 %1848 }
 0x24b   : > { %v2153_v1 = vsel %vm16240_vm3, %v2120_v9, %v1849_v33  ;;  %v2121_v45 = vsel %vm2097_vm9, %v2088_v35, %v1723_v26 }
 0x24c   : > { %1864 = vrot.lane.b32.xlu0 %v874_v42, %s16105_s22  ;;  %1866 = vrot.lane.b32.xlu1 %v875_v19, %s16105_s22  ;;  %s9495_s22 = smov 0.0  }
 0x24d   : > { %8663 = vmatprep.mubr.msk.f32.mxu0 %vm2175_vm10, %v2153_v1 }
 0x24e   : > { %v961_v52 = vpop.permute.xlu0 %960  ;;  %v1343_v22 = vpop.permute.xlu1 %1342 }
 0x24f   : > { %v2024_v9 = vsel %vm16243_vm6, %v1991_v50, %v1343_v22 }
 0x252   : > { %v1469_v4 = vpop.permute.xlu0 %1468  ;;  %v1851_v14 = vpop.permute.xlu1 %1850 }
 0x253   : > { %v2154_v47 = vsel %vm16240_vm3, %v2121_v45, %v1851_v14  ;;  %v2056_v49 = vsel %vm2031_vm7, %v2023_v58, %v1469_v4  ;;  %v1926_v45 = vsel %vm16238_vm0, %v10527_v51, %v961_v52 }
 0x254   : > { %8664 = vmatmul.mubr.msk.f32.gmra.mrb[22].mxu0 %vm2175_vm10, %v2154_v47 }
 0x256   : > { %v963_v25 = vpop.permute.xlu0 %962  ;;  %v1089_v28 = vpop.permute.xlu1 %1088 }
 0x257   : > { %v1959_v4 = vsel %vm16244_vm2, %v1926_v45, %v1089_v28  ;;  %v1927_v28 = vsel %vm16238_vm0, %v10554_v8, %v963_v25 }
 0x25a   : > { %v1471_v20 = vpop.permute.xlu0 %1470  ;;  %v1597_v62 = vpop.permute.xlu1 %1596 }
 0x25b   : > { %v2089_v5 = vsel %vm16242_vm8, %v2056_v49, %v1597_v62  ;;  %v2057_v26 = vsel %vm2031_vm7, %v2024_v9, %v1471_v20 }
 0x25e   : > { %v1091_v61 = vpop.permute.xlu0 %1090  ;;  %v1217_v60 = vpop.permute.xlu1 %1216 }
 0x25f   : > { %v1992_v14 = vsel %vm1965_vm5, %v1959_v4, %v1217_v60  ;;  %v1960_v60 = vsel %vm16244_vm2, %v1927_v28, %v1091_v61 }
 0x262   : > { %v1599_v41 = vpop.permute.xlu0 %1598  ;;  %v1725_v6 = vpop.permute.xlu1 %1724 }
 0x263   : > { %v2122_v15 = vsel %vm2097_vm9, %v2089_v5, %v1725_v6  ;;  %v2090_v33 = vsel %vm16242_vm8, %v2057_v26, %v1599_v41 }
 0x266   : > { %v1219_v37 = vpop.permute.xlu0 %1218  ;;  %v1345_v11 = vpop.permute.xlu1 %1344 }
 0x267   : > { %v2025_v62 = vsel %vm16243_vm6, %v1992_v14, %v1345_v11  ;;  %v1993_v11 = vsel %vm1965_vm5, %v1960_v60, %v1219_v37 }
 0x268   : > { %v10824_v29 = vpop.f32.mrb[10].mxu0 }
 0x269   : > { %v10827_v17 = vpop.f32.mrb[11].mxu0 }
 0x26a   : > { %v1727_v39 = vpop.permute.xlu0 %1726  ;;  %v1853_v43 = vpop.permute.xlu1 %1852 }
 0x26b   : > { %v2155_v30 = vsel %vm16240_vm3, %v2122_v15, %v1853_v43  ;;  %v2123_v1 = vsel %vm2097_vm9, %v2090_v33, %v1727_v39 }
 0x26c   : > { %8666 = vmatprep.mubr.msk.f32.mxu0 %vm2175_vm10, %v2155_v30 }
 0x26e   : > { %v965_v42 = vpop.permute.xlu0 %964  ;;  %v1347_v19 = vpop.permute.xlu1 %1346 }
 0x26f   : > { %v2026_v15 = vsel %vm16243_vm6, %v1993_v11, %v1347_v19 }
 0x272   : > { %v1473_v36 = vpop.permute.xlu0 %1472  ;;  %v1855_v38 = vpop.permute.xlu1 %1854 }
 0x273   : > { %v2156_v23 = vsel %vm16240_vm3, %v2123_v1, %v1855_v38  ;;  %v2058_v41 = vsel %vm2031_vm7, %v2025_v62, %v1473_v36  ;;  %v1928_v1 = vsel %vm16238_vm0, %v10593_v34, %v965_v42 }
 0x274   : > { %8667 = vmatmul.mubr.msk.f32.gmra.mrb[24].mxu0 %vm2175_vm10, %v2156_v23 }
 0x276   : > { %v967_v54 = vpop.permute.xlu0 %966  ;;  %v1093_v18 = vpop.permute.xlu1 %1092 }
 0x277   : > { %v1961_v36 = vsel %vm16244_vm2, %v1928_v1, %v1093_v18  ;;  %v1929_v18 = vsel %vm16238_vm0, %v10620_v56, %v967_v54 }
 0x27a   : > { %v1475_v16 = vpop.permute.xlu0 %1474  ;;  %v1601_v57 = vpop.permute.xlu1 %1600 }
 0x27b   : > { %v2091_v53 = vsel %vm16242_vm8, %v2058_v41, %v1601_v57  ;;  %v2059_v39 = vsel %vm2031_vm7, %v2026_v15, %v1475_v16 }
 0x27e   : > { %v1095_v13 = vpop.permute.xlu0 %1094  ;;  %v1221_v46 = vpop.permute.xlu1 %1220 }
 0x27f   : > { %v1994_v38 = vsel %vm1965_vm5, %v1961_v36, %v1221_v46  ;;  %v1962_v46 = vsel %vm16244_vm2, %v1929_v18, %v1095_v13 }
 0x282   : > { %v1603_v35 = vpop.permute.xlu0 %1602  ;;  %v1729_v22 = vpop.permute.xlu1 %1728 }
 0x283   : > { %v2124_v21 = vsel %vm2097_vm9, %v2091_v53, %v1729_v22  ;;  %v2092_v43 = vsel %vm16242_vm8, %v2059_v39, %v1603_v35 }
 0x286   : > { %v1223_v47 = vpop.permute.xlu0 %1222  ;;  %v1349_v20 = vpop.permute.xlu1 %1348 }
 0x287   : > { %v2027_v57 = vsel %vm16243_vm6, %v1994_v38, %v1349_v20  ;;  %v1995_v20 = vsel %vm1965_vm5, %v1962_v46, %v1223_v47 }
 0x288   : > { %v10850_v6 = vpop.f32.mrb[12].mxu0 }
 0x289   : > { %v10853_v2 = vpop.f32.mrb[13].mxu0 }
 0x28a   : > { %v1731_v58 = vpop.permute.xlu0 %1730  ;;  %v1857_v51 = vpop.permute.xlu1 %1856 }
 0x28b   : > { %v2157_v52 = vsel %vm16240_vm3, %v2124_v21, %v1857_v51  ;;  %v2125_v30 = vsel %vm2097_vm9, %v2092_v43, %v1731_v58 }
 0x28c   : > { %8669 = vmatprep.mubr.msk.f32.mxu0 %vm2175_vm10, %v2157_v52 }
 0x28e   : > { %v969_v49 = vpop.permute.xlu0 %968  ;;  %v1351_v5 = vpop.permute.xlu1 %1350 }
 0x28f   : > { %v2028_v21 = vsel %vm16243_vm6, %v1995_v20, %v1351_v5  ;;  %v1930_v47 = vsel %vm16238_vm0, %v10659_v40, %v969_v49 }
 0x292   : > { %v1477_v3 = vpop.permute.xlu0 %1476  ;;  %v1859_v48 = vpop.permute.xlu1 %1858 }
 0x293   : > { %v2158_v8 = vsel %vm16240_vm3, %v2125_v30, %v1859_v48  ;;  %v2060_v35 = vsel %vm2031_vm7, %v2027_v57, %v1477_v3 }
 0x294   : > { %8670 = vmatmul.mubr.msk.f32.gmra.mrb[26].mxu0 %vm2175_vm10, %v2158_v8 }
 0x296   : > { %v971_v25 = vpop.permute.xlu0 %970  ;;  %v1097_v61 = vpop.permute.xlu1 %1096 }
 0x297   : > { %v1931_v11 = vsel %vm16238_vm0, %v10686_v24, %v971_v25  ;;  %v1963_v5 = vsel %vm16244_vm2, %v1930_v47, %v1097_v61 }
 0x29a   : > { %v1479_v50 = vpop.permute.xlu0 %1478  ;;  %v1605_v37 = vpop.permute.xlu1 %1604 }
 0x29b   : > { %v2093_v45 = vsel %vm16242_vm8, %v2060_v35, %v1605_v37  ;;  %v2061_v58 = vsel %vm2031_vm7, %v2028_v21, %v1479_v50 }
 0x29e   : > { %v1099_v9 = vpop.permute.xlu0 %1098  ;;  %v1225_v26 = vpop.permute.xlu1 %1224 }
 0x29f   : > { %v1964_v15 = vsel %vm16244_vm2, %v1931_v11, %v1099_v9  ;;  %v1996_v39 = vsel %vm1965_vm5, %v1963_v5, %v1225_v26 }
 0x2a2   : > { %v1607_v33 = vpop.permute.xlu0 %1606  ;;  %v1733_v19 = vpop.permute.xlu1 %1732 }
 0x2a3   : > { %v2126_v14 = vsel %vm2097_vm9, %v2093_v45, %v1733_v19  ;;  %v2094_v51 = vsel %vm16242_vm8, %v2061_v58, %v1607_v33  ;;  %v10931_v45 = vld [vmem:[%s16407_s3] ss:$0 sm:$0xff] }
 0x2a4   : > { %v10965_v21 = vadd.f32 %v10931_v45, %v10673_v55  ;;  %v10978_v55 = vadd.f32 %v10667_v44, %v10931_v45  ;;  %v10984_v11 = vadd.f32 %v10931_v45, %v10738_v27 }
 0x2a6   : > { %v1227_v23 = vpop.permute.xlu0 %1226  ;;  %v1353_v16 = vpop.permute.xlu1 %1352  ;;  %v2510_v47 = vsel %vm16244_vm2, %v10965_v21, 0.0  ;;  %v2577_v44 = vmul.f32 %v10978_v55, %v10978_v55  ;;  %v2512_v27 = vsel %vm16244_vm2, %v10978_v55, 0.0 }
 0x2a7   : > { %v1997_v43 = vsel %vm1965_vm5, %v1964_v15, %v1227_v23  ;;  %v2029_v48 = vsel %vm16243_vm6, %v1996_v39, %v1353_v16 }
 0x2a8   : > { %v10874_v22 = vpop.f32.mrb[14].mxu0 }
 0x2a9   : > { %v10877_v4 = vpop.f32.mrb[15].mxu0 }
 0x2aa   : > { %v1735_v62 = vpop.permute.xlu0 %1734  ;;  %v1861_v34 = vpop.permute.xlu1 %1860 }
 0x2ab   : > { %v2159_v42 = vsel %vm16240_vm3, %v2126_v14, %v1861_v34  ;;  %v2127_v52 = vsel %vm2097_vm9, %v2094_v51, %v1735_v62  ;;  %v10935_v14 = vadd.f32 %v10535_v10, %v10931_v45  ;;  %v10939_v62 = vadd.f32 %v10931_v45, %v10541_v31 }
 0x2ac   : > { %8672 = vmatprep.mubr.msk.f32.mxu0 %vm2175_vm10, %v2159_v42  ;;  %v10943_v34 = vadd.f32 %v10931_v45, %v10607_v7 }
 0x2ad   : > { %v2573_v42 = vmul.f32 %v10935_v14, %v10935_v14  ;;  %v2572_v18 = vmul.f32 %v10939_v62, %v10939_v62  ;;  %v2504_v46 = vsel %vm16244_vm2, %v10935_v14, 0.0  ;;  %v2503_v10 = vsel %vm16244_vm2, %v10939_v62, 0.0 }
 0x2ae   : > { %v1355_v41 = vpop.permute.xlu0 %1354  ;;  %v1481_v53 = vpop.permute.xlu1 %1480  ;;  %v2574_v31 = vmul.f32 %v10943_v34, %v10943_v34  ;;  %v2505_v58 = vadd.f32 %v2504_v46, %v2503_v10  ;;  %v11022_v46 = vadd.f32 %v10931_v45, %v10827_v17  ;;  %v11034_v17 = vadd.f32 %v10824_v29, %v10931_v45 }
 0x2af   : > { %v2030_v8 = vsel %vm16243_vm6, %v1997_v43, %v1355_v41  ;;  %v2062_v50 = vsel %vm2031_vm7, %v2029_v48, %v1481_v53  ;;  %v2605_v20 = vsel %vm16244_vm2, %v2573_v42, 0.0  ;;  %v2604_v7 = vsel %vm16244_vm2, %v2572_v18, 0.0 }
 0x2b0   : > { %v10959_v41 = vadd.f32 %v10601_v59, %v10931_v45  ;;  %v2506_v53 = vsel %vm16244_vm2, %v10943_v34, 0.0  ;;  %v2607_v51 = vsel %vm16244_vm2, %v2574_v31, 0.0  ;;  %v2578_v48 = vmul.f32 %v10984_v11, %v10984_v11 }
 0x2b2   : > { %v1863_v28 = vpop.permute.xlu0 %1862  ;;  %v1483_v60 = vpop.permute.xlu1 %1482 }
 0x2b3   : > { %v2160_v56 = vsel %vm16240_vm3, %v2127_v52, %v1863_v28  ;;  %v2063_v40 = vsel %vm2031_vm7, %v2030_v8, %v1483_v60  ;;  %v2606_v52 = vadd.f32 %v2605_v20, %v2604_v7  ;;  %v2507_v28 = vadd.f32 %v2506_v53, %v2505_v58 }
 0x2b4   : > { %8673 = vmatmul.mubr.msk.f32.gmra.mrb[28].mxu0 %vm2175_vm10, %v2160_v56  ;;  %v2575_v60 = vmul.f32 %v10959_v41, %v10959_v41  ;;  %v2576_v56 = vmul.f32 %v10965_v21, %v10965_v21 }
 0x2b5   : > { %v2608_v59 = vadd.f32 %v2607_v51, %v2606_v52 }
 0x2b6   : > { %v1609_v54 = vpop.permute.xlu0 %1608  ;;  %v1611_v13 = vpop.permute.xlu1 %1610  ;;  %v2609_v39 = vsel %vm16244_vm2, %v2575_v60, 0.0  ;;  %v2611_v43 = vsel %vm16244_vm2, %v2576_v56, 0.0  ;;  %v11040_v60 = vadd.f32 %v10931_v45, %v10853_v2  ;;  %v11052_v2 = vadd.f32 %v10850_v6, %v10931_v45 }
 0x2b7   : > { %v2095_v24 = vsel %vm16242_vm8, %v2062_v50, %v1609_v54  ;;  %v2096_v49 = vsel %vm16242_vm8, %v2063_v40, %v1611_v13  ;;  %v2508_v13 = vsel %vm16244_vm2, %v10959_v41, 0.0  ;;  %v10998_v50 = vadd.f32 %v10733_v32, %v10931_v45 }
 0x2b8   : > { %v2509_v15 = vadd.f32 %v2508_v13, %v2507_v28  ;;  %v2514_v40 = vsel %vm16244_vm2, %v10984_v11, 0.0  ;;  %v2522_v28 = vsel %vm16244_vm2, %v11022_v46, 0.0  ;;  %v2584_v29 = vmul.f32 %v11040_v60, %v11040_v60 }
 0x2b9   : > { %v2516_v42 = vsel %vm16244_vm2, %v10998_v50, 0.0 }
 0x2ba   : > { %v1737_v30 = vpop.permute.xlu0 %1736  ;;  %v1739_v3 = vpop.permute.xlu1 %1738 }
 0x2bb   : > { %v2128_v25 = vsel %vm2097_vm9, %v2095_v24, %v1737_v30  ;;  %v2129_v61 = vsel %vm2097_vm9, %v2096_v49, %v1739_v3  ;;  %v2511_v30 = vadd.f32 %v2510_v47, %v2509_v15  ;;  %v2610_v3 = vadd.f32 %v2609_v39, %v2608_v59 }
 0x2bc   : > { %v11004_v24 = vadd.f32 %v10931_v45, %v10795_v63  ;;  %v11016_v63 = vadd.f32 %v10790_v12, %v10931_v45  ;;  %v2582_v12 = vmul.f32 %v11022_v46, %v11022_v46  ;;  %v2583_v39 = vmul.f32 %v11034_v17, %v11034_v17 }
 0x2bd   : > { %v2612_v8 = vadd.f32 %v2611_v43, %v2610_v3  ;;  %v2513_v49 = vadd.f32 %v2512_v27, %v2511_v30  ;;  %v2524_v30 = vsel %vm16244_vm2, %v11034_v17, 0.0  ;;  %v2526_v3 = vsel %vm16244_vm2, %v11040_v60, 0.0 }
 0x2be   : > { %v1865_v37 = vpop.permute.xlu0 %1864  ;;  %v1867_v9 = vpop.permute.xlu1 %1866  ;;  %v2580_v32 = vmul.f32 %v11004_v24, %v11004_v24  ;;  %v2518_v18 = vsel %vm16244_vm2, %v11004_v24, 0.0  ;;  %v2581_v58 = vmul.f32 %v11016_v63, %v11016_v63  ;;  %v2520_v52 = vsel %vm16244_vm2, %v11016_v63, 0.0 }
 0x2bf   : > { %v2161_v26 = vsel %vm16240_vm3, %v2128_v25, %v1865_v37  ;;  %v2162_v33 = vsel %vm16240_vm3, %v2129_v61, %v1867_v9  ;;  %v2613_v25 = vsel %vm16244_vm2, %v2577_v44, 0.0  ;;  %v2615_v61 = vsel %vm16244_vm2, %v2578_v48, 0.0 }
 0x2c0   : > { %8675 = vmatprep.mubr.msk.f32.mxu0 %vm2175_vm10, %v2161_v26  ;;  %v2515_v37 = vadd.f32 %v2514_v40, %v2513_v49  ;;  %v2614_v9 = vadd.f32 %v2613_v25, %v2612_v8  ;;  %v2579_v26 = vmul.f32 %v10998_v50, %v10998_v50  ;;  %v2619_v20 = vsel %vm16244_vm2, %v2580_v32, 0.0 }
 0x2c1   : > { %8676 = vmatmul.mubr.msk.f32.gmra.mrb[30].mxu0 %vm2175_vm10, %v2162_v33  ;;  %v2621_v59 = vsel %vm16244_vm2, %v2581_v58, 0.0  ;;  %v2623_v13 = vsel %vm16244_vm2, %v2582_v12, 0.0  ;;  %v11058_v44 = vadd.f32 %v10931_v45, %v10877_v4  ;;  %v2625_v8 = vsel %vm16244_vm2, %v2583_v39, 0.0 }
 0x2c2   : > { %v2616_v33 = vadd.f32 %v2615_v61, %v2614_v9  ;;  %v2517_v10 = vadd.f32 %v2516_v42, %v2515_v37  ;;  %v2617_v31 = vsel %vm16244_vm2, %v2579_v26, 0.0  ;;  %v2627_v27 = vsel %vm16244_vm2, %v2584_v29, 0.0 }
 0x2c3   : > { %v2585_v25 = vmul.f32 %v11052_v2, %v11052_v2  ;;  %v2586_v6 = vmul.f32 %v11058_v44, %v11058_v44  ;;  %v2528_v37 = vsel %vm16244_vm2, %v11052_v2, 0.0  ;;  %v11070_v4 = vadd.f32 %v10874_v22, %v10931_v45 }
 0x2c4   : > { %v2519_v7 = vadd.f32 %v2518_v18, %v2517_v10  ;;  %v2618_v53 = vadd.f32 %v2617_v31, %v2616_v33  ;;  %v2530_v9 = vsel %vm16244_vm2, %v11058_v44, 0.0 }
 0x2c5   : > { %v2629_v42 = vsel %vm16244_vm2, %v2585_v25, 0.0  ;;  %v2631_v18 = vsel %vm16244_vm2, %v2586_v6, 0.0  ;;  %v2587_v22 = vmul.f32 %v11070_v4, %v11070_v4 }
 0x2c6   : > { %v2620_v51 = vadd.f32 %v2619_v20, %v2618_v53  ;;  %v2521_v56 = vadd.f32 %v2520_v52, %v2519_v7 }
 0x2c8   : > { %v10912_v19 = vpop.f32.mrb[16].mxu0  ;;  %v2523_v47 = vadd.f32 %v2522_v28, %v2521_v56  ;;  %v2622_v15 = vadd.f32 %v2621_v59, %v2620_v51  ;;  %v2633_v28 = vsel %vm16244_vm2, %v2587_v22, 0.0 }
 0x2c9   : > { %v10914_v1 = vpop.f32.mrb[17].mxu0  ;;  %v11090_v58 = vadd.f32 %v10912_v19, %v10931_v45 }
 0x2ca   : > { %v2624_v43 = vadd.f32 %v2623_v13, %v2622_v15  ;;  %v2525_v48 = vadd.f32 %v2524_v30, %v2523_v47  ;;  %v11076_v26 = vadd.f32 %v10931_v45, %v10914_v1  ;;  %v2532_v1 = vsel %vm16244_vm2, %v11070_v4, 0.0 }
 0x2cb   : > { %v2589_v47 = vmul.f32 %v11090_v58, %v11090_v58  ;;  %v2536_v39 = vsel %vm16244_vm2, %v11090_v58, 0.0 }
 0x2cc   : > { %v2527_v40 = vadd.f32 %v2526_v3, %v2525_v48  ;;  %v2626_v49 = vadd.f32 %v2625_v8, %v2624_v43  ;;  %v2588_v7 = vmul.f32 %v11076_v26, %v11076_v26  ;;  %v2534_v12 = vsel %vm16244_vm2, %v11076_v26, 0.0 }
 0x2cd   : > { %v2637_v3 = vsel %vm16244_vm2, %v2589_v47, 0.0 }
 0x2ce   : > { %v2628_v61 = vadd.f32 %v2627_v27, %v2626_v49  ;;  %v2529_v32 = vadd.f32 %v2528_v37, %v2527_v40  ;;  %v2635_v56 = vsel %vm16244_vm2, %v2588_v7, 0.0 }
 0x2d0   : > { %v2531_v31 = vadd.f32 %v2530_v9, %v2529_v32  ;;  %v2630_v20 = vadd.f32 %v2629_v42, %v2628_v61 }
 0x2d2   : > { %v2632_v53 = vadd.f32 %v2631_v18, %v2630_v20  ;;  %v2533_v52 = vadd.f32 %v2532_v1, %v2531_v31 }
 0x2d4   : > { %v2535_v59 = vadd.f32 %v2534_v12, %v2533_v52  ;;  %v2634_v13 = vadd.f32 %v2633_v28, %v2632_v53 }
 0x2d6   : > { %v2636_v15 = vadd.f32 %v2635_v56, %v2634_v13  ;;  %v2537_v30 = vadd.f32 %v2536_v39, %v2535_v59 }
 0x2d8   : > { %v2638_v27 = vadd.f32 %v2637_v3, %v2636_v15 }
 0x2e8   : > { %v10916_v36 = vpop.f32.mrb[18].mxu0 }
 0x2e9   : > { %v10918_v38 = vpop.f32.mrb[19].mxu0 }
 0x2ea   : > { %v11096_v51 = vadd.f32 %v10931_v45, %v10918_v38  ;;  %v11108_v38 = vadd.f32 %v10916_v36, %v10931_v45 }
 0x2ec   : > { %v2590_v19 = vmul.f32 %v11096_v51, %v11096_v51  ;;  %v2538_v29 = vsel %vm16244_vm2, %v11096_v51, 0.0  ;;  %v2591_v40 = vmul.f32 %v11108_v38, %v11108_v38  ;;  %v2540_v25 = vsel %vm16244_vm2, %v11108_v38, 0.0 }
 0x2ed   : > { %v2539_v8 = vadd.f32 %v2538_v29, %v2537_v30 }
 0x2ee   : > { %v2639_v48 = vsel %vm16244_vm2, %v2590_v19, 0.0  ;;  %v2641_v9 = vsel %vm16244_vm2, %v2591_v40, 0.0 }
 0x2ef   : > { %v2640_v49 = vadd.f32 %v2639_v48, %v2638_v27  ;;  %v2541_v37 = vadd.f32 %v2540_v25, %v2539_v8 }
 0x2f1   : > { %v2642_v18 = vadd.f32 %v2641_v9, %v2640_v49 }
 0x308   : > { %v10920_v23 = vpop.f32.mrb[20].mxu0 }
 0x309   : > { %v10922_v16 = vpop.f32.mrb[21].mxu0 }
 0x30a   : > { %v11114_v43 = vadd.f32 %v10931_v45, %v10922_v16  ;;  %v11126_v16 = vadd.f32 %v10920_v23, %v10931_v45 }
 0x30c   : > { %v2592_v36 = vmul.f32 %v11114_v43, %v11114_v43  ;;  %v2542_v6 = vsel %vm16244_vm2, %v11114_v43, 0.0  ;;  %v2593_v31 = vmul.f32 %v11126_v16, %v11126_v16  ;;  %v2544_v22 = vsel %vm16244_vm2, %v11126_v16, 0.0 }
 0x30d   : > { %v2543_v42 = vadd.f32 %v2542_v6, %v2541_v37 }
 0x30e   : > { %v2643_v32 = vsel %vm16244_vm2, %v2592_v36, 0.0  ;;  %v2645_v12 = vsel %vm16244_vm2, %v2593_v31, 0.0 }
 0x30f   : > { %v2644_v20 = vadd.f32 %v2643_v32, %v2642_v18  ;;  %v2545_v1 = vadd.f32 %v2544_v22, %v2543_v42 }
 0x311   : > { %v2646_v56 = vadd.f32 %v2645_v12, %v2644_v20 }
 0x327   : > { %v10924_v57 = vpop.f32.mrb[22].mxu0 }
 0x328   : > { %v10926_v35 = vpop.f32.mrb[23].mxu0 }
 0x329   : > { %v11132_v61 = vadd.f32 %v10931_v45, %v10926_v35  ;;  %v11144_v35 = vadd.f32 %v10924_v57, %v10931_v45 }
 0x32b   : > { %v2594_v23 = vmul.f32 %v11132_v61, %v11132_v61  ;;  %v2546_v7 = vsel %vm16244_vm2, %v11132_v61, 0.0  ;;  %v2595_v59 = vmul.f32 %v11144_v35, %v11144_v35  ;;  %v2548_v47 = vsel %vm16244_vm2, %v11144_v35, 0.0 }
 0x32c   : > { %v2547_v28 = vadd.f32 %v2546_v7, %v2545_v1 }
 0x32d   : > { %v2647_v52 = vsel %vm16244_vm2, %v2594_v23, 0.0  ;;  %v2649_v29 = vsel %vm16244_vm2, %v2595_v59, 0.0 }
 0x32e   : > { %v2648_v13 = vadd.f32 %v2647_v52, %v2646_v56  ;;  %v2549_v39 = vadd.f32 %v2548_v47, %v2547_v28 }
 0x330   : > { %v2650_v48 = vadd.f32 %v2649_v29, %v2648_v13 }
 0x347   : > { %v10972_v54 = vpop.f32.mrb[24].mxu0 }
 0x348   : > { %v10986_v5 = vpop.f32.mrb[25].mxu0 }
 0x349   : > { %v11150_v53 = vadd.f32 %v10931_v45, %v10986_v5  ;;  %v11162_v5 = vadd.f32 %v10972_v54, %v10931_v45 }
 0x34b   : > { %v2596_v57 = vmul.f32 %v11150_v53, %v11150_v53  ;;  %v2550_v19 = vsel %vm16244_vm2, %v11150_v53, 0.0  ;;  %v2597_v27 = vmul.f32 %v11162_v5, %v11162_v5 }
 0x34c   : > { %v2551_v3 = vadd.f32 %v2550_v19, %v2549_v39 }
 0x34d   : > { %v2651_v30 = vsel %vm16244_vm2, %v2596_v57, 0.0  ;;  %v2653_v9 = vsel %vm16244_vm2, %v2597_v27, 0.0 }
 0x34e   : > { %v2652_v36 = vadd.f32 %v2651_v30, %v2650_v48 }
 0x350   : > { %v2654_v18 = vadd.f32 %v2653_v9, %v2652_v36 }
 0x367   : > { %v11078_v33 = vpop.f32.mrb[26].mxu0 }
 0x368   : > { %v2472_v10 = vpop.f32.mrb[27].mxu0  ;;  %v11179_v49 = vadd.f32 %v11078_v33, %v10931_v45 }
 0x369   : > { %v11167_v15 = vadd.f32 %v10931_v45, %v2472_v10  ;;  %v2552_v10 = vsel %vm16244_vm2, %v11162_v5, 0.0 }
 0x36a   : > { %v2553_v37 = vadd.f32 %v2552_v10, %v2551_v3  ;;  %v2599_v31 = vmul.f32 %v11179_v49, %v11179_v49  ;;  %v2556_v20 = vsel %vm16244_vm2, %v11179_v49, 0.0 }
 0x36b   : > { %v2598_v54 = vmul.f32 %v11167_v15, %v11167_v15  ;;  %v2554_v25 = vsel %vm16244_vm2, %v11167_v15, 0.0 }
 0x36c   : > { %v2555_v42 = vadd.f32 %v2554_v25, %v2553_v37  ;;  %v2657_v12 = vsel %vm16244_vm2, %v2599_v31, 0.0 }
 0x36d   : > { %v2655_v32 = vsel %vm16244_vm2, %v2598_v54, 0.0 }
 0x36e   : > { %v2656_v23 = vadd.f32 %v2655_v32, %v2654_v18  ;;  %v2557_v1 = vadd.f32 %v2556_v20, %v2555_v42 }
 0x370   : > { %v2658_v56 = vadd.f32 %v2657_v12, %v2656_v23 }
 0x387   : > { %v8674_v8 = vpop.f32.mrb[28].mxu0 }
 0x388   : > { %v2482_v40 = vpop.f32.mrb[29].mxu0  ;;  %v11195_v22 = vadd.f32 %v8674_v8, %v10931_v45 }
 0x389   : > { %v11184_v6 = vadd.f32 %v10931_v45, %v2482_v40 }
 0x38a   : > { %v2601_v59 = vmul.f32 %v11195_v22, %v11195_v22  ;;  %v2560_v39 = vsel %vm16244_vm2, %v11195_v22, 0.0 }
 0x38b   : > { %v2600_v33 = vmul.f32 %v11184_v6, %v11184_v6  ;;  %v2558_v7 = vsel %vm16244_vm2, %v11184_v6, 0.0 }
 0x38c   : > { %v2559_v28 = vadd.f32 %v2558_v7, %v2557_v1  ;;  %v2661_v3 = vsel %vm16244_vm2, %v2601_v59, 0.0 }
 0x38d   : > { %v2659_v52 = vsel %vm16244_vm2, %v2600_v33, 0.0 }
 0x38e   : > { %v2660_v13 = vadd.f32 %v2659_v52, %v2658_v56  ;;  %v2561_v30 = vadd.f32 %v2560_v39, %v2559_v28 }
 0x390   : > { %v2662_v40 = vadd.f32 %v2661_v3, %v2660_v13 }
 0x394   : > { %v8677_v57 = vpop.f32.mrb[30].mxu0 }
 0x395   : > { %v11204_v47 = vadd.f32 %v8677_v57, %v10931_v45  ;;  %v2492_v19 = vpop.f32.mrb[31].mxu0 }
 0x396   : > { %v11209_v29 = vadd.f32 %v10931_v45, %v2492_v19 }
 0x397   : > { %v2603_v48 = vmul.f32 %v11204_v47, %v11204_v47  ;;  %v2564_v36 = vsel %vm16244_vm2, %v11204_v47, 0.0 }
 0x398   : > { %v2562_v8 = vsel %vm16244_vm2, %v11209_v29, 0.0  ;;  %v2602_v27 = vmul.f32 %v11209_v29, %v11209_v29 }
 0x399   : > { %v2563_v54 = vadd.f32 %v2562_v8, %v2561_v30  ;;  %v2665_v37 = vsel %vm16244_vm2, %v2603_v48, 0.0 }
 0x39a   : > { %v2663_v45 = vsel %vm16244_vm2, %v2602_v27, 0.0 }
 0x39b   : > { %v2565_v10 = vadd.f32 %v2564_v36, %v2563_v54  ;;  %v2664_v25 = vadd.f32 %v2663_v45, %v2662_v40 }
 0x39d   : > { %v2566_v9 = vrot.slane %v2565_v10, 4  ;;  %v2666_v32 = vadd.f32 %v2665_v37, %v2664_v25 }
 0x39f   : > { %v2567_v42 = vadd.f32 %v2566_v9, %v2565_v10  ;;  %v2667_v18 = vrot.slane %v2666_v32, 4 }
 0x3a1   : > { %v2568_v31 = vrot.slane %v2567_v42, 2  ;;  %v2668_v33 = vadd.f32 %v2667_v18, %v2666_v32 }
 0x3a3   : > { %v2569_v23 = vadd.f32 %v2568_v31, %v2567_v42  ;;  %v2669_v20 = vrot.slane %v2668_v33, 2 }
 0x3a5   : > { %v2570_v7 = vrot.slane %v2569_v23, 1  ;;  %v2670_v1 = vadd.f32 %v2669_v20, %v2668_v33 }
 0x3a7   : > { %v2571_v12 = vadd.f32 %v2570_v7, %v2569_v23  ;;  %v2671_v52 = vrot.slane %v2670_v1, 1 }
 0x3a9   : > { %v2674_v28 = vsel %vm16239_vm12, %v2571_v12, 0.0  ;;  %v2672_v56 = vadd.f32 %v2671_v52, %v2670_v1 }
 0x3aa   : > { %2675 = vadd.xlane.f32.xlu0 %v2674_v28 }
 0x3ab   : > { %v2687_v59 = vsel %vm16239_vm12, %v2672_v56, 0.0 }
 0x3ac   : > { %2688 = vadd.xlane.f32.xlu1 %v2687_v59 }
 0x3bd   : > { %2729 = vrot.lane.b32.xlu1 %v2672_v56, %s16103_s0 }
 0x3c0   : > { %2712 = vrot.lane.b32.xlu0 %v2571_v12, %s16103_s0 }
 0x437   : > { %v2676_v57 = vpop.xlane.xlu0 %2675 }
 0x438   : > { %v2677_v13 = vrot.slane %v2676_v57, 4 }
 0x439   : > { %v2689_v19 = vpop.xlane.xlu1 %2688 }
 0x43a   : > { %v2678_v39 = vadd.f32 %v2677_v13, %v2676_v57  ;;  %v2690_v30 = vrot.slane %v2689_v19, 4 }
 0x43b   : > { %v2713_v3 = vpop.permute.xlu0 %2712 }
 0x43c   : > { %v2691_v48 = vadd.f32 %v2690_v30, %v2689_v19  ;;  %v2715_v8 = vsel %vm16239_vm12, %v2713_v3, 0.0  ;;  %v2679_v27 = vrot.slane %v2678_v39, 2  ;;  %v3818_v30 = vld [vmem:[#allocation3 + $0x9] sm:$0xff] }
 0x43d   : > { %v2730_v54 = vpop.permute.xlu1 %2729  ;;  %2716 = vadd.xlane.f32.xlu0 %v2715_v8  ;;  %v3849_v3 = vld [vmem:[#allocation3 + $0x2] sm:$0xff] }
 0x43e   : > { %v2732_v40 = vsel %vm16239_vm12, %v2730_v54, 0.0  ;;  %v2680_v36 = vadd.f32 %v2679_v27, %v2678_v39  ;;  %v2692_v45 = vrot.slane %v2691_v48, 2  ;;  %v3817_v39 = vld [vmem:[#allocation3 + $0x1] sm:$0xff]  ;;  %v2761_v54 = vlaneseq }
 0x43f   : > { %2733 = vadd.xlane.f32.xlu1 %v2732_v40 }
 0x440   : > { %v2681_v10 = vrot.slane %v2680_v36, 1  ;;  %v2693_v25 = vadd.f32 %v2692_v45, %v2691_v48  ;;  %v3850_v48 = vld [vmem:[#allocation3 + $0xa] sm:$0xff]  ;;  %v2762_v40 = vshrl.u32 %v2761_v54, 7 }
 0x442   : > { %v2682_v37 = vadd.f32 %v2681_v10, %v2680_v36  ;;  %v2694_v9 = vrot.slane %v2693_v25, 1  ;;  %v2501_v36 = vld [vmem:[%s16408_s4] sm:$0x1] }
 0x444   : > { %8908 = vpush %v2682_v37  ;;  %v2695_v32 = vadd.f32 %v2694_v9, %v2693_v25  ;;  %v11242_v25 = vsub.s32 0, %v2762_v40 }
 0x446   : > { %8910 = vpush %v2695_v32  ;;  %16409 = vst [vmem:[#allocation14_spill] sm:$0xff] %v11242_v25 }
 0x450   : > { %4108 = vrot.lane.b32.xlu1 %v3818_v30, %s16406_s25 }
 0x453   : > { %4106 = vrot.lane.b32.xlu0 %v3817_v39, %s16406_s25 }
 0x454   : > { %4236 = vrot.lane.b32.xlu1 %v3850_v48, %s16403_s27 }
 0x457   : > { %4234 = vrot.lane.b32.xlu0 %v3849_v3, %s16403_s27 }
 0x475   : > { %s8909_s28 = spop %8908 }
 0x476   : > { %s11228_s15 = smul.f32 0.0009765625, %s8909_s28 }
 0x477   : > { %s8911_s21 = spop %8910 }
 0x478   : > { %s2700_s18 = smul.f32 %s11228_s15, %s11228_s15  ;;  %s2708_s24 = ssub.f32 0.0, %s11228_s15 }
 0x479   : > { %s2699_s20 = smul.f32 0.0009765625, %s8911_s21  ;;  %s9498_s15 = smov 56  }
 0x47b   : > { %s2701_s0 = ssub.f32 %s2699_s20, %s2700_s18 }
 0x47d   : > { %s2702_s26 = smax.f32 %s9495_s22, %s2701_s0 }
 0x47e   : > { %s2703_s2 = sadd.f32 1e-05, %s2702_s26 }
 0x480   : > { %v2704_v42 = vstv %s2703_s2 }
 0x481   : > { %9121 = vrsqrt.f32 %v2704_v42 }
 0x48b   : > { %v9122_v18 = vpop.eup %9121 }
 0x48c   : > { %8912 = vpush %v9122_v18  ;;  %v2502_v18 = vld [vmem:[%s16410_s5] sm:$0x1] }
 0x4bd   : > { %s8913_s2 = spop %8912 }
 0x4be   : > { %s2709_s29 = smul.f32 %s8913_s2, %s2708_s24  ;;  %v2707_v45 = vstv %s8913_s2  ;;  %s9497_s24 = smov 48  }
 0x4bf   : > { %s16267_s2 = smov 64  }
 0x4c0   : > { %v2710_v9 = vstv %s2709_s29  ;;  %s16605_s29 = smov 32  }
 0x4ca   : > { %v2717_v31 = vpop.xlane.xlu0 %2716 }
 0x4cb   : > { %v2718_v33 = vrot.slane %v2717_v31, 4 }
 0x4cc   : > { %v2734_v23 = vpop.xlane.xlu1 %2733 }
 0x4cd   : > { %v2719_v20 = vadd.f32 %v2718_v33, %v2717_v31  ;;  %v2735_v7 = vrot.slane %v2734_v23, 4 }
 0x4cf   : > { %v2736_v1 = vadd.f32 %v2735_v7, %v2734_v23  ;;  %v2720_v12 = vrot.slane %v2719_v20, 2 }
 0x4d1   : > { %v2721_v52 = vadd.f32 %v2720_v12, %v2719_v20  ;;  %v2737_v28 = vrot.slane %v2736_v1, 2 }
 0x4d3   : > { %v2722_v56 = vrot.slane %v2721_v52, 1  ;;  %v2738_v59 = vadd.f32 %v2737_v28, %v2736_v1 }
 0x4d5   : > { %v2723_v57 = vadd.f32 %v2722_v56, %v2721_v52  ;;  %v2739_v13 = vrot.slane %v2738_v59, 1 }
 0x4d7   : > { %8914 = vpush %v2723_v57  ;;  %v2740_v19 = vadd.f32 %v2739_v13, %v2738_v59 }
 0x4d9   : > { %8916 = vpush %v2740_v19 }
 0x508   : > { %s8915_s26 = spop %8914 }
 0x509   : > { %s2727_s0 = smul.f32 0.0009765625, %s8915_s26 }
 0x50a   : > { %s8917_s28 = spop %8916 }
 0x50b   : > { %s2745_s21 = smul.f32 %s2727_s0, %s2727_s0  ;;  %s2753_s16 = ssub.f32 0.0, %s2727_s0 }
 0x50c   : > { %s2744_s18 = smul.f32 0.0009765625, %s8917_s28 }
 0x50e   : > { %s2746_s20 = ssub.f32 %s2744_s18, %s2745_s21 }
 0x510   : > { %s2747_s3 = smax.f32 %s9495_s22, %s2746_s20 }
 0x511   : > { %s2748_s19 = sadd.f32 1e-05, %s2747_s3 }
 0x513   : > { %v2749_v8 = vstv %s2748_s19 }
 0x514   : > { %9123 = vrsqrt.f32 %v2749_v8 }
 0x51e   : > { %v9124_v27 = vpop.eup %9123 }
 0x51f   : > { %8918 = vpush %v9124_v27 }
 0x550   : > { %s8919_s28 = spop %8918 }
 0x551   : > { %v2752_v10 = vstv %s8919_s28  ;;  %s2754_s21 = smul.f32 %s8919_s28, %s2753_s16  ;;  %s9496_s16 = smov 40  }
 0x552   : > { %v2756_v37 = vsel %vm16238_vm0, %v2707_v45, %v2752_v10 }
 0x553   : > { %v2755_v32 = vstv %s2754_s21  ;;  %v2757_v42 = vmul.f32 %v2756_v37, %v2501_v36 }
 0x554   : > { %v2758_v31 = vsel %vm16238_vm0, %v2710_v9, %v2755_v32 }
 0x555   : > { %v2759_v33 = vmul.f32 %v2758_v31, %v2501_v36  ;;  %v11250_v23 = vrot.slane %v2757_v42, %v11242_v25 }
 0x557   : > { %v2760_v20 = vadd.f32 %v2759_v33, %v2502_v18  ;;  %v2767_v7 = vmul.f32 %v11250_v23, %v10943_v34  ;;  %v2768_v1 = vmul.f32 %v11250_v23, %v10959_v41  ;;  %v2769_v12 = vmul.f32 %v11250_v23, %v10965_v21 }
 0x558   : > { %v2770_v28 = vmul.f32 %v11250_v23, %v10978_v55  ;;  %v2771_v56 = vmul.f32 %v11250_v23, %v10984_v11  ;;  %v2772_v59 = vmul.f32 %v11250_v23, %v10998_v50  ;;  %v2773_v34 = vmul.f32 %v11250_v23, %v11004_v24 }
 0x559   : > { %v2800_v52 = vrot.slane %v2760_v20, %v11242_v25  ;;  %v2774_v41 = vmul.f32 %v11250_v23, %v11016_v63  ;;  %v2775_v21 = vmul.f32 %v11250_v23, %v11022_v46  ;;  %v2776_v57 = vmul.f32 %v11250_v23, %v11034_v17 }
 0x55a   : > { %v2777_v55 = vmul.f32 %v11250_v23, %v11040_v60  ;;  %v2778_v11 = vmul.f32 %v11250_v23, %v11052_v2  ;;  %v2779_v50 = vmul.f32 %v11250_v23, %v11058_v44  ;;  %v2780_v24 = vmul.f32 %v11250_v23, %v11070_v4 }
 0x55b   : > { %v2781_v63 = vmul.f32 %v11250_v23, %v11076_v26  ;;  %v2782_v46 = vmul.f32 %v11250_v23, %v11090_v58  ;;  %v2783_v17 = vmul.f32 %v11250_v23, %v11096_v51  ;;  %v2784_v60 = vmul.f32 %v11250_v23, %v11108_v38 }
 0x55c   : > { %v2785_v2 = vmul.f32 %v11250_v23, %v11114_v43  ;;  %v2786_v44 = vmul.f32 %v11250_v23, %v11126_v16  ;;  %v2787_v4 = vmul.f32 %v11250_v23, %v11132_v61  ;;  %v2788_v26 = vmul.f32 %v11250_v23, %v11144_v35 }
 0x55d   : > { %v2789_v58 = vmul.f32 %v11250_v23, %v11150_v53  ;;  %v2790_v51 = vmul.f32 %v11250_v23, %v11162_v5  ;;  %v2791_v38 = vmul.f32 %v11250_v23, %v11167_v15  ;;  %v2792_v43 = vmul.f32 %v11250_v23, %v11179_v49 }
 0x55e   : > { %v2793_v16 = vmul.f32 %v11250_v23, %v11184_v6  ;;  %v2794_v61 = vmul.f32 %v11250_v23, %v11195_v22  ;;  %v2795_v35 = vmul.f32 %v11250_v23, %v11209_v29  ;;  %v2796_v53 = vmul.f32 %v11250_v23, %v11204_v47 }
 0x55f   : > { %v11313_v13 = vadd.f32 %v2800_v52, %v2767_v7  ;;  %v11315_v5 = vadd.f32 %v2800_v52, %v2768_v1  ;;  %v11317_v15 = vadd.f32 %v2800_v52, %v2769_v12  ;;  %v11319_v19 = vadd.f32 %v2800_v52, %v2770_v28 }
 0x560   : > { %v11321_v49 = vadd.f32 %v2800_v52, %v2771_v56  ;;  %v11323_v6 = vadd.f32 %v2800_v52, %v2772_v59  ;;  %v11325_v39 = vadd.f32 %v2800_v52, %v2773_v34  ;;  %v11327_v22 = vadd.f32 %v2800_v52, %v2774_v41 }
 0x561   : > { %v11329_v29 = vadd.f32 %v2800_v52, %v2775_v21  ;;  %v11331_v30 = vadd.f32 %v2800_v52, %v2776_v57  ;;  %v11333_v47 = vadd.f32 %v2800_v52, %v2777_v55  ;;  %v11335_v3 = vadd.f32 %v2800_v52, %v2778_v11 }
 0x562   : > { %v11337_v48 = vadd.f32 %v2800_v52, %v2779_v50  ;;  %v11339_v8 = vadd.f32 %v2800_v52, %v2780_v24  ;;  %v11341_v27 = vadd.f32 %v2800_v52, %v2781_v63  ;;  %v11343_v54 = vadd.f32 %v2800_v52, %v2782_v46 }
 0x563   : > { %v11345_v40 = vadd.f32 %v2800_v52, %v2783_v17  ;;  %v11347_v36 = vadd.f32 %v2800_v52, %v2784_v60  ;;  %v11349_v45 = vadd.f32 %v2800_v52, %v2785_v2  ;;  %v11351_v10 = vadd.f32 %v2800_v52, %v2786_v44 }
 0x564   : > { %v11353_v37 = vadd.f32 %v2800_v52, %v2787_v4  ;;  %v11355_v9 = vadd.f32 %v2800_v52, %v2788_v26  ;;  %v11357_v32 = vadd.f32 %v2800_v52, %v2789_v58  ;;  %v11359_v42 = vadd.f32 %v2800_v52, %v2790_v51 }
 0x565   : > { %v11361_v18 = vadd.f32 %v2800_v52, %v2791_v38  ;;  %v11363_v31 = vadd.f32 %v2800_v52, %v2792_v43  ;;  %v11365_v33 = vadd.f32 %v2800_v52, %v2793_v16  ;;  %v11367_v20 = vadd.f32 %v2800_v52, %v2794_v61 }
 0x566   : > { %v11369_v7 = vadd.f32 %v2800_v52, %v2795_v35  ;;  %v11371_v1 = vadd.f32 %v2800_v52, %v2796_v53  ;;  %v2765_v12 = vmul.f32 %v11250_v23, %v10939_v62  ;;  %v2766_v28 = vmul.f32 %v11250_v23, %v10935_v14 }
 0x567   : > { %v11382_v21 = vmul.f32 0.5, %v11313_v13  ;;  %v11385_v57 = vmul.f32 0.5, %v11315_v5  ;;  %v11388_v55 = vmul.f32 0.5, %v11317_v15  ;;  %v11391_v62 = vmul.f32 0.5, %v11319_v19 }
 0x568   : > { %16411 = vst [vmem:[#allocation15_spill] sm:$0xff] %v11369_v7  ;;  %16412 = vst [vmem:[#allocation16_spill] sm:$0xff] %v11371_v1  ;;  %v2801_v56 = vadd.f32 %v2800_v52, %v2765_v12  ;;  %v2802_v59 = vadd.f32 %v2800_v52, %v2766_v28  ;;  %v11394_v14 = vmul.f32 0.5, %v11321_v49  ;;  %v11397_v23 = vmul.f32 0.5, %v11323_v6 }
 0x569   : > { %16415 = vst [vmem:[#allocation19_spill] sm:$0xff] %v11382_v21  ;;  %16416 = vst [vmem:[#allocation20_spill] sm:$0xff] %v11385_v57  ;;  %v11400_v52 = vmul.f32 0.5, %v11325_v39  ;;  %v11403_v11 = vmul.f32 0.5, %v11327_v22  ;;  %v11406_v50 = vmul.f32 0.5, %v11329_v29  ;;  %v11409_v24 = vmul.f32 0.5, %v11331_v30 }
 0x56a   : > { %v11377_v34 = vmul.f32 0.5, %v2801_v56  ;;  %v11379_v41 = vmul.f32 0.5, %v2802_v59  ;;  %16417 = vst [vmem:[#allocation21_spill] sm:$0xff] %v11388_v55  ;;  %16418 = vst [vmem:[#allocation22_spill] sm:$0xff] %v11391_v62  ;;  %v11412_v63 = vmul.f32 0.5, %v11333_v47  ;;  %v11415_v46 = vmul.f32 0.5, %v11335_v3 }
 0x56b   : > { %16419 = vst [vmem:[#allocation23_spill] sm:$0xff] %v11394_v14  ;;  %16420 = vst [vmem:[#allocation24_spill] sm:$0xff] %v11397_v23  ;;  %v11418_v17 = vmul.f32 0.5, %v11337_v48  ;;  %v11421_v60 = vmul.f32 0.5, %v11339_v8  ;;  %v11424_v2 = vmul.f32 0.5, %v11341_v27  ;;  %v11427_v44 = vmul.f32 0.5, %v11343_v54 }
 0x56c   : > { %16413 = vst [vmem:[#allocation17_spill] sm:$0xff] %v11377_v34  ;;  %16414 = vst [vmem:[#allocation18_spill] sm:$0xff] %v11379_v41  ;;  %v11430_v4 = vmul.f32 0.5, %v11345_v40  ;;  %v11433_v26 = vmul.f32 0.5, %v11347_v36  ;;  %v11436_v58 = vmul.f32 0.5, %v11349_v45  ;;  %v11439_v51 = vmul.f32 0.5, %v11351_v10 }
 0x56d   : > { %16421 = vst [vmem:[#allocation25_spill] sm:$0xff] %v11400_v52  ;;  %16422 = vst [vmem:[#allocation26_spill] sm:$0xff] %v11403_v11  ;;  %v11442_v38 = vmul.f32 0.5, %v11353_v37  ;;  %v11445_v43 = vmul.f32 0.5, %v11355_v9  ;;  %v11448_v16 = vmul.f32 0.5, %v11357_v32  ;;  %v11451_v61 = vmul.f32 0.5, %v11359_v42 }
 0x56e   : > { %16423 = vst [vmem:[#allocation27_spill] sm:$0xff] %v11406_v50  ;;  %16424 = vst [vmem:[#allocation28_spill] sm:$0xff] %v11409_v24  ;;  %v11454_v35 = vmul.f32 0.5, %v11361_v18  ;;  %v11457_v53 = vmul.f32 0.5, %v11363_v31  ;;  %v11460_v12 = vmul.f32 0.5, %v11365_v33  ;;  %v11463_v28 = vmul.f32 0.5, %v11367_v20 }
 0x56f   : > { %16425 = vst [vmem:[#allocation29_spill] sm:$0xff] %v11412_v63  ;;  %16426 = vst [vmem:[#allocation30_spill] sm:$0xff] %v11415_v46  ;;  %v11465_v0 = vmul.f32 0.70710677, %v2801_v56  ;;  %v11467_v25 = vmul.f32 0.70710677, %v2802_v59 }
 0x570   : > { %16427 = vst [vmem:[#allocation31_spill] sm:$0xff] %v11418_v17  ;;  %16428 = vst [vmem:[#allocation32_spill] sm:$0xff] %v11421_v60  ;;  %v11485_v56 = vmul.f32 0.70710677, %v11323_v6  ;;  %v11488_v59 = vmul.f32 0.70710677, %v11325_v39 }
 0x571   : > { %16429 = vst [vmem:[#allocation33_spill] sm:$0xff] %v11424_v2  ;;  %16430 = vst [vmem:[#allocation34_spill] sm:$0xff] %v11427_v44  ;;  %v11506_v6 = vmul.f32 0.70710677, %v11337_v48  ;;  %v11509_v39 = vmul.f32 0.70710677, %v11339_v8 }
 0x572   : > { %16431 = vst [vmem:[#allocation35_spill] sm:$0xff] %v11430_v4  ;;  %16432 = vst [vmem:[#allocation36_spill] sm:$0xff] %v11433_v26  ;;  %v11527_v48 = vmul.f32 0.70710677, %v11351_v10  ;;  %v11530_v8 = vmul.f32 0.70710677, %v11353_v37 }
 0x573   : > { %16433 = vst [vmem:[#allocation37_spill] sm:$0xff] %v11436_v58  ;;  %16434 = vst [vmem:[#allocation38_spill] sm:$0xff] %v11439_v51  ;;  %v11548_v10 = vmul.f32 0.70710677, %v11365_v33  ;;  %v11551_v37 = vmul.f32 0.70710677, %v11367_v20 }
 0x574   : > { %16435 = vst [vmem:[#allocation39_spill] sm:$0xff] %v11442_v38  ;;  %16436 = vst [vmem:[#allocation40_spill] sm:$0xff] %v11445_v43  ;;  %v11581_v38 = vand.u32 2147483647, %v11485_v56  ;;  %v11584_v51 = vand.u32 2147483647, %v11488_v59 }
 0x575   : > { %16437 = vst [vmem:[#allocation41_spill] sm:$0xff] %v11448_v16  ;;  %16438 = vst [vmem:[#allocation42_spill] sm:$0xff] %v11451_v61  ;;  %v11470_v16 = vmul.f32 0.70710677, %v11313_v13  ;;  %v11473_v61 = vmul.f32 0.70710677, %v11315_v5 }
 0x576   : > { %16439 = vst [vmem:[#allocation43_spill] sm:$0xff] %v11454_v35  ;;  %16440 = vst [vmem:[#allocation44_spill] sm:$0xff] %v11457_v53  ;;  %v11476_v35 = vmul.f32 0.70710677, %v11317_v15  ;;  %v11479_v53 = vmul.f32 0.70710677, %v11319_v19 }
 0x577   : > { %16441 = vst [vmem:[#allocation45_spill] sm:$0xff] %v11460_v12  ;;  %16442 = vst [vmem:[#allocation46_spill] sm:$0xff] %v11463_v28  ;;  %v11482_v12 = vmul.f32 0.70710677, %v11321_v49  ;;  %v11491_v13 = vmul.f32 0.70710677, %v11327_v22 }
 0x578   : > { %16443 = vst [vmem:[#allocation47_spill] sm:$0xff] %v11465_v0  ;;  %16444 = vst [vmem:[#allocation48_spill] sm:$0xff] %v11467_v25  ;;  %v11494_v5 = vmul.f32 0.70710677, %v11329_v29  ;;  %v11497_v15 = vmul.f32 0.70710677, %v11331_v30 }
 0x579   : > { %16445 = vst [vmem:[#allocation49_spill] sm:$0xff] %v11470_v16  ;;  %16446 = vst [vmem:[#allocation50_spill] sm:$0xff] %v11473_v61  ;;  %v11500_v19 = vmul.f32 0.70710677, %v11333_v47  ;;  %v11503_v49 = vmul.f32 0.70710677, %v11335_v3 }
 0x57a   : > { %16447 = vst [vmem:[#allocation51_spill] sm:$0xff] %v11476_v35  ;;  %16448 = vst [vmem:[#allocation52_spill] sm:$0xff] %v11479_v53  ;;  %v11512_v22 = vmul.f32 0.70710677, %v11341_v27  ;;  %v11515_v29 = vmul.f32 0.70710677, %v11343_v54 }
 0x57b   : > { %16449 = vst [vmem:[#allocation53_spill] sm:$0xff] %v11482_v12  ;;  %16450 = vst [vmem:[#allocation54_spill] sm:$0xff] %v11485_v56  ;;  %v11518_v30 = vmul.f32 0.70710677, %v11345_v40  ;;  %v11521_v47 = vmul.f32 0.70710677, %v11347_v36 }
 0x57c   : > { %16451 = vst [vmem:[#allocation55_spill] sm:$0xff] %v11488_v59  ;;  %16452 = vst [vmem:[#allocation56_spill] sm:$0xff] %v11491_v13  ;;  %v11524_v3 = vmul.f32 0.70710677, %v11349_v45  ;;  %v11533_v27 = vmul.f32 0.70710677, %v11355_v9 }
 0x57d   : > { %16453 = vst [vmem:[#allocation57_spill] sm:$0xff] %v11494_v5  ;;  %16454 = vst [vmem:[#allocation58_spill] sm:$0xff] %v11497_v15  ;;  %v11536_v54 = vmul.f32 0.70710677, %v11357_v32  ;;  %v11539_v40 = vmul.f32 0.70710677, %v11359_v42 }
 0x57e   : > { %16455 = vst [vmem:[#allocation59_spill] sm:$0xff] %v11500_v19  ;;  %16456 = vst [vmem:[#allocation60_spill] sm:$0xff] %v11503_v49  ;;  %v11542_v36 = vmul.f32 0.70710677, %v11361_v18  ;;  %v11545_v45 = vmul.f32 0.70710677, %v11363_v31 }
 0x57f   : > { %16457 = vst [vmem:[#allocation61_spill] sm:$0xff] %v11506_v6  ;;  %16458 = vst [vmem:[#allocation62_spill] sm:$0xff] %v11509_v39  ;;  %v11554_v9 = vmul.f32 0.70710677, %v11369_v7  ;;  %v11557_v32 = vmul.f32 0.70710677, %v11371_v1 }
 0x580   : > { %16459 = vst [vmem:[#allocation63_spill] sm:$0xff] %v11512_v22  ;;  %16460 = vst [vmem:[#allocation64_spill] sm:$0xff] %v11515_v29  ;;  %v11560_v42 = vand.u32 2147483647, %v11465_v0  ;;  %v11563_v18 = vand.u32 2147483647, %v11467_v25 }
 0x581   : > { %16461 = vst [vmem:[#allocation65_spill] sm:$0xff] %v11518_v30  ;;  %16462 = vst [vmem:[#allocation66_spill] sm:$0xff] %v11521_v47  ;;  %v11566_v31 = vand.u32 2147483647, %v11470_v16  ;;  %v11569_v33 = vand.u32 2147483647, %v11473_v61 }
 0x582   : > { %16463 = vst [vmem:[#allocation67_spill] sm:$0xff] %v11524_v3  ;;  %16464 = vst [vmem:[#allocation68_spill] sm:$0xff] %v11527_v48  ;;  %v11572_v20 = vand.u32 2147483647, %v11476_v35  ;;  %v11575_v28 = vand.u32 2147483647, %v11479_v53 }
 0x583   : > { %16465 = vst [vmem:[#allocation69_spill] sm:$0xff] %v11530_v8  ;;  %16466 = vst [vmem:[#allocation70_spill] sm:$0xff] %v11533_v27  ;;  %v11578_v43 = vand.u32 2147483647, %v11482_v12  ;;  %v11587_v58 = vand.u32 2147483647, %v11491_v13 }
 0x584   : > { %16467 = vst [vmem:[#allocation71_spill] sm:$0xff] %v11536_v54  ;;  %16468 = vst [vmem:[#allocation72_spill] sm:$0xff] %v11539_v40  ;;  %v11590_v26 = vand.u32 2147483647, %v11494_v5  ;;  %v11593_v4 = vand.u32 2147483647, %v11497_v15 }
 0x585   : > { %16469 = vst [vmem:[#allocation73_spill] sm:$0xff] %v11542_v36  ;;  %16470 = vst [vmem:[#allocation74_spill] sm:$0xff] %v11545_v45  ;;  %v11596_v44 = vand.u32 2147483647, %v11500_v19  ;;  %v11599_v2 = vand.u32 2147483647, %v11503_v49 }
 0x586   : > { %16471 = vst [vmem:[#allocation75_spill] sm:$0xff] %v11548_v10  ;;  %16472 = vst [vmem:[#allocation76_spill] sm:$0xff] %v11551_v37  ;;  %v11602_v60 = vand.u32 2147483647, %v11506_v6  ;;  %v11605_v17 = vand.u32 2147483647, %v11509_v39 }
 0x587   : > { %16473 = vst [vmem:[#allocation77_spill] sm:$0xff] %v11554_v9  ;;  %16474 = vst [vmem:[#allocation78_spill] sm:$0xff] %v11557_v32  ;;  %v11608_v46 = vand.u32 2147483647, %v11512_v22  ;;  %v11611_v63 = vand.u32 2147483647, %v11515_v29 }
 0x588   : > { %v11614_v24 = vand.u32 2147483647, %v11518_v30  ;;  %v11617_v50 = vand.u32 2147483647, %v11521_v47  ;;  %v11620_v11 = vand.u32 2147483647, %v11524_v3 }
 0x589   : > { %v11623_v52 = vand.u32 2147483647, %v11527_v48  ;;  %v11626_v23 = vand.u32 2147483647, %v11530_v8  ;;  %v11629_v14 = vand.u32 2147483647, %v11533_v27 }
 0x58a   : > { %16475 = vst [vmem:[#allocation79_spill] sm:$0xff] %v11620_v11  ;;  %v11632_v62 = vand.u32 2147483647, %v11536_v54  ;;  %v11635_v55 = vand.u32 2147483647, %v11539_v40 }
 0x58b   : > { %v11638_v47 = vand.u32 2147483647, %v11542_v36  ;;  %v11641_v3 = vand.u32 2147483647, %v11545_v45  ;;  %v11644_v48 = vand.u32 2147483647, %v11548_v10 }
 0x58c   : > { %v11647_v8 = vand.u32 2147483647, %v11551_v37  ;;  %v11650_v27 = vand.u32 2147483647, %v11554_v9  ;;  %v11653_v54 = vand.u32 2147483647, %v11557_v32 }
 0x58d   : > { %v2929_v40 = vmul.f32 0.3275911, %v11560_v42  ;;  %v2930_v36 = vmul.f32 0.3275911, %v11563_v18  ;;  %v11658_v30 = vmul.f32 0.3275911, %v11566_v31 }
 0x58e   : > { %v11661_v45 = vmul.f32 0.3275911, %v11569_v33  ;;  %v11664_v10 = vmul.f32 0.3275911, %v11572_v20  ;;  %v11667_v37 = vmul.f32 0.3275911, %v11575_v28 }
 0x58f   : > { %v11670_v9 = vmul.f32 0.3275911, %v11578_v43  ;;  %v11673_v32 = vmul.f32 0.3275911, %v11581_v38  ;;  %v11676_v29 = vmul.f32 0.3275911, %v11584_v51 }
 0x590   : > { %v11679_v22 = vmul.f32 0.3275911, %v11587_v58  ;;  %v11682_v39 = vmul.f32 0.3275911, %v11590_v26  ;;  %v11685_v6 = vmul.f32 0.3275911, %v11593_v4 }
 0x591   : > { %v11688_v49 = vmul.f32 0.3275911, %v11596_v44  ;;  %v11691_v19 = vmul.f32 0.3275911, %v11599_v2  ;;  %v11694_v15 = vmul.f32 0.3275911, %v11602_v60 }
 0x592   : > { %v11697_v5 = vmul.f32 0.3275911, %v11605_v17  ;;  %v11700_v13 = vmul.f32 0.3275911, %v11608_v46  ;;  %v11703_v57 = vmul.f32 0.3275911, %v11611_v63 }
 0x593   : > { %v11706_v59 = vmul.f32 0.3275911, %v11614_v24  ;;  %v11709_v56 = vmul.f32 0.3275911, %v11617_v50  ;;  %v11712_v12 = vmul.f32 0.3275911, %v11620_v11 }
 0x594   : > { %v11715_v53 = vmul.f32 0.3275911, %v11623_v52  ;;  %v11718_v35 = vmul.f32 0.3275911, %v11626_v23  ;;  %v11721_v61 = vmul.f32 0.3275911, %v11629_v14 }
 0x595   : > { %16476 = vst [vmem:[#allocation80_spill] sm:$0xff] %v11712_v12  ;;  %v11724_v21 = vmul.f32 0.3275911, %v11632_v62  ;;  %v11727_v16 = vmul.f32 0.3275911, %v11635_v55  ;;  %v2961_v11 = vadd.f32 1.0, %v2929_v40 }
 0x596   : > { %16477 = vst [vmem:[#allocation81_spill] sm:$0xff] %v11715_v53  ;;  %16478 = vst [vmem:[#allocation82_spill] sm:$0xff] %v11718_v35  ;;  %v11730_v1 = vmul.f32 0.3275911, %v11638_v47  ;;  %v11733_v7 = vmul.f32 0.3275911, %v11641_v3 }
 0x597   : > { %16479 = vst [vmem:[#allocation83_spill] sm:$0xff] %v11721_v61  ;;  %16480 = vst [vmem:[#allocation84_spill] sm:$0xff] %v11724_v21  ;;  %v11736_v41 = vmul.f32 0.3275911, %v11644_v48  ;;  %v11739_v34 = vmul.f32 0.3275911, %v11647_v8  ;;  %9125 = vrcp.f32 %v2961_v11 }
 0x598   : > { %16481 = vst [vmem:[#allocation85_spill] sm:$0xff] %v11727_v16  ;;  %16482 = vst [vmem:[#allocation86_spill] sm:$0xff] %v11730_v1  ;;  %v11742_v25 = vmul.f32 0.3275911, %v11650_v27  ;;  %v11745_v0 = vmul.f32 0.3275911, %v11653_v54 }
 0x599   : > { %16483 = vst [vmem:[#allocation87_spill] sm:$0xff] %v11733_v7  ;;  %16484 = vst [vmem:[#allocation88_spill] sm:$0xff] %v11736_v41  ;;  %v3345_v16 = vsub.f32 0.0, %v11560_v42  ;;  %v3346_v21 = vsub.f32 0.0, %v11563_v18  ;;  %v2962_v12 = vadd.f32 1.0, %v2930_v36  ;;  %v11782_v41 = vadd.f32 1.0, %v11658_v30 }
 0x59a   : > { %16485 = vst [vmem:[#allocation89_spill] sm:$0xff] %v11739_v34  ;;  %16486 = vst [vmem:[#allocation90_spill] sm:$0xff] %v11742_v25  ;;  %v11785_v34 = vadd.f32 1.0, %v11661_v45  ;;  %v11788_v25 = vadd.f32 1.0, %v11664_v10  ;;  %v11791_v40 = vadd.f32 1.0, %v11667_v37  ;;  %v11800_v30 = vadd.f32 1.0, %v11676_v29 }
 0x59b   : > { %16487 = vst [vmem:[#allocation91_spill] sm:$0xff] %v11745_v0  ;;  %v3377_v1 = vmul.f32 %v3345_v16, %v11560_v42  ;;  %v3378_v7 = vmul.f32 %v3346_v21, %v11563_v18  ;;  %9127 = vrcp.f32 %v2962_v12  ;;  %v11794_v21 = vadd.f32 1.0, %v11670_v9 }
 0x59c   : > { %v11797_v16 = vadd.f32 1.0, %v11673_v32  ;;  %v11803_v36 = vadd.f32 1.0, %v11679_v22  ;;  %v11812_v11 = vadd.f32 1.0, %v11688_v49  ;;  %v11815_v12 = vadd.f32 1.0, %v11691_v19  ;;  %v16490_v19 = vld [vmem:[#allocation80_spill] sm:$0xff] }
 0x59d   : > { %v3409_v0 = vmul.f32 1.442695, %v3377_v1  ;;  %v3411_v53 = vmul.f32 1.442695, %v3378_v7  ;;  %v11806_v1 = vadd.f32 1.0, %v11682_v39  ;;  %v11809_v7 = vadd.f32 1.0, %v11685_v6 }
 0x59e   : > { %v11818_v29 = vadd.f32 1.0, %v11694_v15  ;;  %v11824_v22 = vadd.f32 1.0, %v11700_v13  ;;  %v11827_v39 = vadd.f32 1.0, %v11703_v57  ;;  %v11833_v49 = vadd.f32 1.0, %v11709_v56  ;;  %v16492_v15 = vld [vmem:[#allocation81_spill] sm:$0xff]  ;;  %v16498_v57 = vld [vmem:[#allocation84_spill] sm:$0xff] }
 0x59f   : > { %9129 = vpow2.f32 %v3409_v0  ;;  %v11821_v0 = vadd.f32 1.0, %v11697_v5  ;;  %v11836_v6 = vadd.f32 1.0, %v16490_v19  ;;  %v11839_v45 = vadd.f32 1.0, %v16492_v15  ;;  %v16502_v56 = vld [vmem:[#allocation86_spill] sm:$0xff] }
 0x5a0   : > { %9131 = vpow2.f32 %v3411_v53  ;;  %v11830_v53 = vadd.f32 1.0, %v11706_v59  ;;  %16489 = vst [vmem:[#allocation93_spill] sm:$0xff] %v11833_v49  ;;  %v16494_v5 = vmov %v11718_v35  ;;  %v16496_v13 = vmov %v11721_v61  ;;  %v16500_v59 = vld [vmem:[#allocation85_spill] sm:$0xff]  ;;  %v16504_v18 = vld [vmem:[#allocation87_spill] sm:$0xff]  ;;  %v16506_v15 = vld [vmem:[#allocation88_spill] sm:$0xff] }
 0x5a1   : > { %16491 = vst [vmem:[#allocation80_spill] sm:$0xff] %v11836_v6  ;;  %16493 = vst [vmem:[#allocation81_spill] sm:$0xff] %v11839_v45  ;;  %v11842_v10 = vadd.f32 1.0, %v16494_v5  ;;  %v11845_v37 = vadd.f32 1.0, %v16496_v13  ;;  %v11848_v9 = vadd.f32 1.0, %v16498_v57  ;;  %v11851_v32 = vadd.f32 1.0, %v16500_v59 }
 0x5a2   : > { %16488 = vst [vmem:[#allocation92_spill] sm:$0xff] %v11830_v53  ;;  %v11854_v42 = vadd.f32 1.0, %v16502_v56  ;;  %v11857_v19 = vadd.f32 1.0, %v16504_v18  ;;  %v11860_v61 = vadd.f32 1.0, %v16506_v15  ;;  %v16508_v5 = vld [vmem:[#allocation89_spill] sm:$0xff]  ;;  %v16510_v13 = vld [vmem:[#allocation90_spill] sm:$0xff]  ;;  %9133 = vrcp.f32 %v11782_v41 }
 0x5a3   : > { %16495 = vst [vmem:[#allocation82_spill] sm:$0xff] %v11842_v10  ;;  %16497 = vst [vmem:[#allocation83_spill] sm:$0xff] %v11845_v37  ;;  %v11863_v35 = vadd.f32 1.0, %v16508_v5  ;;  %v11866_v37 = vadd.f32 1.0, %v16510_v13  ;;  %v16512_v57 = vld [vmem:[#allocation91_spill] sm:$0xff]  ;;  %v16514_v59 = vsub.f32 0.0, %v11566_v31  ;;  %9135 = vrcp.f32 %v11785_v34 }
 0x5a4   : > { %16499 = vst [vmem:[#allocation84_spill] sm:$0xff] %v11848_v9  ;;  %16501 = vst [vmem:[#allocation85_spill] sm:$0xff] %v11851_v32  ;;  %v11869_v9 = vadd.f32 1.0, %v16512_v57  ;;  %v16515_v18 = vsub.f32 0.0, %v11569_v33  ;;  %v16516_v15 = vsub.f32 0.0, %v11572_v20  ;;  %v16517_v5 = vsub.f32 0.0, %v11575_v28 }
 0x5a5   : > { %16503 = vst [vmem:[#allocation86_spill] sm:$0xff] %v11854_v42  ;;  %16505 = vst [vmem:[#allocation87_spill] sm:$0xff] %v11857_v19  ;;  %v3379_v56 = vmul.f32 %v16514_v59, %v11566_v31  ;;  %v16518_v57 = vsub.f32 0.0, %v11578_v43  ;;  %v16520_v59 = vsub.f32 0.0, %v11584_v51  ;;  %v16529_v32 = vsub.f32 0.0, %v11611_v63  ;;  %v16532_v45 = vld [vmem:[#allocation79_spill] sm:$0xff] }
 0x5a6   : > { %16507 = vst [vmem:[#allocation88_spill] sm:$0xff] %v11860_v61  ;;  %16509 = vst [vmem:[#allocation89_spill] sm:$0xff] %v11863_v35  ;;  %v3380_v19 = vmul.f32 %v16515_v18, %v11569_v33  ;;  %v3381_v61 = vmul.f32 %v16516_v15, %v11572_v20  ;;  %v3382_v13 = vmul.f32 %v16517_v5, %v11575_v28  ;;  %v11892_v18 = vpop.eup %9125  ;;  %v16521_v20 = vsub.f32 0.0, %v11587_v58 }
 0x5a7   : > { %16511 = vst [vmem:[#allocation90_spill] sm:$0xff] %v11866_v37  ;;  %16513 = vst [vmem:[#allocation91_spill] sm:$0xff] %v11869_v9  ;;  %v3383_v9 = vmul.f32 %v16518_v57, %v11578_v43  ;;  %v16519_v37 = vsub.f32 0.0, %v11581_v38  ;;  %v3385_v33 = vmul.f32 %v16520_v59, %v11584_v51  ;;  %v16522_v28 = vsub.f32 0.0, %v11590_v26  ;;  %v11906_v35 = vpop.eup %9127 }
 0x5a8   : > { %v3386_v15 = vmul.f32 %v16521_v20, %v11587_v58  ;;  %v16523_v43 = vsub.f32 0.0, %v11593_v4  ;;  %v3057_v51 = vmul.f32 1.0614054, %v11892_v18  ;;  %v16525_v59 = vsub.f32 0.0, %v11599_v2 }
 0x5a9   : > { %v3384_v31 = vmul.f32 %v16519_v37, %v11581_v38  ;;  %v3387_v5 = vmul.f32 %v16522_v28, %v11590_v26  ;;  %v16524_v38 = vsub.f32 0.0, %v11596_v44  ;;  %v16526_v20 = vsub.f32 0.0, %v11602_v60 }
 0x5aa   : > { %v3388_v57 = vmul.f32 %v16523_v43, %v11593_v4  ;;  %v3390_v58 = vmul.f32 %v16525_v59, %v11599_v2  ;;  %v16527_v28 = vsub.f32 0.0, %v11605_v17  ;;  %v11918_v43 = vpop.eup %9129  ;;  %v3394_v2 = vmul.f32 %v16529_v32, %v11611_v63 }
 0x5ab   : > { %v3389_v37 = vmul.f32 %v16524_v38, %v11596_v44  ;;  %v3391_v26 = vmul.f32 %v16526_v20, %v11602_v60  ;;  %v3058_v44 = vmul.f32 1.0614054, %v11906_v35  ;;  %v16528_v38 = vsub.f32 0.0, %v11608_v46  ;;  %v11930_v20 = vpop.eup %9131 }
 0x5ac   : > { %v3392_v4 = vmul.f32 %v16527_v28, %v11605_v17  ;;  %v16530_v59 = vsub.f32 0.0, %v11614_v24  ;;  %v3089_v10 = vadd.f32 -1.4531521, %v3057_v51  ;;  %v16531_v17 = vsub.f32 0.0, %v11617_v50 }
 0x5ad   : > { %v3393_v42 = vmul.f32 %v16528_v38, %v11608_v46  ;;  %v16533_v6 = vsub.f32 0.0, %v16532_v45  ;;  %v16534_v46 = vsub.f32 0.0, %v11623_v52  ;;  %v3090_v63 = vadd.f32 -1.4531521, %v3058_v44 }
 0x5ae   : > { %v3395_v60 = vmul.f32 %v16530_v59, %v11614_v24  ;;  %v3396_v28 = vmul.f32 %v16531_v17, %v11617_v50  ;;  %v16535_v32 = vsub.f32 0.0, %v11626_v23  ;;  %v16536_v51 = vsub.f32 0.0, %v11629_v14 }
 0x5af   : > { %v3397_v49 = vmul.f32 %v16533_v6, %v16532_v45  ;;  %v3398_v38 = vmul.f32 %v16534_v46, %v11623_v52  ;;  %v16537_v50 = vsub.f32 0.0, %v11632_v62  ;;  %v3121_v53 = vmul.f32 %v11892_v18, %v3089_v10 }
 0x5b0   : > { %v3399_v24 = vmul.f32 %v16535_v32, %v11626_v23  ;;  %v3400_v59 = vmul.f32 %v16536_v51, %v11629_v14  ;;  %v16538_v6 = vsub.f32 0.0, %v11635_v55  ;;  %v16539_v52 = vsub.f32 0.0, %v11638_v47 }
 0x5b1   : > { %v3401_v17 = vmul.f32 %v16537_v50, %v11632_v62  ;;  %v16540_v23 = vsub.f32 0.0, %v11641_v3  ;;  %v3122_v14 = vmul.f32 %v11906_v35, %v3090_v63  ;;  %v16541_v62 = vsub.f32 0.0, %v11644_v48 }
 0x5b2   : > { %v3402_v45 = vmul.f32 %v16538_v6, %v11635_v55  ;;  %v3403_v44 = vmul.f32 %v16539_v52, %v11638_v47  ;;  %v16542_v10 = vsub.f32 0.0, %v11647_v8  ;;  %v16543_v47 = vsub.f32 0.0, %v11650_v27 }
 0x5b3   : > { %v11960_v46 = vmul.f32 %v16540_v23, %v11641_v3  ;;  %v11966_v32 = vmul.f32 %v16541_v62, %v11644_v48  ;;  %v3153_v50 = vadd.f32 1.4214138, %v3121_v53  ;;  %v16544_v3 = vsub.f32 0.0, %v11653_v54 }
 0x5b4   : > { %v11971_v55 = vmul.f32 %v16542_v10, %v11647_v8  ;;  %v11976_v51 = vmul.f32 %v16543_v47, %v11650_v27  ;;  %v11984_v48 = vmul.f32 1.442695, %v3379_v56  ;;  %v3154_v6 = vadd.f32 1.4214138, %v3122_v14 }
 0x5b5   : > { %v11981_v63 = vmul.f32 %v16544_v3, %v11653_v54  ;;  %v11987_v8 = vmul.f32 1.442695, %v3380_v19  ;;  %v11989_v52 = vmul.f32 1.442695, %v3381_v61  ;;  %v3185_v27 = vmul.f32 %v11892_v18, %v3153_v50  ;;  %v16571_v3 = vld [vmem:[#allocation93_spill] sm:$0xff] }
 0x5b6   : > { %9137 = vrcp.f32 %v11788_v25  ;;  %v11993_v53 = vmul.f32 1.442695, %v3382_v13  ;;  %v11995_v23 = vmul.f32 1.442695, %v3383_v9  ;;  %v3186_v54 = vmul.f32 %v11906_v35, %v3154_v6 }
 0x5b7   : > { %9139 = vrcp.f32 %v11791_v40  ;;  %v11999_v41 = vmul.f32 1.442695, %v3384_v31  ;;  %v12001_v56 = vmul.f32 1.442695, %v3385_v33  ;;  %v3217_v34 = vadd.f32 -0.28449672, %v3185_v27 }
 0x5b8   : > { %9141 = vrcp.f32 %v11794_v21  ;;  %v12004_v61 = vmul.f32 1.442695, %v3386_v15  ;;  %v12006_v19 = vmul.f32 1.442695, %v3387_v5  ;;  %v3218_v25 = vadd.f32 -0.28449672, %v3186_v54 }
 0x5b9   : > { %9143 = vrcp.f32 %v11797_v16  ;;  %v12009_v9 = vmul.f32 1.442695, %v3388_v57  ;;  %v12011_v13 = vmul.f32 1.442695, %v3389_v37  ;;  %v3249_v40 = vmul.f32 %v11892_v18, %v3217_v34  ;;  %v16572_v54 = vld [vmem:[#allocation80_spill] sm:$0xff] }
 0x5ba   : > { %9145 = vrcp.f32 %v11800_v30  ;;  %v12015_v31 = vmul.f32 1.442695, %v3390_v58  ;;  %v12017_v33 = vmul.f32 1.442695, %v3391_v26  ;;  %v3250_v21 = vmul.f32 %v11906_v35, %v3218_v25  ;;  %v16547_v30 = vld [vmem:[#allocation47_spill] sm:$0xff] }
 0x5bb   : > { %9147 = vrcp.f32 %v11803_v36  ;;  %v12021_v15 = vmul.f32 1.442695, %v3392_v4  ;;  %v12023_v5 = vmul.f32 1.442695, %v3393_v42  ;;  %v3281_v16 = vadd.f32 0.2548296, %v3249_v40  ;;  %v12036_v36 = vpop.eup %9133 }
 0x5bc   : > { %9149 = vrcp.f32 %v11806_v1  ;;  %v12026_v57 = vmul.f32 1.442695, %v3394_v2  ;;  %v12028_v37 = vmul.f32 1.442695, %v3395_v60  ;;  %vm3537_vm13 = vcmp.ge.f32.partialorder %v16547_v30, 0.0  ;;  %16550 = vst [vmem:[#allocation96_spill] sm:$0xff] %v12036_v36  ;;  %v12045_v60 = vpop.eup %9135 }
 0x5bd   : > { %v3282_v58 = vadd.f32 0.2548296, %v3250_v21  ;;  %9151 = vrcp.f32 %v11809_v7  ;;  %v12032_v26 = vmul.f32 1.442695, %v3396_v28  ;;  %v12034_v14 = vmul.f32 1.442695, %v3397_v49 }
 0x5be   : > { %16545 = vst [vmem:[#allocation79_spill] sm:$0xff] %v12026_v57  ;;  %16546 = vst [vmem:[#allocation94_spill] sm:$0xff] %v12028_v37  ;;  %v16551_v42 = vld [vmem:[#allocation48_spill] sm:$0xff]  ;;  %v3313_v4 = vmul.f32 %v11892_v18, %v3281_v16  ;;  %9153 = vrcp.f32 %v11812_v11  ;;  %v12041_v1 = vmul.f32 1.442695, %v3398_v38 }
 0x5bf   : > { %16548 = vst [vmem:[#allocation47_spill] sm:$0xff] %v12032_v26  ;;  %16549 = vst [vmem:[#allocation95_spill] sm:$0xff] %v12034_v14  ;;  %vm3538_vm14 = vcmp.ge.f32.partialorder %v16551_v42, 0.0  ;;  %v12043_v2 = vmul.f32 1.442695, %v3399_v24  ;;  %v3314_v7 = vmul.f32 %v11906_v35, %v3282_v58  ;;  %9155 = vrcp.f32 %v11815_v12  ;;  %v16573_v58 = vld [vmem:[#allocation81_spill] sm:$0xff] }
 0x5c0   : > { %16552 = vst [vmem:[#allocation48_spill] sm:$0xff] %v12041_v1  ;;  %16554 = vst [vmem:[#allocation98_spill] sm:$0xff] %v12045_v60  ;;  %v12049_v49 = vmul.f32 1.442695, %v3400_v59  ;;  %v12051_v28 = vmul.f32 1.442695, %v3401_v17  ;;  %v12053_v62 = vpop.eup %9137  ;;  %v3473_v18 = vmul.f32 %v11918_v43, %v3313_v4  ;;  %9157 = vrcp.f32 %v11818_v29 }
 0x5c1   : > { %16553 = vst [vmem:[#allocation97_spill] sm:$0xff] %v12043_v2  ;;  %16557 = vst [vmem:[#allocation101_spill] sm:$0xff] %v12053_v62  ;;  %v12057_v11 = vmul.f32 1.442695, %v3402_v45  ;;  %v12059_v38 = vmul.f32 1.442695, %v3403_v44  ;;  %v12061_v24 = vpop.eup %9139  ;;  %v3474_v35 = vmul.f32 %v11930_v20, %v3314_v7  ;;  %9159 = vrcp.f32 %v11821_v0 }
 0x5c2   : > { %16555 = vst [vmem:[#allocation99_spill] sm:$0xff] %v12049_v49  ;;  %16556 = vst [vmem:[#allocation100_spill] sm:$0xff] %v12051_v28  ;;  %v12066_v12 = vmul.f32 1.442695, %v11960_v46  ;;  %v12069_v59 = vmul.f32 1.442695, %v11966_v32  ;;  %v12071_v17 = vpop.eup %9141  ;;  %9161 = vrcp.f32 %v11824_v22 }
 0x5c3   : > { %16558 = vst [vmem:[#allocation102_spill] sm:$0xff] %v12057_v11  ;;  %16559 = vst [vmem:[#allocation103_spill] sm:$0xff] %v12059_v38  ;;  %v3505_v43 = vsub.f32 1.0, %v3473_v18  ;;  %v12075_v29 = vmul.f32 1.442695, %v11971_v55  ;;  %v12080_v20 = vpop.eup %9143  ;;  %v3506_v0 = vsub.f32 1.0, %v3474_v35  ;;  %9163 = vrcp.f32 %v11827_v39 }
 0x5c4   : > { %16560 = vst [vmem:[#allocation104_spill] sm:$0xff] %v12061_v24  ;;  %16561 = vst [vmem:[#allocation105_spill] sm:$0xff] %v12066_v12  ;;  %v12078_v45 = vmul.f32 1.442695, %v11976_v51  ;;  %v12084_v44 = vmul.f32 1.442695, %v11981_v63  ;;  %v12087_v32 = vpop.eup %9145 }
 0x5c5   : > { %16562 = vst [vmem:[#allocation106_spill] sm:$0xff] %v12069_v59  ;;  %16563 = vst [vmem:[#allocation107_spill] sm:$0xff] %v12071_v17  ;;  %v3059_v46 = vmul.f32 1.0614054, %v12036_v36  ;;  %v3569_v10 = vsub.f32 0.0, %v3505_v43  ;;  %v16569_v22 = vld [vmem:[#allocation92_spill] sm:$0xff]  ;;  %v12092_v51 = vpop.eup %9147 }
 0x5c6   : > { %16564 = vst [vmem:[#allocation108_spill] sm:$0xff] %v12075_v29  ;;  %16565 = vst [vmem:[#allocation109_spill] sm:$0xff] %v12078_v45  ;;  %9165 = vrcp.f32 %v16569_v22  ;;  %v3060_v55 = vmul.f32 1.0614054, %v12045_v60  ;;  %v3061_v47 = vmul.f32 1.0614054, %v12053_v62  ;;  %v12097_v6 = vpop.eup %9149 }
 0x5c7   : > { %16566 = vst [vmem:[#allocation110_spill] sm:$0xff] %v12080_v20  ;;  %16567 = vst [vmem:[#allocation111_spill] sm:$0xff] %v12084_v44  ;;  %v3570_v50 = vsub.f32 0.0, %v3506_v0  ;;  %9167 = vrcp.f32 %v16571_v3  ;;  %v3062_v39 = vmul.f32 1.0614054, %v12061_v24  ;;  %v3601_v27 = vsel %vm3537_vm13, %v3505_v43, %v3569_v10  ;;  %v12104_v40 = vpop.eup %9151  ;;  %v16574_v18 = vld [vmem:[#allocation82_spill] sm:$0xff] }
 0x5c8   : > { %16568 = vst [vmem:[#allocation112_spill] sm:$0xff] %v12087_v32  ;;  %16570 = vst [vmem:[#allocation92_spill] sm:$0xff] %v12092_v51  ;;  %v3063_v63 = vmul.f32 1.0614054, %v12071_v17  ;;  %9169 = vrcp.f32 %v16572_v54  ;;  %v3064_v34 = vmul.f32 1.0614054, %v12080_v20  ;;  %v12110_v7 = vpop.eup %9153 }
 0x5c9   : > { %v3065_v25 = vmul.f32 1.0614054, %v12087_v32  ;;  %v3602_v21 = vsel %vm3538_vm14, %v3506_v0, %v3570_v50  ;;  %v3633_v16 = vadd.f32 1.0, %v3601_v27  ;;  %9171 = vrcp.f32 %v16573_v58  ;;  %v12115_v10 = vpop.eup %9155  ;;  %v16576_v22 = vld [vmem:[#allocation17_spill] sm:$0xff]  ;;  %v16577_v42 = vld [vmem:[#allocation83_spill] sm:$0xff]  ;;  %v16579_v54 = vld [vmem:[#allocation18_spill] sm:$0xff] }
 0x5ca   : > { %v3066_v4 = vmul.f32 1.0614054, %v12092_v51  ;;  %v3634_v30 = vadd.f32 1.0, %v3602_v21  ;;  %9173 = vrcp.f32 %v16574_v18  ;;  %v3067_v35 = vmul.f32 1.0614054, %v12097_v6  ;;  %16575 = vst [vmem:[#allocation93_spill] sm:$0xff] %v12115_v10  ;;  %v12120_v27 = vpop.eup %9157 }
 0x5cb   : > { %v3068_v43 = vmul.f32 1.0614054, %v12104_v40  ;;  %v3665_v3 = vmul.f32 %v3633_v16, %v16576_v22  ;;  %9175 = vrcp.f32 %v16577_v42  ;;  %v3069_v0 = vmul.f32 1.0614054, %v12110_v7  ;;  %16578 = vst [vmem:[#allocation80_spill] sm:$0xff] %v12120_v27  ;;  %v16580_v21 = vld [vmem:[#allocation84_spill] sm:$0xff]  ;;  %v12125_v45 = vpop.eup %9159 }
 0x5cc   : > { %v3091_v50 = vadd.f32 -1.4531521, %v3059_v46  ;;  %v3666_v58 = vmul.f32 %v3634_v30, %v16579_v54  ;;  %9177 = vrcp.f32 %v16580_v21  ;;  %v3070_v18 = vmul.f32 1.0614054, %v12115_v10  ;;  %v16581_v29 = vld [vmem:[#allocation85_spill] sm:$0xff]  ;;  %v12132_v46 = vpop.eup %9161  ;;  %v16583_v30 = vld [vmem:[#allocation86_spill] sm:$0xff] }
 0x5cd   : > { %v3092_v44 = vadd.f32 -1.4531521, %v3060_v55  ;;  %3753 = vst.msk [vmem:[#allocation3 + $0x19] sm:$0xff] %vm16244_vm2, %v3665_v3  ;;  %9179 = vrcp.f32 %v16581_v29  ;;  %v3071_v16 = vmul.f32 1.0614054, %v12120_v27  ;;  %16582 = vst [vmem:[#allocation81_spill] sm:$0xff] %v12132_v46  ;;  %v12141_v3 = vpop.eup %9163 }
 0x5ce   : > { %v3093_v22 = vadd.f32 -1.4531521, %v3061_v47  ;;  %v12130_v42 = vadd.f32 -1.4531521, %v3062_v39  ;;  %3754 = vst.msk [vmem:[#allocation3 + $0x21] sm:$0xff] %vm16244_vm2, %v3666_v58  ;;  %9181 = vrcp.f32 %v16583_v30  ;;  %16584 = vst [vmem:[#allocation82_spill] sm:$0xff] %v12141_v3 }
 0x5cf   : > { %v3072_v54 = vmul.f32 1.0614054, %v12125_v45  ;;  %v12137_v55 = vadd.f32 -1.4531521, %v3063_v63  ;;  %v12139_v21 = vadd.f32 -1.4531521, %v3064_v34 }
 0x5d0   : > { %v16585_v29 = vld [vmem:[#allocation87_spill] sm:$0xff]  ;;  %v3073_v47 = vmul.f32 1.0614054, %v12132_v46  ;;  %v12145_v39 = vadd.f32 -1.4531521, %v3065_v25  ;;  %v12149_v12 = vpop.eup %9165  ;;  %v16587_v58 = vld [vmem:[#allocation88_spill] sm:$0xff] }
 0x5d1   : > { %9183 = vrcp.f32 %v16585_v29  ;;  %v12147_v59 = vadd.f32 -1.4531521, %v3066_v4  ;;  %16586 = vst [vmem:[#allocation17_spill] sm:$0xff] %v12149_v12  ;;  %v3074_v30 = vmul.f32 1.0614054, %v12141_v3  ;;  %v12157_v38 = vpop.eup %9167  ;;  %v16589_v11 = vld [vmem:[#allocation89_spill] sm:$0xff] }
 0x5d2   : > { %9185 = vrcp.f32 %v16587_v58  ;;  %v12153_v63 = vadd.f32 -1.4531521, %v3067_v35  ;;  %v12155_v34 = vadd.f32 -1.4531521, %v3068_v43  ;;  %16588 = vst [vmem:[#allocation83_spill] sm:$0xff] %v12157_v38  ;;  %v12165_v28 = vpop.eup %9169  ;;  %v16591_v49 = vld [vmem:[#allocation90_spill] sm:$0xff] }
 0x5d3   : > { %9187 = vrcp.f32 %v16589_v11  ;;  %v3075_v29 = vmul.f32 1.0614054, %v12149_v12  ;;  %v12161_v25 = vadd.f32 -1.4531521, %v3069_v0  ;;  %v12163_v4 = vadd.f32 -1.4531521, %v3070_v18  ;;  %v12173_v2 = vpop.eup %9171 }
 0x5d4   : > { %16590 = vst [vmem:[#allocation18_spill] sm:$0xff] %v12165_v28  ;;  %9189 = vrcp.f32 %v16591_v49  ;;  %v3076_v58 = vmul.f32 1.0614054, %v12157_v38  ;;  %v12169_v35 = vadd.f32 -1.4531521, %v3071_v16  ;;  %16592 = vst [vmem:[#allocation84_spill] sm:$0xff] %v12173_v2  ;;  %v12181_v14 = vpop.eup %9173 }
 0x5d5   : > { %v12171_v43 = vadd.f32 -1.4531521, %v3072_v54  ;;  %v16593_v1 = vld [vmem:[#allocation91_spill] sm:$0xff]  ;;  %v3077_v11 = vmul.f32 1.0614054, %v12165_v28  ;;  %16594 = vst [vmem:[#allocation85_spill] sm:$0xff] %v12181_v14  ;;  %v12190_v57 = vpop.eup %9175 }
 0x5d6   : > { %9191 = vrcp.f32 %v16593_v1  ;;  %v12177_v0 = vadd.f32 -1.4531521, %v3073_v47  ;;  %v12179_v18 = vadd.f32 -1.4531521, %v3074_v30  ;;  %v16595_v26 = vld [vmem:[#allocation15_spill] sm:$0xff]  ;;  %16597 = vst [vmem:[#allocation87_spill] sm:$0xff] %v12190_v57 }
 0x5d7   : > { %v12184_v49 = vmul.f32 0.5, %v16595_v26  ;;  %v3881_v37 = vld [vmem:[#allocation3 + $0x18] sm:$0xff]  ;;  %v3078_v16 = vmul.f32 1.0614054, %v12173_v2  ;;  %9193 = vpow2.f32 %v11984_v48  ;;  %v12188_v54 = vadd.f32 -1.4531521, %v3075_v29 }
 0x5d8   : > { %v16598_v1 = vld [vmem:[#allocation16_spill] sm:$0xff]  ;;  %4362 = vrot.lane.b32.xlu0 %v3881_v37, %s16600_s14  ;;  %v3079_v30 = vmul.f32 1.0614054, %v12181_v14  ;;  %9195 = vpow2.f32 %v11987_v8  ;;  %v12198_v26 = vadd.f32 -1.4531521, %v3076_v58  ;;  %v12217_v58 = vmul.f32 %v12045_v60, %v3092_v44 }
 0x5d9   : > { %16596 = vst [vmem:[#allocation86_spill] sm:$0xff] %v12184_v49  ;;  %v12193_v28 = vmul.f32 0.5, %v16598_v1  ;;  %v3882_v47 = vld [vmem:[#allocation3 + $0x20] sm:$0xff]  ;;  %v12200_v49 = vpop.eup %9177  ;;  %v3080_v48 = vmul.f32 1.0614054, %v12190_v57  ;;  %9197 = vpow2.f32 %v11989_v52  ;;  %v12208_v1 = vmul.f32 %v12036_v36, %v3091_v50 }
 0x5da   : > { %16601 = vst [vmem:[#allocation89_spill] sm:$0xff] %v12200_v49  ;;  %4364 = vrot.lane.b32.xlu1 %v3882_v47, %s16600_s14  ;;  %v12205_v29 = vadd.f32 -1.4531521, %v3077_v11  ;;  %v12210_v37 = vpop.eup %9179  ;;  %9199 = vpow2.f32 %v11993_v53  ;;  %v12214_v8 = vadd.f32 -1.4531521, %v3078_v16  ;;  %v3913_v57 = vld [vmem:[#allocation3 + $0x19] sm:$0xff]  ;;  %v12226_v11 = vmul.f32 %v12053_v62, %v3093_v22 }
 0x5db   : > { %16599 = vst [vmem:[#allocation88_spill] sm:$0xff] %v12193_v28  ;;  %16602 = vst [vmem:[#allocation90_spill] sm:$0xff] %v12210_v37  ;;  %v3081_v28 = vmul.f32 1.0614054, %v12200_v49  ;;  %v12219_v47 = vpop.eup %9181  ;;  %v3082_v52 = vmul.f32 1.0614054, %v12210_v37  ;;  %9201 = vpow2.f32 %v11995_v23  ;;  %v12235_v16 = vmul.f32 %v12061_v24, %v12130_v42 }
 0x5dc   : > { %16603 = vst [vmem:[#allocation91_spill] sm:$0xff] %v12219_v47  ;;  %v12223_v50 = vadd.f32 -1.4531521, %v3079_v30  ;;  %v12228_v36 = vpop.eup %9183  ;;  %4490 = vrot.lane.b32.xlu0 %v3913_v57, %s16605_s29  ;;  %v3083_v53 = vmul.f32 1.0614054, %v12219_v47  ;;  %9203 = vpow2.f32 %v11999_v41  ;;  %v12244_v30 = vmul.f32 %v12071_v17, %v12137_v55 }
 0x5dd   : > { %16604 = vst [vmem:[#allocation15_spill] sm:$0xff] %v12228_v36  ;;  %v3112_v44 = vadd.f32 -1.4531521, %v3080_v48  ;;  %v12237_v60 = vpop.eup %9185  ;;  %v3084_v23 = vmul.f32 1.0614054, %v12228_v36  ;;  %9205 = vpow2.f32 %v12001_v56  ;;  %v12252_v48 = vmul.f32 %v12080_v20, %v12139_v21 }
 0x5de   : > { %16606 = vst [vmem:[#allocation16_spill] sm:$0xff] %v12237_v60  ;;  %4110 = vrot.lane.b32.xlu1 %v3913_v57, %s16406_s25  ;;  %v3113_v22 = vadd.f32 -1.4531521, %v3081_v28  ;;  %v12246_v62 = vpop.eup %9187  ;;  %v3085_v41 = vmul.f32 1.0614054, %v12237_v60  ;;  %9207 = vpow2.f32 %v12004_v61  ;;  %v3914_v28 = vld [vmem:[#allocation3 + $0x21] sm:$0xff]  ;;  %v12260_v55 = vmul.f32 %v12087_v32, %v12145_v39 }
 0x5df   : > { %16607 = vst [vmem:[#allocation113_spill] sm:$0xff] %v12246_v62  ;;  %v3114_v42 = vadd.f32 -1.4531521, %v3082_v52  ;;  %v12254_v24 = vpop.eup %9189  ;;  %v3086_v56 = vmul.f32 1.0614054, %v12246_v62  ;;  %9209 = vpow2.f32 %v12006_v19  ;;  %v12269_v52 = vmul.f32 %v12092_v51, %v12147_v59  ;;  %v3945_v19 = vld [vmem:[#allocation3 + $0x1a] sm:$0xff] }
 0x5e0   : > { %16608 = vst [vmem:[#allocation114_spill] sm:$0xff] %v12254_v24  ;;  %v3115_v57 = vadd.f32 -1.4531521, %v3083_v53  ;;  %v12262_v17 = vpop.eup %9191  ;;  %v3087_v61 = vmul.f32 1.0614054, %v12254_v24  ;;  %9211 = vpow2.f32 %v12009_v9  ;;  %4492 = vrot.lane.b32.xlu0 %v3914_v28, %s16605_s29  ;;  %v3131_v32 = vmul.f32 %v12097_v6, %v12153_v63 }
 0x5e1   : > { %16609 = vst [vmem:[#allocation115_spill] sm:$0xff] %v12262_v17  ;;  %v3116_v21 = vadd.f32 -1.4531521, %v3084_v23  ;;  %v12271_v53 = vpop.eup %9193  ;;  %v3088_v20 = vmul.f32 1.0614054, %v12262_v17  ;;  %9213 = vpow2.f32 %v12011_v13  ;;  %v3132_v23 = vmul.f32 %v12104_v40, %v12155_v34 }
 0x5e2   : > { %16610 = vst [vmem:[#allocation116_spill] sm:$0xff] %v12271_v53  ;;  %v3117_v39 = vadd.f32 -1.4531521, %v3085_v41  ;;  %4618 = vrot.lane.b32.xlu1 %v3945_v19, %s9496_s16  ;;  %v12278_v9 = vpop.eup %9195  ;;  %9215 = vpow2.f32 %v12015_v31  ;;  %v3118_v59 = vadd.f32 -1.4531521, %v3086_v56  ;;  %v3133_v53 = vmul.f32 %v12110_v7, %v12161_v25 }
 0x5e3   : > { %16611 = vst [vmem:[#allocation117_spill] sm:$0xff] %v12278_v9  ;;  %v12285_v51 = vpop.eup %9197  ;;  %9217 = vpow2.f32 %v12017_v33  ;;  %v3119_v13 = vadd.f32 -1.4531521, %v3087_v61  ;;  %v3134_v63 = vmul.f32 %v12115_v10, %v12163_v4  ;;  %v3135_v41 = vmul.f32 %v12120_v27, %v12169_v35 }
 0x5e4   : > { %16612 = vst [vmem:[#allocation118_spill] sm:$0xff] %v12285_v51  ;;  %v12292_v9 = vpop.eup %9199  ;;  %9219 = vpow2.f32 %v12021_v15  ;;  %v3120_v31 = vadd.f32 -1.4531521, %v3088_v20  ;;  %v3136_v34 = vmul.f32 %v12125_v45, %v12171_v43  ;;  %v3137_v25 = vmul.f32 %v12132_v46, %v12177_v0  ;;  %4112 = vrot.lane.b32.xlu0 %v3914_v28, %s16406_s25  ;;  %v16616_v43 = vld [vmem:[#allocation79_spill] sm:$0xff]  ;;  %v16617_v0 = vld [vmem:[#allocation18_spill] sm:$0xff] }
 0x5e5   : > { %16613 = vst [vmem:[#allocation119_spill] sm:$0xff] %v12292_v9  ;;  %v12300_v33 = vpop.eup %9201  ;;  %9221 = vpow2.f32 %v12023_v5  ;;  %v3138_v4 = vmul.f32 %v12141_v3, %v12179_v18  ;;  %v3139_v35 = vmul.f32 %v12149_v12, %v12188_v54  ;;  %v3140_v15 = vmul.f32 %v12157_v38, %v12198_v26  ;;  %v16619_v54 = vld [vmem:[#allocation94_spill] sm:$0xff]  ;;  %v16620_v26 = vld [vmem:[#allocation87_spill] sm:$0xff] }
 0x5e6   : > { %16614 = vst [vmem:[#allocation120_spill] sm:$0xff] %v12300_v33  ;;  %4238 = vrot.lane.b32.xlu1 %v3945_v19, %s16403_s27  ;;  %v12310_v20 = vpop.eup %9203  ;;  %9223 = vpow2.f32 %v16616_v43  ;;  %v3141_v56 = vmul.f32 %v16617_v0, %v12205_v29  ;;  %v3142_v5 = vmul.f32 %v12173_v2, %v12214_v8  ;;  %v3143_v18 = vmul.f32 %v12181_v14, %v12223_v50  ;;  %v3946_v43 = vld [vmem:[#allocation3 + $0x22] sm:$0xff]  ;;  %v16622_v29 = vld [vmem:[#allocation47_spill] sm:$0xff] }
 0x5e7   : > { %16615 = vst [vmem:[#allocation121_spill] sm:$0xff] %v12310_v20  ;;  %v12319_v28 = vpop.eup %9205  ;;  %9225 = vpow2.f32 %v16619_v54  ;;  %v3144_v61 = vmul.f32 %v16620_v26, %v3112_v44  ;;  %v3145_v19 = vmul.f32 %v12200_v49, %v3113_v22  ;;  %v3146_v20 = vmul.f32 %v12210_v37, %v3114_v42  ;;  %v16624_v44 = vld [vmem:[#allocation95_spill] sm:$0xff] }
 0x5e8   : > { %16618 = vst [vmem:[#allocation79_spill] sm:$0xff] %v12319_v28  ;;  %v12325_v33 = vpop.eup %9207  ;;  %9227 = vpow2.f32 %v16622_v29  ;;  %v3147_v8 = vmul.f32 %v12219_v47, %v3115_v57  ;;  %v3148_v9 = vmul.f32 %v12228_v36, %v3116_v21  ;;  %v3149_v50 = vmul.f32 %v12237_v60, %v3117_v39  ;;  %4620 = vrot.lane.b32.xlu0 %v3946_v43, %s9496_s16  ;;  %v16626_v29 = vld [vmem:[#allocation48_spill] sm:$0xff]  ;;  %v16649_v60 = vld [vmem:[#allocation101_spill] sm:$0xff] }
 0x5e9   : > { %16621 = vst [vmem:[#allocation94_spill] sm:$0xff] %v12325_v33  ;;  %v12332_v54 = vpop.eup %9209  ;;  %9229 = vpow2.f32 %v16624_v44  ;;  %v3150_v22 = vmul.f32 %v12246_v62, %v3118_v59  ;;  %v3151_v42 = vmul.f32 %v12254_v24, %v3119_v13  ;;  %v3152_v33 = vmul.f32 %v12262_v17, %v3120_v31 }
 0x5ea   : > { %16623 = vst [vmem:[#allocation47_spill] sm:$0xff] %v12332_v54  ;;  %v12338_v28 = vpop.eup %9211  ;;  %9231 = vpow2.f32 %v16626_v29  ;;  %v3155_v57 = vadd.f32 1.4214138, %v12208_v1  ;;  %v3156_v21 = vadd.f32 1.4214138, %v12217_v58  ;;  %v16628_v54 = vld [vmem:[#allocation97_spill] sm:$0xff] }
 0x5eb   : > { %16625 = vst [vmem:[#allocation95_spill] sm:$0xff] %v12338_v28  ;;  %v3157_v39 = vadd.f32 1.4214138, %v12226_v11  ;;  %v12344_v51 = vpop.eup %9213  ;;  %9233 = vpow2.f32 %v16628_v54  ;;  %v3158_v59 = vadd.f32 1.4214138, %v12235_v16  ;;  %v16630_v28 = vld [vmem:[#allocation99_spill] sm:$0xff] }
 0x5ec   : > { %16627 = vst [vmem:[#allocation48_spill] sm:$0xff] %v12344_v51  ;;  %v3159_v13 = vadd.f32 1.4214138, %v12244_v30  ;;  %v3160_v31 = vadd.f32 1.4214138, %v12252_v48  ;;  %v12350_v44 = vpop.eup %9215  ;;  %9235 = vpow2.f32 %v16630_v28  ;;  %4240 = vrot.lane.b32.xlu0 %v3946_v43, %s16403_s27  ;;  %v16632_v54 = vld [vmem:[#allocation100_spill] sm:$0xff] }
 0x5ed   : > { %16629 = vst [vmem:[#allocation97_spill] sm:$0xff] %v12350_v44  ;;  %v3161_v1 = vadd.f32 1.4214138, %v12260_v55  ;;  %v3162_v58 = vadd.f32 1.4214138, %v12269_v52  ;;  %v12356_v11 = vpop.eup %9217  ;;  %9237 = vpow2.f32 %v16632_v54  ;;  %v16634_v48 = vld [vmem:[#allocation102_spill] sm:$0xff] }
 0x5ee   : > { %v3163_v29 = vadd.f32 1.4214138, %v3131_v32  ;;  %16631 = vst [vmem:[#allocation99_spill] sm:$0xff] %v12356_v11  ;;  %v3164_v16 = vadd.f32 1.4214138, %v3132_v23  ;;  %v12359_v17 = vpop.eup %9219  ;;  %9239 = vpow2.f32 %v16634_v48  ;;  %v16636_v52 = vld [vmem:[#allocation103_spill] sm:$0xff] }
 0x5ef   : > { %v3165_v51 = vadd.f32 1.4214138, %v3133_v53  ;;  %v3166_v30 = vadd.f32 1.4214138, %v3134_v63  ;;  %16633 = vst [vmem:[#allocation100_spill] sm:$0xff] %v12359_v17  ;;  %v12362_v55 = vpop.eup %9221  ;;  %9241 = vpow2.f32 %v16636_v52  ;;  %v16638_v54 = vld [vmem:[#allocation105_spill] sm:$0xff] }
 0x5f0   : > { %v3167_v44 = vadd.f32 1.4214138, %v3135_v41  ;;  %v3168_v28 = vadd.f32 1.4214138, %v3136_v34  ;;  %v3169_v24 = vadd.f32 1.4214138, %v3137_v25  ;;  %v12365_v11 = vpop.eup %9223  ;;  %9243 = vpow2.f32 %v16638_v54 }
 0x5f1   : > { %16635 = vst [vmem:[#allocation102_spill] sm:$0xff] %v12362_v55  ;;  %v3170_v32 = vadd.f32 1.4214138, %v3138_v4  ;;  %v3171_v43 = vadd.f32 1.4214138, %v3139_v35  ;;  %16637 = vst [vmem:[#allocation103_spill] sm:$0xff] %v12365_v11  ;;  %v12368_v17 = vpop.eup %9225 }
 0x5f2   : > { %v3172_v62 = vadd.f32 1.4214138, %v3140_v15  ;;  %v3173_v53 = vadd.f32 1.4214138, %v3141_v56  ;;  %v3174_v23 = vadd.f32 1.4214138, %v3142_v5  ;;  %v12371_v55 = vpop.eup %9227 }
 0x5f3   : > { %v3175_v63 = vadd.f32 1.4214138, %v3143_v18  ;;  %16639 = vst [vmem:[#allocation105_spill] sm:$0xff] %v12368_v17  ;;  %v16640_v48 = vld [vmem:[#allocation106_spill] sm:$0xff]  ;;  %v3176_v41 = vadd.f32 1.4214138, %v3144_v61  ;;  %v12374_v11 = vpop.eup %9229 }
 0x5f4   : > { %9245 = vpow2.f32 %v16640_v48  ;;  %v3177_v34 = vadd.f32 1.4214138, %v3145_v19  ;;  %v3178_v25 = vadd.f32 1.4214138, %v3146_v20  ;;  %16641 = vst [vmem:[#allocation106_spill] sm:$0xff] %v12371_v55  ;;  %v16642_v52 = vld [vmem:[#allocation108_spill] sm:$0xff]  ;;  %v12377_v17 = vpop.eup %9231 }
 0x5f5   : > { %9247 = vpow2.f32 %v16642_v52  ;;  %v3179_v4 = vadd.f32 1.4214138, %v3147_v8  ;;  %v3180_v35 = vadd.f32 1.4214138, %v3148_v9  ;;  %v3181_v15 = vadd.f32 1.4214138, %v3149_v50  ;;  %v12383_v8 = vpop.eup %9233 }
 0x5f6   : > { %16643 = vst [vmem:[#allocation108_spill] sm:$0xff] %v12374_v11  ;;  %v16644_v54 = vld [vmem:[#allocation109_spill] sm:$0xff]  ;;  %v3182_v56 = vadd.f32 1.4214138, %v3150_v22  ;;  %v3183_v5 = vadd.f32 1.4214138, %v3151_v42  ;;  %v3189_v52 = vmul.f32 %v16649_v60, %v3157_v39  ;;  %v12389_v47 = vpop.eup %9235  ;;  %v3197_v39 = vmul.f32 %v12110_v7, %v3165_v51 }
 0x5f7   : > { %9249 = vpow2.f32 %v16644_v54  ;;  %v3184_v18 = vadd.f32 1.4214138, %v3152_v33  ;;  %16645 = vst [vmem:[#allocation109_spill] sm:$0xff] %v12377_v17  ;;  %v16646_v48 = vld [vmem:[#allocation111_spill] sm:$0xff]  ;;  %v16647_v61 = vld [vmem:[#allocation96_spill] sm:$0xff]  ;;  %v16648_v19 = vld [vmem:[#allocation98_spill] sm:$0xff]  ;;  %v12395_v60 = vpop.eup %9237  ;;  %v3205_v51 = vmul.f32 %v16617_v0, %v3173_v53 }
 0x5f8   : > { %9251 = vpow2.f32 %v16646_v48  ;;  %v3187_v20 = vmul.f32 %v16647_v61, %v3155_v57  ;;  %v3188_v55 = vmul.f32 %v16648_v19, %v3156_v21  ;;  %16650 = vst [vmem:[#allocation111_spill] sm:$0xff] %v12383_v8  ;;  %v16651_v9 = vld [vmem:[#allocation104_spill] sm:$0xff]  ;;  %v16652_v11 = vld [vmem:[#allocation107_spill] sm:$0xff]  ;;  %v16653_v54 = vld [vmem:[#allocation110_spill] sm:$0xff]  ;;  %v3195_v57 = vmul.f32 %v12097_v6, %v3163_v29  ;;  %v12401_v8 = vpop.eup %9239 }
 0x5f9   : > { %v3190_v50 = vmul.f32 %v16651_v9, %v3158_v59  ;;  %v3191_v36 = vmul.f32 %v16652_v11, %v3159_v13  ;;  %v3192_v22 = vmul.f32 %v16653_v54, %v3160_v31  ;;  %v16654_v42 = vld [vmem:[#allocation112_spill] sm:$0xff]  ;;  %16655 = vst [vmem:[#allocation96_spill] sm:$0xff] %v12389_v47  ;;  %v3196_v21 = vmul.f32 %v12104_v40, %v3164_v16  ;;  %v12407_v47 = vpop.eup %9241 }
 0x5fa   : > { %v3193_v33 = vmul.f32 %v16654_v42, %v3161_v1  ;;  %v16656_v17 = vld [vmem:[#allocation92_spill] sm:$0xff]  ;;  %16657 = vst [vmem:[#allocation98_spill] sm:$0xff] %v12395_v60  ;;  %v3198_v59 = vmul.f32 %v12115_v10, %v3166_v30  ;;  %v3199_v13 = vmul.f32 %v12120_v27, %v3167_v44  ;;  %v3200_v31 = vmul.f32 %v12125_v45, %v3168_v28  ;;  %v12413_v60 = vpop.eup %9243 }
 0x5fb   : > { %v3194_v48 = vmul.f32 %v16656_v17, %v3162_v58  ;;  %v3201_v1 = vmul.f32 %v12132_v46, %v3169_v24  ;;  %16658 = vst [vmem:[#allocation104_spill] sm:$0xff] %v12401_v8  ;;  %v3202_v58 = vmul.f32 %v12141_v3, %v3170_v32  ;;  %v3203_v29 = vmul.f32 %v12149_v12, %v3171_v43  ;;  %v16661_v8 = vld [vmem:[#allocation91_spill] sm:$0xff] }
 0x5fc   : > { %v3204_v16 = vmul.f32 %v12157_v38, %v3172_v62  ;;  %16659 = vst [vmem:[#allocation107_spill] sm:$0xff] %v12407_v47  ;;  %v3206_v30 = vmul.f32 %v12173_v2, %v3174_v23  ;;  %v3207_v44 = vmul.f32 %v12181_v14, %v3175_v63  ;;  %v3208_v28 = vmul.f32 %v16620_v26, %v3176_v41  ;;  %v16662_v12 = vld [vmem:[#allocation15_spill] sm:$0xff]  ;;  %v16663_v38 = vld [vmem:[#allocation16_spill] sm:$0xff]  ;;  %v16665_v47 = vld [vmem:[#allocation113_spill] sm:$0xff] }
 0x5fd   : > { %v3209_v24 = vmul.f32 %v12200_v49, %v3177_v34  ;;  %16660 = vst [vmem:[#allocation110_spill] sm:$0xff] %v12413_v60  ;;  %v3210_v32 = vmul.f32 %v12210_v37, %v3178_v25  ;;  %v3211_v43 = vmul.f32 %v16661_v8, %v3179_v4  ;;  %v3212_v62 = vmul.f32 %v16662_v12, %v3180_v35  ;;  %v16667_v34 = vld [vmem:[#allocation114_spill] sm:$0xff]  ;;  %v16669_v4 = vld [vmem:[#allocation115_spill] sm:$0xff] }
 0x5fe   : > { %v3213_v53 = vmul.f32 %v16663_v38, %v3181_v15  ;;  %v12419_v0 = vpop.eup %9245  ;;  %v3214_v23 = vmul.f32 %v16665_v47, %v3182_v56  ;;  %v3219_v2 = vadd.f32 -0.28449672, %v3187_v20  ;;  %v3220_v63 = vadd.f32 -0.28449672, %v3188_v55 }
 0x5ff   : > { %16664 = vst [vmem:[#allocation112_spill] sm:$0xff] %v12419_v0  ;;  %v3221_v14 = vadd.f32 -0.28449672, %v3189_v52  ;;  %v12422_v41 = vpop.eup %9247  ;;  %v3215_v49 = vmul.f32 %v16667_v34, %v3183_v5  ;;  %v3222_v60 = vadd.f32 -0.28449672, %v3190_v50  ;;  %v3216_v35 = vmul.f32 %v16669_v4, %v3184_v18  ;;  %v16671_v34 = vld [vmem:[#allocation101_spill] sm:$0xff] }
 0x600   : > { %16666 = vst [vmem:[#allocation92_spill] sm:$0xff] %v12422_v41  ;;  %v3223_v26 = vadd.f32 -0.28449672, %v3191_v36  ;;  %v3224_v25 = vadd.f32 -0.28449672, %v3192_v22  ;;  %v3251_v52 = vmul.f32 %v16647_v61, %v3219_v2  ;;  %v3252_v36 = vmul.f32 %v16648_v19, %v3220_v63 }
 0x601   : > { %v12425_v37 = vpop.eup %9249  ;;  %v3225_v12 = vadd.f32 -0.28449672, %v3193_v33  ;;  %v3226_v15 = vadd.f32 -0.28449672, %v3194_v48  ;;  %v3227_v38 = vadd.f32 -0.28449672, %v3195_v57  ;;  %v3253_v18 = vmul.f32 %v16671_v34, %v3221_v14 }
 0x602   : > { %16668 = vst [vmem:[#allocation122_spill] sm:$0xff] %v12425_v37  ;;  %v12428_v0 = vpop.eup %9251  ;;  %v3228_v56 = vadd.f32 -0.28449672, %v3196_v21  ;;  %v3229_v20 = vadd.f32 -0.28449672, %v3197_v39  ;;  %v3255_v2 = vmul.f32 %v16652_v11, %v3223_v26  ;;  %v3256_v63 = vmul.f32 %v16653_v54, %v3224_v25  ;;  %v16675_v25 = vld [vmem:[#allocation84_spill] sm:$0xff] }
 0x603   : > { %16670 = vst [vmem:[#allocation115_spill] sm:$0xff] %v12428_v0  ;;  %v3230_v55 = vadd.f32 -0.28449672, %v3198_v59  ;;  %v3231_v41 = vadd.f32 -0.28449672, %v3199_v13  ;;  %v3254_v0 = vmul.f32 %v16651_v9, %v3222_v60  ;;  %v3257_v14 = vmul.f32 %v16654_v42, %v3225_v12 }
 0x604   : > { %v3232_v47 = vadd.f32 -0.28449672, %v3200_v31  ;;  %v3233_v5 = vadd.f32 -0.28449672, %v3201_v1  ;;  %v3234_v50 = vadd.f32 -0.28449672, %v3202_v58  ;;  %v3260_v60 = vmul.f32 %v12104_v40, %v3228_v56 }
 0x605   : > { %v3235_v22 = vadd.f32 -0.28449672, %v3203_v29  ;;  %v3236_v37 = vadd.f32 -0.28449672, %v3204_v16  ;;  %v3237_v33 = vadd.f32 -0.28449672, %v3205_v51  ;;  %v3258_v51 = vmul.f32 %v16656_v17, %v3226_v15 }
 0x606   : > { %v3238_v48 = vadd.f32 -0.28449672, %v3206_v30  ;;  %v3239_v57 = vadd.f32 -0.28449672, %v3207_v44  ;;  %v3240_v21 = vadd.f32 -0.28449672, %v3208_v28  ;;  %v3259_v30 = vmul.f32 %v12097_v6, %v3227_v38 }
 0x607   : > { %v3241_v39 = vadd.f32 -0.28449672, %v3209_v24  ;;  %v3242_v59 = vadd.f32 -0.28449672, %v3210_v32  ;;  %v3243_v13 = vadd.f32 -0.28449672, %v3211_v43  ;;  %v3261_v44 = vmul.f32 %v12110_v7, %v3229_v20 }
 0x608   : > { %v3244_v31 = vadd.f32 -0.28449672, %v3212_v62  ;;  %v3245_v1 = vadd.f32 -0.28449672, %v3213_v53  ;;  %v3246_v58 = vadd.f32 -0.28449672, %v3214_v23  ;;  %v3262_v26 = vmul.f32 %v12115_v10, %v3230_v55 }
 0x609   : > { %v3247_v29 = vadd.f32 -0.28449672, %v3215_v49  ;;  %v3248_v16 = vadd.f32 -0.28449672, %v3216_v35  ;;  %v3263_v28 = vmul.f32 %v12120_v27, %v3231_v41  ;;  %v3264_v24 = vmul.f32 %v12125_v45, %v3232_v47  ;;  %v16672_v43 = vld [vmem:[#allocation17_spill] sm:$0xff]  ;;  %v16673_v62 = vld [vmem:[#allocation83_spill] sm:$0xff] }
 0x60a   : > { %v3265_v32 = vmul.f32 %v12132_v46, %v3233_v5  ;;  %v3266_v49 = vmul.f32 %v12141_v3, %v3234_v50  ;;  %v3267_v12 = vmul.f32 %v16672_v43, %v3235_v22  ;;  %v3268_v53 = vmul.f32 %v16673_v62, %v3236_v37  ;;  %v16674_v23 = vld [vmem:[#allocation18_spill] sm:$0xff]  ;;  %v16676_v15 = vld [vmem:[#allocation85_spill] sm:$0xff]  ;;  %v16677_v20 = vld [vmem:[#allocation87_spill] sm:$0xff] }
 0x60b   : > { %v3269_v38 = vmul.f32 %v16674_v23, %v3237_v33  ;;  %v3270_v35 = vmul.f32 %v16675_v25, %v3238_v48  ;;  %v3271_v56 = vmul.f32 %v16676_v15, %v3239_v57  ;;  %v3272_v55 = vmul.f32 %v16677_v20, %v3240_v21  ;;  %v16678_v10 = vld [vmem:[#allocation89_spill] sm:$0xff]  ;;  %v16679_v27 = vld [vmem:[#allocation90_spill] sm:$0xff]  ;;  %v16680_v46 = vld [vmem:[#allocation15_spill] sm:$0xff] }
 0x60c   : > { %v3273_v41 = vmul.f32 %v16678_v10, %v3241_v39  ;;  %v3274_v47 = vmul.f32 %v16679_v27, %v3242_v59  ;;  %v3275_v5 = vmul.f32 %v16661_v8, %v3243_v13  ;;  %v3276_v50 = vmul.f32 %v16680_v46, %v3244_v31  ;;  %v16681_v3 = vld [vmem:[#allocation16_spill] sm:$0xff]  ;;  %v16682_v43 = vld [vmem:[#allocation113_spill] sm:$0xff]  ;;  %v16683_v62 = vld [vmem:[#allocation114_spill] sm:$0xff] }
 0x60d   : > { %v3277_v22 = vmul.f32 %v16681_v3, %v3245_v1  ;;  %v3278_v37 = vmul.f32 %v16682_v43, %v3246_v58  ;;  %v3279_v33 = vmul.f32 %v16683_v62, %v3247_v29  ;;  %v3283_v23 = vadd.f32 0.2548296, %v3251_v52  ;;  %v16684_v25 = vld [vmem:[#allocation49_spill] sm:$0xff]  ;;  %v16685_v29 = vld [vmem:[#allocation116_spill] sm:$0xff] }
 0x60e   : > { %v3284_v48 = vadd.f32 0.2548296, %v3252_v36  ;;  %vm3539_vm15 = vcmp.ge.f32.partialorder %v16684_v25, 0.0  ;;  %v3280_v57 = vmul.f32 %v16669_v4, %v3248_v16  ;;  %v3285_v21 = vadd.f32 0.2548296, %v3253_v18 }
 0x60f   : > { %v3286_v39 = vadd.f32 0.2548296, %v3254_v0  ;;  %v3287_v10 = vadd.f32 0.2548296, %v3255_v2  ;;  %v3315_v59 = vmul.f32 %v16647_v61, %v3283_v23  ;;  %v3288_v13 = vadd.f32 0.2548296, %v3256_v63 }
 0x610   : > { %v3289_v8 = vadd.f32 0.2548296, %v3257_v14  ;;  %v3290_v31 = vadd.f32 0.2548296, %v3258_v51  ;;  %v3291_v46 = vadd.f32 0.2548296, %v3259_v30  ;;  %v3316_v58 = vmul.f32 %v16648_v19, %v3284_v48 }
 0x611   : > { %v3292_v1 = vadd.f32 0.2548296, %v3260_v60  ;;  %v3293_v3 = vadd.f32 0.2548296, %v3261_v44  ;;  %v3475_v52 = vmul.f32 %v16685_v29, %v3315_v59  ;;  %v3294_v36 = vadd.f32 0.2548296, %v3262_v26 }
 0x612   : > { %v3295_v62 = vadd.f32 0.2548296, %v3263_v28  ;;  %v3296_v43 = vadd.f32 0.2548296, %v3264_v24  ;;  %v3297_v27 = vadd.f32 0.2548296, %v3265_v32  ;;  %v3317_v0 = vmul.f32 %v16671_v34, %v3285_v21 }
 0x613   : > { %v3298_v16 = vadd.f32 0.2548296, %v3266_v49  ;;  %v3299_v18 = vadd.f32 0.2548296, %v3267_v12  ;;  %v3507_v2 = vsub.f32 1.0, %v3475_v52  ;;  %v3318_v14 = vmul.f32 %v16651_v9, %v3286_v39  ;;  %v16691_v48 = vld [vmem:[#allocation17_spill] sm:$0xff] }
 0x614   : > { %v3300_v61 = vadd.f32 0.2548296, %v3268_v53  ;;  %v3301_v63 = vadd.f32 0.2548296, %v3269_v38  ;;  %v3302_v51 = vadd.f32 0.2548296, %v3270_v35  ;;  %v3319_v19 = vmul.f32 %v16652_v11, %v3287_v10 }
 0x615   : > { %v3303_v30 = vadd.f32 0.2548296, %v3271_v56  ;;  %v3304_v60 = vadd.f32 0.2548296, %v3272_v55  ;;  %v3571_v44 = vsub.f32 0.0, %v3507_v2  ;;  %v3320_v28 = vmul.f32 %v16653_v54, %v3288_v13  ;;  %v16686_v55 = vld [vmem:[#allocation93_spill] sm:$0xff] }
 0x616   : > { %v3305_v23 = vadd.f32 0.2548296, %v3273_v41  ;;  %v3306_v26 = vadd.f32 0.2548296, %v3274_v47  ;;  %v3307_v24 = vadd.f32 0.2548296, %v3275_v5  ;;  %v3321_v34 = vmul.f32 %v16654_v42, %v3289_v8 }
 0x617   : > { %v3308_v32 = vadd.f32 0.2548296, %v3276_v50  ;;  %v3309_v49 = vadd.f32 0.2548296, %v3277_v22  ;;  %v3603_v12 = vsel %vm3539_vm15, %v3507_v2, %v3571_v44  ;;  %v3310_v53 = vadd.f32 0.2548296, %v3278_v37 }
 0x618   : > { %v3311_v9 = vadd.f32 0.2548296, %v3279_v33  ;;  %v3312_v38 = vadd.f32 0.2548296, %v3280_v57  ;;  %v3635_v35 = vadd.f32 1.0, %v3603_v12  ;;  %v3322_v56 = vmul.f32 %v16656_v17, %v3290_v31  ;;  %v16687_v47 = vld [vmem:[#allocation80_spill] sm:$0xff] }
 0x619   : > { %v3323_v10 = vmul.f32 %v12097_v6, %v3291_v46  ;;  %v3324_v11 = vmul.f32 %v12104_v40, %v3292_v1  ;;  %v3325_v54 = vmul.f32 %v12110_v7, %v3293_v3  ;;  %v3326_v41 = vmul.f32 %v16686_v55, %v3294_v36  ;;  %v16688_v42 = vld [vmem:[#allocation19_spill] sm:$0xff]  ;;  %v16689_v50 = vld [vmem:[#allocation81_spill] sm:$0xff]  ;;  %v16690_v37 = vld [vmem:[#allocation82_spill] sm:$0xff] }
 0x61a   : > { %v3327_v5 = vmul.f32 %v16687_v47, %v3295_v62  ;;  %v3328_v8 = vmul.f32 %v12125_v45, %v3296_v43  ;;  %v3667_v25 = vmul.f32 %v3635_v35, %v16688_v42  ;;  %v3329_v22 = vmul.f32 %v16689_v50, %v3297_v27  ;;  %v16692_v57 = vld [vmem:[#allocation83_spill] sm:$0xff]  ;;  %v16693_v46 = vld [vmem:[#allocation18_spill] sm:$0xff]  ;;  %v16694_v21 = vld [vmem:[#allocation84_spill] sm:$0xff] }
 0x61b   : > { %v3330_v33 = vmul.f32 %v16690_v37, %v3298_v16  ;;  %v3331_v17 = vmul.f32 %v16691_v48, %v3299_v18  ;;  %v3332_v6 = vmul.f32 %v16692_v57, %v3300_v61  ;;  %v3333_v40 = vmul.f32 %v16693_v46, %v3301_v63  ;;  %v16695_v43 = vld [vmem:[#allocation89_spill] sm:$0xff]  ;;  %v16696_v39 = vld [vmem:[#allocation90_spill] sm:$0xff]  ;;  %v16697_v59 = vld [vmem:[#allocation91_spill] sm:$0xff] }
 0x61c   : > { %v3334_v7 = vmul.f32 %v16694_v21, %v3302_v51  ;;  %v3335_v3 = vmul.f32 %v16676_v15, %v3303_v30  ;;  %3755 = vst.msk [vmem:[#allocation3 + $0x31] sm:$0xff] %vm16244_vm2, %v3667_v25  ;;  %v3336_v45 = vmul.f32 %v16677_v20, %v3304_v60  ;;  %v3337_v62 = vmul.f32 %v16695_v43, %v3305_v23  ;;  %v16698_v31 = vld [vmem:[#allocation15_spill] sm:$0xff]  ;;  %v16699_v29 = vld [vmem:[#allocation16_spill] sm:$0xff]  ;;  %v16700_v36 = vld [vmem:[#allocation113_spill] sm:$0xff] }
 0x61d   : > { %v3338_v27 = vmul.f32 %v16696_v39, %v3306_v26  ;;  %v3339_v13 = vmul.f32 %v16697_v59, %v3307_v24  ;;  %v3340_v1 = vmul.f32 %v16698_v31, %v3308_v32  ;;  %v3341_v52 = vmul.f32 %v16699_v29, %v3309_v49  ;;  %v16701_v18 = vld [vmem:[#allocation114_spill] sm:$0xff]  ;;  %v16702_v61 = vld [vmem:[#allocation117_spill] sm:$0xff]  ;;  %v16704_v30 = vld [vmem:[#allocation119_spill] sm:$0xff] }
 0x61e   : > { %v3342_v16 = vmul.f32 %v16700_v36, %v3310_v53  ;;  %v3343_v2 = vmul.f32 %v16701_v18, %v3311_v9  ;;  %v3344_v15 = vmul.f32 %v16669_v4, %v3312_v38  ;;  %v3476_v63 = vmul.f32 %v16702_v61, %v3316_v58  ;;  %v16703_v51 = vld [vmem:[#allocation118_spill] sm:$0xff]  ;;  %v16705_v44 = vld [vmem:[#allocation120_spill] sm:$0xff]  ;;  %v16706_v26 = vld [vmem:[#allocation121_spill] sm:$0xff] }
 0x61f   : > { %v12498_v20 = vmul.f32 %v16703_v51, %v3317_v0  ;;  %v12501_v60 = vmul.f32 %v16704_v30, %v3318_v14  ;;  %v12504_v23 = vmul.f32 %v16705_v44, %v3319_v19  ;;  %v12507_v24 = vmul.f32 %v16706_v26, %v3320_v28  ;;  %v16707_v32 = vld [vmem:[#allocation79_spill] sm:$0xff]  ;;  %v16708_v12 = vld [vmem:[#allocation94_spill] sm:$0xff]  ;;  %v16712_v38 = vld [vmem:[#allocation48_spill] sm:$0xff] }
 0x620   : > { %v12510_v49 = vmul.f32 %v16707_v32, %v3321_v34  ;;  %v12513_v53 = vmul.f32 %v16708_v12, %v3322_v56  ;;  %v16709_v4 = vld [vmem:[#allocation50_spill] sm:$0xff]  ;;  %v16710_v58 = vld [vmem:[#allocation47_spill] sm:$0xff]  ;;  %v12523_v19 = vmul.f32 %v16712_v38, %v3325_v54  ;;  %v16713_v35 = vld [vmem:[#allocation97_spill] sm:$0xff]  ;;  %v3508_v30 = vsub.f32 1.0, %v3476_v63 }
 0x621   : > { %vm3540_vm1 = vcmp.ge.f32.partialorder %v16709_v4, 0.0  ;;  %v12517_v0 = vmul.f32 %v16710_v58, %v3323_v10  ;;  %v16711_v9 = vld [vmem:[#allocation95_spill] sm:$0xff]  ;;  %v12526_v28 = vmul.f32 %v16713_v35, %v3326_v41  ;;  %v16715_v47 = vld [vmem:[#allocation100_spill] sm:$0xff]  ;;  %v16717_v42 = vld [vmem:[#allocation102_spill] sm:$0xff]  ;;  %v16241_v44 = vsub.f32 1.0, %v12498_v20 }
 0x622   : > { %v12520_v14 = vmul.f32 %v16711_v9, %v3324_v11  ;;  %v16714_v55 = vld [vmem:[#allocation99_spill] sm:$0xff]  ;;  %v12532_v56 = vmul.f32 %v16715_v47, %v3328_v8  ;;  %v12535_v25 = vmul.f32 %v16717_v42, %v3329_v22  ;;  %v16721_v11 = vld [vmem:[#allocation105_spill] sm:$0xff]  ;;  %v16723_v54 = vld [vmem:[#allocation106_spill] sm:$0xff]  ;;  %v16246_v26 = vsub.f32 1.0, %v12507_v24 }
 0x623   : > { %v12529_v34 = vmul.f32 %v16714_v55, %v3327_v5  ;;  %v16719_v10 = vld [vmem:[#allocation103_spill] sm:$0xff]  ;;  %v12541_v37 = vmul.f32 %v16721_v11, %v3331_v17  ;;  %v12544_v48 = vmul.f32 %v16723_v54, %v3332_v6  ;;  %v16725_v41 = vld [vmem:[#allocation108_spill] sm:$0xff]  ;;  %v16727_v5 = vld [vmem:[#allocation109_spill] sm:$0xff]  ;;  %v3572_v32 = vsub.f32 0.0, %v3508_v30 }
 0x624   : > { %16716 = vst [vmem:[#allocation101_spill] sm:$0xff] %v12532_v56  ;;  %16718 = vst [vmem:[#allocation85_spill] sm:$0xff] %v12535_v25  ;;  %v12538_v50 = vmul.f32 %v16719_v10, %v3330_v33  ;;  %v12547_v57 = vmul.f32 %v16725_v41, %v3333_v40  ;;  %v12550_v46 = vmul.f32 %v16727_v5, %v3334_v7  ;;  %v12552_v8 = vld [vmem:[#allocation3 + $0x30] sm:$0xff]  ;;  %v16730_v21 = vld [vmem:[#allocation111_spill] sm:$0xff]  ;;  %v16252_v12 = vsub.f32 1.0, %v12520_v14 }
 0x625   : > { %16722 = vst [vmem:[#allocation49_spill] sm:$0xff] %v12541_v37  ;;  %16724 = vst [vmem:[#allocation116_spill] sm:$0xff] %v12544_v48  ;;  %v12555_v22 = vmul.f32 %v16730_v21, %v3335_v3  ;;  %v16732_v43 = vld [vmem:[#allocation96_spill] sm:$0xff]  ;;  %v16734_v39 = vld [vmem:[#allocation98_spill] sm:$0xff]  ;;  %4746 = vrot.lane.b32.xlu1 %v12552_v8, %s9497_s24  ;;  %v3604_v38 = vsel %vm3540_vm1, %v3508_v30, %v3572_v32  ;;  %v3573_v32 = vsub.f32 0.0, %v16241_v44  ;;  %v3576_v30 = vsub.f32 0.0, %v16246_v26 }
 0x626   : > { %16720 = vst [vmem:[#allocation87_spill] sm:$0xff] %v12538_v50  ;;  %16726 = vst [vmem:[#allocation93_spill] sm:$0xff] %v12547_v57  ;;  %v12558_v33 = vmul.f32 %v16732_v43, %v3336_v45  ;;  %v12561_v17 = vmul.f32 %v16734_v39, %v3337_v62  ;;  %v16736_v59 = vld [vmem:[#allocation104_spill] sm:$0xff]  ;;  %v16737_v40 = vld [vmem:[#allocation107_spill] sm:$0xff]  ;;  %v3636_v42 = vadd.f32 1.0, %v3604_v38  ;;  %v3580_v26 = vsub.f32 0.0, %v16252_v12 }
 0x627   : > { %16728 = vst [vmem:[#allocation80_spill] sm:$0xff] %v12550_v46  ;;  %16729 = vst [vmem:[#allocation19_spill] sm:$0xff] %v12552_v8  ;;  %v12564_v6 = vmul.f32 %v16736_v59, %v3338_v27  ;;  %v12569_v7 = vmul.f32 %v16737_v40, %v3339_v13  ;;  %v16739_v31 = vld [vmem:[#allocation110_spill] sm:$0xff]  ;;  %v16740_v3 = vld [vmem:[#allocation112_spill] sm:$0xff]  ;;  %v16248_v13 = vsub.f32 1.0, %v12501_v60  ;;  %v16769_v35 = vsub.f32 1.0, %v12529_v34 }
 0x628   : > { %16731 = vst [vmem:[#allocation81_spill] sm:$0xff] %v12555_v22  ;;  %16733 = vst [vmem:[#allocation82_spill] sm:$0xff] %v12558_v33  ;;  %v12572_v29 = vmul.f32 %v16739_v31, %v3340_v1  ;;  %v12575_v36 = vmul.f32 %v16740_v3, %v3341_v52  ;;  %v16741_v45 = vld [vmem:[#allocation92_spill] sm:$0xff]  ;;  %v16742_v62 = vld [vmem:[#allocation122_spill] sm:$0xff]  ;;  %v16245_v1 = vsub.f32 1.0, %v12504_v23  ;;  %v16247_v52 = vsub.f32 1.0, %v12510_v49 }
 0x629   : > { %16735 = vst [vmem:[#allocation17_spill] sm:$0xff] %v12561_v17  ;;  %16738 = vst [vmem:[#allocation83_spill] sm:$0xff] %v12569_v7  ;;  %v12578_v18 = vmul.f32 %v16741_v45, %v3342_v16  ;;  %v12581_v61 = vmul.f32 %v16742_v62, %v3343_v2  ;;  %v16743_v27 = vld [vmem:[#allocation115_spill] sm:$0xff]  ;;  %v16250_v16 = vsub.f32 1.0, %v12513_v53  ;;  %v16251_v2 = vsub.f32 1.0, %v12517_v0  ;;  %4366 = vrot.lane.b32.xlu1 %v12552_v8, %s16600_s14  ;;  %v16747_v59 = vld [vmem:[#allocation52_spill] sm:$0xff] }
 0x62a   : > { %v12584_v51 = vmul.f32 %v16743_v27, %v3344_v15  ;;  %v16253_v15 = vsub.f32 1.0, %v12523_v19  ;;  %v16745_v41 = vld [vmem:[#allocation51_spill] sm:$0xff]  ;;  %vm3542_vm5 = vcmp.ge.f32.partialorder %v16747_v59, 0.0  ;;  %v16748_v40 = vld [vmem:[#allocation53_spill] sm:$0xff]  ;;  %v16749_v31 = vld [vmem:[#allocation54_spill] sm:$0xff]  ;;  %v3577_v44 = vsub.f32 0.0, %v16247_v52 }
 0x62b   : > { %vm3541_vm4 = vcmp.ge.f32.partialorder %v16745_v41, 0.0  ;;  %v12613_v39 = vld [vmem:[#allocation3 + $0x31] sm:$0xff]  ;;  %vm3543_vm7 = vcmp.ge.f32.partialorder %v16748_v40, 0.0  ;;  %vm3544_vm9 = vcmp.ge.f32.partialorder %v16749_v31, 0.0  ;;  %v16751_v45 = vld [vmem:[#allocation20_spill] sm:$0xff]  ;;  %v16753_v43 = vld [vmem:[#allocation57_spill] sm:$0xff] }
 0x62c   : > { %16744 = vst [vmem:[#allocation18_spill] sm:$0xff] %v12584_v51  ;;  %16746 = vst [vmem:[#allocation84_spill] sm:$0xff] %v12613_v39  ;;  %v16750_v3 = vld [vmem:[#allocation55_spill] sm:$0xff]  ;;  %v3668_v62 = vmul.f32 %v3636_v42, %v16751_v45  ;;  %v16752_v38 = vld [vmem:[#allocation56_spill] sm:$0xff]  ;;  %vm3547_vm13 = vcmp.ge.f32.partialorder %v16753_v43, 0.0  ;;  %v3574_v42 = vsub.f32 0.0, %v16248_v13 }
 0x62d   : > { %vm3545_vm10 = vcmp.ge.f32.partialorder %v16750_v3, 0.0  ;;  %4874 = vrot.lane.b32.xlu1 %v12613_v39, %s9498_s15  ;;  %vm3546_vm11 = vcmp.ge.f32.partialorder %v16752_v38, 0.0  ;;  %v16754_v21 = vld [vmem:[#allocation58_spill] sm:$0xff]  ;;  %v16755_v4 = vld [vmem:[#allocation59_spill] sm:$0xff]  ;;  %v16756_v27 = vld [vmem:[#allocation60_spill] sm:$0xff]  ;;  %v3575_v45 = vsub.f32 0.0, %v16245_v1 }
 0x62e   : > { %vm3548_vm14 = vcmp.ge.f32.partialorder %v16754_v21, 0.0  ;;  %vm3549_vm15 = vcmp.ge.f32.partialorder %v16755_v4, 0.0  ;;  %vm3550_vm1 = vcmp.ge.f32.partialorder %v16756_v27, 0.0  ;;  %v16757_v5 = vld [vmem:[#allocation61_spill] sm:$0xff]  ;;  %v16758_v54 = vld [vmem:[#allocation62_spill] sm:$0xff]  ;;  %3756 = vst.msk [vmem:[#allocation3 + $0x39] sm:$0xff] %vm16244_vm2, %v3668_v62 }
 0x62f   : > { %vm3551_vm0 = vcmp.ge.f32.partialorder %v16757_v5, 0.0  ;;  %vm3552_vm12 = vcmp.ge.f32.partialorder %v16758_v54, 0.0  ;;  %v3578_v62 = vsub.f32 0.0, %v16250_v16  ;;  %v3579_v1 = vsub.f32 0.0, %v16251_v2  ;;  %v16775_v13 = vld [vmem:[#allocation75_spill] sm:$0xff]  ;;  %v16780_v54 = vld [vmem:[#allocation76_spill] sm:$0xff] }
 0x630   : > { %v3581_v52 = vsub.f32 0.0, %v16253_v15  ;;  %v16768_v8 = vsub.f32 1.0, %v12526_v28  ;;  %v3583_v2 = vsub.f32 0.0, %v16769_v35  ;;  %v16770_v55 = vsub.f32 1.0, %v12532_v56  ;;  %v16781_v9 = vld [vmem:[#allocation77_spill] sm:$0xff]  ;;  %v16782_v58 = vld [vmem:[#allocation78_spill] sm:$0xff] }
 0x631   : > { %v16771_v47 = vsub.f32 1.0, %v12535_v25  ;;  %4494 = vrot.lane.b32.xlu1 %v12613_v39, %s16605_s29  ;;  %vm3565_vm8 = vcmp.ge.f32.partialorder %v16775_v13, 0.0  ;;  %v16777_v10 = vsub.f32 1.0, %v12541_v37  ;;  %v16778_v11 = vsub.f32 1.0, %v12544_v48  ;;  %v16808_v3 = vld [vmem:[#allocation85_spill] sm:$0xff] }
 0x632   : > { %v3582_v16 = vsub.f32 0.0, %v16768_v8  ;;  %v3584_v12 = vsub.f32 0.0, %v16770_v55  ;;  %v16776_v8 = vsub.f32 1.0, %v12538_v50  ;;  %v16779_v25 = vsub.f32 1.0, %v12547_v57  ;;  %v16818_v38 = vld [vmem:[#allocation65_spill] sm:$0xff] }
 0x633   : > { %v3585_v15 = vsub.f32 0.0, %v16771_v47  ;;  %v3587_v55 = vsub.f32 0.0, %v16777_v10  ;;  %v3588_v47 = vsub.f32 0.0, %v16778_v11  ;;  %vm3566_vm6 = vcmp.ge.f32.partialorder %v16780_v54, 0.0 }
 0x634   : > { %v3586_v35 = vsub.f32 0.0, %v16776_v8  ;;  %v3589_v39 = vsub.f32 0.0, %v16779_v25  ;;  %vm3567_vm3 = vcmp.ge.f32.partialorder %v16781_v9, 0.0  ;;  %vm3568_vm2 = vcmp.ge.f32.partialorder %v16782_v58, 0.0 }
 0x635   : > { %v16783_v13 = vsub.f32 1.0, %v12550_v46  ;;  %v16784_v8 = vsub.f32 1.0, %v12555_v22  ;;  %v16785_v10 = vsub.f32 1.0, %v12558_v33  ;;  %v16786_v11 = vsub.f32 1.0, %v12561_v17  ;;  %v12750_v31 = vld [vmem:[#allocation3 + $0x32] sm:$0xff] }
 0x636   : > { %v16787_v25 = vsub.f32 1.0, %v12564_v6  ;;  %v16788_v54 = vsub.f32 1.0, %v12569_v7  ;;  %v16789_v58 = vsub.f32 1.0, %v12572_v29  ;;  %v12714_v7 = vld [vmem:[#allocation3 + $0x38] sm:$0xff]  ;;  %v16798_v41 = vsub.f32 1.0, %v12510_v49  ;;  %5002 = vrot.lane.b32.xlu1 %v12750_v31, %s16267_s2 }
 0x637   : > { %v3590_v63 = vsub.f32 0.0, %v16783_v13  ;;  %v3591_v50 = vsub.f32 0.0, %v16784_v8  ;;  %v3592_v37 = vsub.f32 0.0, %v16785_v10  ;;  %v3593_v48 = vsub.f32 0.0, %v16786_v11  ;;  %4748 = vrot.lane.b32.xlu0 %v12714_v7, %s9497_s24 }
 0x638   : > { %v3594_v57 = vsub.f32 0.0, %v16787_v25  ;;  %v3595_v9 = vsub.f32 0.0, %v16788_v54  ;;  %v3596_v56 = vsub.f32 0.0, %v16789_v58  ;;  %v16790_v13 = vsub.f32 1.0, %v12575_v36 }
 0x639   : > { %v16791_v8 = vsub.f32 1.0, %v12578_v18  ;;  %v16792_v10 = vsub.f32 1.0, %v12581_v61  ;;  %v16793_v11 = vsub.f32 1.0, %v12584_v51  ;;  %v16794_v25 = vsub.f32 1.0, %v12498_v20 }
 0x63a   : > { %v3597_v46 = vsub.f32 0.0, %v16790_v13  ;;  %v16795_v58 = vsub.f32 1.0, %v12501_v60  ;;  %v16797_v51 = vsub.f32 1.0, %v12507_v24  ;;  %v16799_v60 = vsub.f32 1.0, %v12513_v53 }
 0x63b   : > { %v3598_v22 = vsub.f32 0.0, %v16791_v8  ;;  %v3599_v33 = vsub.f32 0.0, %v16792_v10  ;;  %v3600_v17 = vsub.f32 0.0, %v16793_v11  ;;  %v3605_v54 = vsel %vm3541_vm4, %v16794_v25, %v3573_v32  ;;  %4368 = vrot.lane.b32.xlu0 %v12714_v7, %s16600_s14 }
 0x63c   : > { %v3606_v13 = vsel %vm3542_vm5, %v16795_v58, %v3574_v42  ;;  %v16796_v8 = vsub.f32 1.0, %v12504_v23  ;;  %v3608_v20 = vsel %vm3544_vm9, %v16797_v51, %v3576_v30  ;;  %v3609_v32 = vsel %vm3545_vm10, %v16798_v41, %v3577_v44  ;;  %v16826_v58 = vld [vmem:[#allocation67_spill] sm:$0xff]  ;;  %v16828_v41 = vld [vmem:[#allocation80_spill] sm:$0xff] }
 0x63d   : > { %v3610_v23 = vsel %vm3546_vm11, %v16799_v60, %v3578_v62  ;;  %v16800_v59 = vsub.f32 1.0, %v12517_v0  ;;  %v16801_v51 = vsub.f32 1.0, %v12520_v14  ;;  %v16802_v44 = vsub.f32 1.0, %v12523_v19  ;;  %v16822_v62 = vld [vmem:[#allocation66_spill] sm:$0xff] }
 0x63e   : > { %v3607_v10 = vsel %vm3543_vm7, %v16796_v8, %v3575_v45  ;;  %v16803_v53 = vsub.f32 1.0, %v12526_v28  ;;  %v16804_v43 = vsub.f32 1.0, %v12529_v34  ;;  %v16809_v4 = vsub.f32 1.0, %v16808_v3  ;;  %v16812_v28 = vld [vmem:[#allocation87_spill] sm:$0xff]  ;;  %v16814_v34 = vld [vmem:[#allocation64_spill] sm:$0xff] }
 0x63f   : > { %v3611_v24 = vsel %vm3547_vm13, %v16800_v59, %v3579_v1  ;;  %v3612_v49 = vsel %vm3548_vm14, %v16801_v51, %v3580_v26  ;;  %v3613_v40 = vsel %vm3549_vm15, %v16802_v44, %v3581_v52  ;;  %v16805_v1 = vld [vmem:[#allocation101_spill] sm:$0xff]  ;;  %v16810_v52 = vld [vmem:[#allocation63_spill] sm:$0xff]  ;;  %vm16815_vm5 = vcmp.ge.f32.partialorder %v16814_v34, 0.0  ;;  %v16830_v59 = vld [vmem:[#allocation68_spill] sm:$0xff] }
 0x640   : > { %v3614_v0 = vsel %vm3550_vm1, %v16803_v53, %v3582_v16  ;;  %v3615_v14 = vsel %vm3551_vm0, %v16804_v43, %v3583_v2  ;;  %v16806_v21 = vsub.f32 1.0, %v16805_v1  ;;  %vm16811_vm4 = vcmp.ge.f32.partialorder %v16810_v52, 0.0  ;;  %v16816_v2 = vld [vmem:[#allocation49_spill] sm:$0xff]  ;;  %v16836_v43 = vld [vmem:[#allocation82_spill] sm:$0xff]  ;;  %v16845_v52 = vld [vmem:[#allocation72_spill] sm:$0xff] }
 0x641   : > { %v3617_v30 = vsel %vm16811_vm4, %v16809_v4, %v3585_v15  ;;  %v16813_v16 = vsub.f32 1.0, %v16812_v28  ;;  %v16817_v27 = vsub.f32 1.0, %v16816_v2  ;;  %vm16819_vm0 = vcmp.ge.f32.partialorder %v16818_v38, 0.0  ;;  %v16824_v15 = vld [vmem:[#allocation93_spill] sm:$0xff]  ;;  %v16842_v4 = vld [vmem:[#allocation71_spill] sm:$0xff] }
 0x642   : > { %v3616_v19 = vsel %vm3552_vm12, %v16806_v21, %v3584_v12  ;;  %v16820_v12 = vld [vmem:[#allocation116_spill] sm:$0xff]  ;;  %vm16823_vm12 = vcmp.ge.f32.partialorder %v16822_v62, 0.0  ;;  %v16825_v25 = vsub.f32 1.0, %v16824_v15  ;;  %vm16827_vm7 = vcmp.ge.f32.partialorder %v16826_v58, 0.0  ;;  %v16832_v51 = vld [vmem:[#allocation81_spill] sm:$0xff]  ;;  %v16838_v21 = vld [vmem:[#allocation70_spill] sm:$0xff] }
 0x643   : > { %v3618_v5 = vsel %vm16815_vm5, %v16813_v16, %v3586_v35  ;;  %v3619_v42 = vsel %vm16819_vm0, %v16817_v27, %v3587_v55  ;;  %v16821_v45 = vsub.f32 1.0, %v16820_v12  ;;  %v16829_v60 = vsub.f32 1.0, %v16828_v41  ;;  %v16834_v53 = vld [vmem:[#allocation69_spill] sm:$0xff]  ;;  %v16847_v16 = vld [vmem:[#allocation83_spill] sm:$0xff]  ;;  %v16852_v27 = vld [vmem:[#allocation74_spill] sm:$0xff] }
 0x644   : > { %v3621_v8 = vsel %vm16827_vm7, %v16825_v25, %v3589_v39  ;;  %vm16831_vm9 = vcmp.ge.f32.partialorder %v16830_v59, 0.0  ;;  %v16833_v44 = vsub.f32 1.0, %v16832_v51  ;;  %vm16835_vm10 = vcmp.ge.f32.partialorder %v16834_v53, 0.0  ;;  %v16840_v26 = vld [vmem:[#allocation17_spill] sm:$0xff]  ;;  %v12820_v62 = vld [vmem:[#allocation3 + $0x39] sm:$0xff]  ;;  %v16860_v58 = vld [vmem:[#allocation18_spill] sm:$0xff] }
 0x645   : > { %v3620_v11 = vsel %vm16823_vm12, %v16821_v45, %v3588_v47  ;;  %v3622_v35 = vsel %vm16831_vm9, %v16829_v60, %v3590_v63  ;;  %v16837_v1 = vsub.f32 1.0, %v16836_v43  ;;  %vm16839_vm11 = vcmp.ge.f32.partialorder %v16838_v21, 0.0  ;;  %v16849_v34 = vld [vmem:[#allocation73_spill] sm:$0xff]  ;;  %4496 = vrot.lane.b32.xlu1 %v12820_v62, %s16605_s29  ;;  %4876 = vrot.lane.b32.xlu0 %v12820_v62, %s9498_s15 }
 0x646   : > { %v3623_v55 = vsel %vm16835_vm10, %v16833_v44, %v3591_v50  ;;  %v16841_v3 = vsub.f32 1.0, %v16840_v26  ;;  %vm16843_vm13 = vcmp.ge.f32.partialorder %v16842_v4, 0.0  ;;  %v16844_v63 = vsub.f32 1.0, %v12564_v6  ;;  %v16863_v4 = vld [vmem:[#allocation21_spill] sm:$0xff] }
 0x647   : > { %v3624_v47 = vsel %vm16839_vm11, %v16837_v1, %v3592_v37  ;;  %vm16846_vm14 = vcmp.ge.f32.partialorder %v16845_v52, 0.0  ;;  %v16848_v50 = vsub.f32 1.0, %v16847_v16  ;;  %vm16850_vm15 = vcmp.ge.f32.partialorder %v16849_v34, 0.0 }
 0x648   : > { %v3625_v39 = vsel %vm16843_vm13, %v16841_v3, %v3593_v48  ;;  %v3626_v28 = vsel %vm16846_vm14, %v16844_v63, %v3594_v57  ;;  %v16851_v37 = vsub.f32 1.0, %v12572_v29  ;;  %vm16853_vm1 = vcmp.ge.f32.partialorder %v16852_v27, 0.0  ;;  %v16872_v27 = vld [vmem:[#allocation29_spill] sm:$0xff]  ;;  %v16876_v57 = vld [vmem:[#allocation32_spill] sm:$0xff] }
 0x649   : > { %v3627_v2 = vsel %vm16850_vm15, %v16848_v50, %v3595_v9  ;;  %v16854_v48 = vsub.f32 1.0, %v12575_v36  ;;  %v16856_v6 = vsub.f32 1.0, %v12578_v18  ;;  %v16858_v25 = vsub.f32 1.0, %v12581_v61  ;;  %v16870_v50 = vld [vmem:[#allocation27_spill] sm:$0xff] }
 0x64a   : > { %v3628_v38 = vsel %vm16853_vm1, %v16851_v37, %v3596_v56  ;;  %v16861_v41 = vsub.f32 1.0, %v16860_v58  ;;  %v3637_v60 = vadd.f32 1.0, %v3605_v54  ;;  %v3639_v59 = vadd.f32 1.0, %v3607_v10 }
 0x64b   : > { %v3629_v45 = vsel %vm3565_vm8, %v16854_v48, %v3597_v46  ;;  %v3630_v15 = vsel %vm3566_vm6, %v16856_v6, %v3598_v22  ;;  %v3631_v29 = vsel %vm3567_vm3, %v16858_v25, %v3599_v33  ;;  %v3638_v46 = vadd.f32 1.0, %v3606_v13  ;;  %v16874_v48 = vld [vmem:[#allocation30_spill] sm:$0xff]  ;;  %v16877_v25 = vld [vmem:[#allocation33_spill] sm:$0xff] }
 0x64c   : > { %v3632_v36 = vsel %vm3568_vm2, %v16861_v41, %v3600_v17  ;;  %v3640_v18 = vadd.f32 1.0, %v3608_v20  ;;  %v3641_v51 = vadd.f32 1.0, %v3609_v32  ;;  %v3642_v44 = vadd.f32 1.0, %v3610_v23  ;;  %v12838_v17 = vld [vmem:[#allocation3 + $0x3a] sm:$0xff] }
 0x64d   : > { %v3643_v22 = vadd.f32 1.0, %v3611_v24  ;;  %v3644_v53 = vadd.f32 1.0, %v3612_v49  ;;  %v3645_v61 = vadd.f32 1.0, %v3613_v40  ;;  %v3646_v43 = vadd.f32 1.0, %v3614_v0  ;;  %5004 = vrot.lane.b32.xlu1 %v12838_v17, %s16267_s2  ;;  %v16883_v41 = vld [vmem:[#allocation35_spill] sm:$0xff] }
 0x64e   : > { %v3647_v1 = vadd.f32 1.0, %v3615_v14  ;;  %v3648_v33 = vadd.f32 1.0, %v3616_v19  ;;  %v3649_v21 = vadd.f32 1.0, %v3617_v30  ;;  %v3650_v54 = vadd.f32 1.0, %v3618_v5  ;;  %v16864_v5 = vld [vmem:[#allocation84_spill] sm:$0xff] }
 0x64f   : > { %v3651_v26 = vadd.f32 1.0, %v3619_v42  ;;  %v3652_v3 = vadd.f32 1.0, %v3620_v11  ;;  %v3653_v13 = vadd.f32 1.0, %v3621_v8  ;;  %v3654_v10 = vadd.f32 1.0, %v3622_v35  ;;  %4114 = vrot.lane.b32.xlu0 %v16864_v5, %s16406_s25  ;;  %v16865_v42 = vld [vmem:[#allocation22_spill] sm:$0xff]  ;;  %v16866_v8 = vld [vmem:[#allocation23_spill] sm:$0xff] }
 0x650   : > { %v3655_v20 = vadd.f32 1.0, %v3623_v55  ;;  %v3656_v32 = vadd.f32 1.0, %v3624_v47  ;;  %v3657_v23 = vadd.f32 1.0, %v3625_v39  ;;  %v3658_v24 = vadd.f32 1.0, %v3626_v28  ;;  %v16867_v35 = vld [vmem:[#allocation24_spill] sm:$0xff]  ;;  %v16868_v47 = vld [vmem:[#allocation25_spill] sm:$0xff] }
 0x651   : > { %v3659_v49 = vadd.f32 1.0, %v3627_v2  ;;  %v3660_v40 = vadd.f32 1.0, %v3628_v38  ;;  %v3661_v0 = vadd.f32 1.0, %v3629_v45  ;;  %v3662_v14 = vadd.f32 1.0, %v3630_v15  ;;  %4242 = vrot.lane.b32.xlu1 %v12750_v31, %s16403_s27  ;;  %v16869_v28 = vld [vmem:[#allocation26_spill] sm:$0xff]  ;;  %v16871_v2 = vld [vmem:[#allocation28_spill] sm:$0xff] }
 0x652   : > { %v3663_v19 = vadd.f32 1.0, %v3631_v29  ;;  %v3664_v30 = vadd.f32 1.0, %v3632_v36  ;;  %v3669_v63 = vmul.f32 %v3637_v60, %v16863_v4  ;;  %v3670_v11 = vmul.f32 %v3638_v46, %v16865_v42  ;;  %v16875_v45 = vld [vmem:[#allocation31_spill] sm:$0xff]  ;;  %v16882_v29 = vld [vmem:[#allocation34_spill] sm:$0xff]  ;;  %v16884_v36 = vld [vmem:[#allocation36_spill] sm:$0xff] }
 0x653   : > { %v3671_v52 = vmul.f32 %v3639_v59, %v16866_v8  ;;  %v3672_v55 = vmul.f32 %v3640_v18, %v16867_v35  ;;  %v3673_v39 = vmul.f32 %v3641_v51, %v16868_v47  ;;  %v3674_v16 = vmul.f32 %v3642_v44, %v16869_v28  ;;  %v16885_v46 = vld [vmem:[#allocation37_spill] sm:$0xff]  ;;  %4622 = vrot.lane.b32.xlu0 %v12750_v31, %s9496_s16  ;;  %v16890_v18 = vld [vmem:[#allocation38_spill] sm:$0xff]  ;;  %v16891_v44 = vld [vmem:[#allocation39_spill] sm:$0xff] }
 0x654   : > { %v3675_v34 = vmul.f32 %v3643_v22, %v16870_v50  ;;  %v3676_v37 = vmul.f32 %v3644_v53, %v16871_v2  ;;  %v3677_v38 = vmul.f32 %v3645_v61, %v16872_v27  ;;  %vm16873_vm2 = vcmask 64512   ;;  %v16892_v53 = vld [vmem:[#allocation40_spill] sm:$0xff]  ;;  %v5358_v31 = vld [vmem:[%s16898_s6] sm:$0xff]  ;;  %v12968_v2 = vpop.permute.xlu1 %4108  ;;  %v4107_v27 = vpop.permute.xlu0 %4106 }
 0x655   : > { %3757 = vst.msk [vmem:[#allocation3 + $0x49] sm:$0xff] %vm16873_vm2, %v3669_v63  ;;  %v3678_v12 = vmul.f32 %v3646_v43, %v16874_v48  ;;  %v3679_v6 = vmul.f32 %v3647_v1, %v16875_v45  ;;  %v3680_v15 = vmul.f32 %v3648_v33, %v16876_v57  ;;  %v3681_v9 = vmul.f32 %v3649_v21, %v16877_v25  ;;  %vm16878_vm3 = vmmov %vm16873_vm2  ;;  %v16893_v43 = vld [vmem:[#allocation41_spill] sm:$0xff]  ;;  %v16899_v33 = vld [vmem:[#allocation42_spill] sm:$0xff] }
 0x656   : > { %3758 = vst.msk [vmem:[#allocation3 + $0x51] sm:$0xff] %vm16878_vm3, %v3670_v11  ;;  %vm16879_vm6 = vmmov %vm16873_vm2  ;;  %v3682_v58 = vmul.f32 %v3650_v54, %v16882_v29  ;;  %v3683_v56 = vmul.f32 %v3651_v26, %v16883_v41  ;;  %v3684_v60 = vmul.f32 %v3652_v3, %v16884_v36  ;;  %v3685_v59 = vmul.f32 %v3653_v13, %v16885_v46  ;;  %v16900_v54 = vld [vmem:[#allocation43_spill] sm:$0xff]  ;;  %v16901_v3 = vld [vmem:[#allocation44_spill] sm:$0xff] }
 0x657   : > { %3759 = vst.msk [vmem:[#allocation3 + $0x61] sm:$0xff] %vm16879_vm6, %v3671_v52  ;;  %vm16880_vm8 = vmmov %vm16873_vm2  ;;  %v3686_v51 = vmul.f32 %v3654_v10, %v16890_v18  ;;  %v3687_v22 = vmul.f32 %v3655_v20, %v16891_v44  ;;  %v3688_v61 = vmul.f32 %v3656_v32, %v16892_v53  ;;  %v3689_v1 = vmul.f32 %v3657_v23, %v16893_v43  ;;  %v16902_v10 = vld [vmem:[#allocation45_spill] sm:$0xff]  ;;  %v5359_v32 = vld [vmem:[%s16898_s6 + $0x8] sm:$0xff] }
 0x658   : > { %3760 = vst.msk [vmem:[#allocation3 + $0x69] sm:$0xff] %vm16880_vm8, %v3672_v55  ;;  %vm16881_vm4 = vmmov %vm16873_vm2  ;;  %v3690_v21 = vmul.f32 %v3658_v24, %v16899_v33  ;;  %v3691_v26 = vmul.f32 %v3659_v49, %v16900_v54  ;;  %v3692_v13 = vmul.f32 %v3660_v40, %v16901_v3  ;;  %v3693_v20 = vmul.f32 %v3661_v0, %v16902_v10  ;;  %v5360_v23 = vld [vmem:[%s16898_s6 + $0x10] sm:$0xff]  ;;  %v5361_v24 = vld [vmem:[%s16898_s6 + $0x18] sm:$0xff] }
 0x659   : > { %3761 = vst.msk [vmem:[#allocation3 + $0x79] sm:$0xff] %vm16881_vm4, %v3673_v39  ;;  %vm16886_vm5 = vmmov %vm16873_vm2  ;;  %v16907_v49 = vld [vmem:[#allocation46_spill] sm:$0xff]  ;;  %v16909_v63 = vld [vmem:[#allocation88_spill] sm:$0xff]  ;;  %4116 = vrot.lane.b32.xlu0 %v12820_v62, %s16406_s25 }
 0x65a   : > { %3762 = vst.msk [vmem:[#allocation3 + $0x81] sm:$0xff] %vm16886_vm5, %v3674_v16  ;;  %vm16887_vm0 = vmmov %vm16873_vm2  ;;  %v3694_v40 = vmul.f32 %v3662_v14, %v16907_v49  ;;  %v16908_v0 = vld [vmem:[#allocation86_spill] sm:$0xff]  ;;  %v3696_v5 = vmul.f32 %v3664_v30, %v16909_v63  ;;  %v8776_v30 = vpack.c.bf16 %v5361_v24, %v5360_v23  ;;  %v5363_v62 = vld [vmem:[%s16898_s6 + $0x28] sm:$0xff] }
 0x65b   : > { %3763 = vst.msk [vmem:[#allocation3 + $0x91] sm:$0xff] %vm16887_vm0, %v3675_v34  ;;  %vm16888_vm12 = vmmov %vm16887_vm0  ;;  %v3695_v4 = vmul.f32 %v3663_v19, %v16908_v0  ;;  %v8772_v19 = vpack.c.bf16 %v5359_v32, %v5358_v31  ;;  %v5362_v42 = vld [vmem:[%s16898_s6 + $0x20] sm:$0xff]  ;;  %v5364_v8 = vld [vmem:[%s16898_s6 + $0x30] sm:$0xff] }
 0x65c   : > { %3764 = vst.msk [vmem:[#allocation3 + $0x99] sm:$0xff] %vm16888_vm12, %v3676_v37  ;;  %vm16889_vm7 = vmmov %vm16887_vm0  ;;  %v12918_v14 = vld [vmem:[#allocation3 + $0x48] sm:$0xff]  ;;  %v8780_v11 = vpack.c.bf16 %v5363_v62, %v5362_v42  ;;  %v5366_v39 = vld [vmem:[%s16898_s6 + $0x40] sm:$0xff] }
 0x65d   : > { %3765 = vst.msk [vmem:[#allocation3 + $0xa9] sm:$0xff] %vm16889_vm7, %v3677_v38  ;;  %vm16894_vm9 = vmmov %vm16887_vm0  ;;  %4750 = vrot.lane.b32.xlu1 %v12918_v14, %s9497_s24  ;;  %8773 = vmatprep.subr.bf16.mxu1 %v8772_v19  ;;  %v5365_v52 = vld [vmem:[%s16898_s6 + $0x38] sm:$0xff]  ;;  %v12941_v47 = vld [vmem:[#allocation3 + $0x50] sm:$0xff]  ;;  %v12977_v38 = vpop.permute.xlu1 %4236 }
 0x65e   : > { %3766 = vst.msk [vmem:[#allocation3 + $0xb1] sm:$0xff] %vm16894_vm9, %v3678_v12  ;;  %vm16895_vm10 = vmmov %vm16887_vm0  ;;  %4624 = vrot.lane.b32.xlu0 %v12838_v17, %s9496_s16  ;;  %8775 = vmatpush3.bf16.msra.mxu1 %v8772_v19  ;;  %v4012_v35 = vld [vmem:[#allocation3 + $0x49] sm:$0xff]  ;;  %v8784_v55 = vpack.c.bf16 %v5365_v52, %v5364_v8  ;;  %v4013_v28 = vld [vmem:[#allocation3 + $0x51] sm:$0xff] }
 0x65f   : > { %3767 = vst.msk [vmem:[#allocation3 + $0xc1] sm:$0xff] %vm16895_vm10, %v3679_v6  ;;  %vm16896_vm11 = vmmov %vm16887_vm0  ;;  %8777 = vmatprep.subr.bf16.mxu1 %v8776_v30  ;;  %v4045_v16 = vld [vmem:[#allocation3 + $0x52] sm:$0xff]  ;;  %v12959_v50 = vld [vmem:[#allocation3 + $0x60] sm:$0xff]  ;;  %v4235_v6 = vpop.permute.xlu0 %4234 }
 0x660   : > { %3768 = vst.msk [vmem:[#allocation3 + $0xc9] sm:$0xff] %vm16896_vm11, %v3680_v15  ;;  %vm16897_vm13 = vmmov %vm16887_vm0  ;;  %v4014_v34 = vld [vmem:[#allocation3 + $0x61] sm:$0xff]  ;;  %v4015_v12 = vld [vmem:[#allocation3 + $0x69] sm:$0xff] }
 0x661   : > { %3769 = vst.msk [vmem:[#allocation3 + $0xd9] sm:$0xff] %vm16897_vm13, %v3681_v9  ;;  %vm16903_vm14 = vmmov %vm16887_vm0  ;;  %4370 = vrot.lane.b32.xlu1 %v12918_v14, %s16600_s14  ;;  %v12970_v37 = vld [vmem:[#allocation3 + $0x68] sm:$0xff]  ;;  %v12981_v45 = vpop.permute.xlu1 %4364  ;;  %v4016_v36 = vld [vmem:[#allocation3 + $0x79] sm:$0xff] }
 0x662   : > { %3770 = vst.msk [vmem:[#allocation3 + $0xe1] sm:$0xff] %vm16903_vm14, %v3682_v58  ;;  %vm16904_vm15 = vmmov %vm16887_vm0  ;;  %4244 = vrot.lane.b32.xlu0 %v12838_v17, %s16403_s27  ;;  %8779 = vmatpush3.bf16.msra.mxu1 %v8776_v30  ;;  %v4044_v17 = vld [vmem:[#allocation3 + $0x4a] sm:$0xff]  ;;  %v4046_v48 = vld [vmem:[#allocation3 + $0x62] sm:$0xff]  ;;  %vm16921_vm14 = vcmask 130048  }
 0x663   : > { %3771 = vst.msk [vmem:[#allocation3 + $0xf1] sm:$0xff] %vm16904_vm15, %v3683_v56  ;;  %vm16905_vm1 = vmmov %vm16887_vm0  ;;  %8781 = vmatprep.subr.bf16.mxu1 %v8780_v11  ;;  %v4047_v57 = vld [vmem:[#allocation3 + $0x6a] sm:$0xff]  ;;  %v4363_v15 = vpop.permute.xlu0 %4362  ;;  %v12991_v58 = vld [vmem:[#allocation3 + $0x78] sm:$0xff]  ;;  %vm5226_vm15 = vcmask 326656  }
 0x664   : > { %3772 = vst.msk [vmem:[#allocation3 + $0xf9] sm:$0xff] %vm16905_vm1, %v3684_v60  ;;  %vm16906_vm2 = vmmov %vm16887_vm0  ;;  %v13002_v60 = vld [vmem:[#allocation3 + $0x80] sm:$0xff]  ;;  %vm16922_vm1 = vcmask 195584  }
 0x665   : > { %3773 = vst.msk [vmem:[#allocation3 + $0x109] sm:$0xff] %vm16906_vm2, %v3685_v59  ;;  %vm16910_vm3 = vmmov %vm16887_vm0  ;;  %4878 = vrot.lane.b32.xlu1 %v4012_v35, %s9498_s15  ;;  %v12986_v25 = vpop.permute.xlu1 %4110  ;;  %v3785_v53 = vld [vmem:[#allocation3] sm:$0xff]  ;;  %vm5259_vm2 = vcmask 392192  }
 0x666   : > { %3774 = vst.msk [vmem:[#allocation3 + $0x111] sm:$0xff] %vm16910_vm3, %v3686_v51  ;;  %vm16911_vm6 = vmmov %vm16887_vm0  ;;  %4752 = vrot.lane.b32.xlu0 %v12941_v47, %s9497_s24  ;;  %8783 = vmatpush3.bf16.msra.mxu1 %v8780_v11  ;;  %v4048_v51 = vld [vmem:[#allocation3 + $0x7a] sm:$0xff]  ;;  %v4049_v31 = vld [vmem:[#allocation3 + $0x82] sm:$0xff]  ;;  %vm16923_vm3 = vcmask 261120  }
 0x667   : > { %3775 = vst.msk [vmem:[#allocation3 + $0x121] sm:$0xff] %vm16911_vm6, %v3687_v22  ;;  %vm16912_vm8 = vmmov %vm16887_vm0  ;;  %8785 = vmatprep.subr.bf16.mxu1 %v8784_v55  ;;  %v4491_v9 = vpop.permute.xlu0 %4490  ;;  %v4017_v22 = vld [vmem:[#allocation3 + $0x81] sm:$0xff]  ;;  %vm5292_vm6 = vcmask 457728  }
 0x668   : > { %3776 = vst.msk [vmem:[#allocation3 + $0x129] sm:$0xff] %vm16912_vm8, %v3688_v61  ;;  %vm16913_vm4 = vmmov %vm16887_vm0  ;;  %vm5325_vm8 = vcmask 523264  }
 0x669   : > { %3777 = vst.msk [vmem:[#allocation3 + $0x139] sm:$0xff] %vm16913_vm4, %v3689_v1  ;;  %vm16914_vm5 = vmmov %vm16887_vm0  ;;  %4498 = vrot.lane.b32.xlu1 %v4012_v35, %s16605_s29  ;;  %v4619_v29 = vpop.permute.xlu1 %4618  ;;  %vm5374_vm4 = vcmask 588800  }
 0x66a   : > { %3778 = vst.msk [vmem:[#allocation3 + $0x141] sm:$0xff] %vm16914_vm5, %v3690_v21  ;;  %vm16915_vm12 = vmmov %vm16887_vm0  ;;  %4372 = vrot.lane.b32.xlu0 %v12941_v47, %s16600_s14  ;;  %8787 = vmatpush3.bf16.msra.mxu1 %v8784_v55 }
 0x66b   : > { %3779 = vst.msk [vmem:[#allocation3 + $0x151] sm:$0xff] %vm16887_vm0, %v3691_v26  ;;  %vm16916_vm7 = vmmov %vm16887_vm0  ;;  %8694 = vmatprep.subr.mxu1 %v5366_v39  ;;  %v4493_v41 = vpop.permute.xlu0 %4492  ;;  %v3786_v26 = vld [vmem:[#allocation3 + $0x8] sm:$0xff] }
 0x66c   : > { %3780 = vst.msk [vmem:[#allocation3 + $0x159] sm:$0xff] %vm16915_vm12, %v3692_v13  ;;  %vm16917_vm9 = vmmov %vm16887_vm0 }
 0x66d   : > { %3781 = vst.msk [vmem:[#allocation3 + $0x169] sm:$0xff] %vm16916_vm7, %v3693_v20  ;;  %vm16918_vm10 = vmmov %vm16887_vm0  ;;  %5006 = vrot.lane.b32.xlu1 %v4044_v17, %s16267_s2  ;;  %v12998_v56 = vpop.permute.xlu1 %4238 }
 0x66e   : > { %3782 = vst.msk [vmem:[#allocation3 + $0x171] sm:$0xff] %vm16917_vm9, %v3694_v40  ;;  %vm16919_vm11 = vmmov %vm16887_vm0  ;;  %4880 = vrot.lane.b32.xlu0 %v4013_v28, %s9498_s15  ;;  %8695 = vmatpush3.msra.mxu1 %v5366_v39  ;;  %v13035_v40 = vld [vmem:[#allocation3 + $0x90] sm:$0xff]  ;;  %v13061_v39 = vld [vmem:[#allocation3 + $0x98] sm:$0xff] }
 0x66f   : > { %3783 = vst.msk [vmem:[#allocation3 + $0x181] sm:$0xff] %vm16918_vm10, %v3695_v4  ;;  %v13006_v46 = vpop.permute.xlu0 %4112  ;;  %vm16920_vm13 = vmmov %vm16887_vm0 }
 0x670   : > { %3784 = vst.msk [vmem:[#allocation3 + $0x189] sm:$0xff] %vm16919_vm11, %v3696_v5  ;;  %v5098_v43 = vsel %vm16920_vm13, %v3785_v53, %v4107_v27  ;;  %vm16924_vm5 = vmmov %vm16887_vm0  ;;  %v3788_v53 = vld [vmem:[#allocation3 + $0x20] sm:$0xff] }
 0x671   : > { %4500 = vrot.lane.b32.xlu1 %v4013_v28, %s16605_s29  ;;  %v5130_v21 = vsel %vm16921_vm14, %v5098_v43, %v4235_v6  ;;  %v5099_v32 = vsel %vm16924_vm5, %v3786_v26, %v12968_v2  ;;  %vm16925_vm0 = vmmov %vm16921_vm14  ;;  %v4019_v2 = vld [vmem:[#allocation3 + $0x99] sm:$0xff] }
 0x672   : > { %4118 = vrot.lane.b32.xlu0 %v4012_v35, %s16406_s25  ;;  %v5162_v54 = vsel %vm16922_vm1, %v5130_v21, %v4363_v15  ;;  %v5131_v0 = vsel %vm16925_vm0, %v5099_v32, %v12977_v38  ;;  %vm16926_vm12 = vmmov %vm16922_vm1  ;;  %v4018_v35 = vld [vmem:[#allocation3 + $0x91] sm:$0xff] }
 0x673   : > { %v4621_v44 = vpop.permute.xlu0 %4620  ;;  %v5194_v3 = vsel %vm16923_vm3, %v5162_v54, %v4491_v9  ;;  %v5163_v63 = vsel %vm16926_vm12, %v5131_v0, %v12981_v45  ;;  %vm16927_vm7 = vmmov %vm16923_vm3  ;;  %v4052_v0 = vld [vmem:[#allocation3 + $0xaa] sm:$0xff] }
 0x674   : > { %v5227_v13 = vsel %vm5226_vm15, %v5194_v3, %v4619_v29  ;;  %v5195_v19 = vsel %vm16927_vm7, %v5163_v63, %v4493_v41  ;;  %vm16928_vm9 = vmmov %vm16924_vm5  ;;  %v4020_v3 = vld [vmem:[#allocation3 + $0xa9] sm:$0xff]  ;;  %v4021_v63 = vld [vmem:[#allocation3 + $0xb1] sm:$0xff] }
 0x675   : > { %5008 = vrot.lane.b32.xlu1 %v4045_v16, %s16267_s2  ;;  %v5228_v30 = vsel %vm5226_vm15, %v5195_v19, %v4621_v44  ;;  %vm16929_vm10 = vmmov %vm16925_vm0 }
 0x676   : > { %4626 = vrot.lane.b32.xlu0 %v4044_v17, %s9496_s16  ;;  %vm16930_vm11 = vmmov %vm16922_vm1 }
 0x677   : > { %v13018_v1 = vpop.permute.xlu0 %4240  ;;  %vm16931_vm13 = vmmov %vm16923_vm3 }
 0x678   : > { %vm16932_vm14 = vmmov %vm16924_vm5 }
 0x679   : > { %4246 = vrot.lane.b32.xlu1 %v4044_v17, %s16403_s27  ;;  %v5101_v43 = vsel %vm16932_vm14, %v3788_v53, %v13006_v46  ;;  %vm16933_vm1 = vmmov %vm16925_vm0 }
 0x67a   : > { %4120 = vrot.lane.b32.xlu0 %v4013_v28, %s16406_s25  ;;  %vm16934_vm3 = vmmov %vm16930_vm11 }
 0x67b   : > { %vm16935_vm5 = vmmov %vm16927_vm7 }
 0x67c   : > { %vm16937_vm0 = vmmov %vm16928_vm9 }
 0x67d   : > { %4754 = vrot.lane.b32.xlu1 %v12959_v50, %s9497_s24  ;;  %vm16938_vm12 = vmmov %vm16933_vm1 }
 0x67e   : > { %4628 = vrot.lane.b32.xlu0 %v4045_v16, %s9496_s16  ;;  %vm16939_vm7 = vmmov %vm16934_vm3 }
 0x67f   : > { %vm16944_vm14 = vmmov %vm16935_vm5 }
 0x681   : > { %4374 = vrot.lane.b32.xlu1 %v12959_v50, %s16600_s14 }
 0x682   : > { %4248 = vrot.lane.b32.xlu0 %v4045_v16, %s16403_s27  ;;  %v4050_v16 = vld [vmem:[#allocation3 + $0x92] sm:$0xff] }
 0x685   : > { %4882 = vrot.lane.b32.xlu1 %v4014_v34, %s9498_s15 }
 0x686   : > { %4756 = vrot.lane.b32.xlu0 %v12970_v37, %s9497_s24 }
 0x689   : > { %4502 = vrot.lane.b32.xlu1 %v4014_v34, %s16605_s29 }
 0x68a   : > { %4376 = vrot.lane.b32.xlu0 %v12970_v37, %s16600_s14 }
 0x68d   : > { %5010 = vrot.lane.b32.xlu1 %v4046_v48, %s16267_s2 }
 0x68e   : > { %4884 = vrot.lane.b32.xlu0 %v4015_v12, %s9498_s15 }
 0x691   : > { %4504 = vrot.lane.b32.xlu1 %v4015_v12, %s16605_s29 }
 0x692   : > { %4122 = vrot.lane.b32.xlu0 %v4014_v34, %s16406_s25 }
 0x695   : > { %5012 = vrot.lane.b32.xlu1 %v4047_v57, %s16267_s2 }
 0x696   : > { %4630 = vrot.lane.b32.xlu0 %v4046_v48, %s9496_s16 }
 0x697   : > { %v4747_v59 = vpop.permute.xlu1 %4746 }
 0x698   : > { %v5260_v10 = vsel %vm5259_vm2, %v5227_v13, %v4747_v59 }
 0x699   : > { %4250 = vrot.lane.b32.xlu1 %v4046_v48, %s16403_s27 }
 0x69a   : > { %4124 = vrot.lane.b32.xlu0 %v4015_v12, %s16406_s25  ;;  %v4051_v12 = vld [vmem:[#allocation3 + $0x9a] sm:$0xff] }
 0x69b   : > { %v13011_v18 = vpop.permute.xlu1 %4366 }
 0x69d   : > { %4758 = vrot.lane.b32.xlu1 %v12991_v58, %s9497_s24 }
 0x69e   : > { %4632 = vrot.lane.b32.xlu0 %v4047_v57, %s9496_s16 }
 0x69f   : > { %v4875_v61 = vpop.permute.xlu1 %4874 }
 0x6a0   : > { %v5293_v23 = vsel %vm5292_vm6, %v5260_v10, %v4875_v61 }
 0x6a1   : > { %4378 = vrot.lane.b32.xlu1 %v12991_v58, %s16600_s14 }
 0x6a2   : > { %4252 = vrot.lane.b32.xlu0 %v4047_v57, %s16403_s27  ;;  %v3787_v57 = vld [vmem:[#allocation3 + $0x18] sm:$0xff] }
 0x6a3   : > { %v13020_v33 = vpop.permute.xlu1 %4494  ;;  %v5100_v15 = vsel %vm16928_vm9, %v3787_v57, %v12986_v25  ;;  %vm16940_vm9 = vmmov %vm16935_vm5 }
 0x6a4   : > { %v5132_v29 = vsel %vm16929_vm10, %v5100_v15, %v12998_v56  ;;  %vm16941_vm10 = vmmov %vm16937_vm0 }
 0x6a5   : > { %4886 = vrot.lane.b32.xlu1 %v4016_v36, %s9498_s15  ;;  %v5164_v41 = vsel %vm16930_vm11, %v5132_v29, %v13011_v18  ;;  %vm16942_vm11 = vmmov %vm16933_vm1 }
 0x6a6   : > { %4760 = vrot.lane.b32.xlu0 %v13002_v60, %s9497_s24  ;;  %v5196_v59 = vsel %vm16931_vm13, %v5164_v41, %v13020_v33  ;;  %v5133_v33 = vsel %vm16933_vm1, %v5101_v43, %v13018_v1  ;;  %vm16943_vm13 = vmmov %vm16934_vm3  ;;  %v4054_v43 = vld [vmem:[#allocation3 + $0xc2] sm:$0xff] }
 0x6a7   : > { %vm16945_vm1 = vmmov %vm16937_vm0 }
 0x6a8   : > { %v5003_v24 = vpop.permute.xlu1 %5002 }
 0x6a9   : > { %4506 = vrot.lane.b32.xlu1 %v4016_v36, %s16605_s29  ;;  %v4749_v20 = vpop.permute.xlu0 %4748  ;;  %v5326_v49 = vsel %vm5325_vm8, %v5293_v23, %v5003_v24 }
 0x6aa   : > { %4380 = vrot.lane.b32.xlu0 %v13002_v60, %s16600_s14  ;;  %8696 = vmatprep.mubr.msk.f32.mxu1 %vm5374_vm4, %v5326_v49  ;;  %v5261_v42 = vsel %vm5259_vm2, %v5228_v30, %v4749_v20  ;;  %v13120_v20 = vld [vmem:[#allocation3 + $0xb0] sm:$0xff] }
 0x6ad   : > { %5014 = vrot.lane.b32.xlu1 %v4048_v51, %s16267_s2  ;;  %v13040_v4 = vpop.permute.xlu0 %4368 }
 0x6ae   : > { %4888 = vrot.lane.b32.xlu0 %v4017_v22, %s9498_s15  ;;  %v5165_v21 = vsel %vm16934_vm3, %v5133_v33, %v13040_v4  ;;  %v4023_v33 = vld [vmem:[#allocation3 + $0xc9] sm:$0xff]  ;;  %vm16946_vm3 = vmmov %vm16942_vm11 }
 0x6b1   : > { %4508 = vrot.lane.b32.xlu1 %v4017_v22, %s16605_s29 }
 0x6b2   : > { %4126 = vrot.lane.b32.xlu0 %v4016_v36, %s16406_s25 }
 0x6b5   : > { %5016 = vrot.lane.b32.xlu1 %v4049_v31, %s16267_s2 }
 0x6b6   : > { %4634 = vrot.lane.b32.xlu0 %v4048_v51, %s9496_s16 }
 0x6b7   : > { %v13046_v5 = vpop.permute.xlu1 %4496  ;;  %v4877_v62 = vpop.permute.xlu0 %4876 }
 0x6b8   : > { %v5294_v11 = vsel %vm5292_vm6, %v5261_v42, %v4877_v62  ;;  %v5197_v26 = vsel %vm16935_vm5, %v5165_v21, %v13046_v5  ;;  %v4053_v42 = vld [vmem:[#allocation3 + $0xb2] sm:$0xff]  ;;  %vm16947_vm5 = vmmov %vm16939_vm7 }
 0x6b9   : > { %4254 = vrot.lane.b32.xlu1 %v4048_v51, %s16403_s27  ;;  %v13092_v51 = vld [vmem:[#allocation3 + $0xa8] sm:$0xff] }
 0x6ba   : > { %4128 = vrot.lane.b32.xlu0 %v4017_v22, %s16406_s25 }
 0x6bd   : > { %4762 = vrot.lane.b32.xlu1 %v13035_v40, %s9497_s24 }
 0x6be   : > { %4636 = vrot.lane.b32.xlu0 %v4049_v31, %s9496_s16 }
 0x6bf   : > { %v5005_v8 = vpop.permute.xlu1 %5004 }
 0x6c0   : > { %v5327_v52 = vsel %vm5325_vm8, %v5294_v11, %v5005_v8  ;;  %v16936_v8 = vld [vmem:[#allocation19_spill] sm:$0xff] }
 0x6c1   : > { %4382 = vrot.lane.b32.xlu1 %v13035_v40, %s16600_s14  ;;  %8697 = vmatmul.mubr.msk.f32.vlgmr.msra.gmra.mrb[0].mxu1 %vm5374_vm4, %v5327_v52  ;;  %v13058_v55 = vpop.permute.xlu0 %4114 }
 0x6c2   : > { %4256 = vrot.lane.b32.xlu0 %v4049_v31, %s16403_s27  ;;  %v5102_v52 = vsel %vm16937_vm0, %v16936_v8, %v13058_v55  ;;  %vm16948_vm0 = vmmov %vm16940_vm9 }
 0x6c3   : > { %v13066_v28 = vpop.permute.xlu1 %4242 }
 0x6c5   : > { %4890 = vrot.lane.b32.xlu1 %v4018_v35, %s9498_s15  ;;  %v4623_v17 = vpop.permute.xlu0 %4622 }
 0x6c6   : > { %4764 = vrot.lane.b32.xlu0 %v13061_v39, %s9497_s24  ;;  %v5229_v44 = vsel %vm5226_vm15, %v5196_v59, %v4623_v17  ;;  %v5134_v17 = vsel %vm16938_vm12, %v5102_v52, %v13066_v28  ;;  %vm16949_vm12 = vmmov %vm16945_vm1 }
 0x6c9   : > { %4510 = vrot.lane.b32.xlu1 %v4018_v35, %s16605_s29 }
 0x6ca   : > { %4384 = vrot.lane.b32.xlu0 %v13061_v39, %s16600_s14 }
 0x6cb   : > { %v13070_v34 = vpop.permute.xlu0 %4116 }
 0x6cc   : > { %v5103_v15 = vsel %vm16941_vm10, %v12714_v7, %v13070_v34  ;;  %vm16952_vm10 = vmmov %vm16948_vm0 }
 0x6cd   : > { %5018 = vrot.lane.b32.xlu1 %v4050_v16, %s16267_s2 }
 0x6ce   : > { %4892 = vrot.lane.b32.xlu0 %v4019_v2, %s9498_s15 }
 0x6cf   : > { %v4751_v27 = vpop.permute.xlu1 %4750 }
 0x6d0   : > { %v4625_v38 = vpop.permute.xlu0 %4624  ;;  %v5262_v56 = vsel %vm5259_vm2, %v5229_v44, %v4751_v27  ;;  %v4022_v44 = vld [vmem:[#allocation3 + $0xc1] sm:$0xff] }
 0x6d1   : > { %4512 = vrot.lane.b32.xlu1 %v4019_v2, %s16605_s29  ;;  %v5230_v46 = vsel %vm5226_vm15, %v5197_v26, %v4625_v38  ;;  %v13154_v38 = vld [vmem:[#allocation3 + $0xc0] sm:$0xff] }
 0x6d2   : > { %4130 = vrot.lane.b32.xlu0 %v4018_v35, %s16406_s25 }
 0x6d3   : > { %v13076_v48 = vpop.permute.xlu1 %4370 }
 0x6d4   : > { %v13078_v45 = vpop.permute.xlu0 %4244 }
 0x6d5   : > { %5020 = vrot.lane.b32.xlu1 %v4051_v12, %s16267_s2  ;;  %v5135_v29 = vsel %vm16942_vm11, %v5103_v15, %v13078_v45  ;;  %vm16953_vm11 = vmmov %vm16945_vm1 }
 0x6d6   : > { %4638 = vrot.lane.b32.xlu0 %v4050_v16, %s9496_s16 }
 0x6d7   : > { %v4879_v6 = vpop.permute.xlu1 %4878 }
 0x6d8   : > { %v4753_v9 = vpop.permute.xlu0 %4752  ;;  %v5295_v22 = vsel %vm5292_vm6, %v5262_v56, %v4879_v6 }
 0x6d9   : > { %4258 = vrot.lane.b32.xlu1 %v4050_v16, %s16403_s27  ;;  %v5263_v10 = vsel %vm5259_vm2, %v5230_v46, %v4753_v9  ;;  %v5166_v16 = vsel %vm16939_vm7, %v5134_v17, %v13076_v48  ;;  %vm16950_vm7 = vmmov %vm16946_vm3 }
 0x6da   : > { %4132 = vrot.lane.b32.xlu0 %v4019_v2, %s16406_s25 }
 0x6db   : > { %v4499_v36 = vpop.permute.xlu1 %4498 }
 0x6dc   : > { %v13095_v25 = vpop.permute.xlu0 %4372  ;;  %v5198_v27 = vsel %vm16940_vm9, %v5166_v16, %v4499_v36  ;;  %vm16951_vm9 = vmmov %vm16947_vm5 }
 0x6dd   : > { %4766 = vrot.lane.b32.xlu1 %v13092_v51, %s9497_s24  ;;  %v5167_v41 = vsel %vm16943_vm13, %v5135_v29, %v13095_v25  ;;  %vm16954_vm13 = vmmov %vm16946_vm3 }
 0x6de   : > { %4640 = vrot.lane.b32.xlu0 %v4051_v12, %s9496_s16 }
 0x6df   : > { %v5007_v18 = vpop.permute.xlu1 %5006 }
 0x6e0   : > { %v5328_v61 = vsel %vm5325_vm8, %v5295_v22, %v5007_v18  ;;  %v4881_v31 = vpop.permute.xlu0 %4880  ;;  %v13182_v22 = vld [vmem:[#allocation3 + $0xc8] sm:$0xff] }
 0x6e1   : > { %4386 = vrot.lane.b32.xlu1 %v13092_v51, %s16600_s14  ;;  %8699 = vmatprep.mubr.msk.f32.mxu1 %vm5374_vm4, %v5328_v61  ;;  %v5296_v1 = vsel %vm5292_vm6, %v5263_v10, %v4881_v31 }
 0x6e2   : > { %4260 = vrot.lane.b32.xlu0 %v4051_v12, %s16403_s27 }
 0x6e3   : > { %v4501_v54 = vpop.permute.xlu1 %4500 }
 0x6e4   : > { %v13116_v13 = vpop.permute.xlu0 %4118  ;;  %v5199_v59 = vsel %vm16944_vm14, %v5167_v41, %v4501_v54  ;;  %vm16955_vm14 = vmmov %vm16947_vm5 }
 0x6e5   : > { %4894 = vrot.lane.b32.xlu1 %v4020_v3, %s9498_s15 }
 0x6e6   : > { %4768 = vrot.lane.b32.xlu0 %v13120_v20, %s9497_s24 }
 0x6e7   : > { %v5009_v32 = vpop.permute.xlu1 %5008 }
 0x6e8   : > { %v5329_v23 = vsel %vm5325_vm8, %v5296_v1, %v5009_v32  ;;  %v4627_v24 = vpop.permute.xlu0 %4626  ;;  %v5104_v1 = vsel %vm16945_vm1, %v12918_v14, %v13116_v13  ;;  %vm16956_vm1 = vmmov %vm16948_vm0 }
 0x6e9   : > { %4514 = vrot.lane.b32.xlu1 %v4020_v3, %s16605_s29  ;;  %8700 = vmatmul.mubr.msk.f32.gmra.mrb[2].mxu1 %vm5374_vm4, %v5329_v23  ;;  %v5231_v12 = vsel %vm5226_vm15, %v5198_v27, %v4627_v24 }
 0x6ea   : > { %4388 = vrot.lane.b32.xlu0 %v13120_v20, %s16600_s14 }
 0x6eb   : > { %v13130_v49 = vpop.permute.xlu1 %4246 }
 0x6ec   : > { %v13132_v4 = vpop.permute.xlu0 %4120  ;;  %v5136_v23 = vsel %vm16946_vm3, %v5104_v1, %v13130_v49  ;;  %vm16957_vm3 = vmmov %vm16953_vm11 }
 0x6ed   : > { %5022 = vrot.lane.b32.xlu1 %v4052_v0, %s16267_s2 }
 0x6ee   : > { %4896 = vrot.lane.b32.xlu0 %v4021_v63, %s9498_s15 }
 0x6ef   : > { %v4755_v5 = vpop.permute.xlu1 %4754 }
 0x6f0   : > { %v4629_v19 = vpop.permute.xlu0 %4628  ;;  %v5264_v55 = vsel %vm5259_vm2, %v5231_v12, %v4755_v5  ;;  %v13216_v5 = vld [vmem:[#allocation3 + $0xd8] sm:$0xff]  ;;  %v13244_v12 = vld [vmem:[#allocation3 + $0xe0] sm:$0xff] }
 0x6f1   : > { %4516 = vrot.lane.b32.xlu1 %v4021_v63, %s16605_s29  ;;  %v5232_v7 = vsel %vm5226_vm15, %v5199_v59, %v4629_v19  ;;  %v4057_v59 = vld [vmem:[#allocation3 + $0xe2] sm:$0xff] }
 0x6f2   : > { %4134 = vrot.lane.b32.xlu0 %v4020_v3, %s16406_s25  ;;  %v4055_v3 = vld [vmem:[#allocation3 + $0xca] sm:$0xff] }
 0x6f3   : > { %v13138_v30 = vpop.permute.xlu1 %4374 }
 0x6f4   : > { %v13140_v62 = vpop.permute.xlu0 %4248  ;;  %v5168_v24 = vsel %vm16947_vm5, %v5136_v23, %v13138_v30  ;;  %vm16958_vm5 = vmmov %vm16950_vm7 }
 0x6f5   : > { %5024 = vrot.lane.b32.xlu1 %v4053_v42, %s16267_s2 }
 0x6f6   : > { %4642 = vrot.lane.b32.xlu0 %v4052_v0, %s9496_s16 }
 0x6f7   : > { %v4883_v11 = vpop.permute.xlu1 %4882 }
 0x6f8   : > { %v4757_v35 = vpop.permute.xlu0 %4756  ;;  %v5297_v28 = vsel %vm5292_vm6, %v5264_v55, %v4883_v11  ;;  %v5105_v11 = vsel %vm16949_vm12, %v12941_v47, %v13132_v4  ;;  %vm16960_vm12 = vmmov %vm16956_vm1 }
 0x6f9   : > { %4262 = vrot.lane.b32.xlu1 %v4052_v0, %s16403_s27  ;;  %v5265_v56 = vsel %vm5259_vm2, %v5232_v7, %v4757_v35  ;;  %v5137_v52 = vsel %vm16950_vm7, %v5105_v11, %v13140_v62  ;;  %vm16961_vm7 = vmmov %vm16957_vm3 }
 0x6fa   : > { %4136 = vrot.lane.b32.xlu0 %v4021_v63, %s16406_s25 }
 0x6fb   : > { %v4503_v2 = vpop.permute.xlu1 %4502 }
 0x6fc   : > { %v13157_v6 = vpop.permute.xlu0 %4376  ;;  %v5200_v63 = vsel %vm16948_vm0, %v5168_v24, %v4503_v2  ;;  %v4024_v2 = vld [vmem:[#allocation3 + $0xd9] sm:$0xff]  ;;  %vm16959_vm0 = vmmov %vm16951_vm9 }
 0x6fd   : > { %4770 = vrot.lane.b32.xlu1 %v13154_v38, %s9497_s24  ;;  %v5169_v35 = vsel %vm16951_vm9, %v5137_v52, %v13157_v6  ;;  %vm16962_vm9 = vmmov %vm16958_vm5 }
 0x6fe   : > { %4644 = vrot.lane.b32.xlu0 %v4053_v42, %s9496_s16 }
 0x6ff   : > { %v5011_v48 = vpop.permute.xlu1 %5010 }
 0x700   : > { %v5330_v57 = vsel %vm5325_vm8, %v5297_v28, %v5011_v48  ;;  %v4885_v9 = vpop.permute.xlu0 %4884 }
 0x701   : > { %4390 = vrot.lane.b32.xlu1 %v13154_v38, %s16600_s14  ;;  %8702 = vmatprep.mubr.msk.f32.mxu1 %vm5374_vm4, %v5330_v57  ;;  %v5298_v45 = vsel %vm5292_vm6, %v5265_v56, %v4885_v9  ;;  %v4056_v57 = vld [vmem:[#allocation3 + $0xda] sm:$0xff] }
 0x702   : > { %4264 = vrot.lane.b32.xlu0 %v4053_v42, %s16403_s27  ;;  %v4025_v9 = vld [vmem:[#allocation3 + $0xe1] sm:$0xff] }
 0x703   : > { %v4505_v36 = vpop.permute.xlu1 %4504 }
 0x704   : > { %v13178_v34 = vpop.permute.xlu0 %4122  ;;  %v5201_v16 = vsel %vm16952_vm10, %v5169_v35, %v4505_v36  ;;  %vm16963_vm10 = vmmov %vm16959_vm0 }
 0x705   : > { %4898 = vrot.lane.b32.xlu1 %v4022_v44, %s9498_s15  ;;  %v5106_v56 = vsel %vm16953_vm11, %v12959_v50, %v13178_v34  ;;  %vm16964_vm11 = vmmov %vm16956_vm1 }
 0x706   : > { %4772 = vrot.lane.b32.xlu0 %v13182_v22, %s9497_s24 }
 0x707   : > { %v5013_v25 = vpop.permute.xlu1 %5012 }
 0x708   : > { %v5331_v18 = vsel %vm5325_vm8, %v5298_v45, %v5013_v25  ;;  %v4631_v53 = vpop.permute.xlu0 %4630 }
 0x709   : > { %4518 = vrot.lane.b32.xlu1 %v4022_v44, %s16605_s29  ;;  %8703 = vmatmul.mubr.msk.f32.gmra.mrb[4].mxu1 %vm5374_vm4, %v5331_v18  ;;  %v5233_v19 = vsel %vm5226_vm15, %v5200_v63, %v4631_v53 }
 0x70a   : > { %4392 = vrot.lane.b32.xlu0 %v13182_v22, %s16600_s14 }
 0x70b   : > { %v13192_v61 = vpop.permute.xlu1 %4250 }
 0x70c   : > { %v13194_v31 = vpop.permute.xlu0 %4124  ;;  %v5138_v25 = vsel %vm16954_vm13, %v5106_v56, %v13192_v61  ;;  %vm16965_vm13 = vmmov %vm16957_vm3 }
 0x70d   : > { %5026 = vrot.lane.b32.xlu1 %v4054_v43, %s16267_s2 }
 0x70e   : > { %4900 = vrot.lane.b32.xlu0 %v4023_v33, %s9498_s15 }
 0x70f   : > { %v4759_v21 = vpop.permute.xlu1 %4758 }
 0x710   : > { %v4633_v54 = vpop.permute.xlu0 %4632  ;;  %v5266_v14 = vsel %vm5259_vm2, %v5233_v19, %v4759_v21  ;;  %v13306_v19 = vld [vmem:[#allocation3 + $0xf8] sm:$0xff] }
 0x711   : > { %4520 = vrot.lane.b32.xlu1 %v4023_v33, %s16605_s29  ;;  %v5234_v47 = vsel %vm5226_vm15, %v5201_v16, %v4633_v54  ;;  %v4059_v16 = vld [vmem:[#allocation3 + $0xfa] sm:$0xff] }
 0x712   : > { %4138 = vrot.lane.b32.xlu0 %v4022_v44, %s16406_s25 }
 0x713   : > { %v13200_v26 = vpop.permute.xlu1 %4378 }
 0x714   : > { %v13202_v46 = vpop.permute.xlu0 %4252  ;;  %v5170_v18 = vsel %vm16955_vm14, %v5138_v25, %v13200_v26  ;;  %vm16966_vm14 = vmmov %vm16958_vm5 }
 0x715   : > { %5028 = vrot.lane.b32.xlu1 %v4055_v3, %s16267_s2 }
 0x716   : > { %4646 = vrot.lane.b32.xlu0 %v4054_v43, %s9496_s16 }
 0x717   : > { %v4887_v10 = vpop.permute.xlu1 %4886 }
 0x718   : > { %v4761_v32 = vpop.permute.xlu0 %4760  ;;  %v5299_v13 = vsel %vm5292_vm6, %v5266_v14, %v4887_v10 }
 0x719   : > { %4266 = vrot.lane.b32.xlu1 %v4054_v43, %s16403_s27  ;;  %v5267_v27 = vsel %vm5259_vm2, %v5234_v47, %v4761_v32 }
 0x71a   : > { %4140 = vrot.lane.b32.xlu0 %v4023_v33, %s16406_s25  ;;  %v13278_v33 = vld [vmem:[#allocation3 + $0xf0] sm:$0xff] }
 0x71b   : > { %v4507_v0 = vpop.permute.xlu1 %4506 }
 0x71c   : > { %v13219_v42 = vpop.permute.xlu0 %4380  ;;  %v5202_v43 = vsel %vm16956_vm1, %v5170_v18, %v4507_v0  ;;  %v4026_v0 = vld [vmem:[#allocation3 + $0xf1] sm:$0xff]  ;;  %vm16967_vm1 = vmmov %vm16959_vm0 }
 0x71d   : > { %4774 = vrot.lane.b32.xlu1 %v13216_v5, %s9497_s24 }
 0x71e   : > { %4648 = vrot.lane.b32.xlu0 %v4055_v3, %s9496_s16 }
 0x71f   : > { %v5015_v49 = vpop.permute.xlu1 %5014 }
 0x720   : > { %v5332_v30 = vsel %vm5325_vm8, %v5299_v13, %v5015_v49  ;;  %v4889_v8 = vpop.permute.xlu0 %4888 }
 0x721   : > { %4394 = vrot.lane.b32.xlu1 %v13216_v5, %s16600_s14  ;;  %8705 = vmatprep.mubr.msk.f32.mxu1 %vm5374_vm4, %v5332_v30  ;;  %v5300_v62 = vsel %vm5292_vm6, %v5267_v27, %v4889_v8  ;;  %v4058_v30 = vld [vmem:[#allocation3 + $0xf2] sm:$0xff] }
 0x722   : > { %4268 = vrot.lane.b32.xlu0 %v4055_v3, %s16403_s27  ;;  %v5107_v3 = vsel %vm16957_vm3, %v12970_v37, %v13194_v31  ;;  %v4027_v8 = vld [vmem:[#allocation3 + $0xf9] sm:$0xff]  ;;  %vm16968_vm3 = vmmov %vm16964_vm11 }
 0x723   : > { %v4509_v17 = vpop.permute.xlu1 %4508  ;;  %v5139_v1 = vsel %vm16958_vm5, %v5107_v3, %v13202_v46  ;;  %vm16969_vm5 = vmmov %vm16961_vm7 }
 0x724   : > { %v13240_v4 = vpop.permute.xlu0 %4126  ;;  %v5171_v32 = vsel %vm16959_vm0, %v5139_v1, %v13219_v42  ;;  %vm16970_vm0 = vmmov %vm16962_vm9 }
 0x725   : > { %4902 = vrot.lane.b32.xlu1 %v4024_v2, %s9498_s15  ;;  %v5203_v24 = vsel %vm16960_vm12, %v5171_v32, %v4509_v17  ;;  %v5108_v27 = vsel %vm16961_vm7, %v12991_v58, %v13240_v4  ;;  %vm16971_vm12 = vmmov %vm16967_vm1 }
 0x726   : > { %4776 = vrot.lane.b32.xlu0 %v13244_v12, %s9497_s24  ;;  %vm16972_vm7 = vmmov %vm16968_vm3 }
 0x727   : > { %v5017_v6 = vpop.permute.xlu1 %5016 }
 0x728   : > { %v5333_v55 = vsel %vm5325_vm8, %v5300_v62, %v5017_v6  ;;  %v4635_v28 = vpop.permute.xlu0 %4634 }
 0x729   : > { %4522 = vrot.lane.b32.xlu1 %v4024_v2, %s16605_s29  ;;  %8706 = vmatmul.mubr.msk.f32.gmra.mrb[6].mxu1 %vm5374_vm4, %v5333_v55  ;;  %v5235_v21 = vsel %vm5226_vm15, %v5202_v43, %v4635_v28 }
 0x72a   : > { %4396 = vrot.lane.b32.xlu0 %v13244_v12, %s16600_s14 }
 0x72b   : > { %v13254_v48 = vpop.permute.xlu1 %4254 }
 0x72c   : > { %v13256_v15 = vpop.permute.xlu0 %4128  ;;  %v5140_v6 = vsel %vm16962_vm9, %v5108_v27, %v13254_v48  ;;  %vm16973_vm9 = vmmov %vm16969_vm5 }
 0x72d   : > { %5030 = vrot.lane.b32.xlu1 %v4056_v57, %s16267_s2 }
 0x72e   : > { %4904 = vrot.lane.b32.xlu0 %v4025_v9, %s9498_s15 }
 0x72f   : > { %v4763_v29 = vpop.permute.xlu1 %4762 }
 0x730   : > { %v4637_v41 = vpop.permute.xlu0 %4636  ;;  %v5268_v50 = vsel %vm5259_vm2, %v5235_v21, %v4763_v29  ;;  %v13368_v21 = vld [vmem:[#allocation3 + $0x110] sm:$0xff] }
 0x731   : > { %4524 = vrot.lane.b32.xlu1 %v4025_v9, %s16605_s29  ;;  %v5236_v37 = vsel %vm5226_vm15, %v5203_v24, %v4637_v41  ;;  %v4061_v24 = vld [vmem:[#allocation3 + $0x112] sm:$0xff] }
 0x732   : > { %4142 = vrot.lane.b32.xlu0 %v4024_v2, %s16406_s25 }
 0x733   : > { %v13262_v36 = vpop.permute.xlu1 %4382 }
 0x734   : > { %v13264_v44 = vpop.permute.xlu0 %4256  ;;  %v5172_v55 = vsel %vm16963_vm10, %v5140_v6, %v13262_v36  ;;  %vm16974_vm10 = vmmov %vm16970_vm0 }
 0x735   : > { %5032 = vrot.lane.b32.xlu1 %v4057_v59, %s16267_s2 }
 0x736   : > { %4650 = vrot.lane.b32.xlu0 %v4056_v57, %s9496_s16 }
 0x737   : > { %v4891_v7 = vpop.permute.xlu1 %4890 }
 0x738   : > { %v4765_v45 = vpop.permute.xlu0 %4764  ;;  %v5301_v34 = vsel %vm5292_vm6, %v5268_v50, %v4891_v7 }
 0x739   : > { %4270 = vrot.lane.b32.xlu1 %v4056_v57, %s16403_s27  ;;  %v5269_v63 = vsel %vm5259_vm2, %v5236_v37, %v4765_v45 }
 0x73a   : > { %4144 = vrot.lane.b32.xlu0 %v4025_v9, %s16406_s25  ;;  %v13340_v9 = vld [vmem:[#allocation3 + $0x108] sm:$0xff] }
 0x73b   : > { %v4511_v53 = vpop.permute.xlu1 %4510 }
 0x73c   : > { %v13281_v54 = vpop.permute.xlu0 %4384  ;;  %v5204_v57 = vsel %vm16964_vm11, %v5172_v55, %v4511_v53  ;;  %v4028_v53 = vld [vmem:[#allocation3 + $0x109] sm:$0xff]  ;;  %vm16975_vm11 = vmmov %vm16967_vm1 }
 0x73d   : > { %4778 = vrot.lane.b32.xlu1 %v13278_v33, %s9497_s24 }
 0x73e   : > { %4652 = vrot.lane.b32.xlu0 %v4057_v59, %s9496_s16 }
 0x73f   : > { %v5019_v61 = vpop.permute.xlu1 %5018 }
 0x740   : > { %v5334_v26 = vsel %vm5325_vm8, %v5301_v34, %v5019_v61  ;;  %v4893_v10 = vpop.permute.xlu0 %4892 }
 0x741   : > { %4398 = vrot.lane.b32.xlu1 %v13278_v33, %s16600_s14  ;;  %8708 = vmatprep.mubr.msk.f32.mxu1 %vm5374_vm4, %v5334_v26  ;;  %v5302_v46 = vsel %vm5292_vm6, %v5269_v63, %v4893_v10  ;;  %v4060_v26 = vld [vmem:[#allocation3 + $0x10a] sm:$0xff] }
 0x742   : > { %4272 = vrot.lane.b32.xlu0 %v4057_v59, %s16403_s27  ;;  %v5109_v59 = vsel %vm16965_vm13, %v13002_v60, %v13256_v15  ;;  %v4029_v10 = vld [vmem:[#allocation3 + $0x111] sm:$0xff]  ;;  %vm16976_vm13 = vmmov %vm16968_vm3 }
 0x743   : > { %v4513_v23 = vpop.permute.xlu1 %4512  ;;  %v5141_v56 = vsel %vm16966_vm14, %v5109_v59, %v13264_v44  ;;  %vm16977_vm14 = vmmov %vm16969_vm5 }
 0x744   : > { %v13302_v31 = vpop.permute.xlu0 %4130  ;;  %v5173_v45 = vsel %vm16967_vm1, %v5141_v56, %v13281_v54  ;;  %vm16978_vm1 = vmmov %vm16970_vm0 }
 0x745   : > { %4906 = vrot.lane.b32.xlu1 %v4026_v0, %s9498_s15  ;;  %v5205_v18 = vsel %vm16968_vm3, %v5173_v45, %v4513_v23  ;;  %v5110_v63 = vsel %vm16969_vm5, %v13035_v40, %v13302_v31  ;;  %vm16979_vm3 = vmmov %vm16975_vm11 }
 0x746   : > { %4780 = vrot.lane.b32.xlu0 %v13306_v19, %s9497_s24  ;;  %vm16980_vm5 = vmmov %vm16972_vm7 }
 0x747   : > { %v5021_v42 = vpop.permute.xlu1 %5020 }
 0x748   : > { %v5335_v14 = vsel %vm5325_vm8, %v5302_v46, %v5021_v42  ;;  %v4639_v13 = vpop.permute.xlu0 %4638 }
 0x749   : > { %4526 = vrot.lane.b32.xlu1 %v4026_v0, %s16605_s29  ;;  %8709 = vmatmul.mubr.msk.f32.gmra.mrb[8].mxu1 %vm5374_vm4, %v5335_v14  ;;  %v5237_v29 = vsel %vm5226_vm15, %v5204_v57, %v4639_v13 }
 0x74a   : > { %4400 = vrot.lane.b32.xlu0 %v13306_v19, %s16600_s14 }
 0x74b   : > { %v13316_v49 = vpop.permute.xlu1 %4258 }
 0x74c   : > { %v13318_v11 = vpop.permute.xlu0 %4132  ;;  %v5142_v42 = vsel %vm16970_vm0, %v5110_v63, %v13316_v49  ;;  %vm16981_vm0 = vmmov %vm16973_vm9 }
 0x74d   : > { %5034 = vrot.lane.b32.xlu1 %v4058_v30, %s16267_s2 }
 0x74e   : > { %4908 = vrot.lane.b32.xlu0 %v4027_v8, %s9498_s15 }
 0x74f   : > { %v4767_v52 = vpop.permute.xlu1 %4766 }
 0x750   : > { %v4641_v35 = vpop.permute.xlu0 %4640  ;;  %v5270_v58 = vsel %vm5259_vm2, %v5237_v29, %v4767_v52  ;;  %v13430_v29 = vld [vmem:[#allocation3 + $0x128] sm:$0xff] }
 0x751   : > { %4528 = vrot.lane.b32.xlu1 %v4027_v8, %s16605_s29  ;;  %v5238_v60 = vsel %vm5226_vm15, %v5205_v18, %v4641_v35  ;;  %v4063_v18 = vld [vmem:[#allocation3 + $0x12a] sm:$0xff] }
 0x752   : > { %4146 = vrot.lane.b32.xlu0 %v4026_v0, %s16406_s25 }
 0x753   : > { %v13324_v17 = vpop.permute.xlu1 %4386 }
 0x754   : > { %v13326_v2 = vpop.permute.xlu0 %4260  ;;  %v5174_v14 = vsel %vm16971_vm12, %v5142_v42, %v13324_v17  ;;  %vm16982_vm12 = vmmov %vm16978_vm1 }
 0x755   : > { %5036 = vrot.lane.b32.xlu1 %v4059_v16, %s16267_s2 }
 0x756   : > { %4654 = vrot.lane.b32.xlu0 %v4058_v30, %s9496_s16 }
 0x757   : > { %v4895_v47 = vpop.permute.xlu1 %4894 }
 0x758   : > { %v4769_v62 = vpop.permute.xlu0 %4768  ;;  %v5303_v4 = vsel %vm5292_vm6, %v5270_v58, %v4895_v47 }
 0x759   : > { %4274 = vrot.lane.b32.xlu1 %v4058_v30, %s16403_s27  ;;  %v5271_v43 = vsel %vm5259_vm2, %v5238_v60, %v4769_v62 }
 0x75a   : > { %4148 = vrot.lane.b32.xlu0 %v4027_v8, %s16406_s25  ;;  %v13402_v8 = vld [vmem:[#allocation3 + $0x120] sm:$0xff] }
 0x75b   : > { %v4515_v28 = vpop.permute.xlu1 %4514 }
 0x75c   : > { %v13343_v41 = vpop.permute.xlu0 %4388  ;;  %v5206_v30 = vsel %vm16972_vm7, %v5174_v14, %v4515_v28  ;;  %v4030_v28 = vld [vmem:[#allocation3 + $0x121] sm:$0xff]  ;;  %vm16983_vm7 = vmmov %vm16979_vm3 }
 0x75d   : > { %4782 = vrot.lane.b32.xlu1 %v13340_v9, %s9497_s24 }
 0x75e   : > { %4656 = vrot.lane.b32.xlu0 %v4059_v16, %s9496_s16 }
 0x75f   : > { %v5023_v48 = vpop.permute.xlu1 %5022 }
 0x760   : > { %v5336_v36 = vsel %vm5325_vm8, %v5303_v4, %v5023_v48  ;;  %v4897_v7 = vpop.permute.xlu0 %4896 }
 0x761   : > { %4402 = vrot.lane.b32.xlu1 %v13340_v9, %s16600_s14  ;;  %8711 = vmatprep.mubr.msk.f32.mxu1 %vm5374_vm4, %v5336_v36  ;;  %v5304_v44 = vsel %vm5292_vm6, %v5271_v43, %v4897_v7  ;;  %v4062_v36 = vld [vmem:[#allocation3 + $0x122] sm:$0xff] }
 0x762   : > { %4276 = vrot.lane.b32.xlu0 %v4059_v16, %s16403_s27  ;;  %v5111_v16 = vsel %vm16973_vm9, %v13061_v39, %v13318_v11  ;;  %v4031_v7 = vld [vmem:[#allocation3 + $0x129] sm:$0xff]  ;;  %vm16984_vm9 = vmmov %vm16980_vm5 }
 0x763   : > { %v4517_v25 = vpop.permute.xlu1 %4516  ;;  %v5143_v27 = vsel %vm16974_vm10, %v5111_v16, %v13326_v2  ;;  %vm16985_vm10 = vmmov %vm16981_vm0 }
 0x764   : > { %v13364_v15 = vpop.permute.xlu0 %4134  ;;  %v5175_v62 = vsel %vm16975_vm11, %v5143_v27, %v13343_v41  ;;  %vm16986_vm11 = vmmov %vm16978_vm1 }
 0x765   : > { %4910 = vrot.lane.b32.xlu1 %v4028_v53, %s9498_s15  ;;  %v5207_v55 = vsel %vm16976_vm13, %v5175_v62, %v4517_v25  ;;  %v4033_v62 = vld [vmem:[#allocation3 + $0x141] sm:$0xff]  ;;  %vm16987_vm13 = vmmov %vm16979_vm3 }
 0x766   : > { %4784 = vrot.lane.b32.xlu0 %v13368_v21, %s9497_s24 }
 0x767   : > { %v5025_v54 = vpop.permute.xlu1 %5024 }
 0x768   : > { %v5337_v50 = vsel %vm5325_vm8, %v5304_v44, %v5025_v54  ;;  %v4643_v34 = vpop.permute.xlu0 %4642  ;;  %v5112_v54 = vsel %vm16977_vm14, %v13092_v51, %v13364_v15  ;;  %vm16988_vm14 = vmmov %vm16980_vm5 }
 0x769   : > { %4530 = vrot.lane.b32.xlu1 %v4028_v53, %s16605_s29  ;;  %8712 = vmatmul.mubr.msk.f32.gmra.mrb[10].mxu1 %vm5374_vm4, %v5337_v50  ;;  %v5239_v52 = vsel %vm5226_vm15, %v5206_v30, %v4643_v34 }
 0x76a   : > { %4404 = vrot.lane.b32.xlu0 %v13368_v21, %s16600_s14 }
 0x76b   : > { %v13378_v61 = vpop.permute.xlu1 %4262 }
 0x76c   : > { %v13380_v3 = vpop.permute.xlu0 %4136  ;;  %v5144_v34 = vsel %vm16978_vm1, %v5112_v54, %v13378_v61  ;;  %vm16989_vm1 = vmmov %vm16981_vm0 }
 0x76d   : > { %5038 = vrot.lane.b32.xlu1 %v4060_v26, %s16267_s2  ;;  %v5113_v63 = vsel %vm16981_vm0, %v13120_v20, %v13380_v3  ;;  %vm16992_vm0 = vmmov %vm16984_vm9 }
 0x76e   : > { %4912 = vrot.lane.b32.xlu0 %v4029_v10, %s9498_s15 }
 0x76f   : > { %v4771_v1 = vpop.permute.xlu1 %4770 }
 0x770   : > { %v4645_v32 = vpop.permute.xlu0 %4644  ;;  %v5272_v40 = vsel %vm5259_vm2, %v5239_v52, %v4771_v1  ;;  %v4032_v52 = vld [vmem:[#allocation3 + $0x139] sm:$0xff] }
 0x771   : > { %4532 = vrot.lane.b32.xlu1 %v4029_v10, %s16605_s29  ;;  %v5240_v39 = vsel %vm5226_vm15, %v5207_v55, %v4645_v32  ;;  %v13468_v32 = vld [vmem:[#allocation3 + $0x138] sm:$0xff] }
 0x772   : > { %4150 = vrot.lane.b32.xlu0 %v4028_v53, %s16406_s25 }
 0x773   : > { %v13386_v23 = vpop.permute.xlu1 %4390 }
 0x774   : > { %v13388_v0 = vpop.permute.xlu0 %4264 }
 0x775   : > { %5040 = vrot.lane.b32.xlu1 %v4061_v24, %s16267_s2  ;;  %v5145_v42 = vsel %vm16982_vm12, %v5113_v63, %v13388_v0  ;;  %vm16993_vm12 = vmmov %vm16989_vm1 }
 0x776   : > { %4658 = vrot.lane.b32.xlu0 %v4060_v26, %s9496_s16 }
 0x777   : > { %v4899_v37 = vpop.permute.xlu1 %4898 }
 0x778   : > { %v4773_v46 = vpop.permute.xlu0 %4772  ;;  %v5305_v31 = vsel %vm5292_vm6, %v5272_v40, %v4899_v37 }
 0x779   : > { %4278 = vrot.lane.b32.xlu1 %v4060_v26, %s16403_s27  ;;  %v5273_v57 = vsel %vm5259_vm2, %v5240_v39, %v4773_v46  ;;  %v5176_v26 = vsel %vm16979_vm3, %v5144_v34, %v13386_v23  ;;  %v4065_v39 = vld [vmem:[#allocation3 + $0x142] sm:$0xff]  ;;  %vm16990_vm3 = vmmov %vm16986_vm11 }
 0x77a   : > { %4152 = vrot.lane.b32.xlu0 %v4029_v10, %s16406_s25 }
 0x77b   : > { %v4519_v13 = vpop.permute.xlu1 %4518 }
 0x77c   : > { %v13405_v35 = vpop.permute.xlu0 %4392  ;;  %v5208_v1 = vsel %vm16980_vm5, %v5176_v26, %v4519_v13  ;;  %vm16991_vm5 = vmmov %vm16983_vm7 }
 0x77d   : > { %4786 = vrot.lane.b32.xlu1 %v13402_v8, %s9497_s24  ;;  %v5177_v14 = vsel %vm16983_vm7, %v5145_v42, %v13405_v35  ;;  %vm16994_vm7 = vmmov %vm16990_vm3 }
 0x77e   : > { %4660 = vrot.lane.b32.xlu0 %v4061_v24, %s9496_s16 }
 0x77f   : > { %v5027_v49 = vpop.permute.xlu1 %5026 }
 0x780   : > { %v5338_v17 = vsel %vm5325_vm8, %v5305_v31, %v5027_v49  ;;  %v4901_v47 = vpop.permute.xlu0 %4900  ;;  %v13496_v31 = vld [vmem:[#allocation3 + $0x140] sm:$0xff] }
 0x781   : > { %4406 = vrot.lane.b32.xlu1 %v13402_v8, %s16600_s14  ;;  %8714 = vmatprep.mubr.msk.f32.mxu1 %vm5374_vm4, %v5338_v17  ;;  %v5306_v2 = vsel %vm5292_vm6, %v5273_v57, %v4901_v47  ;;  %v4064_v47 = vld [vmem:[#allocation3 + $0x13a] sm:$0xff] }
 0x782   : > { %4280 = vrot.lane.b32.xlu0 %v4061_v24, %s16403_s27 }
 0x783   : > { %v4521_v6 = vpop.permute.xlu1 %4520 }
 0x784   : > { %v13426_v11 = vpop.permute.xlu0 %4138  ;;  %v5209_v30 = vsel %vm16984_vm9, %v5177_v14, %v4521_v6  ;;  %v4066_v14 = vld [vmem:[#allocation3 + $0x152] sm:$0xff]  ;;  %vm16995_vm9 = vmmov %vm16991_vm5 }
 0x785   : > { %4914 = vrot.lane.b32.xlu1 %v4030_v28, %s9498_s15 }
 0x786   : > { %4788 = vrot.lane.b32.xlu0 %v13430_v29, %s9497_s24 }
 0x787   : > { %v5029_v41 = vpop.permute.xlu1 %5028 }
 0x788   : > { %v5339_v58 = vsel %vm5325_vm8, %v5306_v2, %v5029_v41  ;;  %v4647_v4 = vpop.permute.xlu0 %4646  ;;  %v5114_v41 = vsel %vm16985_vm10, %v13154_v38, %v13426_v11  ;;  %vm16996_vm10 = vmmov %vm16992_vm0 }
 0x789   : > { %4534 = vrot.lane.b32.xlu1 %v4030_v28, %s16605_s29  ;;  %8715 = vmatmul.mubr.msk.f32.gmra.mrb[12].mxu1 %vm5374_vm4, %v5339_v58  ;;  %v5241_v24 = vsel %vm5226_vm15, %v5208_v1, %v4647_v4 }
 0x78a   : > { %4408 = vrot.lane.b32.xlu0 %v13430_v29, %s16600_s14 }
 0x78b   : > { %v13440_v48 = vpop.permute.xlu1 %4266 }
 0x78c   : > { %v13442_v59 = vpop.permute.xlu0 %4140  ;;  %v5146_v4 = vsel %vm16986_vm11, %v5114_v41, %v13440_v48  ;;  %v13598_v41 = vld [vmem:[#allocation3 + $0x168] sm:$0xff]  ;;  %vm16997_vm11 = vmmov %vm16989_vm1 }
 0x78d   : > { %5042 = vrot.lane.b32.xlu1 %v4062_v36, %s16267_s2  ;;  %v5115_v34 = vsel %vm16989_vm1, %v13182_v22, %v13442_v59  ;;  %vm17000_vm1 = vmmov %vm16992_vm0 }
 0x78e   : > { %4916 = vrot.lane.b32.xlu0 %v4031_v7, %s9498_s15 }
 0x78f   : > { %v4775_v56 = vpop.permute.xlu1 %4774 }
 0x790   : > { %v4649_v45 = vpop.permute.xlu0 %4648  ;;  %v5274_v51 = vsel %vm5259_vm2, %v5241_v24, %v4775_v56 }
 0x791   : > { %4536 = vrot.lane.b32.xlu1 %v4031_v7, %s16605_s29  ;;  %v5242_v20 = vsel %vm5226_vm15, %v5209_v30, %v4649_v45  ;;  %v4035_v30 = vld [vmem:[#allocation3 + $0x159] sm:$0xff] }
 0x792   : > { %4154 = vrot.lane.b32.xlu0 %v4030_v28, %s16406_s25 }
 0x793   : > { %v13448_v25 = vpop.permute.xlu1 %4394 }
 0x794   : > { %v13450_v53 = vpop.permute.xlu0 %4268  ;;  %v13454_v43 = vpop.f32.mrb[0].mxu1 }
 0x795   : > { %5044 = vrot.lane.b32.xlu1 %v4063_v18, %s16267_s2  ;;  %v13456_v44 = vpop.f32.mrb[1].mxu1 }
 0x796   : > { %4662 = vrot.lane.b32.xlu0 %v4062_v36, %s9496_s16 }
 0x797   : > { %v4903_v60 = vpop.permute.xlu1 %4902 }
 0x798   : > { %v4777_v50 = vpop.permute.xlu0 %4776  ;;  %v5307_v15 = vsel %vm5292_vm6, %v5274_v51, %v4903_v60 }
 0x799   : > { %4282 = vrot.lane.b32.xlu1 %v4062_v36, %s16403_s27  ;;  %v5275_v40 = vsel %vm5259_vm2, %v5242_v20, %v4777_v50  ;;  %v5178_v36 = vsel %vm16987_vm13, %v5146_v4, %v13448_v25  ;;  %vm16998_vm13 = vmmov %vm16990_vm3 }
 0x79a   : > { %4156 = vrot.lane.b32.xlu0 %v4031_v7, %s16406_s25 }
 0x79b   : > { %v4523_v10 = vpop.permute.xlu1 %4522 }
 0x79c   : > { %v13471_v37 = vpop.permute.xlu0 %4396  ;;  %v5210_v56 = vsel %vm16988_vm14, %v5178_v36, %v4523_v10  ;;  %v5147_v10 = vsel %vm16990_vm3, %v5115_v34, %v13450_v53  ;;  %vm16999_vm14 = vmmov %vm16991_vm5 }
 0x79d   : > { %4790 = vrot.lane.b32.xlu1 %v13468_v32, %s9497_s24  ;;  %v5179_v1 = vsel %vm16991_vm5, %v5147_v10, %v13471_v37  ;;  %vm17001_vm3 = vmmov %vm16997_vm11 }
 0x79e   : > { %4664 = vrot.lane.b32.xlu0 %v4063_v18, %s9496_s16  ;;  %vm17002_vm5 = vmmov %vm16994_vm7 }
 0x79f   : > { %v5031_v61 = vpop.permute.xlu1 %5030 }
 0x7a0   : > { %v5340_v23 = vsel %vm5325_vm8, %v5307_v15, %v5031_v61  ;;  %v4905_v46 = vpop.permute.xlu0 %4904  ;;  %v4034_v15 = vld [vmem:[#allocation3 + $0x151] sm:$0xff] }
 0x7a1   : > { %4410 = vrot.lane.b32.xlu1 %v13468_v32, %s16600_s14  ;;  %8717 = vmatprep.mubr.msk.f32.mxu1 %vm5374_vm4, %v5340_v23  ;;  %v5308_v0 = vsel %vm5292_vm6, %v5275_v40, %v4905_v46  ;;  %v13562_v23 = vld [vmem:[#allocation3 + $0x158] sm:$0xff] }
 0x7a2   : > { %4284 = vrot.lane.b32.xlu0 %v4063_v18, %s16403_s27  ;;  %v13532_v18 = vld [vmem:[#allocation3 + $0x150] sm:$0xff] }
 0x7a3   : > { %v4525_v13 = vpop.permute.xlu1 %4524 }
 0x7a4   : > { %v13492_v3 = vpop.permute.xlu0 %4142  ;;  %v5211_v51 = vsel %vm16992_vm0, %v5179_v1, %v4525_v13  ;;  %vm17003_vm0 = vmmov %vm16995_vm9 }
 0x7a5   : > { %4918 = vrot.lane.b32.xlu1 %v4032_v52, %s9498_s15 }
 0x7a6   : > { %4792 = vrot.lane.b32.xlu0 %v13496_v31, %s9497_s24 }
 0x7a7   : > { %v5033_v35 = vpop.permute.xlu1 %5032 }
 0x7a8   : > { %v5341_v49 = vsel %vm5325_vm8, %v5308_v0, %v5033_v35  ;;  %v4651_v17 = vpop.permute.xlu0 %4650  ;;  %v4067_v0 = vld [vmem:[#allocation3 + $0x15a] sm:$0xff] }
 0x7a9   : > { %4538 = vrot.lane.b32.xlu1 %v4032_v52, %s16605_s29  ;;  %8718 = vmatmul.mubr.msk.f32.gmra.mrb[14].mxu1 %vm5374_vm4, %v5341_v49  ;;  %v5243_v38 = vsel %vm5226_vm15, %v5210_v56, %v4651_v17  ;;  %v5116_v17 = vsel %vm16993_vm12, %v13216_v5, %v13492_v3  ;;  %vm17004_vm12 = vmmov %vm17000_vm1 }
 0x7aa   : > { %4412 = vrot.lane.b32.xlu0 %v13496_v31, %s16600_s14 }
 0x7ab   : > { %v13506_v16 = vpop.permute.xlu1 %4270 }
 0x7ac   : > { %v13508_v27 = vpop.permute.xlu0 %4144 }
 0x7ad   : > { %5046 = vrot.lane.b32.xlu1 %v4064_v47, %s16267_s2 }
 0x7ae   : > { %4920 = vrot.lane.b32.xlu0 %v4033_v62, %s9498_s15 }
 0x7af   : > { %v4779_v6 = vpop.permute.xlu1 %4778 }
 0x7b0   : > { %v4653_v55 = vpop.permute.xlu0 %4652  ;;  %v5276_v25 = vsel %vm5259_vm2, %v5243_v38, %v4779_v6 }
 0x7b1   : > { %4540 = vrot.lane.b32.xlu1 %v4033_v62, %s16605_s29  ;;  %v5244_v22 = vsel %vm5226_vm15, %v5211_v51, %v4653_v55  ;;  %v4068_v51 = vld [vmem:[#allocation3 + $0x16a] sm:$0xff] }
 0x7b2   : > { %4158 = vrot.lane.b32.xlu0 %v4032_v52, %s16406_s25 }
 0x7b3   : > { %v13514_v28 = vpop.permute.xlu1 %4398 }
 0x7b4   : > { %v13516_v57 = vpop.permute.xlu0 %4272 }
 0x7b5   : > { %5048 = vrot.lane.b32.xlu1 %v4065_v39, %s16267_s2 }
 0x7b6   : > { %4666 = vrot.lane.b32.xlu0 %v4064_v47, %s9496_s16 }
 0x7b7   : > { %v4907_v2 = vpop.permute.xlu1 %4906 }
 0x7b8   : > { %v4781_v58 = vpop.permute.xlu0 %4780  ;;  %v5309_v60 = vsel %vm5292_vm6, %v5276_v25, %v4907_v2 }
 0x7b9   : > { %4286 = vrot.lane.b32.xlu1 %v4064_v47, %s16403_s27  ;;  %v5277_v61 = vsel %vm5259_vm2, %v5244_v22, %v4781_v58  ;;  %v4037_v22 = vld [vmem:[#allocation3 + $0x171] sm:$0xff] }
 0x7ba   : > { %4160 = vrot.lane.b32.xlu0 %v4033_v62, %s16406_s25  ;;  %v5148_v62 = vsel %vm16994_vm7, %v5116_v17, %v13506_v16  ;;  %vm17005_vm7 = vmmov %vm17001_vm3 }
 0x7bb   : > { %v4527_v7 = vpop.permute.xlu1 %4526  ;;  %v5180_v6 = vsel %vm16995_vm9, %v5148_v62, %v13514_v28  ;;  %v4006_v62 = vld [vmem:[#allocation3 + $0x180] sm:$0xff]  ;;  %vm17006_vm9 = vmmov %vm17002_vm5 }
 0x7bc   : > { %v13530_v45 = vpop.f32.mrb[2].mxu1  ;;  %v13535_v11 = vpop.permute.xlu0 %4400 }
 0x7bd   : > { %4794 = vrot.lane.b32.xlu1 %v13532_v18, %s9497_s24  ;;  %v13539_v48 = vpop.f32.mrb[3].mxu1 }
 0x7be   : > { %4668 = vrot.lane.b32.xlu0 %v4065_v39, %s9496_s16 }
 0x7bf   : > { %v5035_v54 = vpop.permute.xlu1 %5034 }
 0x7c0   : > { %v5342_v50 = vsel %vm5325_vm8, %v5309_v60, %v5035_v54  ;;  %v4909_v26 = vpop.permute.xlu0 %4908 }
 0x7c1   : > { %4414 = vrot.lane.b32.xlu1 %v13532_v18, %s16600_s14  ;;  %8720 = vmatprep.mubr.msk.f32.mxu1 %vm5374_vm4, %v5342_v50  ;;  %v5310_v53 = vsel %vm5292_vm6, %v5277_v61, %v4909_v26  ;;  %v4036_v50 = vld [vmem:[#allocation3 + $0x169] sm:$0xff] }
 0x7c2   : > { %4288 = vrot.lane.b32.xlu0 %v4065_v39, %s16403_s27  ;;  %v5212_v39 = vsel %vm16996_vm10, %v5180_v6, %v4527_v7  ;;  %v5117_v7 = vsel %vm16997_vm11, %v13244_v12, %v13508_v27  ;;  %v13628_v26 = vld [vmem:[#allocation3 + $0x170] sm:$0xff]  ;;  %vm17007_vm10 = vmmov %vm17003_vm0 }
 0x7c3   : > { %v4529_v24 = vpop.permute.xlu1 %4528  ;;  %v5149_v38 = vsel %vm16998_vm13, %v5117_v7, %v13516_v57  ;;  %vm17008_vm11 = vmmov %vm17000_vm1 }
 0x7c4   : > { %v13558_v59 = vpop.permute.xlu0 %4146  ;;  %v5181_v25 = vsel %vm16999_vm14, %v5149_v38, %v13535_v11  ;;  %vm17009_vm13 = vmmov %vm17001_vm3 }
 0x7c5   : > { %4922 = vrot.lane.b32.xlu1 %v4034_v15, %s9498_s15  ;;  %v5213_v54 = vsel %vm17000_vm1, %v5181_v25, %v4529_v24  ;;  %v4007_v25 = vld [vmem:[#allocation3 + $0x188] sm:$0xff]  ;;  %vm17010_vm14 = vmmov %vm17002_vm5 }
 0x7c6   : > { %4796 = vrot.lane.b32.xlu0 %v13562_v23, %s9497_s24  ;;  %vm17011_vm1 = vmmov %vm17003_vm0 }
 0x7c7   : > { %v5037_v37 = vpop.permute.xlu1 %5036 }
 0x7c8   : > { %v5343_v63 = vsel %vm5325_vm8, %v5310_v53, %v5037_v37  ;;  %v4655_v46 = vpop.permute.xlu0 %4654 }
 0x7c9   : > { %4542 = vrot.lane.b32.xlu1 %v4034_v15, %s16605_s29  ;;  %8721 = vmatmul.mubr.msk.f32.gmra.mrb[16].mxu1 %vm5374_vm4, %v5343_v63  ;;  %v5245_v5 = vsel %vm5226_vm15, %v5212_v39, %v4655_v46  ;;  %v4069_v63 = vld [vmem:[#allocation3 + $0x172] sm:$0xff] }
 0x7ca   : > { %4416 = vrot.lane.b32.xlu0 %v13562_v23, %s16600_s14 }
 0x7cb   : > { %v13572_v42 = vpop.permute.xlu1 %4274 }
 0x7cc   : > { %v13574_v13 = vpop.permute.xlu0 %4148 }
 0x7cd   : > { %5050 = vrot.lane.b32.xlu1 %v4066_v14, %s16267_s2 }
 0x7ce   : > { %4924 = vrot.lane.b32.xlu0 %v4035_v30, %s9498_s15 }
 0x7cf   : > { %v4783_v52 = vpop.permute.xlu1 %4782 }
 0x7d0   : > { %v4657_v20 = vpop.permute.xlu0 %4656  ;;  %v5278_v28 = vsel %vm5259_vm2, %v5245_v5, %v4783_v52  ;;  %v5119_v5 = vsel %vm17005_vm7, %v13306_v19, %v13574_v13 }
 0x7d1   : > { %4544 = vrot.lane.b32.xlu1 %v4035_v30, %s16605_s29  ;;  %v5246_v12 = vsel %vm5226_vm15, %v5213_v54, %v4657_v20 }
 0x7d2   : > { %4162 = vrot.lane.b32.xlu0 %v4034_v15, %s16406_s25 }
 0x7d3   : > { %v13580_v40 = vpop.permute.xlu1 %4402 }
 0x7d4   : > { %v13582_v35 = vpop.permute.xlu0 %4276 }
 0x7d5   : > { %5052 = vrot.lane.b32.xlu1 %v4067_v0, %s16267_s2 }
 0x7d6   : > { %4670 = vrot.lane.b32.xlu0 %v4066_v14, %s9496_s16 }
 0x7d7   : > { %v4911_v49 = vpop.permute.xlu1 %4910 }
 0x7d8   : > { %v4785_v47 = vpop.permute.xlu0 %4784  ;;  %v5311_v58 = vsel %vm5292_vm6, %v5278_v28, %v4911_v49 }
 0x7d9   : > { %4290 = vrot.lane.b32.xlu1 %v4066_v14, %s16403_s27  ;;  %v5279_v34 = vsel %vm5259_vm2, %v5246_v12, %v4785_v47  ;;  %v4070_v12 = vld [vmem:[#allocation3 + $0x182] sm:$0xff] }
 0x7da   : > { %4164 = vrot.lane.b32.xlu0 %v4035_v30, %s16406_s25  ;;  %v5118_v30 = vsel %vm17001_vm3, %v13278_v33, %v13558_v59  ;;  %vm17012_vm3 = vmmov %vm17008_vm11 }
 0x7db   : > { %v4531_v55 = vpop.permute.xlu1 %4530  ;;  %v5150_v20 = vsel %vm17002_vm5, %v5118_v30, %v13572_v42  ;;  %vm17013_vm5 = vmmov %vm17005_vm7 }
 0x7dc   : > { %v13596_v2 = vpop.f32.mrb[4].mxu1  ;;  %v13601_v3 = vpop.permute.xlu0 %4404  ;;  %vm17016_vm7 = vmmov %vm17012_vm3 }
 0x7dd   : > { %4798 = vrot.lane.b32.xlu1 %v13598_v41, %s9497_s24  ;;  %v13605_v16 = vpop.f32.mrb[5].mxu1 }
 0x7de   : > { %4672 = vrot.lane.b32.xlu0 %v4067_v0, %s9496_s16 }
 0x7df   : > { %v5039_v4 = vpop.permute.xlu1 %5038 }
 0x7e0   : > { %v5344_v36 = vsel %vm5325_vm8, %v5311_v58, %v5039_v4  ;;  %v4913_v56 = vpop.permute.xlu0 %4912  ;;  %v5151_v58 = vsel %vm17006_vm9, %v5119_v5, %v13582_v35  ;;  %v4072_v5 = vld [vmem:[#allocation3 + $0x19a] sm:$0xff] }
 0x7e1   : > { %4418 = vrot.lane.b32.xlu1 %v13598_v41, %s16600_s14  ;;  %8723 = vmatprep.mubr.msk.f32.mxu1 %vm5374_vm4, %v5344_v36  ;;  %v5312_v57 = vsel %vm5292_vm6, %v5279_v34, %v4913_v56  ;;  %v5183_v4 = vsel %vm17007_vm10, %v5151_v58, %v13601_v3  ;;  %v4038_v56 = vld [vmem:[#allocation3 + $0x181] sm:$0xff] }
 0x7e2   : > { %4292 = vrot.lane.b32.xlu0 %v4067_v0, %s16403_s27  ;;  %v5182_v0 = vsel %vm17003_vm0, %v5150_v20, %v13580_v40  ;;  %v4041_v20 = vld [vmem:[#allocation3 + $0x1a1] sm:$0xff]  ;;  %vm17014_vm0 = vmmov %vm17006_vm9 }
 0x7e3   : > { %v4533_v60 = vpop.permute.xlu1 %4532  ;;  %v5214_v17 = vsel %vm17004_vm12, %v5182_v0, %v4531_v55  ;;  %vm17015_vm12 = vmmov %vm17011_vm1 }
 0x7e4   : > { %v13624_v27 = vpop.permute.xlu0 %4150  ;;  %v5215_v7 = vsel %vm17008_vm11, %v5183_v4, %v4533_v60  ;;  %vm17017_vm9 = vmmov %vm17013_vm5 }
 0x7e5   : > { %4926 = vrot.lane.b32.xlu1 %v4036_v50, %s9498_s15  ;;  %vm17018_vm10 = vmmov %vm17014_vm0 }
 0x7e6   : > { %4800 = vrot.lane.b32.xlu0 %v13628_v26, %s9497_s24  ;;  %vm17019_vm11 = vmmov %vm17011_vm1 }
 0x7e7   : > { %v5041_v11 = vpop.permute.xlu1 %5040 }
 0x7e8   : > { %v5345_v10 = vsel %vm5325_vm8, %v5312_v57, %v5041_v11  ;;  %v4659_v1 = vpop.permute.xlu0 %4658  ;;  %v4039_v57 = vld [vmem:[#allocation3 + $0x189] sm:$0xff] }
 0x7e9   : > { %4546 = vrot.lane.b32.xlu1 %v4036_v50, %s16605_s29  ;;  %8724 = vmatmul.mubr.msk.f32.gmra.mrb[18].mxu1 %vm5374_vm4, %v5345_v10  ;;  %v5247_v33 = vsel %vm5226_vm15, %v5214_v17, %v4659_v1 }
 0x7ea   : > { %4420 = vrot.lane.b32.xlu0 %v13628_v26, %s16600_s14 }
 0x7eb   : > { %v13638_v24 = vpop.permute.xlu1 %4278 }
 0x7ec   : > { %v13640_v15 = vpop.permute.xlu0 %4152 }
 0x7ed   : > { %5054 = vrot.lane.b32.xlu1 %v4068_v51, %s16267_s2 }
 0x7ee   : > { %4928 = vrot.lane.b32.xlu0 %v4037_v22, %s9498_s15 }
 0x7ef   : > { %v4787_v61 = vpop.permute.xlu1 %4786 }
 0x7f0   : > { %v4661_v53 = vpop.permute.xlu0 %4660  ;;  %v5280_v42 = vsel %vm5259_vm2, %v5247_v33, %v4787_v61  ;;  %v4009_v61 = vld [vmem:[#allocation3 + $0x1a0] sm:$0xff] }
 0x7f1   : > { %4548 = vrot.lane.b32.xlu1 %v4037_v22, %s16605_s29  ;;  %v5248_v19 = vsel %vm5226_vm15, %v5215_v7, %v4661_v53 }
 0x7f2   : > { %4166 = vrot.lane.b32.xlu0 %v4036_v50, %s16406_s25 }
 0x7f3   : > { %v13646_v37 = vpop.permute.xlu1 %4406 }
 0x7f4   : > { %v13648_v46 = vpop.permute.xlu0 %4280 }
 0x7f5   : > { %5056 = vrot.lane.b32.xlu1 %v4069_v63, %s16267_s2 }
 0x7f6   : > { %4674 = vrot.lane.b32.xlu0 %v4068_v51, %s9496_s16 }
 0x7f7   : > { %v4915_v14 = vpop.permute.xlu1 %4914 }
 0x7f8   : > { %v4789_v52 = vpop.permute.xlu0 %4788  ;;  %v5313_v40 = vsel %vm5292_vm6, %v5280_v42, %v4915_v14  ;;  %v5120_v14 = vsel %vm17009_vm13, %v13340_v9, %v13624_v27  ;;  %v4040_v42 = vld [vmem:[#allocation3 + $0x199] sm:$0xff]  ;;  %vm17020_vm13 = vmmov %vm17012_vm3 }
 0x7f9   : > { %4294 = vrot.lane.b32.xlu1 %v4068_v51, %s16403_s27  ;;  %v5281_v38 = vsel %vm5259_vm2, %v5248_v19, %v4789_v52  ;;  %v3976_v51 = vld [vmem:[#allocation3 + $0x18a] sm:$0xff]  ;;  %v5152_v52 = vsel %vm17010_vm14, %v5120_v14, %v13638_v24  ;;  %vm17021_vm14 = vmmov %vm17013_vm5 }
 0x7fa   : > { %4168 = vrot.lane.b32.xlu0 %v4037_v22, %s16406_s25  ;;  %v5184_v0 = vsel %vm17011_vm1, %v5152_v52, %v13646_v37  ;;  %vm17022_vm1 = vmmov %vm17014_vm0 }
 0x7fb   : > { %v13661_v49 = vpop.permute.xlu1 %4534 }
 0x7fc   : > { %v13664_v47 = vpop.f32.mrb[6].mxu1  ;;  %v13667_v59 = vpop.permute.xlu0 %4408 }
 0x7fd   : > { %4802 = vrot.lane.b32.xlu1 %v4006_v62, %s9497_s24  ;;  %v13670_v6 = vpop.f32.mrb[7].mxu1 }
 0x7fe   : > { %4676 = vrot.lane.b32.xlu0 %v4069_v63, %s9496_s16 }
 0x7ff   : > { %v5043_v39 = vpop.permute.xlu1 %5042 }
 0x800   : > { %v5346_v55 = vsel %vm5325_vm8, %v5313_v40, %v5043_v39  ;;  %v4917_v28 = vpop.permute.xlu0 %4916  ;;  %v4073_v39 = vld [vmem:[#allocation3 + $0x1a2] sm:$0xff] }
 0x801   : > { %4422 = vrot.lane.b32.xlu1 %v4006_v62, %s16600_s14  ;;  %8726 = vmatprep.mubr.msk.f32.mxu1 %vm5374_vm4, %v5346_v55  ;;  %v5314_v35 = vsel %vm5292_vm6, %v5281_v38, %v4917_v28  ;;  %v5216_v62 = vsel %vm17012_vm3, %v5184_v0, %v13661_v49  ;;  %v5121_v28 = vsel %vm17013_vm5, %v13368_v21, %v13640_v15  ;;  %vm17023_vm3 = vmmov %vm17019_vm11 }
 0x802   : > { %4296 = vrot.lane.b32.xlu0 %v4069_v63, %s16403_s27  ;;  %v4008_v63 = vld [vmem:[#allocation3 + $0x198] sm:$0xff]  ;;  %v5153_v4 = vsel %vm17014_vm0, %v5121_v28, %v13648_v46  ;;  %vm17024_vm5 = vmmov %vm17016_vm7 }
 0x803   : > { %v13686_v36 = vpop.permute.xlu1 %4536  ;;  %v5185_v7 = vsel %vm17015_vm12, %v5153_v4, %v13667_v59  ;;  %vm17025_vm0 = vmmov %vm17017_vm9 }
 0x804   : > { %v13690_v13 = vpop.permute.xlu0 %4154  ;;  %v5217_v19 = vsel %vm17016_vm7, %v5185_v7, %v13686_v36  ;;  %vm17026_vm12 = vmmov %vm17022_vm1 }
 0x805   : > { %4930 = vrot.lane.b32.xlu1 %v4038_v56, %s9498_s15  ;;  %vm17027_vm7 = vmmov %vm17023_vm3 }
 0x806   : > { %4804 = vrot.lane.b32.xlu0 %v4007_v25, %s9497_s24 }
 0x807   : > { %v5045_v3 = vpop.permute.xlu1 %5044 }
 0x808   : > { %v5347_v54 = vsel %vm5325_vm8, %v5314_v35, %v5045_v3  ;;  %v4663_v50 = vpop.permute.xlu0 %4662 }
 0x809   : > { %4550 = vrot.lane.b32.xlu1 %v4038_v56, %s16605_s29  ;;  %8727 = vmatmul.mubr.msk.f32.gmra.mrb[20].mxu1 %vm5374_vm4, %v5347_v54  ;;  %v5249_v9 = vsel %vm5226_vm15, %v5216_v62, %v4663_v50 }
 0x80a   : > { %4424 = vrot.lane.b32.xlu0 %v4007_v25, %s16600_s14 }
 0x80b   : > { %v13700_v60 = vpop.permute.xlu1 %4282 }
 0x80c   : > { %v13702_v34 = vpop.permute.xlu0 %4156 }
 0x80d   : > { %5058 = vrot.lane.b32.xlu1 %v4070_v12, %s16267_s2 }
 0x80e   : > { %4932 = vrot.lane.b32.xlu0 %v4039_v57, %s9498_s15 }
 0x80f   : > { %v4791_v11 = vpop.permute.xlu1 %4790 }
 0x810   : > { %v4665_v10 = vpop.permute.xlu0 %4664  ;;  %v5282_v24 = vsel %vm5259_vm2, %v5249_v9, %v4791_v11 }
 0x811   : > { %4678 = vrot.lane.b32.xlu1 %v4070_v12, %s9496_s16  ;;  %v5250_v38 = vsel %vm5226_vm15, %v5217_v19, %v4665_v10  ;;  %v5122_v10 = vsel %vm17017_vm9, %v13402_v8, %v13690_v13  ;;  %vm17028_vm9 = vmmov %vm17024_vm5 }
 0x812   : > { %4552 = vrot.lane.b32.xlu0 %v4039_v57, %s16605_s29 }
 0x813   : > { %v4411_v1 = vpop.permute.xlu1 %4410 }
 0x814   : > { %v13708_v22 = vpop.permute.xlu0 %4284 }
 0x815   : > { %4680 = vrot.lane.b32.xlu1 %v3976_v51, %s9496_s16 }
 0x816   : > { %5060 = vrot.lane.b32.xlu0 %v3976_v51, %s16267_s2 }
 0x817   : > { %v4919_v53 = vpop.permute.xlu1 %4918 }
 0x818   : > { %v4793_v30 = vpop.permute.xlu0 %4792  ;;  %v5315_v37 = vsel %vm5292_vm6, %v5282_v24, %v4919_v53 }
 0x819   : > { %4808 = vrot.lane.b32.xlu1 %v4009_v61, %s9497_s24  ;;  %v5283_v15 = vsel %vm5259_vm2, %v5250_v38, %v4793_v30  ;;  %v5154_v61 = vsel %vm17018_vm10, %v5122_v10, %v13700_v60  ;;  %v5123_v60 = vsel %vm17021_vm14, %v13430_v29, %v13702_v34  ;;  %vm17029_vm10 = vmmov %vm17025_vm0 }
 0x81a   : > { %4806 = vrot.lane.b32.xlu0 %v4008_v63, %s9497_s24  ;;  %v5186_v53 = vsel %vm17019_vm11, %v5154_v61, %v4411_v1  ;;  %vm17030_vm11 = vmmov %vm17022_vm1 }
 0x81b   : > { %v4539_v17 = vpop.permute.xlu1 %4538  ;;  %vm17032_vm14 = vmmov %vm17024_vm5 }
 0x81c   : > { %v13723_v33 = vpop.f32.mrb[8].mxu1  ;;  %v4413_v27 = vpop.permute.xlu0 %4412  ;;  %v5218_v14 = vsel %vm17020_vm13, %v5186_v53, %v4539_v17  ;;  %v5155_v17 = vsel %vm17022_vm1, %v5123_v60, %v13708_v22  ;;  %vm17031_vm13 = vmmov %vm17023_vm3 }
 0x81d   : > { %4936 = vrot.lane.b32.xlu1 %v4041_v20, %s9498_s15  ;;  %v13727_v40 = vpop.f32.mrb[9].mxu1  ;;  %v5187_v9 = vsel %vm17023_vm3, %v5155_v17, %v4413_v27  ;;  %vm17033_vm1 = vmmov %vm17025_vm0 }
 0x81e   : > { %4934 = vrot.lane.b32.xlu0 %v4040_v42, %s9498_s15  ;;  %vm17034_vm3 = vmmov %vm17030_vm11  ;;  %s17112_s15 = smov 124  }
 0x81f   : > { %v5047_v55 = vpop.permute.xlu1 %5046 }
 0x820   : > { %v5348_v49 = vsel %vm5325_vm8, %v5315_v37, %v5047_v55  ;;  %v4921_v58 = vpop.permute.xlu0 %4920 }
 0x821   : > { %5064 = vrot.lane.b32.xlu1 %v4073_v39, %s16267_s2  ;;  %8729 = vmatprep.mubr.msk.f32.mxu1 %vm5374_vm4, %v5348_v49  ;;  %v5316_v25 = vsel %vm5292_vm6, %v5283_v15, %v4921_v58 }
 0x822   : > { %5062 = vrot.lane.b32.xlu0 %v4072_v5, %s16267_s2 }
 0x823   : > { %v4541_v56 = vpop.permute.xlu1 %4540 }
 0x824   : > { %v4159_v21 = vpop.permute.xlu0 %4158  ;;  %v5219_v39 = vsel %vm17024_vm5, %v5187_v9, %v4541_v56  ;;  %vm17035_vm5 = vmmov %vm17027_vm7 }
 0x825   : > { %v5124_v38 = vsel %vm17025_vm0, %v13468_v32, %v4159_v21  ;;  %vm17036_vm0 = vmmov %vm17028_vm9 }
 0x827   : > { %v5049_v35 = vpop.permute.xlu1 %5048 }
 0x828   : > { %v5349_v3 = vsel %vm5325_vm8, %v5316_v25, %v5049_v35  ;;  %v4667_v46 = vpop.permute.xlu0 %4666 }
 0x829   : > { %8730 = vmatmul.mubr.msk.f32.gmra.mrb[22].mxu1 %vm5374_vm4, %v5349_v3  ;;  %v5251_v52 = vsel %vm5226_vm15, %v5218_v14, %v4667_v46 }
 0x82b   : > { %v4287_v59 = vpop.permute.xlu1 %4286 }
 0x82c   : > { %v4161_v54 = vpop.permute.xlu0 %4160  ;;  %v5156_v25 = vsel %vm17026_vm12, %v5124_v38, %v4287_v59  ;;  %vm17037_vm12 = vmmov %vm17033_vm1 }
 0x82d   : > { %v5125_v59 = vsel %vm17029_vm10, %v13496_v31, %v4161_v54  ;;  %vm17040_vm10 = vmmov %vm17036_vm0 }
 0x82f   : > { %v4795_v50 = vpop.permute.xlu1 %4794 }
 0x830   : > { %v4669_v12 = vpop.permute.xlu0 %4668  ;;  %v5284_v62 = vsel %vm5259_vm2, %v5251_v52, %v4795_v50 }
 0x831   : > { %v5252_v37 = vsel %vm5226_vm15, %v5219_v39, %v4669_v12 }
 0x833   : > { %v4415_v57 = vpop.permute.xlu1 %4414 }
 0x834   : > { %v4289_v11 = vpop.permute.xlu0 %4288  ;;  %v5188_v35 = vsel %vm17027_vm7, %v5156_v25, %v4415_v57  ;;  %vm17038_vm7 = vmmov %vm17034_vm3 }
 0x835   : > { %v5157_v53 = vsel %vm17030_vm11, %v5125_v59, %v4289_v11  ;;  %vm17041_vm11 = vmmov %vm17033_vm1 }
 0x837   : > { %v4923_v36 = vpop.permute.xlu1 %4922 }
 0x838   : > { %v4797_v51 = vpop.permute.xlu0 %4796  ;;  %v5317_v8 = vsel %vm5292_vm6, %v5284_v62, %v4923_v36 }
 0x839   : > { %v5285_v49 = vsel %vm5259_vm2, %v5252_v37, %v4797_v51 }
 0x83b   : > { %v4543_v63 = vpop.permute.xlu1 %4542 }
 0x83c   : > { %v13757_v30 = vpop.f32.mrb[10].mxu1  ;;  %v4417_v20 = vpop.permute.xlu0 %4416  ;;  %v5220_v46 = vsel %vm17028_vm9, %v5188_v35, %v4543_v63  ;;  %vm17039_vm9 = vmmov %vm17035_vm5 }
 0x83d   : > { %v13760_v0 = vpop.f32.mrb[11].mxu1  ;;  %v5189_v63 = vsel %vm17031_vm13, %v5157_v53, %v4417_v20  ;;  %vm17042_vm13 = vmmov %vm17033_vm1 }
 0x83f   : > { %v5051_v13 = vpop.permute.xlu1 %5050 }
 0x840   : > { %v5350_v42 = vsel %vm5325_vm8, %v5317_v8, %v5051_v13  ;;  %v4925_v1 = vpop.permute.xlu0 %4924 }
 0x841   : > { %8732 = vmatprep.mubr.msk.f32.mxu1 %vm5374_vm4, %v5350_v42  ;;  %v5318_v5 = vsel %vm5292_vm6, %v5285_v49, %v4925_v1 }
 0x843   : > { %v4545_v24 = vpop.permute.xlu1 %4544 }
 0x844   : > { %v4163_v55 = vpop.permute.xlu0 %4162  ;;  %v5221_v52 = vsel %vm17032_vm14, %v5189_v63, %v4545_v24  ;;  %vm17043_vm14 = vmmov %vm17034_vm3 }
 0x845   : > { %v5126_v37 = vsel %vm17033_vm1, %v13532_v18, %v4163_v55  ;;  %vm17044_vm1 = vmmov %vm17034_vm3 }
 0x847   : > { %v5053_v28 = vpop.permute.xlu1 %5052 }
 0x848   : > { %v5351_v29 = vsel %vm5325_vm8, %v5318_v5, %v5053_v28  ;;  %v4671_v34 = vpop.permute.xlu0 %4670 }
 0x849   : > { %8733 = vmatmul.mubr.msk.f32.gmra.mrb[24].mxu1 %vm5374_vm4, %v5351_v29  ;;  %v5253_v12 = vsel %vm5226_vm15, %v5220_v46, %v4671_v34 }
 0x84b   : > { %v4291_v58 = vpop.permute.xlu1 %4290 }
 0x84c   : > { %v4165_v22 = vpop.permute.xlu0 %4164  ;;  %v5158_v5 = vsel %vm17034_vm3, %v5126_v37, %v4291_v58  ;;  %vm17045_vm3 = vmmov %vm17035_vm5 }
 0x84f   : > { %v4799_v4 = vpop.permute.xlu1 %4798 }
 0x850   : > { %v4673_v27 = vpop.permute.xlu0 %4672  ;;  %v5286_v51 = vsel %vm5259_vm2, %v5253_v12, %v4799_v4 }
 0x851   : > { %v5254_v62 = vsel %vm5226_vm15, %v5221_v52, %v4673_v27 }
 0x853   : > { %v4419_v7 = vpop.permute.xlu1 %4418 }
 0x854   : > { %v4293_v19 = vpop.permute.xlu0 %4292  ;;  %v5190_v28 = vsel %vm17035_vm5, %v5158_v5, %v4419_v7  ;;  %v5127_v7 = vsel %vm17037_vm12, %v13562_v23, %v4165_v22  ;;  %vm17046_vm5 = vmmov %vm17045_vm3 }
 0x855   : > { %vm17047_vm12 = vmmov %vm17036_vm0 }
 0x857   : > { %v4927_v56 = vpop.permute.xlu1 %4926 }
 0x858   : > { %v4801_v15 = vpop.permute.xlu0 %4800  ;;  %v5319_v61 = vsel %vm5292_vm6, %v5286_v51, %v4927_v56 }
 0x859   : > { %v5287_v13 = vsel %vm5259_vm2, %v5254_v62, %v4801_v15 }
 0x85b   : > { %v4547_v3 = vpop.permute.xlu1 %4546 }
 0x85c   : > { %v13783_v50 = vpop.f32.mrb[12].mxu1  ;;  %v4421_v36 = vpop.permute.xlu0 %4420  ;;  %v5222_v34 = vsel %vm17036_vm0, %v5190_v28, %v4547_v3  ;;  %v5159_v3 = vsel %vm17038_vm7, %v5127_v7, %v4293_v19 }
 0x85d   : > { %v13786_v10 = vpop.f32.mrb[13].mxu1  ;;  %v5191_v46 = vsel %vm17039_vm9, %v5159_v3, %v4421_v36 }
 0x85f   : > { %v5055_v32 = vpop.permute.xlu1 %5054 }
 0x860   : > { %v5352_v21 = vsel %vm5325_vm8, %v5319_v61, %v5055_v32  ;;  %v4929_v57 = vpop.permute.xlu0 %4928 }
 0x861   : > { %8735 = vmatprep.mubr.msk.f32.mxu1 %vm5374_vm4, %v5352_v21  ;;  %v5320_v42 = vsel %vm5292_vm6, %v5287_v13, %v4929_v57 }
 0x863   : > { %v4549_v14 = vpop.permute.xlu1 %4548 }
 0x864   : > { %v4167_v8 = vpop.permute.xlu0 %4166  ;;  %v5223_v51 = vsel %vm17040_vm10, %v5191_v46, %v4549_v14 }
 0x865   : > { %v5128_v36 = vsel %vm17042_vm13, %v13598_v41, %v4167_v8 }
 0x867   : > { %v5057_v60 = vpop.permute.xlu1 %5056 }
 0x868   : > { %v5353_v31 = vsel %vm5325_vm8, %v5320_v42, %v5057_v60  ;;  %v4675_v54 = vpop.permute.xlu0 %4674 }
 0x869   : > { %8736 = vmatmul.mubr.msk.f32.gmra.mrb[26].mxu1 %vm5374_vm4, %v5353_v31  ;;  %v5255_v27 = vsel %vm5226_vm15, %v5222_v34, %v4675_v54 }
 0x86b   : > { %v4295_v1 = vpop.permute.xlu1 %4294 }
 0x86c   : > { %v4169_v11 = vpop.permute.xlu0 %4168  ;;  %v5160_v52 = vsel %vm17044_vm1, %v5128_v36, %v4295_v1 }
 0x86d   : > { %v5129_v19 = vsel %vm17041_vm11, %v13628_v26, %v4169_v11 }
 0x86f   : > { %v4803_v17 = vpop.permute.xlu1 %4802 }
 0x870   : > { %v4677_v20 = vpop.permute.xlu0 %4676  ;;  %v5288_v15 = vsel %vm5259_vm2, %v5255_v27, %v4803_v17 }
 0x871   : > { %v5256_v61 = vsel %vm5226_vm15, %v5223_v51, %v4677_v20 }
 0x873   : > { %v4423_v9 = vpop.permute.xlu1 %4422 }
 0x874   : > { %v4297_v39 = vpop.permute.xlu0 %4296  ;;  %v5192_v13 = vsel %vm17046_vm5, %v5160_v52, %v4423_v9 }
 0x875   : > { %v5161_v63 = vsel %vm17043_vm14, %v5129_v19, %v4297_v39 }
 0x877   : > { %v4931_v24 = vpop.permute.xlu1 %4930 }
 0x878   : > { %v4805_v49 = vpop.permute.xlu0 %4804  ;;  %v5321_v25 = vsel %vm5292_vm6, %v5288_v15, %v4931_v24 }
 0x879   : > { %v5289_v21 = vsel %vm5259_vm2, %v5256_v61, %v4805_v49 }
 0x87b   : > { %v4551_v29 = vpop.permute.xlu1 %4550 }
 0x87c   : > { %v13807_v4 = vpop.f32.mrb[14].mxu1  ;;  %v4425_v56 = vpop.permute.xlu0 %4424  ;;  %v5224_v31 = vsel %vm17047_vm12, %v5192_v13, %v4551_v29 }
 0x87d   : > { %v13810_v38 = vpop.f32.mrb[15].mxu1  ;;  %v5193_v62 = vsel %vm17045_vm3, %v5161_v63, %v4425_v56  ;;  %v13865_v56 = vld [vmem:[%s17048_s7] ss:$0 sm:$0xff] }
 0x87e   : > { %v13869_v15 = vadd.f32 %v13454_v43, %v13865_v56  ;;  %v13893_v3 = vadd.f32 %v13530_v45, %v13865_v56  ;;  %v13920_v36 = vadd.f32 %v13865_v56, %v13670_v6  ;;  %v13932_v6 = vadd.f32 %v13664_v47, %v13865_v56 }
 0x87f   : > { %v5059_v18 = vpop.permute.xlu1 %5058 }
 0x880   : > { %v5354_v55 = vsel %vm5325_vm8, %v5321_v25, %v5059_v18  ;;  %v4933_v58 = vpop.permute.xlu0 %4932  ;;  %v13873_v25 = vadd.f32 %v13865_v56, %v13456_v44  ;;  %v13877_v18 = vadd.f32 %v13865_v56, %v13539_v48 }
 0x881   : > { %8738 = vmatprep.mubr.msk.f32.mxu1 %vm5374_vm4, %v5354_v55  ;;  %v5322_v59 = vsel %vm5292_vm6, %v5289_v21, %v4933_v58  ;;  %v5768_v55 = vmul.f32 %v13869_v15, %v13869_v15 }
 0x882   : > { %v5767_v58 = vmul.f32 %v13873_v25, %v13873_v25  ;;  %v5769_v44 = vmul.f32 %v13877_v18, %v13877_v18 }
 0x883   : > { %v4679_v35 = vpop.permute.xlu1 %4678 }
 0x884   : > { %v4553_v12 = vpop.permute.xlu0 %4552  ;;  %v5257_v26 = vsel %vm5226_vm15, %v5224_v31, %v4679_v35 }
 0x885   : > { %v5225_v42 = vsel %vm17036_vm0, %v5193_v62, %v4553_v12  ;;  %v13899_v12 = vadd.f32 %v13865_v56, %v13605_v16 }
 0x887   : > { %v4681_v32 = vpop.permute.xlu1 %4680  ;;  %v5771_v45 = vmul.f32 %v13899_v12, %v13899_v12 }
 0x888   : > { %v5061_v57 = vpop.permute.xlu0 %5060  ;;  %v5258_v54 = vsel %vm5226_vm15, %v5225_v42, %v4681_v32  ;;  %vm17049_vm15 = vmmov %vm17041_vm11 }
 0x889   : > { %v5355_v53 = vsel %vm5325_vm8, %v5322_v59, %v5061_v57  ;;  %v5699_v7 = vsel %vm17049_vm15, %v13869_v15, 0.0  ;;  %v5770_v57 = vmul.f32 %v13893_v3, %v13893_v3 }
 0x88a   : > { %8739 = vmatmul.mubr.msk.f32.gmra.mrb[28].mxu1 %vm5374_vm4, %v5355_v53 }
 0x88b   : > { %v4809_v23 = vpop.permute.xlu1 %4808 }
 0x88c   : > { %v4807_v22 = vpop.permute.xlu0 %4806  ;;  %v5291_v41 = vsel %vm5259_vm2, %v5258_v54, %v4809_v23 }
 0x88d   : > { %v5290_v11 = vsel %vm5259_vm2, %v5257_v26, %v4807_v22  ;;  %vm17050_vm2 = vmmov %vm17041_vm11  ;;  %v13914_v22 = vadd.f32 %v13596_v2, %v13865_v56  ;;  %v5773_v2 = vmul.f32 %v13920_v36, %v13920_v36  ;;  %v13938_v26 = vadd.f32 %v13865_v56, %v13727_v40 }
 0x88e   : > { %v5698_v43 = vsel %vm17050_vm2, %v13873_v25, 0.0  ;;  %vm17053_vm7 = vmmov %vm17050_vm2  ;;  %v13950_v40 = vadd.f32 %v13723_v33, %v13865_v56 }
 0x88f   : > { %v4937_v14 = vpop.permute.xlu1 %4936  ;;  %v5701_v46 = vsel %vm17053_vm7, %v13877_v18, 0.0  ;;  %v5700_v51 = vadd.f32 %v5699_v7, %v5698_v43  ;;  %vm17054_vm9 = vmmov %vm17050_vm2  ;;  %v5772_v42 = vmul.f32 %v13914_v22, %v13914_v22  ;;  %v5775_v47 = vmul.f32 %v13938_v26, %v13938_v26 }
 0x890   : > { %v4935_v60 = vpop.permute.xlu0 %4934  ;;  %v5324_v1 = vsel %vm5292_vm6, %v5291_v41, %v4937_v14  ;;  %v5802_v61 = vsel %vm17054_vm9, %v5769_v44, 0.0  ;;  %vm17055_vm10 = vmmov %vm17050_vm2 }
 0x891   : > { %v5323_v17 = vsel %vm5292_vm6, %v5290_v11, %v4935_v60  ;;  %vm17051_vm6 = vmmov %vm17050_vm2  ;;  %v5702_v21 = vadd.f32 %v5701_v46, %v5700_v51  ;;  %v5703_v16 = vsel %vm17055_vm10, %v13893_v3, 0.0  ;;  %v5776_v46 = vmul.f32 %v13950_v40, %v13950_v40 }
 0x892   : > { %v5800_v35 = vsel %vm17051_vm6, %v5768_v55, 0.0  ;;  %vm17056_vm11 = vmmov %vm17050_vm2 }
 0x893   : > { %v5065_v8 = vpop.permute.xlu1 %5064  ;;  %v5705_v19 = vsel %vm17056_vm11, %v13899_v12, 0.0  ;;  %v5704_v63 = vadd.f32 %v5703_v16, %v5702_v21  ;;  %vm17057_vm13 = vmmov %vm17050_vm2  ;;  %v13974_v21 = vadd.f32 %v13865_v56, %v13786_v10  ;;  %v13986_v10 = vadd.f32 %v13783_v50, %v13865_v56 }
 0x894   : > { %v5357_v20 = vsel %vm5325_vm8, %v5324_v1, %v5065_v8  ;;  %v5063_v9 = vpop.permute.xlu0 %5062  ;;  %v5804_v14 = vsel %vm17057_vm13, %v5770_v57, 0.0  ;;  %vm17058_vm14 = vmmov %vm17050_vm2 }
 0x895   : > { %v5356_v39 = vsel %vm5325_vm8, %v5323_v17, %v5063_v9  ;;  %v5806_v52 = vsel %vm17058_vm14, %v5771_v45, 0.0  ;;  %v5706_v62 = vadd.f32 %v5705_v19, %v5704_v63  ;;  %vm17059_vm1 = vmmov %vm17050_vm2 }
 0x896   : > { %8741 = vmatprep.mubr.msk.f32.mxu1 %vm5374_vm4, %v5356_v39  ;;  %v5707_v31 = vsel %vm17059_vm1, %v13914_v22, 0.0  ;;  %vm17060_vm3 = vmmov %vm17059_vm1 }
 0x897   : > { %8742 = vmatmul.mubr.msk.f32.gmra.mrb[30].mxu1 %vm5374_vm4, %v5357_v20  ;;  %vm17052_vm4 = vmmov %vm17050_vm2  ;;  %v5709_v54 = vsel %vm17060_vm3, %v13920_v36, 0.0  ;;  %v5708_v41 = vadd.f32 %v5707_v31, %v5706_v62  ;;  %v5774_v20 = vmul.f32 %v13932_v6, %v13932_v6 }
 0x898   : > { %v5799_v48 = vsel %vm17052_vm4, %v5767_v58, 0.0  ;;  %vm17061_vm5 = vmmov %vm17059_vm1  ;;  %v13956_v58 = vadd.f32 %v13865_v56, %v13760_v0  ;;  %v13968_v0 = vadd.f32 %v13757_v30, %v13865_v56  ;;  %v5779_v30 = vmul.f32 %v13974_v21, %v13974_v21 }
 0x899   : > { %v5801_v32 = vadd.f32 %v5800_v35, %v5799_v48  ;;  %v5808_v8 = vsel %vm17061_vm5, %v5772_v42, 0.0  ;;  %vm17062_vm0 = vmmov %vm17059_vm1  ;;  %v5710_v1 = vadd.f32 %v5709_v54, %v5708_v41  ;;  %v5780_v41 = vmul.f32 %v13986_v10, %v13986_v10 }
 0x89a   : > { %v5810_v11 = vsel %vm17062_vm0, %v5773_v2, 0.0  ;;  %vm17063_vm12 = vmmov %vm17062_vm0  ;;  %v5777_v33 = vmul.f32 %v13956_v58, %v13956_v58  ;;  %v5778_v63 = vmul.f32 %v13968_v0, %v13968_v0 }
 0x89b   : > { %v5803_v23 = vadd.f32 %v5802_v61, %v5801_v32  ;;  %v5711_v39 = vsel %vm17063_vm12, %v13932_v6, 0.0  ;;  %vm17064_vm15 = vmmov %vm17062_vm0 }
 0x89c   : > { %v13846_v24 = vpop.f32.mrb[16].mxu1  ;;  %v5713_v55 = vsel %vm17064_vm15, %v13938_v26, 0.0  ;;  %v5712_v7 = vadd.f32 %v5711_v39, %v5710_v1  ;;  %vm17065_vm2 = vmmov %vm17062_vm0  ;;  %v14006_v1 = vadd.f32 %v13807_v4, %v13865_v56  ;;  %v5824_v39 = vsel %vm17062_vm0, %v5780_v41, 0.0 }
 0x89d   : > { %v13848_v37 = vpop.f32.mrb[17].mxu1  ;;  %v5805_v13 = vadd.f32 %v5804_v14, %v5803_v23  ;;  %v5812_v43 = vsel %vm17065_vm2, %v5774_v20, 0.0  ;;  %vm17066_vm6 = vmmov %vm17062_vm0 }
 0x89e   : > { %v5814_v44 = vsel %vm17066_vm6, %v5775_v47, 0.0  ;;  %v5714_v35 = vadd.f32 %v5713_v55, %v5712_v7  ;;  %vm17067_vm4 = vmmov %vm17062_vm0  ;;  %v14012_v20 = vadd.f32 %v13865_v56, %v13848_v37  ;;  %v14024_v37 = vadd.f32 %v13846_v24, %v13865_v56 }
 0x89f   : > { %v5807_v60 = vadd.f32 %v5806_v52, %v5805_v13  ;;  %v5715_v61 = vsel %vm17067_vm4, %v13950_v40, 0.0  ;;  %vm17068_vm7 = vmmov %vm17062_vm0  ;;  %v13992_v13 = vadd.f32 %v13865_v56, %v13810_v38 }
 0x8a0   : > { %v5717_v32 = vsel %vm17068_vm7, %v13956_v58, 0.0  ;;  %v5716_v57 = vadd.f32 %v5715_v61, %v5714_v35  ;;  %vm17069_vm9 = vmmov %vm17062_vm0  ;;  %v5783_v4 = vmul.f32 %v14012_v20, %v14012_v20 }
 0x8a1   : > { %v5809_v17 = vadd.f32 %v5808_v8, %v5807_v60  ;;  %v5816_v45 = vsel %vm17069_vm9, %v5776_v46, 0.0  ;;  %vm17070_vm10 = vmmov %vm17062_vm0  ;;  %v5781_v50 = vmul.f32 %v13992_v13, %v13992_v13 }
 0x8a2   : > { %v5818_v23 = vsel %vm17070_vm10, %v5777_v33, 0.0  ;;  %v5718_v16 = vadd.f32 %v5717_v32, %v5716_v57  ;;  %vm17071_vm11 = vmmov %vm17062_vm0 }
 0x8a3   : > { %v5811_v9 = vadd.f32 %v5810_v11, %v5809_v17  ;;  %v5719_v52 = vsel %vm17071_vm11, %v13968_v0, 0.0  ;;  %vm17072_vm13 = vmmov %vm17062_vm0 }
 0x8a4   : > { %v5721_v62 = vsel %vm17072_vm13, %v13974_v21, 0.0  ;;  %v5720_v42 = vadd.f32 %v5719_v52, %v5718_v16  ;;  %vm17073_vm14 = vmmov %vm17062_vm0 }
 0x8a5   : > { %v5813_v48 = vadd.f32 %v5812_v43, %v5811_v9  ;;  %v5820_v2 = vsel %vm17073_vm14, %v5778_v63, 0.0  ;;  %vm17074_vm1 = vmmov %vm17062_vm0 }
 0x8a6   : > { %v5822_v60 = vsel %vm17074_vm1, %v5779_v30, 0.0  ;;  %v5722_v31 = vadd.f32 %v5721_v62, %v5720_v42  ;;  %vm17075_vm3 = vmmov %vm17062_vm0 }
 0x8a7   : > { %v5815_v51 = vadd.f32 %v5814_v44, %v5813_v48  ;;  %v5723_v38 = vsel %vm17075_vm3, %v13986_v10, 0.0  ;;  %vm17076_vm5 = vmmov %vm17062_vm0  ;;  %v5782_v44 = vmul.f32 %v14006_v1, %v14006_v1 }
 0x8a8   : > { %v5725_v17 = vsel %vm17076_vm5, %v13992_v13, 0.0  ;;  %v5724_v9 = vadd.f32 %v5723_v38, %v5722_v31  ;;  %vm17077_vm12 = vmmov %vm17062_vm0 }
 0x8a9   : > { %v5817_v19 = vadd.f32 %v5816_v45, %v5815_v51  ;;  %v5826_v55 = vsel %vm17077_vm12, %v5781_v50, 0.0  ;;  %vm17078_vm15 = vmmov %vm17062_vm0 }
 0x8aa   : > { %v5726_v7 = vadd.f32 %v5725_v17, %v5724_v9  ;;  %v5727_v48 = vsel %vm17078_vm15, %v14006_v1, 0.0  ;;  %vm17079_vm2 = vmmov %vm17062_vm0 }
 0x8ab   : > { %v5819_v14 = vadd.f32 %v5818_v23, %v5817_v19  ;;  %v5729_v46 = vsel %vm17079_vm2, %v14012_v20, 0.0  ;;  %vm17080_vm6 = vmmov %vm17062_vm0  ;;  %v5784_v23 = vmul.f32 %v14024_v37, %v14024_v37 }
 0x8ac   : > { %v5728_v51 = vadd.f32 %v5727_v48, %v5726_v7  ;;  %v5828_v61 = vsel %vm17080_vm6, %v5782_v44, 0.0  ;;  %vm17081_vm4 = vmmov %vm17062_vm0 }
 0x8ad   : > { %v5821_v54 = vadd.f32 %v5820_v2, %v5819_v14  ;;  %v5830_v32 = vsel %vm17081_vm4, %v5783_v4, 0.0  ;;  %vm17082_vm7 = vmmov %vm17062_vm0 }
 0x8ae   : > { %v5730_v57 = vadd.f32 %v5729_v46, %v5728_v51  ;;  %v5731_v19 = vsel %vm17082_vm7, %v14024_v37, 0.0  ;;  %vm17083_vm9 = vmmov %vm17062_vm0 }
 0x8af   : > { %v5823_v8 = vadd.f32 %v5822_v60, %v5821_v54  ;;  %vm17084_vm10 = vmmov %vm17062_vm0 }
 0x8b0   : > { %v5732_v14 = vadd.f32 %v5731_v19, %v5730_v57  ;;  %v5832_v52 = vsel %vm17084_vm10, %v5784_v23, 0.0  ;;  %vm17085_vm11 = vmmov %vm17062_vm0 }
 0x8b1   : > { %v5825_v43 = vadd.f32 %v5824_v39, %v5823_v8  ;;  %vm17086_vm13 = vmmov %vm17062_vm0 }
 0x8b2   : > { %vm17087_vm14 = vmmov %vm17062_vm0 }
 0x8b3   : > { %v5827_v35 = vadd.f32 %v5826_v55, %v5825_v43  ;;  %vm17088_vm1 = vmmov %vm17062_vm0 }
 0x8b4   : > { %vm17089_vm3 = vmmov %vm17062_vm0 }
 0x8b5   : > { %v5829_v45 = vadd.f32 %v5828_v61, %v5827_v35  ;;  %vm17090_vm5 = vmmov %vm17062_vm0 }
 0x8b6   : > { %vm17091_vm12 = vmmov %vm17062_vm0 }
 0x8b7   : > { %v5831_v16 = vadd.f32 %v5830_v32, %v5829_v45  ;;  %vm17092_vm15 = vmmov %vm17062_vm0 }
 0x8b8   : > { %vm17093_vm2 = vmmov %vm17062_vm0 }
 0x8b9   : > { %v5833_v2 = vadd.f32 %v5832_v52, %v5831_v16  ;;  %vm17094_vm6 = vmmov %vm17062_vm0 }
 0x8ba   : > { %vm17095_vm4 = vmmov %vm17062_vm0 }
 0x8bb   : > { %vm17096_vm7 = vmmov %vm17062_vm0 }
 0x8bc   : > { %v13850_v49 = vpop.f32.mrb[18].mxu1  ;;  %vm17098_vm10 = vmmov %vm17062_vm0 }
 0x8bd   : > { %v13852_v5 = vpop.f32.mrb[19].mxu1 }
 0x8be   : > { %v14030_v33 = vadd.f32 %v13865_v56, %v13852_v5  ;;  %v14042_v5 = vadd.f32 %v13850_v49, %v13865_v56 }
 0x8c0   : > { %v5785_v24 = vmul.f32 %v14030_v33, %v14030_v33  ;;  %v5733_v63 = vsel %vm17083_vm9, %v14030_v33, 0.0  ;;  %v5786_v60 = vmul.f32 %v14042_v5, %v14042_v5  ;;  %v5735_v54 = vsel %vm17086_vm13, %v14042_v5, 0.0  ;;  %vm17097_vm9 = vmmov %vm17062_vm0 }
 0x8c1   : > { %v5734_v42 = vadd.f32 %v5733_v63, %v5732_v14  ;;  %vm17100_vm13 = vmmov %vm17062_vm0 }
 0x8c2   : > { %v5834_v62 = vsel %vm17085_vm11, %v5785_v24, 0.0  ;;  %v5836_v38 = vsel %vm17088_vm1, %v5786_v60, 0.0  ;;  %vm17099_vm11 = vmmov %vm17062_vm0 }
 0x8c3   : > { %v5835_v31 = vadd.f32 %v5834_v62, %v5833_v2  ;;  %v5736_v8 = vadd.f32 %v5735_v54, %v5734_v42  ;;  %vm17102_vm1 = vmmov %vm17062_vm0 }
 0x8c5   : > { %v5837_v39 = vadd.f32 %v5836_v38, %v5835_v31 }
 0x8dc   : > { %v13854_v28 = vpop.f32.mrb[20].mxu1 }
 0x8dd   : > { %v13856_v29 = vpop.f32.mrb[21].mxu1 }
 0x8de   : > { %v14048_v30 = vadd.f32 %v13865_v56, %v13856_v29  ;;  %v14060_v29 = vadd.f32 %v13854_v28, %v13865_v56 }
 0x8e0   : > { %v5787_v49 = vmul.f32 %v14048_v30, %v14048_v30  ;;  %v5737_v41 = vsel %vm17087_vm14, %v14048_v30, 0.0  ;;  %v5788_v55 = vmul.f32 %v14060_v29, %v14060_v29  ;;  %v5739_v43 = vsel %vm17090_vm5, %v14060_v29, 0.0  ;;  %vm17101_vm14 = vmmov %vm17062_vm0 }
 0x8e1   : > { %v5738_v9 = vadd.f32 %v5737_v41, %v5736_v8  ;;  %vm17104_vm5 = vmmov %vm17062_vm0 }
 0x8e2   : > { %v5838_v17 = vsel %vm17089_vm3, %v5787_v49, 0.0  ;;  %v5840_v48 = vsel %vm17091_vm12, %v5788_v55, 0.0  ;;  %vm17103_vm3 = vmmov %vm17062_vm0 }
 0x8e3   : > { %v5839_v7 = vadd.f32 %v5838_v17, %v5837_v39  ;;  %v5740_v35 = vadd.f32 %v5739_v43, %v5738_v9  ;;  %vm17105_vm12 = vmmov %vm17062_vm0 }
 0x8e5   : > { %v5841_v61 = vadd.f32 %v5840_v48, %v5839_v7 }
 0x8fc   : > { %v13858_v34 = vpop.f32.mrb[22].mxu1 }
 0x8fd   : > { %v13860_v27 = vpop.f32.mrb[23].mxu1 }
 0x8fe   : > { %v14066_v50 = vadd.f32 %v13865_v56, %v13860_v27  ;;  %v14078_v27 = vadd.f32 %v13858_v34, %v13865_v56 }
 0x900   : > { %v5789_v28 = vmul.f32 %v14066_v50, %v14066_v50  ;;  %v5741_v44 = vsel %vm17062_vm0, %v14066_v50, 0.0  ;;  %v5790_v32 = vmul.f32 %v14078_v27, %v14078_v27  ;;  %v5743_v45 = vsel %vm17093_vm2, %v14078_v27, 0.0  ;;  %vm17107_vm2 = vmmov %vm17062_vm0 }
 0x901   : > { %v5742_v51 = vadd.f32 %v5741_v44, %v5740_v35 }
 0x902   : > { %v5842_v46 = vsel %vm17092_vm15, %v5789_v28, 0.0  ;;  %v5844_v19 = vsel %vm17095_vm4, %v5790_v32, 0.0  ;;  %vm17106_vm15 = vmmov %vm17062_vm0 }
 0x903   : > { %v5843_v57 = vadd.f32 %v5842_v46, %v5841_v61  ;;  %v5744_v16 = vadd.f32 %v5743_v45, %v5742_v51  ;;  %vm17109_vm4 = vmmov %vm17062_vm0 }
 0x905   : > { %v5845_v52 = vadd.f32 %v5844_v19, %v5843_v57 }
 0x91c   : > { %v13902_v59 = vpop.f32.mrb[24].mxu1 }
 0x91d   : > { %v13908_v53 = vpop.f32.mrb[25].mxu1 }
 0x91e   : > { %v14084_v4 = vadd.f32 %v13865_v56, %v13908_v53  ;;  %v14096_v53 = vadd.f32 %v13902_v59, %v13865_v56 }
 0x920   : > { %v5791_v34 = vmul.f32 %v14084_v4, %v14084_v4  ;;  %v5745_v23 = vsel %vm17094_vm6, %v14084_v4, 0.0  ;;  %v5792_v42 = vmul.f32 %v14096_v53, %v14096_v53  ;;  %vm17108_vm6 = vmmov %vm17062_vm0 }
 0x921   : > { %v5746_v14 = vadd.f32 %v5745_v23, %v5744_v16 }
 0x922   : > { %v5846_v63 = vsel %vm17096_vm7, %v5791_v34, 0.0  ;;  %v5848_v8 = vsel %vm17099_vm11, %v5792_v42, 0.0  ;;  %vm17110_vm7 = vcmask 24576  }
 0x923   : > { %v5847_v60 = vadd.f32 %v5846_v63, %v5845_v52  ;;  %vm17114_vm11 = vmmov %vm17110_vm7 }
 0x925   : > { %v5849_v9 = vadd.f32 %v5848_v8, %v5847_v60 }
 0x93c   : > { %v14000_v11 = vpop.f32.mrb[26].mxu1 }
 0x93d   : > { %v5667_v47 = vpop.f32.mrb[27].mxu1  ;;  %v14113_v49 = vadd.f32 %v14000_v11, %v13865_v56 }
 0x93e   : > { %v14101_v24 = vadd.f32 %v13865_v56, %v5667_v47  ;;  %v5747_v47 = vsel %vm17097_vm9, %v14096_v53, 0.0  ;;  %vm17111_vm9 = vmmov %vm17110_vm7 }
 0x93f   : > { %v5748_v41 = vadd.f32 %v5747_v47, %v5746_v14  ;;  %v5794_v39 = vmul.f32 %v14113_v49, %v14113_v49  ;;  %v5751_v28 = vsel %vm17101_vm14, %v14113_v49, 0.0 }
 0x940   : > { %v5793_v59 = vmul.f32 %v14101_v24, %v14101_v24  ;;  %v5749_v31 = vsel %vm17098_vm10, %v14101_v24, 0.0  ;;  %vm17113_vm10 = vmmov %vm17110_vm7 }
 0x941   : > { %v5750_v17 = vadd.f32 %v5749_v31, %v5748_v41  ;;  %v5852_v35 = vsel %vm17103_vm3, %v5794_v39, 0.0 }
 0x942   : > { %v5850_v38 = vsel %vm17100_vm13, %v5793_v59, 0.0  ;;  %vm17115_vm13 = vcmask 31744  }
 0x943   : > { %v5851_v55 = vadd.f32 %v5850_v38, %v5849_v9  ;;  %v5752_v44 = vadd.f32 %v5751_v28, %v5750_v17  ;;  %vm17116_vm14 = vmmov %vm17115_vm13 }
 0x945   : > { %v5853_v51 = vadd.f32 %v5852_v35, %v5851_v55 }
 0x95d   : > { %v8740_v62 = vpop.f32.mrb[28].mxu1 }
 0x95e   : > { %v5677_v2 = vpop.f32.mrb[29].mxu1  ;;  %v14129_v7 = vadd.f32 %v8740_v62, %v13865_v56 }
 0x95f   : > { %v14118_v54 = vadd.f32 %v13865_v56, %v5677_v2 }
 0x960   : > { %v5796_v61 = vmul.f32 %v14129_v7, %v14129_v7  ;;  %v5755_v23 = vsel %vm17062_vm0, %v14129_v7, 0.0 }
 0x961   : > { %v5795_v11 = vmul.f32 %v14118_v54, %v14118_v54  ;;  %v5753_v43 = vsel %vm17102_vm1, %v14118_v54, 0.0 }
 0x962   : > { %v5754_v46 = vadd.f32 %v5753_v43, %v5752_v44  ;;  %v5856_v63 = vsel %vm17105_vm12, %v5796_v61, 0.0 }
 0x963   : > { %v5854_v48 = vsel %vm17104_vm5, %v5795_v11, 0.0 }
 0x964   : > { %v5855_v34 = vadd.f32 %v5854_v48, %v5853_v51  ;;  %v5756_v19 = vadd.f32 %v5755_v23, %v5754_v46 }
 0x966   : > { %v5857_v59 = vadd.f32 %v5856_v63, %v5855_v34 }
 0x96a   : > { %v8743_v32 = vpop.f32.mrb[30].mxu1 }
 0x96b   : > { %v14138_v57 = vadd.f32 %v8743_v32, %v13865_v56  ;;  %v5687_v45 = vpop.f32.mrb[31].mxu1 }
 0x96c   : > { %v14143_v16 = vadd.f32 %v13865_v56, %v5687_v45 }
 0x96d   : > { %v5798_v14 = vmul.f32 %v14138_v57, %v14138_v57  ;;  %v5759_v2 = vsel %vm17107_vm2, %v14138_v57, 0.0 }
 0x96e   : > { %v5757_v52 = vsel %vm17106_vm15, %v14143_v16, 0.0  ;;  %v5797_v62 = vmul.f32 %v14143_v16, %v14143_v16 }
 0x96f   : > { %v5758_v42 = vadd.f32 %v5757_v52, %v5756_v19  ;;  %v5860_v31 = vsel %vm17109_vm4, %v5798_v14, 0.0 }
 0x970   : > { %v5858_v56 = vsel %vm17108_vm6, %v5797_v62, 0.0 }
 0x971   : > { %v5760_v60 = vadd.f32 %v5759_v2, %v5758_v42  ;;  %v5859_v47 = vadd.f32 %v5858_v56, %v5857_v59 }
 0x973   : > { %v5761_v41 = vrot.slane %v5760_v60, 4  ;;  %v5861_v8 = vadd.f32 %v5860_v31, %v5859_v47 }
 0x975   : > { %v5762_v38 = vadd.f32 %v5761_v41, %v5760_v60  ;;  %v5862_v17 = vrot.slane %v5861_v8, 4 }
 0x977   : > { %v5763_v9 = vrot.slane %v5762_v38, 2  ;;  %v5863_v39 = vadd.f32 %v5862_v17, %v5861_v8 }
 0x979   : > { %v5764_v11 = vadd.f32 %v5763_v9, %v5762_v38  ;;  %v5864_v55 = vrot.slane %v5863_v39, 2 }
 0x97b   : > { %v5765_v28 = vrot.slane %v5764_v11, 1  ;;  %v5865_v43 = vadd.f32 %v5864_v55, %v5863_v39 }
 0x97d   : > { %v5766_v44 = vadd.f32 %v5765_v28, %v5764_v11  ;;  %v5866_v35 = vrot.slane %v5865_v43, 1 }
 0x97f   : > { %v5868_v48 = vsel %vm17110_vm7, %v5766_v44, 0.0  ;;  %v5867_v46 = vadd.f32 %v5866_v35, %v5865_v43 }
 0x980   : > { %5869 = vadd.xlane.f32.xlu0 %v5868_v48 }
 0x981   : > { %v5881_v51 = vsel %vm17111_vm9, %v5867_v46, 0.0 }
 0x982   : > { %5882 = vadd.xlane.f32.xlu1 %v5881_v51 }
 0x993   : > { %5923 = vrot.lane.b32.xlu1 %v5867_v46, %s17112_s15 }
 0x996   : > { %5906 = vrot.lane.b32.xlu0 %v5766_v44, %s17112_s15 }
 0xa0d   : > { %v5870_v61 = vpop.xlane.xlu0 %5869 }
 0xa0e   : > { %v5871_v32 = vrot.slane %v5870_v61, 4 }
 0xa0f   : > { %v5883_v34 = vpop.xlane.xlu1 %5882 }
 0xa10   : > { %v5872_v45 = vadd.f32 %v5871_v32, %v5870_v61  ;;  %v5884_v23 = vrot.slane %v5883_v34, 4 }
 0xa11   : > { %v5907_v19 = vpop.permute.xlu0 %5906 }
 0xa12   : > { %v5873_v63 = vrot.slane %v5872_v45, 2  ;;  %v5885_v14 = vadd.f32 %v5884_v23, %v5883_v34  ;;  %v5909_v52 = vsel %vm17113_vm10, %v5907_v19, 0.0 }
 0xa13   : > { %v5924_v62 = vpop.permute.xlu1 %5923  ;;  %5910 = vadd.xlane.f32.xlu0 %v5909_v52 }
 0xa14   : > { %v5886_v42 = vrot.slane %v5885_v14, 2  ;;  %v5926_v59 = vsel %vm17114_vm11, %v5924_v62, 0.0  ;;  %v5874_v2 = vadd.f32 %v5873_v63, %v5872_v45  ;;  %v5696_v62 = vld [vmem:[%s16085_s8] sm:$0x1] }
 0xa15   : > { %5927 = vadd.xlane.f32.xlu1 %v5926_v59  ;;  %v16269_v59 = vmov 0.0|0.0  }
 0xa16   : > { %v5875_v56 = vrot.slane %v5874_v2, 1  ;;  %v5887_v60 = vadd.f32 %v5886_v42, %v5885_v14  ;;  %8788 = vmatprep.subr.bf16.mxu0 %v16269_v59  ;;  %8876 = vmatprep.subr.bf16.mxu1 %v16269_v59 }
 0xa18   : > { %v5876_v47 = vadd.f32 %v5875_v56, %v5874_v2  ;;  %v5888_v31 = vrot.slane %v5887_v60, 1 }
 0xa1a   : > { %8920 = vpush %v5876_v47  ;;  %v5889_v41 = vadd.f32 %v5888_v31, %v5887_v60  ;;  %v5697_v60 = vld [vmem:[%s16086_s9] sm:$0x1] }
 0xa1b   : > { %v17117_v31 = vld [vmem:[#allocation14_spill] sm:$0xff] }
 0xa1c   : > { %8922 = vpush %v5889_v41 }
 0xa4b   : > { %s8921_s20 = spop %8920 }
 0xa4c   : > { %s14162_s26 = smul.f32 0.0009765625, %s8921_s20 }
 0xa4d   : > { %s8923_s28 = spop %8922 }
 0xa4e   : > { %s5894_s21 = smul.f32 %s14162_s26, %s14162_s26  ;;  %s5902_s2 = ssub.f32 0.0, %s14162_s26 }
 0xa4f   : > { %s5893_s3 = smul.f32 0.0009765625, %s8923_s28 }
 0xa51   : > { %s5895_s19 = ssub.f32 %s5893_s3, %s5894_s21 }
 0xa53   : > { %s5896_s0 = smax.f32 %s9495_s22, %s5895_s19 }
 0xa54   : > { %s5897_s18 = sadd.f32 1e-05, %s5896_s0 }
 0xa56   : > { %v5898_v8 = vstv %s5897_s18 }
 0xa57   : > { %9253 = vrsqrt.f32 %v5898_v8 }
 0xa61   : > { %v9254_v38 = vpop.eup %9253 }
 0xa62   : > { %8924 = vpush %v9254_v38 }
 0xa93   : > { %s8925_s16 = spop %8924 }
 0xa94   : > { %s5903_s4 = smul.f32 %s8925_s16, %s5902_s2  ;;  %v5901_v14 = vstv %s8925_s16  ;;  %s9501_s16 = smov 96  }
 0xa96   : > { %v5904_v19 = vstv %s5903_s4 }
 0xaa0   : > { %v5911_v17 = vpop.xlane.xlu0 %5910 }
 0xaa1   : > { %v5912_v9 = vrot.slane %v5911_v17, 4 }
 0xaa2   : > { %v5928_v39 = vpop.xlane.xlu1 %5927 }
 0xaa3   : > { %v5913_v11 = vadd.f32 %v5912_v9, %v5911_v17  ;;  %v5929_v55 = vrot.slane %v5928_v39, 4 }
 0xaa5   : > { %v5914_v28 = vrot.slane %v5913_v11, 2  ;;  %v5930_v43 = vadd.f32 %v5929_v55, %v5928_v39 }
 0xaa7   : > { %v5931_v44 = vrot.slane %v5930_v43, 2  ;;  %v5915_v35 = vadd.f32 %v5914_v28, %v5913_v11 }
 0xaa9   : > { %v5916_v48 = vrot.slane %v5915_v35, 1  ;;  %v5932_v46 = vadd.f32 %v5931_v44, %v5930_v43 }
 0xaab   : > { %v5917_v51 = vadd.f32 %v5916_v48, %v5915_v35  ;;  %v5933_v61 = vrot.slane %v5932_v46, 1 }
 0xaad   : > { %8926 = vpush %v5917_v51  ;;  %v5934_v32 = vadd.f32 %v5933_v61, %v5932_v46 }
 0xaaf   : > { %8928 = vpush %v5934_v32 }
 0xade   : > { %s8927_s24 = spop %8926 }
 0xadf   : > { %s5921_s20 = smul.f32 0.0009765625, %s8927_s24 }
 0xae0   : > { %s8929_s28 = spop %8928 }
 0xae1   : > { %s5939_s21 = smul.f32 %s5921_s20, %s5921_s20  ;;  %s5947_s5 = ssub.f32 0.0, %s5921_s20 }
 0xae2   : > { %s5938_s3 = smul.f32 0.0009765625, %s8929_s28  ;;  %s17373_s20 = smov 64  }
 0xae4   : > { %s5940_s19 = ssub.f32 %s5938_s3, %s5939_s21 }
 0xae6   : > { %s5941_s0 = smax.f32 %s9495_s22, %s5940_s19 }
 0xae7   : > { %s5942_s18 = sadd.f32 1e-05, %s5941_s0 }
 0xae9   : > { %v5943_v34 = vstv %s5942_s18 }
 0xaea   : > { %9255 = vrsqrt.f32 %v5943_v34 }
 0xaf4   : > { %v9256_v45 = vpop.eup %9255 }
 0xaf5   : > { %8930 = vpush %v9256_v45 }
 0xb26   : > { %s8931_s6 = spop %8930 }
 0xb27   : > { %s5948_s7 = smul.f32 %s8931_s6, %s5947_s5  ;;  %v5946_v23 = vstv %s8931_s6 }
 0xb28   : > { %v5950_v42 = vsel %vm17116_vm14, %v5901_v14, %v5946_v23 }
 0xb29   : > { %v5949_v63 = vstv %s5948_s7  ;;  %v5951_v2 = vmul.f32 %v5950_v42, %v5696_v62 }
 0xb2a   : > { %v5952_v52 = vsel %vm17115_vm13, %v5904_v19, %v5949_v63 }
 0xb2b   : > { %v5953_v56 = vmul.f32 %v5952_v52, %v5696_v62  ;;  %v5958_v41 = vrot.slane %v5951_v2, %v17117_v31 }
 0xb2d   : > { %v5954_v47 = vadd.f32 %v5953_v56, %v5697_v60  ;;  %v5977_v38 = vmul.f32 %v5958_v41, %v14030_v33  ;;  %v5978_v17 = vmul.f32 %v5958_v41, %v14042_v5  ;;  %v5979_v9 = vmul.f32 %v5958_v41, %v14048_v30 }
 0xb2e   : > { %v5980_v39 = vmul.f32 %v5958_v41, %v14060_v29  ;;  %v5981_v11 = vmul.f32 %v5958_v41, %v14066_v50  ;;  %v5982_v55 = vmul.f32 %v5958_v41, %v14078_v27  ;;  %v5983_v28 = vmul.f32 %v5958_v41, %v14084_v4 }
 0xb2f   : > { %v14181_v8 = vrot.slane %v5954_v47, %v17117_v31  ;;  %v5984_v43 = vmul.f32 %v5958_v41, %v14096_v53  ;;  %v5985_v44 = vmul.f32 %v5958_v41, %v14101_v24  ;;  %v5986_v35 = vmul.f32 %v5958_v41, %v14113_v49 }
 0xb30   : > { %v5987_v33 = vmul.f32 %v5958_v41, %v14118_v54  ;;  %v5988_v5 = vmul.f32 %v5958_v41, %v14129_v7  ;;  %v5989_v30 = vmul.f32 %v5958_v41, %v14143_v16  ;;  %v5990_v29 = vmul.f32 %v5958_v41, %v14138_v57 }
 0xb31   : > { %v14198_v50 = vadd.f32 %v14181_v8, %v5977_v38  ;;  %v14201_v27 = vadd.f32 %v14181_v8, %v5978_v17  ;;  %v14204_v4 = vadd.f32 %v14181_v8, %v5979_v9  ;;  %v14207_v53 = vadd.f32 %v14181_v8, %v5980_v39 }
 0xb32   : > { %v14210_v24 = vadd.f32 %v14181_v8, %v5981_v11  ;;  %v14213_v49 = vadd.f32 %v14181_v8, %v5982_v55  ;;  %v14216_v54 = vadd.f32 %v14181_v8, %v5983_v28  ;;  %v14219_v7 = vadd.f32 %v14181_v8, %v5984_v43 }
 0xb33   : > { %v14222_v57 = vadd.f32 %v14181_v8, %v5985_v44  ;;  %v14225_v16 = vadd.f32 %v14181_v8, %v5986_v35  ;;  %v14228_v48 = vadd.f32 %v14181_v8, %v5987_v33  ;;  %v14231_v46 = vadd.f32 %v14181_v8, %v5988_v5 }
 0xb34   : > { %v14234_v51 = vadd.f32 %v14181_v8, %v5989_v30  ;;  %v14237_v61 = vadd.f32 %v14181_v8, %v5990_v29  ;;  %v5959_v32 = vmul.f32 %v5958_v41, %v13873_v25  ;;  %v5960_v34 = vmul.f32 %v5958_v41, %v13869_v15 }
 0xb35   : > { %v5961_v45 = vmul.f32 %v5958_v41, %v13877_v18  ;;  %v5962_v23 = vmul.f32 %v5958_v41, %v13893_v3  ;;  %v5963_v19 = vmul.f32 %v5958_v41, %v13899_v12  ;;  %v5964_v63 = vmul.f32 %v5958_v41, %v13914_v22 }
 0xb36   : > { %17118 = vst [vmem:[#allocation89_spill] sm:$0xff] %v14234_v51  ;;  %17119 = vst [vmem:[#allocation90_spill] sm:$0xff] %v14237_v61  ;;  %v5965_v14 = vmul.f32 %v5958_v41, %v13920_v36  ;;  %v5966_v52 = vmul.f32 %v5958_v41, %v13932_v6  ;;  %v5967_v62 = vmul.f32 %v5958_v41, %v13938_v26 }
 0xb37   : > { %v5968_v42 = vmul.f32 %v5958_v41, %v13950_v40  ;;  %v5969_v25 = vmul.f32 %v5958_v41, %v13956_v58  ;;  %v5970_v15 = vmul.f32 %v5958_v41, %v13968_v0  ;;  %v5971_v18 = vmul.f32 %v5958_v41, %v13974_v21 }
 0xb38   : > { %v5972_v3 = vmul.f32 %v5958_v41, %v13986_v10  ;;  %v5973_v12 = vmul.f32 %v5958_v41, %v13992_v13  ;;  %v5974_v22 = vmul.f32 %v5958_v41, %v14006_v1  ;;  %v5975_v36 = vmul.f32 %v5958_v41, %v14012_v20 }
 0xb39   : > { %v5976_v6 = vmul.f32 %v5958_v41, %v14024_v37  ;;  %v5995_v26 = vadd.f32 %v14181_v8, %v5959_v32  ;;  %v5996_v40 = vadd.f32 %v14181_v8, %v5960_v34  ;;  %v5997_v58 = vadd.f32 %v14181_v8, %v5961_v45 }
 0xb3a   : > { %v5998_v0 = vadd.f32 %v14181_v8, %v5962_v23  ;;  %v5999_v21 = vadd.f32 %v14181_v8, %v5963_v19  ;;  %v6000_v10 = vadd.f32 %v14181_v8, %v5964_v63  ;;  %v6001_v13 = vadd.f32 %v14181_v8, %v5965_v14 }
 0xb3b   : > { %v6002_v1 = vadd.f32 %v14181_v8, %v5966_v52  ;;  %v6003_v20 = vadd.f32 %v14181_v8, %v5967_v62  ;;  %v6004_v37 = vadd.f32 %v14181_v8, %v5968_v42  ;;  %v6005_v2 = vadd.f32 %v14181_v8, %v5969_v25 }
 0xb3c   : > { %v6006_v56 = vadd.f32 %v14181_v8, %v5970_v15  ;;  %v6007_v60 = vadd.f32 %v14181_v8, %v5971_v18  ;;  %v6008_v47 = vadd.f32 %v14181_v8, %v5972_v3  ;;  %v6009_v41 = vadd.f32 %v14181_v8, %v5973_v12 }
 0xb3d   : > { %v6010_v38 = vadd.f32 %v14181_v8, %v5974_v22  ;;  %v6011_v17 = vadd.f32 %v14181_v8, %v5975_v36  ;;  %v6012_v9 = vadd.f32 %v14181_v8, %v5976_v6  ;;  %v14275_v39 = vmul.f32 0.5, %v5995_v26 }
 0xb3e   : > { %v14277_v11 = vmul.f32 0.5, %v5996_v40  ;;  %v14279_v55 = vmul.f32 0.5, %v5997_v58  ;;  %v14281_v28 = vmul.f32 0.5, %v5998_v0  ;;  %v14283_v43 = vmul.f32 0.5, %v5999_v21 }
 0xb3f   : > { %17120 = vst [vmem:[#allocation91_spill] sm:$0xff] %v14275_v39  ;;  %v14285_v44 = vmul.f32 0.5, %v6000_v10  ;;  %v14287_v35 = vmul.f32 0.5, %v6001_v13  ;;  %v14289_v33 = vmul.f32 0.5, %v6002_v1  ;;  %v14291_v5 = vmul.f32 0.5, %v6003_v20 }
 0xb40   : > { %17121 = vst [vmem:[#allocation15_spill] sm:$0xff] %v14277_v11  ;;  %17122 = vst [vmem:[#allocation16_spill] sm:$0xff] %v14279_v55  ;;  %v14293_v30 = vmul.f32 0.5, %v6004_v37  ;;  %v14295_v8 = vmul.f32 0.5, %v6005_v2  ;;  %v14297_v29 = vmul.f32 0.5, %v6006_v56  ;;  %v14299_v32 = vmul.f32 0.5, %v6007_v60 }
 0xb41   : > { %17123 = vst [vmem:[#allocation113_spill] sm:$0xff] %v14281_v28  ;;  %17124 = vst [vmem:[#allocation114_spill] sm:$0xff] %v14283_v43  ;;  %v14301_v34 = vmul.f32 0.5, %v6008_v47  ;;  %v14303_v45 = vmul.f32 0.5, %v6009_v41  ;;  %v14305_v23 = vmul.f32 0.5, %v6010_v38  ;;  %v14307_v19 = vmul.f32 0.5, %v6011_v17 }
 0xb42   : > { %17125 = vst [vmem:[#allocation117_spill] sm:$0xff] %v14285_v44  ;;  %17126 = vst [vmem:[#allocation118_spill] sm:$0xff] %v14287_v35  ;;  %v14309_v63 = vmul.f32 0.5, %v6012_v9  ;;  %v14312_v14 = vmul.f32 0.5, %v14198_v50  ;;  %v14315_v52 = vmul.f32 0.5, %v14201_v27  ;;  %v14318_v62 = vmul.f32 0.5, %v14204_v4 }
 0xb43   : > { %17127 = vst [vmem:[#allocation119_spill] sm:$0xff] %v14289_v33  ;;  %17128 = vst [vmem:[#allocation120_spill] sm:$0xff] %v14291_v5  ;;  %v14321_v42 = vmul.f32 0.5, %v14207_v53  ;;  %v14324_v25 = vmul.f32 0.5, %v14210_v24  ;;  %v14327_v15 = vmul.f32 0.5, %v14213_v49  ;;  %v14330_v18 = vmul.f32 0.5, %v14216_v54 }
 0xb44   : > { %17129 = vst [vmem:[#allocation121_spill] sm:$0xff] %v14293_v30  ;;  %17130 = vst [vmem:[#allocation79_spill] sm:$0xff] %v14295_v8  ;;  %v14333_v3 = vmul.f32 0.5, %v14219_v7  ;;  %v14336_v12 = vmul.f32 0.5, %v14222_v57  ;;  %v14339_v22 = vmul.f32 0.5, %v14225_v16  ;;  %v14342_v36 = vmul.f32 0.5, %v14228_v48 }
 0xb45   : > { %17131 = vst [vmem:[#allocation94_spill] sm:$0xff] %v14297_v29  ;;  %17132 = vst [vmem:[#allocation50_spill] sm:$0xff] %v14299_v32  ;;  %v14345_v6 = vmul.f32 0.5, %v14231_v46  ;;  %v14347_v59 = vmul.f32 0.70710677, %v5995_v26 }
 0xb46   : > { %17133 = vst [vmem:[#allocation47_spill] sm:$0xff] %v14301_v34  ;;  %17134 = vst [vmem:[#allocation95_spill] sm:$0xff] %v14303_v45  ;;  %v14349_v31 = vmul.f32 0.70710677, %v5996_v40  ;;  %v14367_v26 = vmul.f32 0.70710677, %v6005_v2 }
 0xb47   : > { %17135 = vst [vmem:[#allocation48_spill] sm:$0xff] %v14305_v23  ;;  %17136 = vst [vmem:[#allocation97_spill] sm:$0xff] %v14307_v19  ;;  %v14369_v40 = vmul.f32 0.70710677, %v6006_v56  ;;  %v14390_v2 = vmul.f32 0.70710677, %v14204_v4 }
 0xb48   : > { %17137 = vst [vmem:[#allocation99_spill] sm:$0xff] %v14309_v63  ;;  %17138 = vst [vmem:[#allocation100_spill] sm:$0xff] %v14312_v14  ;;  %v14393_v56 = vmul.f32 0.70710677, %v14207_v53  ;;  %v14411_v4 = vmul.f32 0.70710677, %v14225_v16 }
 0xb49   : > { %17139 = vst [vmem:[#allocation102_spill] sm:$0xff] %v14315_v52  ;;  %17140 = vst [vmem:[#allocation103_spill] sm:$0xff] %v14318_v62  ;;  %v14414_v53 = vmul.f32 0.70710677, %v14228_v48  ;;  %v14459_v62 = vand.u32 2147483647, %v14369_v40 }
 0xb4a   : > { %17141 = vst [vmem:[#allocation105_spill] sm:$0xff] %v14321_v42  ;;  %17142 = vst [vmem:[#allocation106_spill] sm:$0xff] %v14324_v25  ;;  %v14359_v25 = vmul.f32 0.70710677, %v6001_v13  ;;  %v14365_v42 = vmul.f32 0.70710677, %v6004_v37 }
 0xb4b   : > { %17143 = vst [vmem:[#allocation108_spill] sm:$0xff] %v14327_v15  ;;  %17144 = vst [vmem:[#allocation109_spill] sm:$0xff] %v14330_v18  ;;  %v14351_v18 = vmul.f32 0.70710677, %v5997_v58  ;;  %v14353_v15 = vmul.f32 0.70710677, %v5998_v0 }
 0xb4c   : > { %17145 = vst [vmem:[#allocation111_spill] sm:$0xff] %v14333_v3  ;;  %17146 = vst [vmem:[#allocation96_spill] sm:$0xff] %v14336_v12  ;;  %v14355_v3 = vmul.f32 0.70710677, %v5999_v21  ;;  %v14357_v12 = vmul.f32 0.70710677, %v6000_v10 }
 0xb4d   : > { %17147 = vst [vmem:[#allocation98_spill] sm:$0xff] %v14339_v22  ;;  %17148 = vst [vmem:[#allocation104_spill] sm:$0xff] %v14342_v36  ;;  %v14361_v22 = vmul.f32 0.70710677, %v6002_v1  ;;  %v14363_v36 = vmul.f32 0.70710677, %v6003_v20 }
 0xb4e   : > { %17149 = vst [vmem:[#allocation107_spill] sm:$0xff] %v14345_v6  ;;  %17150 = vst [vmem:[#allocation110_spill] sm:$0xff] %v14347_v59  ;;  %v14371_v58 = vmul.f32 0.70710677, %v6007_v60  ;;  %v14373_v0 = vmul.f32 0.70710677, %v6008_v47 }
 0xb4f   : > { %17151 = vst [vmem:[#allocation112_spill] sm:$0xff] %v14349_v31  ;;  %17152 = vst [vmem:[#allocation92_spill] sm:$0xff] %v14351_v18  ;;  %v14375_v21 = vmul.f32 0.70710677, %v6009_v41  ;;  %v14377_v10 = vmul.f32 0.70710677, %v6010_v38 }
 0xb50   : > { %17153 = vst [vmem:[#allocation122_spill] sm:$0xff] %v14353_v15  ;;  %17154 = vst [vmem:[#allocation115_spill] sm:$0xff] %v14355_v3  ;;  %v14379_v13 = vmul.f32 0.70710677, %v6011_v17  ;;  %v14381_v1 = vmul.f32 0.70710677, %v6012_v9 }
 0xb51   : > { %17155 = vst [vmem:[#allocation51_spill] sm:$0xff] %v14357_v12  ;;  %17156 = vst [vmem:[#allocation52_spill] sm:$0xff] %v14359_v25  ;;  %v14384_v20 = vmul.f32 0.70710677, %v14198_v50  ;;  %v14387_v37 = vmul.f32 0.70710677, %v14201_v27 }
 0xb52   : > { %17157 = vst [vmem:[#allocation53_spill] sm:$0xff] %v14361_v22  ;;  %17158 = vst [vmem:[#allocation54_spill] sm:$0xff] %v14363_v36  ;;  %v14396_v60 = vmul.f32 0.70710677, %v14210_v24  ;;  %v14399_v47 = vmul.f32 0.70710677, %v14213_v49 }
 0xb53   : > { %17159 = vst [vmem:[#allocation55_spill] sm:$0xff] %v14365_v42  ;;  %17160 = vst [vmem:[#allocation20_spill] sm:$0xff] %v14367_v26  ;;  %v14402_v41 = vmul.f32 0.70710677, %v14216_v54  ;;  %v14405_v50 = vmul.f32 0.70710677, %v14219_v7 }
 0xb54   : > { %17161 = vst [vmem:[#allocation56_spill] sm:$0xff] %v14369_v40  ;;  %17162 = vst [vmem:[#allocation57_spill] sm:$0xff] %v14371_v58  ;;  %v14408_v27 = vmul.f32 0.70710677, %v14222_v57  ;;  %v14417_v24 = vmul.f32 0.70710677, %v14231_v46 }
 0xb55   : > { %17163 = vst [vmem:[#allocation58_spill] sm:$0xff] %v14373_v0  ;;  %17164 = vst [vmem:[#allocation59_spill] sm:$0xff] %v14375_v21  ;;  %v14420_v49 = vmul.f32 0.70710677, %v14234_v51  ;;  %v14423_v54 = vmul.f32 0.70710677, %v14237_v61 }
 0xb56   : > { %17165 = vst [vmem:[#allocation60_spill] sm:$0xff] %v14377_v10  ;;  %17166 = vst [vmem:[#allocation61_spill] sm:$0xff] %v14379_v13  ;;  %v14426_v7 = vand.u32 2147483647, %v14347_v59  ;;  %v14429_v57 = vand.u32 2147483647, %v14349_v31 }
 0xb57   : > { %17167 = vst [vmem:[#allocation101_spill] sm:$0xff] %v14381_v1  ;;  %17168 = vst [vmem:[#allocation62_spill] sm:$0xff] %v14384_v20  ;;  %v14432_v16 = vand.u32 2147483647, %v14351_v18  ;;  %v14435_v48 = vand.u32 2147483647, %v14353_v15 }
 0xb58   : > { %17169 = vst [vmem:[#allocation85_spill] sm:$0xff] %v14387_v37  ;;  %17170 = vst [vmem:[#allocation63_spill] sm:$0xff] %v14390_v2  ;;  %v14438_v46 = vand.u32 2147483647, %v14355_v3  ;;  %v14441_v38 = vand.u32 2147483647, %v14357_v12 }
 0xb59   : > { %17171 = vst [vmem:[#allocation87_spill] sm:$0xff] %v14393_v56  ;;  %17172 = vst [vmem:[#allocation64_spill] sm:$0xff] %v14396_v60  ;;  %v14444_v17 = vand.u32 2147483647, %v14359_v25  ;;  %v14447_v9 = vand.u32 2147483647, %v14361_v22 }
 0xb5a   : > { %17173 = vst [vmem:[#allocation49_spill] sm:$0xff] %v14399_v47  ;;  %17174 = vst [vmem:[#allocation65_spill] sm:$0xff] %v14402_v41  ;;  %v14450_v61 = vand.u32 2147483647, %v14363_v36  ;;  %v14453_v51 = vand.u32 2147483647, %v14365_v42 }
 0xb5b   : > { %17175 = vst [vmem:[#allocation116_spill] sm:$0xff] %v14405_v50  ;;  %17176 = vst [vmem:[#allocation66_spill] sm:$0xff] %v14408_v27  ;;  %v14456_v6 = vand.u32 2147483647, %v14367_v26  ;;  %v14462_v52 = vand.u32 2147483647, %v14371_v58 }
 0xb5c   : > { %17177 = vst [vmem:[#allocation93_spill] sm:$0xff] %v14411_v4  ;;  %17178 = vst [vmem:[#allocation67_spill] sm:$0xff] %v14414_v53  ;;  %v14465_v14 = vand.u32 2147483647, %v14373_v0  ;;  %v14468_v63 = vand.u32 2147483647, %v14375_v21 }
 0xb5d   : > { %17179 = vst [vmem:[#allocation80_spill] sm:$0xff] %v14417_v24  ;;  %17180 = vst [vmem:[#allocation68_spill] sm:$0xff] %v14420_v49  ;;  %v14471_v19 = vand.u32 2147483647, %v14377_v10  ;;  %v14474_v23 = vand.u32 2147483647, %v14379_v13 }
 0xb5e   : > { %17181 = vst [vmem:[#allocation81_spill] sm:$0xff] %v14423_v54  ;;  %17182 = vst [vmem:[#allocation69_spill] sm:$0xff] %v14468_v63  ;;  %v14477_v45 = vand.u32 2147483647, %v14381_v1  ;;  %v14480_v34 = vand.u32 2147483647, %v14384_v20 }
 0xb5f   : > { %17183 = vst [vmem:[#allocation82_spill] sm:$0xff] %v14471_v19  ;;  %17184 = vst [vmem:[#allocation70_spill] sm:$0xff] %v14474_v23  ;;  %v14483_v32 = vand.u32 2147483647, %v14387_v37  ;;  %v14486_v29 = vand.u32 2147483647, %v14390_v2 }
 0xb60   : > { %17185 = vst [vmem:[#allocation17_spill] sm:$0xff] %v14477_v45  ;;  %17186 = vst [vmem:[#allocation71_spill] sm:$0xff] %v14480_v34  ;;  %v14489_v21 = vand.u32 2147483647, %v14393_v56  ;;  %v14492_v10 = vand.u32 2147483647, %v14396_v60 }
 0xb61   : > { %17187 = vst [vmem:[#allocation72_spill] sm:$0xff] %v14483_v32  ;;  %17188 = vst [vmem:[#allocation83_spill] sm:$0xff] %v14486_v29  ;;  %v14495_v13 = vand.u32 2147483647, %v14399_v47  ;;  %v14498_v1 = vand.u32 2147483647, %v14402_v41 }
 0xb62   : > { %17189 = vst [vmem:[#allocation73_spill] sm:$0xff] %v14489_v21  ;;  %17190 = vst [vmem:[#allocation74_spill] sm:$0xff] %v14492_v10  ;;  %v14501_v20 = vand.u32 2147483647, %v14405_v50  ;;  %v14504_v37 = vand.u32 2147483647, %v14408_v27 }
 0xb63   : > { %17191 = vst [vmem:[#allocation75_spill] sm:$0xff] %v14495_v13  ;;  %17192 = vst [vmem:[#allocation76_spill] sm:$0xff] %v14498_v1  ;;  %v14507_v2 = vand.u32 2147483647, %v14411_v4  ;;  %v14510_v56 = vand.u32 2147483647, %v14414_v53 }
 0xb64   : > { %17193 = vst [vmem:[#allocation77_spill] sm:$0xff] %v14501_v20  ;;  %17194 = vst [vmem:[#allocation18_spill] sm:$0xff] %v14504_v37  ;;  %v14513_v60 = vand.u32 2147483647, %v14417_v24  ;;  %v14516_v47 = vand.u32 2147483647, %v14420_v49 }
 0xb65   : > { %17195 = vst [vmem:[#allocation78_spill] sm:$0xff] %v14507_v2  ;;  %17196 = vst [vmem:[#allocation21_spill] sm:$0xff] %v14510_v56  ;;  %v14519_v41 = vand.u32 2147483647, %v14423_v54  ;;  %v6123_v50 = vmul.f32 0.3275911, %v14426_v7 }
 0xb66   : > { %17197 = vst [vmem:[#allocation84_spill] sm:$0xff] %v14513_v60  ;;  %17198 = vst [vmem:[#allocation22_spill] sm:$0xff] %v14516_v47  ;;  %v6124_v27 = vmul.f32 0.3275911, %v14429_v57  ;;  %v6125_v8 = vmul.f32 0.3275911, %v14432_v16 }
 0xb67   : > { %v6126_v4 = vmul.f32 0.3275911, %v14435_v48  ;;  %v6127_v53 = vmul.f32 0.3275911, %v14438_v46  ;;  %v6128_v30 = vmul.f32 0.3275911, %v14441_v38 }
 0xb68   : > { %v6129_v24 = vmul.f32 0.3275911, %v14444_v17  ;;  %v6130_v49 = vmul.f32 0.3275911, %v14447_v9  ;;  %v6131_v5 = vmul.f32 0.3275911, %v14450_v61 }
 0xb69   : > { %v6132_v54 = vmul.f32 0.3275911, %v14453_v51  ;;  %v6133_v33 = vmul.f32 0.3275911, %v14456_v6  ;;  %v6134_v0 = vmul.f32 0.3275911, %v14459_v62 }
 0xb6a   : > { %v6135_v58 = vmul.f32 0.3275911, %v14462_v52  ;;  %v6136_v35 = vmul.f32 0.3275911, %v14465_v14  ;;  %v6137_v40 = vmul.f32 0.3275911, %v14468_v63 }
 0xb6b   : > { %v6138_v26 = vmul.f32 0.3275911, %v14471_v19  ;;  %v6139_v42 = vmul.f32 0.3275911, %v14474_v23  ;;  %v6140_v36 = vmul.f32 0.3275911, %v14477_v45 }
 0xb6c   : > { %v6141_v22 = vmul.f32 0.3275911, %v14480_v34  ;;  %v6142_v25 = vmul.f32 0.3275911, %v14483_v32  ;;  %v6143_v44 = vmul.f32 0.3275911, %v14486_v29 }
 0xb6d   : > { %v6144_v43 = vmul.f32 0.3275911, %v14489_v21  ;;  %v6145_v28 = vmul.f32 0.3275911, %v14492_v10  ;;  %v6146_v55 = vmul.f32 0.3275911, %v14495_v13 }
 0xb6e   : > { %v6147_v11 = vmul.f32 0.3275911, %v14498_v1  ;;  %v6148_v39 = vmul.f32 0.3275911, %v14501_v20  ;;  %v6149_v12 = vmul.f32 0.3275911, %v14504_v37 }
 0xb6f   : > { %v6150_v3 = vmul.f32 0.3275911, %v14507_v2  ;;  %v6151_v15 = vmul.f32 0.3275911, %v14510_v56  ;;  %v6152_v18 = vmul.f32 0.3275911, %v14513_v60 }
 0xb70   : > { %v6153_v31 = vmul.f32 0.3275911, %v14516_v47  ;;  %v6154_v59 = vmul.f32 0.3275911, %v14519_v41  ;;  %v6155_v21 = vadd.f32 1.0, %v6123_v50  ;;  %v6156_v10 = vadd.f32 1.0, %v6124_v27 }
 0xb71   : > { %v6157_v29 = vadd.f32 1.0, %v6125_v8  ;;  %v6158_v13 = vadd.f32 1.0, %v6126_v4  ;;  %v6159_v32 = vadd.f32 1.0, %v6127_v53  ;;  %v6160_v1 = vadd.f32 1.0, %v6128_v30  ;;  %v17214_v4 = vld [vmem:[#allocation17_spill] sm:$0xff] }
 0xb72   : > { %v6161_v34 = vadd.f32 1.0, %v6129_v24  ;;  %v6162_v20 = vadd.f32 1.0, %v6130_v49  ;;  %v6163_v45 = vadd.f32 1.0, %v6131_v5  ;;  %v6164_v37 = vadd.f32 1.0, %v6132_v54  ;;  %v17216_v49 = vld [vmem:[#allocation71_spill] sm:$0xff]  ;;  %v17217_v54 = vld [vmem:[#allocation72_spill] sm:$0xff] }
 0xb73   : > { %v6165_v23 = vadd.f32 1.0, %v6133_v33  ;;  %v6166_v2 = vadd.f32 1.0, %v6134_v0  ;;  %v6167_v19 = vadd.f32 1.0, %v6135_v58  ;;  %v6168_v56 = vadd.f32 1.0, %v6136_v35  ;;  %v17210_v0 = vld [vmem:[#allocation69_spill] sm:$0xff] }
 0xb74   : > { %v6169_v63 = vadd.f32 1.0, %v6137_v40  ;;  %v14553_v60 = vadd.f32 1.0, %v6138_v26  ;;  %v14555_v47 = vadd.f32 1.0, %v6139_v42  ;;  %9257 = vrcp.f32 %v6155_v21 }
 0xb75   : > { %v14557_v50 = vadd.f32 1.0, %v6140_v36  ;;  %v14559_v8 = vadd.f32 1.0, %v6141_v22  ;;  %v14561_v27 = vadd.f32 1.0, %v6142_v25  ;;  %9259 = vrcp.f32 %v6156_v10 }
 0xb76   : > { %v14563_v30 = vadd.f32 1.0, %v6143_v44  ;;  %v14565_v5 = vadd.f32 1.0, %v6144_v43  ;;  %v14567_v33 = vadd.f32 1.0, %v6145_v28  ;;  %9261 = vrcp.f32 %v6157_v29 }
 0xb77   : > { %v14569_v35 = vadd.f32 1.0, %v6146_v55  ;;  %v14571_v26 = vadd.f32 1.0, %v6147_v11  ;;  %v14573_v42 = vadd.f32 1.0, %v6148_v39  ;;  %9263 = vrcp.f32 %v6158_v13  ;;  %v17212_v13 = vld [vmem:[#allocation82_spill] sm:$0xff] }
 0xb78   : > { %17199 = vst [vmem:[#allocation23_spill] sm:$0xff] %v14567_v33  ;;  %v14575_v36 = vadd.f32 1.0, %v6149_v12  ;;  %v14577_v22 = vadd.f32 1.0, %v6150_v3  ;;  %v14579_v25 = vadd.f32 1.0, %v6151_v15  ;;  %9265 = vrcp.f32 %v6159_v32 }
 0xb79   : > { %17200 = vst [vmem:[#allocation24_spill] sm:$0xff] %v14569_v35  ;;  %17201 = vst [vmem:[#allocation25_spill] sm:$0xff] %v14571_v26  ;;  %v14581_v44 = vadd.f32 1.0, %v6152_v18  ;;  %v14583_v43 = vadd.f32 1.0, %v6153_v31  ;;  %v14585_v28 = vadd.f32 1.0, %v6154_v59  ;;  %9267 = vrcp.f32 %v6160_v1  ;;  %v17225_v35 = vld [vmem:[#allocation77_spill] sm:$0xff] }
 0xb7a   : > { %17202 = vst [vmem:[#allocation26_spill] sm:$0xff] %v14573_v42  ;;  %17203 = vst [vmem:[#allocation27_spill] sm:$0xff] %v14575_v36  ;;  %9269 = vrcp.f32 %v6161_v34  ;;  %v6539_v11 = vsub.f32 0.0, %v14426_v7  ;;  %v6540_v39 = vsub.f32 0.0, %v14429_v57  ;;  %v6541_v55 = vsub.f32 0.0, %v14432_v16  ;;  %v17222_v36 = vld [vmem:[#allocation75_spill] sm:$0xff] }
 0xb7b   : > { %17204 = vst [vmem:[#allocation28_spill] sm:$0xff] %v14577_v22  ;;  %17205 = vst [vmem:[#allocation29_spill] sm:$0xff] %v14579_v25  ;;  %9271 = vrcp.f32 %v6162_v20  ;;  %v6542_v29 = vsub.f32 0.0, %v14435_v48  ;;  %v6543_v15 = vsub.f32 0.0, %v14438_v46  ;;  %v6544_v32 = vsub.f32 0.0, %v14441_v38  ;;  %v17213_v20 = vld [vmem:[#allocation70_spill] sm:$0xff] }
 0xb7c   : > { %17206 = vst [vmem:[#allocation30_spill] sm:$0xff] %v14581_v44  ;;  %17207 = vst [vmem:[#allocation31_spill] sm:$0xff] %v14583_v43  ;;  %9273 = vrcp.f32 %v6163_v45  ;;  %v6545_v31 = vsub.f32 0.0, %v14444_v17  ;;  %v6546_v59 = vsub.f32 0.0, %v14447_v9  ;;  %v6547_v34 = vsub.f32 0.0, %v14450_v61  ;;  %v17221_v25 = vld [vmem:[#allocation74_spill] sm:$0xff] }
 0xb7d   : > { %17208 = vst [vmem:[#allocation32_spill] sm:$0xff] %v14585_v28  ;;  %9275 = vrcp.f32 %v6164_v37  ;;  %v6548_v18 = vsub.f32 0.0, %v14453_v51  ;;  %v6549_v3 = vsub.f32 0.0, %v14456_v6  ;;  %v6550_v12 = vsub.f32 0.0, %v14459_v62  ;;  %v17218_v28 = vld [vmem:[#allocation83_spill] sm:$0xff] }
 0xb7e   : > { %v14599_v40 = vpop.eup %9257  ;;  %9277 = vrcp.f32 %v6165_v23  ;;  %v6551_v58 = vsub.f32 0.0, %v14462_v52  ;;  %v6552_v45 = vsub.f32 0.0, %v14465_v14  ;;  %v6553_v21 = vsub.f32 0.0, %v17210_v0 }
 0xb7f   : > { %17209 = vst [vmem:[#allocation33_spill] sm:$0xff] %v14599_v40  ;;  %v14604_v10 = vpop.eup %9259  ;;  %9279 = vrcp.f32 %v6166_v2  ;;  %v6554_v1 = vsub.f32 0.0, %v17212_v13  ;;  %v6555_v37 = vsub.f32 0.0, %v17213_v20  ;;  %v6556_v53 = vsub.f32 0.0, %v17214_v4  ;;  %v17226_v4 = vld [vmem:[#allocation18_spill] sm:$0xff] }
 0xb80   : > { %17211 = vst [vmem:[#allocation34_spill] sm:$0xff] %v14604_v10  ;;  %v14609_v24 = vpop.eup %9261  ;;  %9281 = vrcp.f32 %v6167_v19  ;;  %v6557_v23 = vsub.f32 0.0, %v17216_v49  ;;  %v6558_v40 = vsub.f32 0.0, %v17217_v54  ;;  %v6559_v43 = vsub.f32 0.0, %v17218_v28  ;;  %v17220_v10 = vld [vmem:[#allocation73_spill] sm:$0xff] }
 0xb81   : > { %17215 = vst [vmem:[#allocation35_spill] sm:$0xff] %v14609_v24  ;;  %v14614_v44 = vpop.eup %9263  ;;  %9283 = vrcp.f32 %v6168_v56  ;;  %v6560_v2 = vsub.f32 0.0, %v17220_v10  ;;  %v6561_v22 = vsub.f32 0.0, %v17221_v25  ;;  %v6562_v42 = vsub.f32 0.0, %v17222_v36  ;;  %v17224_v24 = vld [vmem:[#allocation76_spill] sm:$0xff]  ;;  %v17228_v56 = vld [vmem:[#allocation78_spill] sm:$0xff] }
 0xb82   : > { %17219 = vst [vmem:[#allocation36_spill] sm:$0xff] %v14614_v44  ;;  %v14619_v26 = vpop.eup %9265  ;;  %9285 = vrcp.f32 %v6169_v63  ;;  %v6563_v19 = vsub.f32 0.0, %v17224_v24  ;;  %v6564_v49 = vsub.f32 0.0, %v17225_v35  ;;  %v6565_v54 = vsub.f32 0.0, %v17226_v4  ;;  %v17229_v10 = vld [vmem:[#allocation21_spill] sm:$0xff]  ;;  %v17230_v25 = vld [vmem:[#allocation84_spill] sm:$0xff] }
 0xb83   : > { %17223 = vst [vmem:[#allocation37_spill] sm:$0xff] %v14619_v26  ;;  %v14624_v20 = vpop.eup %9267  ;;  %9287 = vrcp.f32 %v14553_v60  ;;  %v6566_v44 = vsub.f32 0.0, %v17228_v56  ;;  %v6567_v28 = vsub.f32 0.0, %v17229_v10  ;;  %v6568_v33 = vsub.f32 0.0, %v17230_v25  ;;  %v17232_v63 = vld [vmem:[#allocation22_spill] sm:$0xff] }
 0xb84   : > { %17227 = vst [vmem:[#allocation38_spill] sm:$0xff] %v14624_v20  ;;  %v14630_v36 = vpop.eup %9269  ;;  %9289 = vrcp.f32 %v14555_v47  ;;  %v6569_v26 = vsub.f32 0.0, %v17232_v63  ;;  %v6570_v35 = vsub.f32 0.0, %v14519_v41  ;;  %v6571_v4 = vmul.f32 %v6539_v11, %v14426_v7 }
 0xb85   : > { %17231 = vst [vmem:[#allocation39_spill] sm:$0xff] %v14630_v36  ;;  %v14636_v24 = vpop.eup %9271  ;;  %9291 = vrcp.f32 %v14557_v50  ;;  %v6572_v60 = vmul.f32 %v6540_v39, %v14429_v57  ;;  %v6573_v20 = vmul.f32 %v6541_v55, %v14432_v16  ;;  %v6574_v25 = vmul.f32 %v6542_v29, %v14435_v48  ;;  %v17233_v39 = vld [vmem:[#allocation23_spill] sm:$0xff]  ;;  %v17235_v55 = vld [vmem:[#allocation17_spill] sm:$0xff] }
 0xb86   : > { %v14642_v10 = vpop.eup %9273  ;;  %9293 = vrcp.f32 %v14559_v8  ;;  %v6575_v47 = vmul.f32 %v6543_v15, %v14438_v46  ;;  %v6576_v36 = vmul.f32 %v6544_v32, %v14441_v38  ;;  %v6577_v7 = vmul.f32 %v6545_v31, %v14444_v17  ;;  %v17236_v29 = vld [vmem:[#allocation71_spill] sm:$0xff]  ;;  %v17237_v32 = vld [vmem:[#allocation24_spill] sm:$0xff] }
 0xb87   : > { %v14648_v11 = vpop.eup %9275  ;;  %9295 = vrcp.f32 %v14561_v27  ;;  %v6578_v57 = vmul.f32 %v6546_v59, %v14447_v9  ;;  %v6579_v16 = vmul.f32 %v6547_v34, %v14450_v61  ;;  %v6580_v48 = vmul.f32 %v6548_v18, %v14453_v51  ;;  %v17239_v31 = vld [vmem:[#allocation83_spill] sm:$0xff]  ;;  %v17240_v34 = vld [vmem:[#allocation73_spill] sm:$0xff] }
 0xb88   : > { %v14654_v50 = vpop.eup %9277  ;;  %9297 = vrcp.f32 %v14563_v30  ;;  %v6581_v46 = vmul.f32 %v6549_v3, %v14456_v6  ;;  %v6582_v38 = vmul.f32 %v6550_v12, %v14459_v62  ;;  %v6583_v17 = vmul.f32 %v6551_v58, %v14462_v52  ;;  %v17234_v30 = vld [vmem:[#allocation70_spill] sm:$0xff]  ;;  %v17241_v12 = vld [vmem:[#allocation25_spill] sm:$0xff] }
 0xb89   : > { %v14660_v8 = vpop.eup %9279  ;;  %9299 = vrcp.f32 %v14565_v5  ;;  %v6584_v9 = vmul.f32 %v6552_v45, %v14465_v14  ;;  %v6585_v61 = vmul.f32 %v6553_v21, %v17210_v0  ;;  %v6586_v51 = vmul.f32 %v6554_v1, %v17212_v13  ;;  %v17238_v5 = vld [vmem:[#allocation72_spill] sm:$0xff]  ;;  %v17242_v58 = vld [vmem:[#allocation74_spill] sm:$0xff]  ;;  %v17243_v0 = vld [vmem:[#allocation75_spill] sm:$0xff] }
 0xb8a   : > { %v14666_v27 = vpop.eup %9281  ;;  %9301 = vrcp.f32 %v17233_v39  ;;  %v6587_v6 = vmul.f32 %v6555_v37, %v17234_v30  ;;  %v6588_v62 = vmul.f32 %v6556_v53, %v17235_v55  ;;  %v6589_v52 = vmul.f32 %v6557_v23, %v17236_v29  ;;  %v17244_v13 = vld [vmem:[#allocation76_spill] sm:$0xff]  ;;  %v17245_v53 = vld [vmem:[#allocation26_spill] sm:$0xff]  ;;  %v17246_v23 = vld [vmem:[#allocation77_spill] sm:$0xff] }
 0xb8b   : > { %v14672_v15 = vpop.eup %9283  ;;  %9303 = vrcp.f32 %v17237_v32  ;;  %v6590_v14 = vmul.f32 %v6558_v40, %v17238_v5  ;;  %v6591_v59 = vmul.f32 %v6559_v43, %v17239_v31  ;;  %v6592_v18 = vmul.f32 %v6560_v2, %v17240_v34  ;;  %v17247_v39 = vld [vmem:[#allocation18_spill] sm:$0xff]  ;;  %v17248_v55 = vld [vmem:[#allocation27_spill] sm:$0xff]  ;;  %v17249_v29 = vld [vmem:[#allocation21_spill] sm:$0xff] }
 0xb8c   : > { %v14678_v3 = vpop.eup %9285  ;;  %9305 = vrcp.f32 %v17241_v12  ;;  %v6593_v45 = vmul.f32 %v6561_v22, %v17242_v58  ;;  %v6594_v21 = vmul.f32 %v6562_v42, %v17243_v0  ;;  %v6595_v1 = vmul.f32 %v6563_v19, %v17244_v13  ;;  %v17250_v32 = vld [vmem:[#allocation84_spill] sm:$0xff] }
 0xb8d   : > { %v14684_v37 = vpop.eup %9287  ;;  %9307 = vrcp.f32 %v17245_v53  ;;  %v6596_v40 = vmul.f32 %v6564_v49, %v17246_v23  ;;  %v6597_v43 = vmul.f32 %v6565_v54, %v17247_v39  ;;  %v6598_v2 = vmul.f32 %v6566_v44, %v17228_v56  ;;  %v17251_v31 = vld [vmem:[#allocation28_spill] sm:$0xff]  ;;  %v17252_v44 = vld [vmem:[#allocation29_spill] sm:$0xff]  ;;  %v17254_v23 = vld [vmem:[#allocation31_spill] sm:$0xff] }
 0xb8e   : > { %v14690_v30 = vpop.eup %9289  ;;  %9309 = vrcp.f32 %v17248_v55  ;;  %v6599_v22 = vmul.f32 %v6567_v28, %v17249_v29  ;;  %v6600_v42 = vmul.f32 %v6568_v33, %v17250_v32  ;;  %v6601_v19 = vmul.f32 %v6569_v26, %v17232_v63  ;;  %v17253_v33 = vld [vmem:[#allocation30_spill] sm:$0xff]  ;;  %v17255_v39 = vld [vmem:[#allocation32_spill] sm:$0xff] }
 0xb8f   : > { %v14696_v5 = vpop.eup %9291  ;;  %9311 = vrcp.f32 %v17251_v31  ;;  %v6602_v49 = vmul.f32 %v6570_v35, %v14519_v41  ;;  %v6603_v34 = vmul.f32 1.442695, %v6571_v4  ;;  %v6605_v54 = vmul.f32 1.442695, %v6572_v60 }
 0xb90   : > { %v14700_v12 = vpop.eup %9293  ;;  %9313 = vrcp.f32 %v17252_v44  ;;  %v6607_v56 = vmul.f32 1.442695, %v6573_v20  ;;  %v6609_v58 = vmul.f32 1.442695, %v6574_v25  ;;  %v6611_v0 = vmul.f32 1.442695, %v6575_v47 }
 0xb91   : > { %v14703_v28 = vpop.eup %9295  ;;  %9315 = vrcp.f32 %v17253_v33  ;;  %v6613_v26 = vmul.f32 1.442695, %v6576_v36  ;;  %v6615_v63 = vmul.f32 1.442695, %v6577_v7  ;;  %v6617_v13 = vmul.f32 1.442695, %v6578_v57 }
 0xb92   : > { %v14706_v53 = vpop.eup %9297  ;;  %9317 = vrcp.f32 %v17254_v23  ;;  %v6619_v41 = vmul.f32 1.442695, %v6579_v16  ;;  %v6621_v35 = vmul.f32 1.442695, %v6580_v48  ;;  %v6623_v4 = vmul.f32 1.442695, %v6581_v46 }
 0xb93   : > { %v14709_v60 = vpop.eup %9299  ;;  %9319 = vrcp.f32 %v17255_v39  ;;  %v6625_v25 = vmul.f32 1.442695, %v6582_v38  ;;  %v6627_v20 = vmul.f32 1.442695, %v6583_v17  ;;  %v14712_v47 = vmul.f32 1.442695, %v6584_v9 }
 0xb94   : > { %v14714_v55 = vpop.eup %9301  ;;  %9321 = vpow2.f32 %v6603_v34  ;;  %v14716_v36 = vmul.f32 1.442695, %v6585_v61  ;;  %v14718_v7 = vmul.f32 1.442695, %v6586_v51  ;;  %v14720_v57 = vmul.f32 1.442695, %v6587_v6 }
 0xb95   : > { %17256 = vst [vmem:[#allocation40_spill] sm:$0xff] %v14714_v55  ;;  %v14722_v16 = vpop.eup %9303  ;;  %9323 = vpow2.f32 %v6605_v54  ;;  %v14724_v48 = vmul.f32 1.442695, %v6588_v62  ;;  %v14726_v46 = vmul.f32 1.442695, %v6589_v52  ;;  %v17265_v34 = vld [vmem:[#allocation33_spill] sm:$0xff] }
 0xb96   : > { %17257 = vst [vmem:[#allocation41_spill] sm:$0xff] %v14722_v16  ;;  %v14728_v38 = vmul.f32 1.442695, %v6590_v14  ;;  %v14730_v17 = vpop.eup %9305  ;;  %9325 = vpow2.f32 %v6607_v56  ;;  %v14732_v9 = vmul.f32 1.442695, %v6591_v59 }
 0xb97   : > { %17258 = vst [vmem:[#allocation42_spill] sm:$0xff] %v14730_v17  ;;  %v14734_v61 = vmul.f32 1.442695, %v6592_v18  ;;  %v14736_v51 = vmul.f32 1.442695, %v6593_v45  ;;  %v14738_v6 = vpop.eup %9307  ;;  %9327 = vpow2.f32 %v6609_v58  ;;  %v17269_v58 = vld [vmem:[#allocation36_spill] sm:$0xff] }
 0xb98   : > { %17259 = vst [vmem:[#allocation43_spill] sm:$0xff] %v14738_v6  ;;  %v14740_v29 = vmul.f32 1.442695, %v6594_v21  ;;  %v14742_v62 = vmul.f32 1.442695, %v6595_v1  ;;  %v14746_v14 = vpop.eup %9309  ;;  %9329 = vpow2.f32 %v6611_v0 }
 0xb99   : > { %v14744_v52 = vmul.f32 1.442695, %v6596_v40  ;;  %17260 = vst [vmem:[#allocation44_spill] sm:$0xff] %v14746_v14  ;;  %v14748_v32 = vmul.f32 1.442695, %v6597_v43  ;;  %v14754_v45 = vpop.eup %9311  ;;  %9331 = vpow2.f32 %v6613_v26  ;;  %v17266_v43 = vld [vmem:[#allocation34_spill] sm:$0xff] }
 0xb9a   : > { %v14750_v59 = vmul.f32 1.442695, %v6598_v2  ;;  %v14752_v18 = vmul.f32 1.442695, %v6599_v22  ;;  %17261 = vst [vmem:[#allocation45_spill] sm:$0xff] %v14754_v45  ;;  %v14762_v40 = vpop.eup %9313  ;;  %9333 = vpow2.f32 %v6615_v63  ;;  %v17267_v2 = vld [vmem:[#allocation35_spill] sm:$0xff] }
 0xb9b   : > { %v14756_v31 = vmul.f32 1.442695, %v6600_v42  ;;  %v14758_v21 = vmul.f32 1.442695, %v6601_v19  ;;  %v14760_v1 = vmul.f32 1.442695, %v6602_v49  ;;  %v14767_v22 = vpop.eup %9315  ;;  %9335 = vpow2.f32 %v6617_v13 }
 0xb9c   : > { %17264 = vst [vmem:[#allocation88_spill] sm:$0xff] %v14762_v40  ;;  %v6251_v54 = vmul.f32 1.0614054, %v17265_v34  ;;  %v6252_v44 = vmul.f32 1.0614054, %v17266_v43  ;;  %17268 = vst [vmem:[#allocation19_spill] sm:$0xff] %v14767_v22  ;;  %v14772_v49 = vpop.eup %9317  ;;  %9337 = vpow2.f32 %v6619_v41 }
 0xb9d   : > { %17262 = vst [vmem:[#allocation46_spill] sm:$0xff] %v14758_v21  ;;  %17263 = vst [vmem:[#allocation86_spill] sm:$0xff] %v14760_v1  ;;  %v6253_v56 = vmul.f32 1.0614054, %v17267_v2  ;;  %v6254_v0 = vmul.f32 1.0614054, %v17269_v58  ;;  %v14774_v1 = vpop.eup %9319  ;;  %9339 = vpow2.f32 %v6621_v35 }
 0xb9e   : > { %v17270_v42 = vld [vmem:[#allocation37_spill] sm:$0xff]  ;;  %v17271_v19 = vld [vmem:[#allocation38_spill] sm:$0xff]  ;;  %17272 = vst [vmem:[#allocation69_spill] sm:$0xff] %v14772_v49  ;;  %v6283_v23 = vadd.f32 -1.4531521, %v6251_v54  ;;  %17273 = vst [vmem:[#allocation82_spill] sm:$0xff] %v14774_v1  ;;  %v14776_v22 = vpop.eup %9321  ;;  %9341 = vpow2.f32 %v6623_v4 }
 0xb9f   : > { %v6255_v33 = vmul.f32 1.0614054, %v17270_v42  ;;  %v6256_v26 = vmul.f32 1.0614054, %v17271_v19  ;;  %v6284_v63 = vadd.f32 -1.4531521, %v6252_v44  ;;  %v14781_v49 = vpop.eup %9323  ;;  %9343 = vpow2.f32 %v6625_v25 }
 0xba0   : > { %v6285_v39 = vadd.f32 -1.4531521, %v6253_v56  ;;  %v6286_v21 = vadd.f32 -1.4531521, %v6254_v0  ;;  %v6315_v13 = vmul.f32 %v17265_v34, %v6283_v23  ;;  %v14786_v44 = vpop.eup %9325  ;;  %9345 = vpow2.f32 %v6627_v20 }
 0xba1   : > { %v6287_v40 = vadd.f32 -1.4531521, %v6255_v33  ;;  %v6288_v45 = vadd.f32 -1.4531521, %v6256_v26  ;;  %v6316_v14 = vmul.f32 %v17266_v43, %v6284_v63  ;;  %v14788_v33 = vpop.eup %9327  ;;  %9347 = vpow2.f32 %v14712_v47 }
 0xba2   : > { %v6317_v6 = vmul.f32 %v17267_v2, %v6285_v39  ;;  %v6318_v41 = vmul.f32 %v17269_v58, %v6286_v21  ;;  %v6347_v56 = vadd.f32 1.4214138, %v6315_v13  ;;  %v14791_v25 = vpop.eup %9329  ;;  %9349 = vpow2.f32 %v14716_v36 }
 0xba3   : > { %v6319_v54 = vmul.f32 %v17270_v42, %v6287_v40  ;;  %v6320_v35 = vmul.f32 %v17271_v19, %v6288_v45  ;;  %v6348_v4 = vadd.f32 1.4214138, %v6316_v14  ;;  %v9332_v40 = vpop.eup %9331  ;;  %9351 = vpow2.f32 %v14718_v7 }
 0xba4   : > { %v6349_v0 = vadd.f32 1.4214138, %v6317_v6  ;;  %v6350_v26 = vadd.f32 1.4214138, %v6318_v41  ;;  %v6379_v21 = vmul.f32 %v17265_v34, %v6347_v56  ;;  %v14801_v39 = vpop.eup %9333  ;;  %9353 = vpow2.f32 %v14720_v57 }
 0xba5   : > { %v6351_v23 = vadd.f32 1.4214138, %v6319_v54  ;;  %v6352_v63 = vadd.f32 1.4214138, %v6320_v35  ;;  %v6380_v45 = vmul.f32 %v17266_v43, %v6348_v4  ;;  %v14804_v54 = vpop.eup %9335  ;;  %9355 = vpow2.f32 %v14724_v48 }
 0xba6   : > { %v6381_v20 = vmul.f32 %v17267_v2, %v6349_v0  ;;  %v6382_v6 = vmul.f32 %v17269_v58, %v6350_v26  ;;  %v6411_v36 = vadd.f32 -0.28449672, %v6379_v21  ;;  %v14807_v4 = vpop.eup %9337  ;;  %9357 = vpow2.f32 %v14726_v46 }
 0xba7   : > { %v6383_v47 = vmul.f32 %v17270_v42, %v6351_v23  ;;  %v6384_v14 = vmul.f32 %v17271_v19, %v6352_v63  ;;  %v6412_v13 = vadd.f32 -0.28449672, %v6380_v45  ;;  %v14813_v23 = vpop.eup %9339  ;;  %9359 = vpow2.f32 %v14728_v38  ;;  %v17275_v38 = vld [vmem:[#allocation112_spill] sm:$0xff] }
 0xba8   : > { %v6413_v41 = vadd.f32 -0.28449672, %v6381_v20  ;;  %v6414_v35 = vadd.f32 -0.28449672, %v6382_v6  ;;  %v6443_v0 = vmul.f32 %v17265_v34, %v6411_v36  ;;  %v14819_v45 = vpop.eup %9341  ;;  %9361 = vpow2.f32 %v14732_v9  ;;  %v17276_v36 = vld [vmem:[#allocation92_spill] sm:$0xff]  ;;  %v17277_v9 = vld [vmem:[#allocation122_spill] sm:$0xff] }
 0xba9   : > { %v6415_v56 = vadd.f32 -0.28449672, %v6383_v47  ;;  %v6416_v7 = vadd.f32 -0.28449672, %v6384_v14  ;;  %v6444_v26 = vmul.f32 %v17266_v43, %v6412_v13  ;;  %v14822_v47 = vpop.eup %9343  ;;  %9363 = vpow2.f32 %v14734_v61  ;;  %v17274_v14 = vld [vmem:[#allocation110_spill] sm:$0xff] }
 0xbaa   : > { %v6445_v57 = vmul.f32 %v17267_v2, %v6413_v41  ;;  %v6446_v63 = vmul.f32 %v17269_v58, %v6414_v35  ;;  %v6475_v46 = vadd.f32 0.2548296, %v6443_v0  ;;  %vm6731_vm1 = vcmp.ge.f32.partialorder %v17274_v14, 0.0 }
 0xbab   : > { %v6447_v48 = vmul.f32 %v17270_v42, %v6415_v56  ;;  %v6448_v21 = vmul.f32 %v17271_v19, %v6416_v7  ;;  %v6476_v20 = vadd.f32 0.2548296, %v6444_v26  ;;  %vm6732_vm3 = vcmp.ge.f32.partialorder %v17275_v38, 0.0  ;;  %v14828_v56 = vpop.eup %9345 }
 0xbac   : > { %v6477_v6 = vadd.f32 0.2548296, %v6445_v57  ;;  %vm6733_vm5 = vcmp.ge.f32.partialorder %v17276_v36, 0.0  ;;  %v6478_v13 = vadd.f32 0.2548296, %v6446_v63  ;;  %9365 = vpow2.f32 %v14736_v51  ;;  %v14835_v26 = vpop.eup %9347  ;;  %v17278_v57 = vld [vmem:[#allocation115_spill] sm:$0xff] }
 0xbad   : > { %v6479_v41 = vadd.f32 0.2548296, %v6447_v48  ;;  %v6480_v35 = vadd.f32 0.2548296, %v6448_v21  ;;  %vm6734_vm0 = vcmp.ge.f32.partialorder %v17277_v9, 0.0  ;;  %v6507_v7 = vmul.f32 %v17265_v34, %v6475_v46  ;;  %v17279_v63 = vld [vmem:[#allocation51_spill] sm:$0xff]  ;;  %v14843_v1 = vpop.eup %9349 }
 0xbae   : > { %v6508_v0 = vmul.f32 %v17266_v43, %v6476_v20  ;;  %v6509_v61 = vmul.f32 %v17267_v2, %v6477_v6  ;;  %9367 = vpow2.f32 %v14740_v29  ;;  %vm6735_vm12 = vcmp.ge.f32.partialorder %v17278_v57, 0.0  ;;  %v14849_v2 = vpop.eup %9351  ;;  %v17284_v9 = vld [vmem:[#allocation16_spill] sm:$0xff] }
 0xbaf   : > { %vm6736_vm15 = vcmp.ge.f32.partialorder %v17279_v63, 0.0  ;;  %v6510_v48 = vmul.f32 %v17269_v58, %v6478_v13  ;;  %v6511_v51 = vmul.f32 %v17270_v42, %v6479_v41  ;;  %v6512_v21 = vmul.f32 %v17271_v19, %v6480_v35  ;;  %v14854_v19 = vpop.eup %9353 }
 0xbb0   : > { %9369 = vpow2.f32 %v14742_v62  ;;  %v6667_v34 = vmul.f32 %v14776_v22, %v6507_v7  ;;  %v6668_v43 = vmul.f32 %v14781_v49, %v6508_v0  ;;  %v6669_v29 = vmul.f32 %v14786_v44, %v6509_v61  ;;  %v6892_v49 = vld [vmem:[%s16078_s1 + $0x8] sm:$0xff]  ;;  %v14860_v44 = vpop.eup %9355 }
 0xbb1   : > { %9371 = vpow2.f32 %v14744_v52  ;;  %v6670_v58 = vmul.f32 %v14788_v33, %v6510_v48  ;;  %v6671_v42 = vmul.f32 %v14791_v25, %v6511_v51  ;;  %v6672_v46 = vmul.f32 %v9332_v40, %v6512_v21  ;;  %v17280_v33 = vld [vmem:[#allocation39_spill] sm:$0xff]  ;;  %7019 = vmatprep.mubr.f32.mxu0 %v6892_v49  ;;  %v14863_v25 = vpop.eup %9357 }
 0xbb2   : > { %9373 = vpow2.f32 %v14748_v32  ;;  %v6699_v62 = vsub.f32 1.0, %v6667_v34  ;;  %v6700_v20 = vsub.f32 1.0, %v6668_v43  ;;  %v6701_v22 = vsub.f32 1.0, %v6669_v29  ;;  %v14866_v0 = vpop.eup %9359 }
 0xbb3   : > { %v6702_v6 = vsub.f32 1.0, %v6670_v58  ;;  %v6703_v52 = vsub.f32 1.0, %v6671_v42  ;;  %v6704_v13 = vsub.f32 1.0, %v6672_v46  ;;  %v6257_v41 = vmul.f32 1.0614054, %v17280_v33  ;;  %v14868_v34 = vpop.eup %9361 }
 0xbb4   : > { %v6763_v40 = vsub.f32 0.0, %v6699_v62  ;;  %v6764_v35 = vsub.f32 0.0, %v6700_v20  ;;  %v6765_v32 = vsub.f32 0.0, %v6701_v22  ;;  %v6258_v7 = vmul.f32 1.0614054, %v14636_v24  ;;  %17281 = vst [vmem:[#allocation78_spill] sm:$0xff] %v14868_v34  ;;  %v14876_v46 = vpop.eup %9363 }
 0xbb5   : > { %v6766_v61 = vsub.f32 0.0, %v6702_v6  ;;  %v6767_v48 = vsub.f32 0.0, %v6703_v52  ;;  %v6768_v51 = vsub.f32 0.0, %v6704_v13  ;;  %v6289_v21 = vadd.f32 -1.4531521, %v6257_v41 }
 0xbb6   : > { %v6795_v43 = vsel %vm6731_vm1, %v6699_v62, %v6763_v40  ;;  %v6796_v29 = vsel %vm6732_vm3, %v6700_v20, %v6764_v35  ;;  %v6797_v58 = vsel %vm6733_vm5, %v6701_v22, %v6765_v32  ;;  %v6290_v42 = vadd.f32 -1.4531521, %v6258_v7  ;;  %v14880_v55 = vpop.eup %9365  ;;  %v17282_v20 = vld [vmem:[#allocation91_spill] sm:$0xff] }
 0xbb7   : > { %v6827_v49 = vadd.f32 1.0, %v6795_v43  ;;  %v6828_v17 = vadd.f32 1.0, %v6796_v29  ;;  %v6798_v16 = vsel %vm6734_vm0, %v6702_v6, %v6766_v61  ;;  %v6829_v41 = vadd.f32 1.0, %v6797_v58  ;;  %v17283_v40 = vld [vmem:[#allocation15_spill] sm:$0xff]  ;;  %v17287_v58 = vld [vmem:[#allocation117_spill] sm:$0xff] }
 0xbb8   : > { %v6830_v34 = vadd.f32 1.0, %v6798_v16  ;;  %v6799_v14 = vsel %vm6735_vm12, %v6703_v52, %v6767_v48  ;;  %v6800_v38 = vsel %vm6736_vm15, %v6704_v13, %v6768_v51  ;;  %v6321_v36 = vmul.f32 %v17280_v33, %v6289_v21  ;;  %v14887_v62 = vpop.eup %9367  ;;  %v17285_v16 = vld [vmem:[#allocation113_spill] sm:$0xff]  ;;  %v17286_v51 = vld [vmem:[#allocation114_spill] sm:$0xff] }
 0xbb9   : > { %v6859_v22 = vmul.f32 %v6827_v49, %v17282_v20  ;;  %v6860_v35 = vmul.f32 %v6828_v17, %v17283_v40  ;;  %v6861_v6 = vmul.f32 %v6829_v41, %v17284_v9  ;;  %v6831_v32 = vadd.f32 1.0, %v6799_v14 }
 0xbba   : > { %v14892_v7 = vpop.eup %9369  ;;  %v6862_v61 = vmul.f32 %v6830_v34, %v17285_v16  ;;  %v6832_v57 = vadd.f32 1.0, %v6800_v38  ;;  %v6322_v52 = vmul.f32 %v14636_v24, %v6290_v42  ;;  %v6353_v63 = vadd.f32 1.4214138, %v6321_v36 }
 0xbbb   : > { %v14896_v13 = vpop.eup %9371  ;;  %v8789_v48 = vpack.c.bf16 %v6860_v35, %v6859_v22  ;;  %v6863_v21 = vmul.f32 %v6831_v32, %v17286_v51  ;;  %v6259_v43 = vmul.f32 1.0614054, %v14642_v10  ;;  %v6260_v17 = vmul.f32 1.0614054, %v14648_v11 }
 0xbbc   : > { %v14901_v29 = vpop.eup %9373  ;;  %9375 = vpow2.f32 %v14750_v59  ;;  %v6864_v49 = vmul.f32 %v6832_v57, %v17287_v58  ;;  %v6354_v34 = vadd.f32 1.4214138, %v6322_v52  ;;  %v6385_v41 = vmul.f32 %v17280_v33, %v6353_v63 }
 0xbbd   : > { %8790 = vmatpush1.bf16.msra.mxu0 %v8789_v48  ;;  %8892 = vmatpush1.bf16.msra.mxu1 %v8789_v48  ;;  %v8792_v42 = vpack.c.bf16 %v6862_v61, %v6861_v6  ;;  %v6291_v14 = vadd.f32 -1.4531521, %v6259_v43  ;;  %v6292_v38 = vadd.f32 -1.4531521, %v6260_v17  ;;  %v6261_v36 = vmul.f32 1.0614054, %v14654_v50 }
 0xbbe   : > { %v17288_v20 = vmov 0.0|0.0   ;;  %v8795_v22 = vpack.c.bf16 %v6864_v49, %v6863_v21  ;;  %v6386_v40 = vmul.f32 %v14636_v24, %v6354_v34  ;;  %v6417_v59 = vadd.f32 -0.28449672, %v6385_v41  ;;  %v6938_v41 = vld [vmem:[%s16078_s1 + $0x178] sm:$0xff] }
 0xbbf   : > { %8791 = vmatprep.subr.bf16.mxu0 %v17288_v20  ;;  %8877 = vmatprep.subr.bf16.mxu1 %v17288_v20  ;;  %v6262_v35 = vmul.f32 1.0614054, %v14660_v8  ;;  %v6323_v9 = vmul.f32 %v14642_v10, %v6291_v14  ;;  %v6324_v32 = vmul.f32 %v14648_v11, %v6292_v38  ;;  %v6293_v16 = vadd.f32 -1.4531521, %v6261_v36 }
 0xbc0   : > { %v6263_v6 = vmul.f32 1.0614054, %v14666_v27  ;;  %v6418_v61 = vadd.f32 -0.28449672, %v6386_v40  ;;  %v6449_v57 = vmul.f32 %v17280_v33, %v6417_v59  ;;  %v6264_v63 = vmul.f32 1.0614054, %v14672_v15  ;;  %7134 = vmatprep.mubr.f32.mxu1 %v6938_v41 }
 0xbc1   : > { %v6294_v52 = vadd.f32 -1.4531521, %v6262_v35  ;;  %8793 = vmatpush1.bf16.msra.mxu0 %v8792_v42  ;;  %8893 = vmatpush1.bf16.msra.mxu1 %v8792_v42  ;;  %v6355_v48 = vadd.f32 1.4214138, %v6323_v9  ;;  %v6356_v51 = vadd.f32 1.4214138, %v6324_v32  ;;  %v6325_v21 = vmul.f32 %v14654_v50, %v6293_v16 }
 0xbc2   : > { %v6295_v43 = vadd.f32 -1.4531521, %v6263_v6  ;;  %8794 = vmatprep.subr.bf16.mxu0 %v17288_v20  ;;  %8878 = vmatprep.subr.bf16.mxu1 %v17288_v20  ;;  %v6450_v17 = vmul.f32 %v14636_v24, %v6418_v61  ;;  %v6481_v58 = vadd.f32 0.2548296, %v6449_v57  ;;  %v6296_v34 = vadd.f32 -1.4531521, %v6264_v63 }
 0xbc3   : > { %v6326_v49 = vmul.f32 %v14660_v8, %v6294_v52  ;;  %v17289_v42 = vld [vmem:[#allocation52_spill] sm:$0xff]  ;;  %v6387_v14 = vmul.f32 %v14642_v10, %v6355_v48  ;;  %v6388_v38 = vmul.f32 %v14648_v11, %v6356_v51  ;;  %v6357_v36 = vadd.f32 1.4214138, %v6325_v21  ;;  %v17290_v16 = vld [vmem:[#allocation53_spill] sm:$0xff] }
 0xbc4   : > { %vm6737_vm2 = vcmp.ge.f32.partialorder %v17289_v42, 0.0  ;;  %v6327_v40 = vmul.f32 %v14666_v27, %v6295_v43  ;;  %v6482_v59 = vadd.f32 0.2548296, %v6450_v17  ;;  %v6513_v35 = vmul.f32 %v17280_v33, %v6481_v58 }
 0xbc5   : > { %v6358_v9 = vadd.f32 1.4214138, %v6326_v49  ;;  %v6328_v32 = vmul.f32 %v14672_v15, %v6296_v34  ;;  %vm6738_vm6 = vcmp.ge.f32.partialorder %v17290_v16, 0.0  ;;  %8796 = vmatpush1.bf16.msra.mxu0 %v8795_v22  ;;  %8894 = vmatpush1.bf16.msra.mxu1 %v8795_v22  ;;  %v6419_v6 = vadd.f32 -0.28449672, %v6387_v14 }
 0xbc6   : > { %v6420_v61 = vadd.f32 -0.28449672, %v6388_v38  ;;  %v6389_v57 = vmul.f32 %v14654_v50, %v6357_v36  ;;  %v6359_v52 = vadd.f32 1.4214138, %v6327_v40  ;;  %v14932_v63 = vpop.eup %9375  ;;  %8797 = vmatprep.subr.bf16.mxu0 %v17288_v20  ;;  %8879 = vmatprep.subr.bf16.mxu1 %v17288_v20  ;;  %v6514_v33 = vmul.f32 %v14636_v24, %v6482_v59  ;;  %v17291_v40 = vld [vmem:[#allocation54_spill] sm:$0xff]  ;;  %v17292_v59 = vld [vmem:[#allocation55_spill] sm:$0xff] }
 0xbc7   : > { %v6673_v48 = vmul.f32 %v14801_v39, %v6513_v35  ;;  %v6390_v51 = vmul.f32 %v14660_v8, %v6358_v9  ;;  %v6360_v21 = vadd.f32 1.4214138, %v6328_v32  ;;  %v6451_v22 = vmul.f32 %v14642_v10, %v6419_v6 }
 0xbc8   : > { %v6452_v43 = vmul.f32 %v14648_v11, %v6420_v61  ;;  %v6421_v17 = vadd.f32 -0.28449672, %v6389_v57  ;;  %v6391_v58 = vmul.f32 %v14666_v27, %v6359_v52  ;;  %v6674_v49 = vmul.f32 %v14804_v54, %v6514_v33 }
 0xbc9   : > { %v6705_v34 = vsub.f32 1.0, %v6673_v48  ;;  %v6422_v41 = vadd.f32 -0.28449672, %v6390_v51  ;;  %v6392_v14 = vmul.f32 %v14672_v15, %v6360_v21  ;;  %v6483_v38 = vadd.f32 0.2548296, %v6451_v22  ;;  %v17293_v22 = vld [vmem:[#allocation20_spill] sm:$0xff] }
 0xbca   : > { %v6484_v24 = vadd.f32 0.2548296, %v6452_v43  ;;  %v6453_v39 = vmul.f32 %v14654_v50, %v6421_v17  ;;  %v6423_v36 = vadd.f32 -0.28449672, %v6391_v58  ;;  %vm6739_vm4 = vcmp.ge.f32.partialorder %v17291_v40, 0.0 }
 0xbcb   : > { %vm6740_vm7 = vcmp.ge.f32.partialorder %v17292_v59, 0.0  ;;  %v6706_v35 = vsub.f32 1.0, %v6674_v49  ;;  %v6769_v9 = vsub.f32 0.0, %v6705_v34  ;;  %v6454_v32 = vmul.f32 %v14660_v8, %v6422_v41  ;;  %v17300_v59 = vld [vmem:[#allocation121_spill] sm:$0xff] }
 0xbcc   : > { %v6424_v6 = vadd.f32 -0.28449672, %v6392_v14  ;;  %v6515_v54 = vmul.f32 %v14642_v10, %v6483_v38  ;;  %v6516_v61 = vmul.f32 %v14648_v11, %v6484_v24  ;;  %v6485_v57 = vadd.f32 0.2548296, %v6453_v39  ;;  %v17294_v11 = vld [vmem:[#allocation56_spill] sm:$0xff]  ;;  %v17295_v38 = vld [vmem:[#allocation118_spill] sm:$0xff] }
 0xbcd   : > { %v6455_v52 = vmul.f32 %v14666_v27, %v6423_v36  ;;  %v6770_v33 = vsub.f32 0.0, %v6706_v35  ;;  %v6801_v48 = vsel %vm6737_vm2, %v6705_v34, %v6769_v9  ;;  %v6486_v51 = vadd.f32 0.2548296, %v6454_v32  ;;  %v17296_v9 = vld [vmem:[#allocation57_spill] sm:$0xff] }
 0xbce   : > { %v6456_v21 = vmul.f32 %v14672_v15, %v6424_v6  ;;  %vm6741_vm9 = vcmp.ge.f32.partialorder %v17293_v22, 0.0  ;;  %v6833_v43 = vadd.f32 1.0, %v6801_v48  ;;  %v6675_v17 = vmul.f32 %v14807_v4, %v6515_v54  ;;  %v17297_v4 = vld [vmem:[#allocation58_spill] sm:$0xff] }
 0xbcf   : > { %v6676_v58 = vmul.f32 %v14813_v23, %v6516_v61  ;;  %v6517_v10 = vmul.f32 %v14654_v50, %v6485_v57  ;;  %vm6742_vm10 = vcmp.ge.f32.partialorder %v17294_v11, 0.0  ;;  %v6802_v49 = vsel %vm6738_vm6, %v6706_v35, %v6770_v33 }
 0xbd0   : > { %v6518_v42 = vmul.f32 %v14660_v8, %v6486_v51  ;;  %v6487_v34 = vadd.f32 0.2548296, %v6455_v52  ;;  %v6488_v41 = vadd.f32 0.2548296, %v6456_v21  ;;  %v6834_v14 = vadd.f32 1.0, %v6802_v49  ;;  %v17298_v8 = vld [vmem:[#allocation119_spill] sm:$0xff] }
 0xbd1   : > { %v6865_v24 = vmul.f32 %v6833_v43, %v17295_v38  ;;  %v6707_v39 = vsub.f32 1.0, %v6675_v17  ;;  %v6708_v36 = vsub.f32 1.0, %v6676_v58  ;;  %vm6743_vm11 = vcmp.ge.f32.partialorder %v17296_v9, 0.0 }
 0xbd2   : > { %vm6744_vm13 = vcmp.ge.f32.partialorder %v17297_v4, 0.0  ;;  %v6677_v50 = vmul.f32 %v14819_v45, %v6517_v10  ;;  %v6678_v23 = vmul.f32 %v14822_v47, %v6518_v42  ;;  %v6519_v16 = vmul.f32 %v14666_v27, %v6487_v34 }
 0xbd3   : > { %v6520_v35 = vmul.f32 %v14672_v15, %v6488_v41  ;;  %v6866_v32 = vmul.f32 %v6834_v14, %v17298_v8  ;;  %v6771_v6 = vsub.f32 0.0, %v6707_v39  ;;  %v6772_v54 = vsub.f32 0.0, %v6708_v36 }
 0xbd4   : > { %v6265_v61 = vmul.f32 1.0614054, %v14678_v3  ;;  %v6709_v57 = vsub.f32 1.0, %v6677_v50  ;;  %v6710_v52 = vsub.f32 1.0, %v6678_v23  ;;  %v6679_v33 = vmul.f32 %v14828_v56, %v6519_v16 }
 0xbd5   : > { %v6680_v48 = vmul.f32 %v14835_v26, %v6520_v35  ;;  %v8798_v51 = vpack.c.bf16 %v6866_v32, %v6865_v24  ;;  %v6803_v45 = vsel %vm6739_vm4, %v6707_v39, %v6771_v6  ;;  %v6804_v27 = vsel %vm6740_vm7, %v6708_v36, %v6772_v54  ;;  %v17299_v26 = vld [vmem:[#allocation120_spill] sm:$0xff]  ;;  %v17301_v35 = vld [vmem:[#allocation79_spill] sm:$0xff]  ;;  %v17302_v6 = vld [vmem:[#allocation94_spill] sm:$0xff] }
 0xbd6   : > { %v6266_v15 = vmul.f32 1.0614054, %v14684_v37  ;;  %v6835_v47 = vadd.f32 1.0, %v6803_v45  ;;  %v6836_v21 = vadd.f32 1.0, %v6804_v27  ;;  %v6773_v43 = vsub.f32 0.0, %v6709_v57  ;;  %v17304_v27 = vld [vmem:[#allocation47_spill] sm:$0xff] }
 0xbd7   : > { %v6774_v17 = vsub.f32 0.0, %v6710_v52  ;;  %8799 = vmatpush1.bf16.msra.mxu0 %v8798_v51  ;;  %8895 = vmatpush1.bf16.msra.mxu1 %v8798_v51  ;;  %v6711_v58 = vsub.f32 1.0, %v6679_v33  ;;  %v6712_v10 = vsub.f32 1.0, %v6680_v48  ;;  %v6297_v56 = vadd.f32 -1.4531521, %v6265_v61  ;;  %v17303_v51 = vld [vmem:[#allocation50_spill] sm:$0xff] }
 0xbd8   : > { %v6298_v49 = vadd.f32 -1.4531521, %v6266_v15  ;;  %8800 = vmatprep.subr.bf16.mxu0 %v17288_v20  ;;  %8880 = vmatprep.subr.bf16.mxu1 %v17288_v20  ;;  %v6867_v40 = vmul.f32 %v6835_v47, %v17299_v26  ;;  %v6868_v42 = vmul.f32 %v6836_v21, %v17300_v59  ;;  %v6805_v34 = vsel %vm6741_vm9, %v6709_v57, %v6773_v43 }
 0xbd9   : > { %v6267_v41 = vmul.f32 1.0614054, %v14690_v30  ;;  %v6806_v14 = vsel %vm6742_vm10, %v6710_v52, %v6774_v17  ;;  %v6837_v38 = vadd.f32 1.0, %v6805_v34  ;;  %v6775_v24 = vsub.f32 0.0, %v6711_v58 }
 0xbda   : > { %v6776_v39 = vsub.f32 0.0, %v6712_v10  ;;  %v8801_v36 = vpack.c.bf16 %v6868_v42, %v6867_v40  ;;  %v6838_v50 = vadd.f32 1.0, %v6806_v14  ;;  %v6329_v23 = vmul.f32 %v14678_v3, %v6297_v56 }
 0xbdb   : > { %v6330_v16 = vmul.f32 %v14684_v37, %v6298_v49  ;;  %v6869_v8 = vmul.f32 %v6837_v38, %v17301_v35  ;;  %v6807_v22 = vsel %vm6743_vm11, %v6711_v58, %v6775_v24  ;;  %v6268_v11 = vmul.f32 1.0614054, %v14696_v5  ;;  %v17305_v35 = vld [vmem:[#allocation59_spill] sm:$0xff] }
 0xbdc   : > { %v6808_v32 = vsel %vm6744_vm13, %v6712_v10, %v6776_v39  ;;  %8802 = vmatpush1.bf16.msra.mxu0 %v8801_v36  ;;  %8896 = vmatpush1.bf16.msra.mxu1 %v8801_v36  ;;  %v6870_v54 = vmul.f32 %v6838_v50, %v17302_v6  ;;  %v6839_v61 = vadd.f32 1.0, %v6807_v22  ;;  %v6361_v52 = vadd.f32 1.4214138, %v6329_v23  ;;  %v17306_v6 = vld [vmem:[#allocation60_spill] sm:$0xff] }
 0xbdd   : > { %v6840_v57 = vadd.f32 1.0, %v6808_v32  ;;  %9377 = vpow2.f32 %v14752_v18  ;;  %8803 = vmatprep.subr.bf16.mxu0 %v17288_v20  ;;  %8881 = vmatprep.subr.bf16.mxu1 %v17288_v20  ;;  %v6362_v9 = vadd.f32 1.4214138, %v6330_v16  ;;  %v6299_v33 = vadd.f32 -1.4531521, %v6267_v41 }
 0xbde   : > { %v6300_v48 = vadd.f32 -1.4531521, %v6268_v11  ;;  %v8804_v4 = vpack.c.bf16 %v6870_v54, %v6869_v8  ;;  %v6871_v45 = vmul.f32 %v6839_v61, %v17303_v51  ;;  %v6393_v47 = vmul.f32 %v14678_v3, %v6361_v52 }
 0xbdf   : > { %v6872_v15 = vmul.f32 %v6840_v57, %v17304_v27  ;;  %v6394_v21 = vmul.f32 %v14684_v37, %v6362_v9  ;;  %v6331_v43 = vmul.f32 %v14690_v30, %v6299_v33  ;;  %v6269_v17 = vmul.f32 1.0614054, %v14700_v12 }
 0xbe0   : > { %v6332_v18 = vmul.f32 %v14696_v5, %v6300_v48  ;;  %9379 = vpow2.f32 %v14756_v31  ;;  %8805 = vmatpush1.bf16.msra.mxu0 %v8804_v4  ;;  %8897 = vmatpush1.bf16.msra.mxu1 %v8804_v4  ;;  %v6425_v58 = vadd.f32 -0.28449672, %v6393_v47  ;;  %v6270_v10 = vmul.f32 1.0614054, %v14703_v28 }
 0xbe1   : > { %v6271_v56 = vmul.f32 1.0614054, %v14706_v53  ;;  %8806 = vmatprep.subr.bf16.mxu0 %v17288_v20  ;;  %8882 = vmatprep.subr.bf16.mxu1 %v17288_v20  ;;  %v8807_v49 = vpack.c.bf16 %v6872_v15, %v6871_v45  ;;  %v6426_v26 = vadd.f32 -0.28449672, %v6394_v21  ;;  %v6363_v40 = vadd.f32 1.4214138, %v6331_v43 }
 0xbe2   : > { %v6364_v59 = vadd.f32 1.4214138, %v6332_v18  ;;  %v6457_v42 = vmul.f32 %v14678_v3, %v6425_v58  ;;  %v6301_v34 = vadd.f32 -1.4531521, %v6269_v17  ;;  %v6302_v41 = vadd.f32 -1.4531521, %v6270_v10 }
 0xbe3   : > { %v6272_v31 = vmul.f32 1.0614054, %v14709_v60  ;;  %v6458_v14 = vmul.f32 %v14684_v37, %v6426_v26  ;;  %v6395_v38 = vmul.f32 %v14690_v30, %v6363_v40  ;;  %v6303_v39 = vadd.f32 -1.4531521, %v6271_v56  ;;  %v17308_v58 = vld [vmem:[#allocation101_spill] sm:$0xff] }
 0xbe4   : > { %v6396_v24 = vmul.f32 %v14696_v5, %v6364_v59  ;;  %8808 = vmatpush1.bf16.msra.mxu0 %v8807_v49  ;;  %8898 = vmatpush1.bf16.msra.mxu1 %v8807_v49  ;;  %v6489_v36 = vadd.f32 0.2548296, %v6457_v42  ;;  %v6333_v50 = vmul.f32 %v14700_v12, %v6301_v34  ;;  %v6334_v23 = vmul.f32 %v14703_v28, %v6302_v41 }
 0xbe5   : > { %v6304_v16 = vadd.f32 -1.4531521, %v6272_v31  ;;  %vm6745_vm14 = vcmp.ge.f32.partialorder %v17305_v35, 0.0  ;;  %8809 = vmatprep.subr.bf16.mxu0 %v17288_v20  ;;  %8883 = vmatprep.subr.bf16.mxu1 %v17288_v20  ;;  %v6490_v8 = vadd.f32 0.2548296, %v6458_v14  ;;  %v6335_v11 = vmul.f32 %v14706_v53, %v6303_v39 }
 0xbe6   : > { %v6427_v22 = vadd.f32 -0.28449672, %v6395_v38  ;;  %v6428_v32 = vadd.f32 -0.28449672, %v6396_v24  ;;  %vm6746_vm1 = vcmp.ge.f32.partialorder %v17306_v6, 0.0  ;;  %v6521_v54 = vmul.f32 %v14678_v3, %v6489_v36  ;;  %v17313_v6 = vld [vmem:[#allocation87_spill] sm:$0xff] }
 0xbe7   : > { %v6365_v61 = vadd.f32 1.4214138, %v6333_v50  ;;  %v6366_v57 = vadd.f32 1.4214138, %v6334_v23  ;;  %v6336_v52 = vmul.f32 %v14709_v60, %v6304_v16  ;;  %v15025_v9 = vpop.eup %9377  ;;  %v6522_v33 = vmul.f32 %v14684_v37, %v6490_v8  ;;  %v17307_v37 = vld [vmem:[#allocation61_spill] sm:$0xff]  ;;  %v17309_v23 = vld [vmem:[#allocation62_spill] sm:$0xff] }
 0xbe8   : > { %v6459_v48 = vmul.f32 %v14690_v30, %v6427_v22  ;;  %v6460_v4 = vmul.f32 %v14696_v5, %v6428_v32  ;;  %v6367_v51 = vadd.f32 1.4214138, %v6335_v11  ;;  %v6681_v45 = vmul.f32 %v14843_v1, %v6521_v54 }
 0xbe9   : > { %v6397_v27 = vmul.f32 %v14700_v12, %v6365_v61  ;;  %v6398_v15 = vmul.f32 %v14703_v28, %v6366_v57  ;;  %v6368_v3 = vadd.f32 1.4214138, %v6336_v52  ;;  %v6682_v47 = vmul.f32 %v14849_v2, %v6522_v33  ;;  %v17311_v61 = vld [vmem:[#allocation95_spill] sm:$0xff] }
 0xbea   : > { %v6491_v21 = vadd.f32 0.2548296, %v6459_v48  ;;  %v6492_v43 = vadd.f32 0.2548296, %v6460_v4  ;;  %v6399_v18 = vmul.f32 %v14706_v53, %v6367_v51  ;;  %v15035_v17 = vpop.eup %9379  ;;  %vm6747_vm3 = vcmp.ge.f32.partialorder %v17307_v37, 0.0  ;;  %v17312_v4 = vld [vmem:[#allocation63_spill] sm:$0xff] }
 0xbeb   : > { %vm6748_vm5 = vcmp.ge.f32.partialorder %v17308_v58, 0.0  ;;  %v6713_v10 = vsub.f32 1.0, %v6681_v45  ;;  %v6429_v56 = vadd.f32 -0.28449672, %v6397_v27  ;;  %v6430_v1 = vadd.f32 -0.28449672, %v6398_v15 }
 0xbec   : > { %v6400_v49 = vmul.f32 %v14709_v60, %v6368_v3  ;;  %v6714_v26 = vsub.f32 1.0, %v6682_v47  ;;  %v6523_v40 = vmul.f32 %v14690_v30, %v6491_v21  ;;  %v6524_v2 = vmul.f32 %v14696_v5, %v6492_v43  ;;  %v17314_v51 = vld [vmem:[#allocation48_spill] sm:$0xff]  ;;  %v17318_v37 = vld [vmem:[#allocation97_spill] sm:$0xff] }
 0xbed   : > { %v6431_v59 = vadd.f32 -0.28449672, %v6399_v18  ;;  %v6777_v42 = vsub.f32 0.0, %v6713_v10  ;;  %v6461_v34 = vmul.f32 %v14700_v12, %v6429_v56  ;;  %v6462_v41 = vmul.f32 %v14703_v28, %v6430_v1  ;;  %v17315_v21 = vld [vmem:[#allocation40_spill] sm:$0xff] }
 0xbee   : > { %v6432_v31 = vadd.f32 -0.28449672, %v6400_v49  ;;  %v6778_v14 = vsub.f32 0.0, %v6714_v26  ;;  %v6683_v38 = vmul.f32 %v14854_v19, %v6523_v40  ;;  %v6684_v24 = vmul.f32 %v14860_v44, %v6524_v2  ;;  %v17310_v19 = vld [vmem:[#allocation85_spill] sm:$0xff]  ;;  %v17319_v2 = vld [vmem:[#allocation99_spill] sm:$0xff] }
 0xbef   : > { %v6463_v39 = vmul.f32 %v14706_v53, %v6431_v59  ;;  %v6809_v36 = vsel %vm6745_vm14, %v6713_v10, %v6777_v42  ;;  %v6493_v30 = vadd.f32 0.2548296, %v6461_v34  ;;  %v6494_v50 = vadd.f32 0.2548296, %v6462_v41 }
 0xbf0   : > { %v6464_v5 = vmul.f32 %v14709_v60, %v6432_v31  ;;  %vm6749_vm0 = vcmp.ge.f32.partialorder %v17309_v23, 0.0  ;;  %v6810_v16 = vsel %vm6746_vm1, %v6714_v26, %v6778_v14  ;;  %v6841_v8 = vadd.f32 1.0, %v6809_v36  ;;  %v17322_v23 = vld [vmem:[#allocation100_spill] sm:$0xff] }
 0xbf1   : > { %v6715_v22 = vsub.f32 1.0, %v6683_v38  ;;  %v6716_v32 = vsub.f32 1.0, %v6684_v24  ;;  %vm6750_vm12 = vcmp.ge.f32.partialorder %v17310_v19, 0.0  ;;  %v6842_v44 = vadd.f32 1.0, %v6810_v16 }
 0xbf2   : > { %v6525_v11 = vmul.f32 %v14700_v12, %v6493_v30  ;;  %v6526_v35 = vmul.f32 %v14703_v28, %v6494_v50  ;;  %v6495_v54 = vadd.f32 0.2548296, %v6463_v39  ;;  %v6873_v57 = vmul.f32 %v6841_v8, %v17311_v61  ;;  %v17320_v39 = vld [vmem:[#allocation42_spill] sm:$0xff] }
 0xbf3   : > { %v6779_v52 = vsub.f32 0.0, %v6715_v22  ;;  %v6780_v33 = vsub.f32 0.0, %v6716_v32  ;;  %v6496_v48 = vadd.f32 0.2548296, %v6464_v5  ;;  %vm6751_vm15 = vcmp.ge.f32.partialorder %v17312_v4, 0.0 }
 0xbf4   : > { %vm6752_vm2 = vcmp.ge.f32.partialorder %v17313_v6, 0.0  ;;  %v6874_v45 = vmul.f32 %v6842_v44, %v17314_v51  ;;  %v6685_v27 = vmul.f32 %v14863_v25, %v6525_v11  ;;  %v6686_v15 = vmul.f32 %v14866_v0, %v6526_v35  ;;  %v17316_v25 = vld [vmem:[#allocation78_spill] sm:$0xff]  ;;  %v17321_v44 = vld [vmem:[#allocation43_spill] sm:$0xff] }
 0xbf5   : > { %v6527_v12 = vmul.f32 %v14706_v53, %v6495_v54  ;;  %v6811_v28 = vsel %vm6747_vm3, %v6715_v22, %v6779_v52  ;;  %v6812_v3 = vsel %vm6748_vm5, %v6716_v32, %v6780_v33  ;;  %v6528_v47 = vmul.f32 %v14709_v60, %v6496_v48  ;;  %v17317_v53 = vld [vmem:[#allocation41_spill] sm:$0xff] }
 0xbf6   : > { %v6273_v43 = vmul.f32 1.0614054, %v17315_v21  ;;  %v8810_v18 = vpack.c.bf16 %v6874_v45, %v6873_v57  ;;  %v6843_v10 = vadd.f32 1.0, %v6811_v28  ;;  %v6844_v56 = vadd.f32 1.0, %v6812_v3  ;;  %v17323_v57 = vld [vmem:[#allocation102_spill] sm:$0xff] }
 0xbf7   : > { %v6717_v1 = vsub.f32 1.0, %v6685_v27  ;;  %v6718_v49 = vsub.f32 1.0, %v6686_v15  ;;  %v6687_v26 = vmul.f32 %v17316_v25, %v6527_v12  ;;  %v6688_v0 = vmul.f32 %v14876_v46, %v6528_v47  ;;  %v17324_v12 = vld [vmem:[#allocation44_spill] sm:$0xff]  ;;  %v17325_v47 = vld [vmem:[#allocation103_spill] sm:$0xff] }
 0xbf8   : > { %v6274_v40 = vmul.f32 1.0614054, %v17317_v53  ;;  %8811 = vmatpush1.bf16.msra.mxu0 %v8810_v18  ;;  %8899 = vmatpush1.bf16.msra.mxu1 %v8810_v18  ;;  %v6875_v58 = vmul.f32 %v6843_v10, %v17318_v37  ;;  %v6876_v59 = vmul.f32 %v6844_v56, %v17319_v2  ;;  %v6305_v42 = vadd.f32 -1.4531521, %v6273_v43  ;;  %v17326_v43 = vld [vmem:[#allocation105_spill] sm:$0xff]  ;;  %v17328_v37 = vld [vmem:[#allocation88_spill] sm:$0xff] }
 0xbf9   : > { %v6781_v60 = vsub.f32 0.0, %v6717_v1  ;;  %8812 = vmatprep.subr.bf16.mxu0 %v17288_v20  ;;  %8884 = vmatprep.subr.bf16.mxu1 %v17288_v20  ;;  %v6782_v34 = vsub.f32 0.0, %v6718_v49  ;;  %v6719_v41 = vsub.f32 1.0, %v6687_v26  ;;  %v6720_v31 = vsub.f32 1.0, %v6688_v0 }
 0xbfa   : > { %v6306_v14 = vadd.f32 -1.4531521, %v6274_v40  ;;  %v8813_v38 = vpack.c.bf16 %v6876_v59, %v6875_v58  ;;  %v6337_v24 = vmul.f32 %v17315_v21, %v6305_v42  ;;  %v6275_v36 = vmul.f32 1.0614054, %v17320_v39 }
 0xbfb   : > { %v6813_v46 = vsel %vm6749_vm0, %v6717_v1, %v6781_v60  ;;  %v6814_v30 = vsel %vm6750_vm12, %v6718_v49, %v6782_v34  ;;  %v6783_v5 = vsub.f32 0.0, %v6719_v41  ;;  %v6784_v16 = vsub.f32 0.0, %v6720_v31  ;;  %v17327_v49 = vld [vmem:[#allocation45_spill] sm:$0xff] }
 0xbfc   : > { %v6845_v50 = vadd.f32 1.0, %v6813_v46  ;;  %8814 = vmatpush1.bf16.msra.mxu0 %v8813_v38  ;;  %8900 = vmatpush1.bf16.msra.mxu1 %v8813_v38  ;;  %v6846_v8 = vadd.f32 1.0, %v6814_v30  ;;  %v6338_v22 = vmul.f32 %v17317_v53, %v6306_v14  ;;  %v6369_v32 = vadd.f32 1.4214138, %v6337_v24 }
 0xbfd   : > { %v6276_v11 = vmul.f32 1.0614054, %v17321_v44  ;;  %8815 = vmatprep.subr.bf16.mxu0 %v17288_v20  ;;  %8885 = vmatprep.subr.bf16.mxu1 %v17288_v20  ;;  %v6815_v19 = vsel %vm6751_vm15, %v6719_v41, %v6783_v5  ;;  %v6816_v54 = vsel %vm6752_vm2, %v6720_v31, %v6784_v16  ;;  %v6307_v61 = vadd.f32 -1.4531521, %v6275_v36  ;;  %v17329_v31 = vld [vmem:[#allocation19_spill] sm:$0xff] }
 0xbfe   : > { %v6877_v35 = vmul.f32 %v6845_v50, %v17322_v23  ;;  %v6878_v52 = vmul.f32 %v6846_v8, %v17323_v57  ;;  %v6847_v33 = vadd.f32 1.0, %v6815_v19  ;;  %v6848_v48 = vadd.f32 1.0, %v6816_v54  ;;  %v17330_v50 = vld [vmem:[#allocation64_spill] sm:$0xff] }
 0xbff   : > { %v6370_v51 = vadd.f32 1.4214138, %v6338_v22  ;;  %v6401_v45 = vmul.f32 %v17315_v21, %v6369_v32  ;;  %v6308_v27 = vadd.f32 -1.4531521, %v6276_v11  ;;  %v6339_v15 = vmul.f32 %v17320_v39, %v6307_v61  ;;  %v17331_v32 = vld [vmem:[#allocation49_spill] sm:$0xff] }
 0xc00   : > { %v6277_v28 = vmul.f32 1.0614054, %v17324_v12  ;;  %v8816_v3 = vpack.c.bf16 %v6878_v52, %v6877_v35  ;;  %v6879_v4 = vmul.f32 %v6847_v33, %v17325_v47  ;;  %v6880_v18 = vmul.f32 %v6848_v48, %v17326_v43 }
 0xc01   : > { %v6402_v6 = vmul.f32 %v17317_v53, %v6370_v51  ;;  %v6433_v10 = vadd.f32 -0.28449672, %v6401_v45  ;;  %v6340_v56 = vmul.f32 %v17321_v44, %v6308_v27  ;;  %v6371_v1 = vadd.f32 1.4214138, %v6339_v15  ;;  %v17332_v27 = vld [vmem:[#allocation65_spill] sm:$0xff] }
 0xc02   : > { %v6278_v25 = vmul.f32 1.0614054, %v17327_v49  ;;  %8817 = vmatpush1.bf16.msra.mxu0 %v8816_v3  ;;  %8901 = vmatpush1.bf16.msra.mxu1 %v8816_v3  ;;  %v8819_v26 = vpack.c.bf16 %v6880_v18, %v6879_v4  ;;  %v6309_v40 = vadd.f32 -1.4531521, %v6277_v28  ;;  %v6279_v58 = vmul.f32 1.0614054, %v17328_v37 }
 0xc03   : > { %v6434_v0 = vadd.f32 -0.28449672, %v6402_v6  ;;  %8818 = vmatprep.subr.bf16.mxu0 %v17288_v20  ;;  %8886 = vmatprep.subr.bf16.mxu1 %v17288_v20  ;;  %v6465_v2 = vmul.f32 %v17315_v21, %v6433_v10  ;;  %v6372_v59 = vadd.f32 1.4214138, %v6340_v56  ;;  %v6403_v60 = vmul.f32 %v17320_v39, %v6371_v1  ;;  %v17333_v18 = vld [vmem:[#allocation116_spill] sm:$0xff] }
 0xc04   : > { %v6310_v42 = vadd.f32 -1.4531521, %v6278_v25  ;;  %v6341_v41 = vmul.f32 %v17324_v12, %v6309_v40  ;;  %v6280_v14 = vmul.f32 1.0614054, %v17329_v31  ;;  %v6311_v38 = vadd.f32 -1.4531521, %v6279_v58 }
 0xc05   : > { %v6466_v34 = vmul.f32 %v17317_v53, %v6434_v0  ;;  %v6497_v46 = vadd.f32 0.2548296, %v6465_v2  ;;  %v6404_v24 = vmul.f32 %v17321_v44, %v6372_v59  ;;  %v6435_v36 = vadd.f32 -0.28449672, %v6403_v60  ;;  %v17334_v2 = vld [vmem:[#allocation66_spill] sm:$0xff] }
 0xc06   : > { %v6342_v30 = vmul.f32 %v17327_v49, %v6310_v42  ;;  %vm6753_vm6 = vcmp.ge.f32.partialorder %v17330_v50, 0.0  ;;  %8820 = vmatpush1.bf16.msra.mxu0 %v8819_v26  ;;  %8902 = vmatpush1.bf16.msra.mxu1 %v8819_v26  ;;  %v6373_v16 = vadd.f32 1.4214138, %v6341_v41  ;;  %v6312_v8 = vadd.f32 -1.4531521, %v6280_v14 }
 0xc07   : > { %v6498_v5 = vadd.f32 0.2548296, %v6466_v34  ;;  %v6343_v22 = vmul.f32 %v17328_v37, %v6311_v38  ;;  %vm6754_vm4 = vcmp.ge.f32.partialorder %v17331_v32, 0.0  ;;  %8821 = vmatprep.subr.bf16.mxu0 %v17288_v20  ;;  %8887 = vmatprep.subr.bf16.mxu1 %v17288_v20  ;;  %v6529_v11 = vmul.f32 %v17315_v21, %v6497_v46 }
 0xc08   : > { %v6436_v23 = vadd.f32 -0.28449672, %v6404_v24  ;;  %v6467_v35 = vmul.f32 %v17320_v39, %v6435_v36  ;;  %v6374_v19 = vadd.f32 1.4214138, %v6342_v30  ;;  %v6405_v61 = vmul.f32 %v17324_v12, %v6373_v16  ;;  %v17335_v30 = vld [vmem:[#allocation106_spill] sm:$0xff] }
 0xc09   : > { %v6530_v54 = vmul.f32 %v17317_v53, %v6498_v5  ;;  %v6344_v57 = vmul.f32 %v17329_v31, %v6312_v8  ;;  %v6375_v52 = vadd.f32 1.4214138, %v6343_v22  ;;  %v6689_v33 = vmul.f32 %v14880_v55, %v6529_v11  ;;  %v17336_v8 = vld [vmem:[#allocation108_spill] sm:$0xff] }
 0xc0a   : > { %v6468_v48 = vmul.f32 %v17321_v44, %v6436_v23  ;;  %v6499_v51 = vadd.f32 0.2548296, %v6467_v35  ;;  %v6406_v45 = vmul.f32 %v17327_v49, %v6374_v19  ;;  %vm6755_vm7 = vcmp.ge.f32.partialorder %v17332_v27, 0.0 }
 0xc0b   : > { %v6690_v21 = vmul.f32 %v14887_v62, %v6530_v54  ;;  %v6437_v15 = vadd.f32 -0.28449672, %v6405_v61  ;;  %v6376_v28 = vadd.f32 1.4214138, %v6344_v57  ;;  %v6407_v53 = vmul.f32 %v17328_v37, %v6375_v52  ;;  %v17337_v57 = vld [vmem:[#allocation69_spill] sm:$0xff] }
 0xc0c   : > { %v6721_v3 = vsub.f32 1.0, %v6689_v33  ;;  %v6500_v47 = vadd.f32 0.2548296, %v6468_v48  ;;  %v6531_v4 = vmul.f32 %v17320_v39, %v6499_v51  ;;  %v6438_v43 = vadd.f32 -0.28449672, %v6406_v45  ;;  %v17338_v48 = vld [vmem:[#allocation109_spill] sm:$0xff] }
 0xc0d   : > { %vm6756_vm9 = vcmp.ge.f32.partialorder %v17333_v18, 0.0  ;;  %v6722_v55 = vsub.f32 1.0, %v6690_v21  ;;  %v6469_v6 = vmul.f32 %v17324_v12, %v6437_v15  ;;  %v6408_v10 = vmul.f32 %v17329_v31, %v6376_v28  ;;  %v17339_v21 = vld [vmem:[#allocation82_spill] sm:$0xff]  ;;  %v17340_v28 = vld [vmem:[#allocation93_spill] sm:$0xff] }
 0xc0e   : > { %v6439_v56 = vadd.f32 -0.28449672, %v6407_v53  ;;  %v6785_v1 = vsub.f32 0.0, %v6721_v3  ;;  %v6532_v62 = vmul.f32 %v17321_v44, %v6500_v47  ;;  %v6691_v25 = vmul.f32 %v14892_v7, %v6531_v4  ;;  %v17341_v53 = vld [vmem:[#allocation111_spill] sm:$0xff] }
 0xc0f   : > { %v6470_v26 = vmul.f32 %v17327_v49, %v6438_v43  ;;  %v6786_v0 = vsub.f32 0.0, %v6722_v55  ;;  %v6501_v40 = vadd.f32 0.2548296, %v6469_v6  ;;  %v6440_v58 = vadd.f32 -0.28449672, %v6408_v10 }
 0xc10   : > { %v6471_v39 = vmul.f32 %v17328_v37, %v6439_v56  ;;  %vm6757_vm10 = vcmp.ge.f32.partialorder %v17334_v2, 0.0  ;;  %v6817_v59 = vsel %vm6753_vm6, %v6721_v3, %v6785_v1  ;;  %v6692_v60 = vmul.f32 %v14896_v13, %v6532_v62  ;;  %v17342_v1 = vld [vmem:[#allocation67_spill] sm:$0xff]  ;;  %v17343_v62 = vld [vmem:[#allocation96_spill] sm:$0xff] }
 0xc11   : > { %v6723_v42 = vsub.f32 1.0, %v6691_v25  ;;  %v6502_v34 = vadd.f32 0.2548296, %v6470_v26  ;;  %v6818_v44 = vsel %vm6754_vm4, %v6722_v55, %v6786_v0  ;;  %v6849_v7 = vadd.f32 1.0, %v6817_v59 }
 0xc12   : > { %v6533_v41 = vmul.f32 %v17324_v12, %v6501_v40  ;;  %v6472_v14 = vmul.f32 %v17329_v31, %v6440_v58  ;;  %v6850_v38 = vadd.f32 1.0, %v6818_v44  ;;  %v6724_v46 = vsub.f32 1.0, %v6692_v60  ;;  %v17344_v40 = vld [vmem:[#allocation80_spill] sm:$0xff]  ;;  %v17345_v58 = vld [vmem:[#allocation98_spill] sm:$0xff] }
 0xc13   : > { %v6787_v24 = vsub.f32 0.0, %v6723_v42  ;;  %v6534_v36 = vmul.f32 %v17327_v49, %v6502_v34  ;;  %v6881_v50 = vmul.f32 %v6849_v7, %v17335_v30  ;;  %v6503_v13 = vadd.f32 0.2548296, %v6471_v39  ;;  %v17346_v60 = vld [vmem:[#allocation46_spill] sm:$0xff]  ;;  %v17349_v30 = vld [vmem:[#allocation107_spill] sm:$0xff] }
 0xc14   : > { %v6693_v5 = vmul.f32 %v14901_v29, %v6533_v41  ;;  %v6504_v16 = vadd.f32 0.2548296, %v6472_v14  ;;  %v6882_v22 = vmul.f32 %v6850_v38, %v17336_v8  ;;  %v6788_v32 = vsub.f32 0.0, %v6724_v46  ;;  %v17347_v7 = vld [vmem:[#allocation86_spill] sm:$0xff] }
 0xc15   : > { %v6819_v11 = vsel %vm6755_vm7, %v6723_v42, %v6787_v24  ;;  %v6694_v12 = vmul.f32 %v14932_v63, %v6534_v36  ;;  %v6535_v19 = vmul.f32 %v17328_v37, %v6503_v13  ;;  %v6281_v52 = vmul.f32 1.0614054, %v17337_v57 }
 0xc16   : > { %v6851_v23 = vadd.f32 1.0, %v6819_v11  ;;  %v6725_v35 = vsub.f32 1.0, %v6693_v5  ;;  %v6536_v49 = vmul.f32 %v17329_v31, %v6504_v16  ;;  %v8822_v54 = vpack.c.bf16 %v6882_v22, %v6881_v50 }
 0xc17   : > { %v6820_v29 = vsel %vm6756_vm9, %v6724_v46, %v6788_v32  ;;  %v6726_v61 = vsub.f32 1.0, %v6694_v12  ;;  %v6695_v27 = vmul.f32 %v15025_v9, %v6535_v19  ;;  %v6282_v31 = vmul.f32 1.0614054, %v17339_v21  ;;  %v17348_v46 = vld [vmem:[#allocation104_spill] sm:$0xff] }
 0xc18   : > { %v6852_v33 = vadd.f32 1.0, %v6820_v29  ;;  %v6883_v51 = vmul.f32 %v6851_v23, %v17338_v48  ;;  %v6789_v45 = vsub.f32 0.0, %v6725_v35  ;;  %8823 = vmatpush1.bf16.msra.mxu0 %v8822_v54  ;;  %8903 = vmatpush1.bf16.msra.mxu1 %v8822_v54  ;;  %v6696_v37 = vmul.f32 %v15035_v17, %v6536_v49 }
 0xc19   : > { %v6790_v63 = vsub.f32 0.0, %v6726_v61  ;;  %v6313_v15 = vadd.f32 -1.4531521, %v6281_v52  ;;  %vm6758_vm11 = vcmp.ge.f32.partialorder %v17340_v28, 0.0  ;;  %8824 = vmatprep.subr.bf16.mxu0 %v17288_v20  ;;  %8888 = vmatprep.subr.bf16.mxu1 %v17288_v20  ;;  %v6727_v9 = vsub.f32 1.0, %v6695_v27  ;;  %v17352_v27 = vld [vmem:[#allocation89_spill] sm:$0xff] }
 0xc1a   : > { %v6884_v3 = vmul.f32 %v6852_v33, %v17341_v53  ;;  %v6821_v47 = vsel %vm6757_vm10, %v6725_v35, %v6789_v45  ;;  %v6728_v18 = vsub.f32 1.0, %v6696_v37  ;;  %v6314_v55 = vadd.f32 -1.4531521, %v6282_v31  ;;  %v17350_v33 = vld [vmem:[#allocation68_spill] sm:$0xff] }
 0xc1b   : > { %v6822_v4 = vsel %vm6758_vm11, %v6726_v61, %v6790_v63  ;;  %v6853_v43 = vadd.f32 1.0, %v6821_v47  ;;  %v6791_v10 = vsub.f32 0.0, %v6727_v9  ;;  %v6345_v56 = vmul.f32 %v17337_v57, %v6313_v15  ;;  %v6937_v47 = vld [vmem:[%s16078_s1 + $0x170] sm:$0xff] }
 0xc1c   : > { %v8825_v17 = vpack.c.bf16 %v6884_v3, %v6883_v51  ;;  %v6854_v6 = vadd.f32 1.0, %v6822_v4  ;;  %vm6759_vm13 = vcmp.ge.f32.partialorder %v17342_v1, 0.0  ;;  %v6792_v26 = vsub.f32 0.0, %v6728_v18  ;;  %v17351_v51 = vld [vmem:[#allocation81_spill] sm:$0xff]  ;;  %v6891_v3 = vld [vmem:[%s16078_s1] sm:$0xff]  ;;  %v6940_v4 = vld [vmem:[%s16078_s1 + $0x188] sm:$0xff] }
 0xc1d   : > { %v6885_v25 = vmul.f32 %v6853_v43, %v17343_v62  ;;  %v6346_v0 = vmul.f32 %v17339_v21, %v6314_v55  ;;  %vm6760_vm14 = vcmp.ge.f32.partialorder %v17344_v40, 0.0  ;;  %v6823_v2 = vsel %vm6759_vm13, %v6727_v9, %v6791_v10  ;;  %v6894_v9 = vld [vmem:[%s16078_s1 + $0x18] sm:$0xff]  ;;  %v6893_v43 = vld [vmem:[%s16078_s1 + $0x10] sm:$0xff]  ;;  %v6896_v55 = vld [vmem:[%s16078_s1 + $0x28] sm:$0xff] }
 0xc1e   : > { %8826 = vmatpush1.bf16.msra.mxu0 %v8825_v17  ;;  %8904 = vmatpush1.bf16.msra.mxu1 %v8825_v17  ;;  %v6886_v39 = vmul.f32 %v6854_v6, %v17345_v58  ;;  %v6377_v59 = vadd.f32 1.4214138, %v6345_v56  ;;  %9381 = vpow2.f32 %v17346_v60  ;;  %v6824_v42 = vsel %vm6760_vm14, %v6728_v18, %v6792_v26  ;;  %v6939_v18 = vld [vmem:[%s16078_s1 + $0x180] sm:$0xff]  ;;  %v6942_v17 = vld [vmem:[%s16078_s1 + $0x198] sm:$0xff]  ;;  %v6941_v10 = vld [vmem:[%s16078_s1 + $0x190] sm:$0xff] }
 0xc1f   : > { %8827 = vmatprep.subr.bf16.mxu0 %v17288_v20  ;;  %8889 = vmatprep.subr.bf16.mxu1 %v17288_v20  ;;  %v6855_v34 = vadd.f32 1.0, %v6823_v2  ;;  %v6378_v44 = vadd.f32 1.4214138, %v6346_v0  ;;  %9383 = vpow2.f32 %v17347_v7  ;;  %v6856_v14 = vadd.f32 1.0, %v6824_v42  ;;  %v6895_v6 = vld [vmem:[%s16078_s1 + $0x20] sm:$0xff]  ;;  %v6898_v56 = vld [vmem:[%s16078_s1 + $0x38] sm:$0xff] }
 0xc20   : > { %v8828_v41 = vpack.c.bf16 %v6886_v39, %v6885_v25  ;;  %v6409_v38 = vmul.f32 %v17337_v57, %v6377_v59  ;;  %vm6761_vm1 = vcmp.ge.f32.partialorder %v17350_v33, 0.0  ;;  %vm6762_vm3 = vcmp.ge.f32.partialorder %v17351_v51, 0.0  ;;  %v6944_v1 = vld [vmem:[%s16078_s1 + $0x1a8] sm:$0xff]  ;;  %v6897_v62 = vld [vmem:[%s16078_s1 + $0x30] sm:$0xff]  ;;  %v6943_v25 = vld [vmem:[%s16078_s1 + $0x1a0] sm:$0xff] }
 0xc21   : > { %v6887_v24 = vmul.f32 %v6855_v34, %v17348_v46  ;;  %v6410_v36 = vmul.f32 %v17339_v21, %v6378_v44  ;;  %v6888_v50 = vmul.f32 %v6856_v14, %v17349_v30  ;;  %v6900_v26 = vld [vmem:[%s16078_s1 + $0x48] sm:$0xff]  ;;  %v6946_v0 = vld [vmem:[%s16078_s1 + $0x1b8] sm:$0xff]  ;;  %v6899_v40 = vld [vmem:[%s16078_s1 + $0x40] sm:$0xff]  ;;  %vm7301_vm5 = vcmask 254976  }
 0xc22   : > { %8829 = vmatpush1.bf16.msra.mxu0 %v8828_v41  ;;  %8905 = vmatpush1.bf16.msra.mxu1 %v8828_v41  ;;  %v6441_v5 = vadd.f32 -0.28449672, %v6409_v38  ;;  %v6945_v58 = vld [vmem:[%s16078_s1 + $0x1b0] sm:$0xff]  ;;  %v6902_v39 = vld [vmem:[%s16078_s1 + $0x58] sm:$0xff]  ;;  %v6948_v2 = vld [vmem:[%s16078_s1 + $0x1c8] sm:$0xff]  ;;  %vm17355_vm0 = vcmask 64512  }
 0xc23   : > { %8830 = vmatprep.subr.bf16.mxu0 %v17288_v20  ;;  %8890 = vmatprep.subr.bf16.mxu1 %v17288_v20  ;;  %v6442_v13 = vadd.f32 -0.28449672, %v6410_v36  ;;  %v8831_v16 = vpack.c.bf16 %v6888_v50, %v6887_v24  ;;  %v6901_v59 = vld [vmem:[%s16078_s1 + $0x50] sm:$0xff]  ;;  %v6947_v60 = vld [vmem:[%s16078_s1 + $0x1c0] sm:$0xff]  ;;  %v6904_v42 = vld [vmem:[%s16078_s1 + $0x68] sm:$0xff]  ;;  %vm17356_vm12 = vcmask 130048  }
 0xc24   : > { %v6473_v8 = vmul.f32 %v17337_v57, %v6441_v5  ;;  %v6950_v34 = vld [vmem:[%s16078_s1 + $0x1d8] sm:$0xff]  ;;  %v6903_v44 = vld [vmem:[%s16078_s1 + $0x60] sm:$0xff]  ;;  %v6949_v7 = vld [vmem:[%s16078_s1 + $0x1d0] sm:$0xff]  ;;  %vm17357_vm15 = vcmask 195584   ;;  %vm17358_vm2 = vcmask 261120  }
 0xc25   : > { %v6474_v22 = vmul.f32 %v17339_v21, %v6442_v13  ;;  %v6906_v41 = vld [vmem:[%s16078_s1 + $0x78] sm:$0xff]  ;;  %v6952_v14 = vld [vmem:[%s16078_s1 + $0x1e8] sm:$0xff]  ;;  %v6905_v38 = vld [vmem:[%s16078_s1 + $0x70] sm:$0xff] }
 0xc26   : > { %8832 = vmatpush1.bf16.msra.mxu0 %v8831_v16  ;;  %8906 = vmatpush1.bf16.msra.mxu1 %v8831_v16  ;;  %v6505_v32 = vadd.f32 0.2548296, %v6473_v8  ;;  %v6951_v46 = vld [vmem:[%s16078_s1 + $0x1e0] sm:$0xff]  ;;  %v6908_v24 = vld [vmem:[%s16078_s1 + $0x88] sm:$0xff]  ;;  %v6954_v36 = vld [vmem:[%s16078_s1 + $0x1f8] sm:$0xff] }
 0xc27   : > { %8833 = vmatprep.subr.bf16.mxu0 %v17288_v20  ;;  %8891 = vmatprep.subr.bf16.mxu1 %v17288_v20  ;;  %v6506_v11 = vadd.f32 0.2548296, %v6474_v22  ;;  %v6057_v20 = vmul.f32 0.5, %v17352_v27  ;;  %v6907_v30 = vld [vmem:[%s16078_s1 + $0x80] sm:$0xff]  ;;  %v6953_v50 = vld [vmem:[%s16078_s1 + $0x1f0] sm:$0xff]  ;;  %v6910_v5 = vld [vmem:[%s16078_s1 + $0x98] sm:$0xff] }
 0xc28   : > { %v6537_v12 = vmul.f32 %v17337_v57, %v6505_v32  ;;  %v9382_v23 = vpop.eup %9381  ;;  %v17353_v57 = vld [vmem:[#allocation90_spill] sm:$0xff]  ;;  %v6909_v13 = vld [vmem:[%s16078_s1 + $0x90] sm:$0xff]  ;;  %v6912_v16 = vld [vmem:[%s16078_s1 + $0xa8] sm:$0xff] }
 0xc29   : > { %v6538_v35 = vmul.f32 %v17339_v21, %v6506_v11  ;;  %v9384_v19 = vpop.eup %9383  ;;  %v6058_v31 = vmul.f32 0.5, %v17353_v57  ;;  %v6911_v8 = vld [vmem:[%s16078_s1 + $0xa0] sm:$0xff]  ;;  %v6914_v22 = vld [vmem:[%s16078_s1 + $0xb8] sm:$0xff]  ;;  %v6913_v32 = vld [vmem:[%s16078_s1 + $0xb0] sm:$0xff] }
 0xc2a   : > { %v6697_v49 = vmul.f32 %v9382_v23, %v6537_v12  ;;  %v6916_v11 = vld [vmem:[%s16078_s1 + $0xc8] sm:$0xff]  ;;  %v6915_v12 = vld [vmem:[%s16078_s1 + $0xc0] sm:$0xff]  ;;  %v6918_v23 = vld [vmem:[%s16078_s1 + $0xd8] sm:$0xff] }
 0xc2b   : > { %v6698_v54 = vmul.f32 %v9384_v19, %v6538_v35  ;;  %v6917_v35 = vld [vmem:[%s16078_s1 + $0xd0] sm:$0xff]  ;;  %v6920_v19 = vld [vmem:[%s16078_s1 + $0xe8] sm:$0xff]  ;;  %v6926_v33 = vld [vmem:[%s16078_s1 + $0x118] sm:$0xff] }
 0xc2c   : > { %v6729_v29 = vsub.f32 1.0, %v6697_v49  ;;  %v6919_v49 = vld [vmem:[%s16078_s1 + $0xe0] sm:$0xff]  ;;  %v6928_v51 = vld [vmem:[%s16078_s1 + $0x128] sm:$0xff]  ;;  %v6930_v27 = vld [vmem:[%s16078_s1 + $0x138] sm:$0xff] }
 0xc2d   : > { %v6730_v61 = vsub.f32 1.0, %v6698_v54  ;;  %v6922_v54 = vld [vmem:[%s16078_s1 + $0xf8] sm:$0xff]  ;;  %vm17359_vm6 = vmmov %vm17355_vm0 }
 0xc2e   : > { %v6793_v52 = vsub.f32 0.0, %v6729_v29  ;;  %v6934_v57 = vld [vmem:[%s16078_s1 + $0x158] sm:$0xff]  ;;  %vm17360_vm4 = vmmov %vm17356_vm12 }
 0xc2f   : > { %v6794_v48 = vsub.f32 0.0, %v6730_v61  ;;  %vm17361_vm7 = vmmov %vm17357_vm15 }
 0xc30   : > { %v6825_v45 = vsel %vm6761_vm1, %v6729_v29, %v6793_v52  ;;  %v6921_v29 = vld [vmem:[%s16078_s1 + $0xf0] sm:$0xff]  ;;  %v6923_v52 = vld [vmem:[%s16078_s1 + $0x100] sm:$0xff]  ;;  %vm17362_vm9 = vmmov %vm17358_vm2 }
 0xc31   : > { %v6826_v63 = vsel %vm6762_vm3, %v6730_v61, %v6794_v48  ;;  %v6857_v37 = vadd.f32 1.0, %v6825_v45  ;;  %v6924_v61 = vld [vmem:[%s16078_s1 + $0x108] sm:$0xff]  ;;  %v6925_v48 = vld [vmem:[%s16078_s1 + $0x110] sm:$0xff]  ;;  %v6927_v45 = vld [vmem:[%s16078_s1 + $0x120] sm:$0xff] }
 0xc32   : > { %v6858_v15 = vadd.f32 1.0, %v6826_v63  ;;  %v6932_v63 = vld [vmem:[%s16078_s1 + $0x148] sm:$0xff]  ;;  %vm17363_vm10 = vmmov %vm17355_vm0 }
 0xc33   : > { %v6889_v21 = vmul.f32 %v6857_v37, %v6057_v20  ;;  %v6929_v20 = vld [vmem:[%s16078_s1 + $0x130] sm:$0xff]  ;;  %v6931_v37 = vld [vmem:[%s16078_s1 + $0x140] sm:$0xff]  ;;  %vm17364_vm11 = vmmov %vm17360_vm4 }
 0xc34   : > { %v6890_v28 = vmul.f32 %v6858_v15, %v6058_v31  ;;  %v6933_v31 = vld [vmem:[%s16078_s1 + $0x150] sm:$0xff]  ;;  %v6936_v15 = vld [vmem:[%s16078_s1 + $0x168] sm:$0xff]  ;;  %vm17365_vm13 = vmmov %vm17361_vm7 }
 0xc35   : > { %vm17366_vm14 = vmmov %vm17358_vm2 }
 0xc36   : > { %v8834_v53 = vpack.c.bf16 %v6890_v28, %v6889_v21  ;;  %v6935_v21 = vld [vmem:[%s16078_s1 + $0x160] sm:$0xff]  ;;  %vm17367_vm1 = vmmov %vm17355_vm0 }
 0xc37   : > { %vm17368_vm3 = vmmov %vm17360_vm4 }
 0xc38   : > { %8835 = vmatpush1.bf16.msra.mxu0 %v8834_v53  ;;  %8907 = vmatpush1.bf16.msra.mxu1 %v8834_v53 }
 0xc3b   : > { %7020 = vmatmul.mubr.f32.vlgmr.msra.gmra.mrb[32].mxu0 %v6891_v3  ;;  %7135 = vmatmul.mubr.f32.vlgmr.msra.gmra.mrb[32].mxu1 %v6937_v47 }
 0xc3c   : > { %7024 = vmatprep.mubr.f32.mxu0 %v6894_v9  ;;  %7139 = vmatprep.mubr.f32.mxu1 %v6940_v4 }
 0xc3f   : > { %7025 = vmatmul.mubr.f32.gmra.mrb[34].mxu0 %v6893_v43  ;;  %7140 = vmatmul.mubr.f32.gmra.mrb[34].mxu1 %v6939_v18 }
 0xc40   : > { %7029 = vmatprep.mubr.f32.mxu0 %v6896_v55  ;;  %7144 = vmatprep.mubr.f32.mxu1 %v6942_v17 }
 0xc43   : > { %7030 = vmatmul.mubr.f32.gmra.mrb[36].mxu0 %v6895_v6  ;;  %7145 = vmatmul.mubr.f32.gmra.mrb[36].mxu1 %v6941_v10 }
 0xc44   : > { %7034 = vmatprep.mubr.f32.mxu0 %v6898_v56  ;;  %7149 = vmatprep.mubr.f32.mxu1 %v6944_v1 }
 0xc47   : > { %7035 = vmatmul.mubr.f32.gmra.mrb[38].mxu0 %v6897_v62  ;;  %7150 = vmatmul.mubr.f32.gmra.mrb[38].mxu1 %v6943_v25 }
 0xc48   : > { %7039 = vmatprep.mubr.f32.mxu0 %v6900_v26  ;;  %7154 = vmatprep.mubr.f32.mxu1 %v6946_v0 }
 0xc4b   : > { %7040 = vmatmul.mubr.f32.gmra.mrb[40].mxu0 %v6899_v40  ;;  %7155 = vmatmul.mubr.f32.gmra.mrb[40].mxu1 %v6945_v58 }
 0xc4c   : > { %7044 = vmatprep.mubr.f32.mxu0 %v6902_v39  ;;  %7159 = vmatprep.mubr.f32.mxu1 %v6948_v2 }
 0xc4f   : > { %7045 = vmatmul.mubr.f32.gmra.mrb[42].mxu0 %v6901_v59  ;;  %7160 = vmatmul.mubr.f32.gmra.mrb[42].mxu1 %v6947_v60 }
 0xc50   : > { %7049 = vmatprep.mubr.f32.mxu0 %v6904_v42  ;;  %7164 = vmatprep.mubr.f32.mxu1 %v6950_v34 }
 0xc53   : > { %7050 = vmatmul.mubr.f32.gmra.mrb[44].mxu0 %v6903_v44  ;;  %7165 = vmatmul.mubr.f32.gmra.mrb[44].mxu1 %v6949_v7 }
 0xc54   : > { %7054 = vmatprep.mubr.f32.mxu0 %v6906_v41  ;;  %7169 = vmatprep.mubr.f32.mxu1 %v6952_v14 }
 0xc57   : > { %7055 = vmatmul.mubr.f32.gmra.mrb[46].mxu0 %v6905_v38  ;;  %7170 = vmatmul.mubr.f32.gmra.mrb[46].mxu1 %v6951_v46 }
 0xc58   : > { %7059 = vmatprep.mubr.f32.mxu0 %v6908_v24  ;;  %7174 = vmatprep.mubr.f32.mxu1 %v6954_v36 }
 0xc5b   : > { %7060 = vmatmul.mubr.f32.gmra.mrb[48].mxu0 %v6907_v30  ;;  %7175 = vmatmul.mubr.f32.gmra.mrb[48].mxu1 %v6953_v50 }
 0xc5c   : > { %7064 = vmatprep.mubr.f32.mxu0 %v6910_v5  ;;  %v17354_v5 = vmov 0.0  }
 0xc5d   : > { %7304 = vst.msk [vmem:[#allocation4 + $0x18] sm:$0x3] %vm7301_vm5, %v17354_v5  ;;  %7302 = vst.msk [vmem:[#allocation4 + $0x8] sm:$0x3] %vm7301_vm5, %v17354_v5 }
 0xc5e   : > { %7306 = vst.msk [vmem:[#allocation4 + $0x28] sm:$0x3] %vm7301_vm5, %v17354_v5  ;;  %7308 = vst.msk [vmem:[#allocation4 + $0x38] sm:$0x3] %vm7301_vm5, %v17354_v5 }
 0xc5f   : > { %7065 = vmatmul.mubr.f32.gmra.mrb[50].mxu0 %v6909_v13  ;;  %7310 = vst.msk [vmem:[#allocation4 + $0x48] sm:$0x3] %vm7301_vm5, %v17354_v5  ;;  %7312 = vst.msk [vmem:[#allocation4 + $0x58] sm:$0x3] %vm7301_vm5, %v17354_v5 }
 0xc60   : > { %7069 = vmatprep.mubr.f32.mxu0 %v6912_v16  ;;  %7314 = vst.msk [vmem:[#allocation4 + $0x68] sm:$0x3] %vm7301_vm5, %v17354_v5  ;;  %7316 = vst.msk [vmem:[#allocation4 + $0x78] sm:$0x3] %vm7301_vm5, %v17354_v5 }
 0xc61   : > { %7318 = vst.msk [vmem:[#allocation4 + $0x88] sm:$0x3] %vm7301_vm5, %v17354_v5  ;;  %7320 = vst.msk [vmem:[#allocation4 + $0x98] sm:$0x3] %vm7301_vm5, %v17354_v5  ;;  %v7652_v5 = vld [vmem:[%s16087_s10 + $0x40] sm:$0xff] }
 0xc62   : > { %vm17369_vm5 = vmmov %vm17361_vm7 }
 0xc63   : > { %7070 = vmatmul.mubr.f32.gmra.mrb[52].mxu0 %v6911_v8 }
 0xc64   : > { %7074 = vmatprep.mubr.f32.mxu0 %v6914_v22 }
 0xc67   : > { %7075 = vmatmul.mubr.f32.gmra.mrb[54].mxu0 %v6913_v32 }
 0xc68   : > { %7079 = vmatprep.mubr.f32.mxu0 %v6916_v11 }
 0xc6b   : > { %7080 = vmatmul.mubr.f32.gmra.mrb[56].mxu0 %v6915_v12 }
 0xc6c   : > { %7084 = vmatprep.mubr.f32.mxu0 %v6918_v23 }
 0xc6f   : > { %7085 = vmatmul.mubr.f32.gmra.mrb[58].mxu0 %v6917_v35 }
 0xc70   : > { %7089 = vmatprep.mubr.f32.mxu0 %v6920_v19 }
 0xc73   : > { %7090 = vmatmul.mubr.f32.gmra.mrb[60].mxu0 %v6919_v49 }
 0xc74   : > { %7094 = vmatprep.mubr.f32.mxu0 %v6922_v54 }
 0xc77   : > { %7095 = vmatmul.mubr.f32.gmra.mrb[62].mxu0 %v6921_v29 }
 0xc78   : > { %7099 = vmatprep.mubr.f32.mxu0 %v6924_v61 }
 0xc7b   : > { %7100 = vmatmul.mubr.f32.gmra.mrb[64].mxu0 %v6923_v52 }
 0xc7c   : > { %7104 = vmatprep.mubr.f32.mxu0 %v6926_v33 }
 0xc7f   : > { %7105 = vmatmul.mubr.f32.gmra.mrb[66].mxu0 %v6925_v48 }
 0xc80   : > { %7109 = vmatprep.mubr.f32.mxu0 %v6928_v51 }
 0xc83   : > { %7110 = vmatmul.mubr.f32.gmra.mrb[68].mxu0 %v6927_v45 }
 0xc84   : > { %7114 = vmatprep.mubr.f32.mxu0 %v6930_v27 }
 0xc87   : > { %7115 = vmatmul.mubr.f32.gmra.mrb[70].mxu0 %v6929_v20 }
 0xc88   : > { %7119 = vmatprep.mubr.f32.mxu0 %v6932_v63 }
 0xc8b   : > { %7120 = vmatmul.mubr.f32.gmra.mrb[72].mxu0 %v6931_v37 }
 0xc8c   : > { %7124 = vmatprep.mubr.f32.mxu0 %v6934_v57 }
 0xc8f   : > { %7125 = vmatmul.mubr.f32.gmra.mrb[74].mxu0 %v6933_v31 }
 0xc90   : > { %7129 = vmatprep.mubr.f32.mxu0 %v6936_v15 }
 0xc93   : > { %7130 = vmatmul.mubr.f32.gmra.mrb[76].mxu0 %v6935_v21 }
 0xd0e   : > { %v15376_v28 = vpop.f32.mrb[32].mxu0  ;;  %v15378_v53 = vpop.f32.mrb[32].mxu1 }
 0xd0f   : > { %v7023_v3 = vpop.f32.mrb[33].mxu0  ;;  %v7138_v47 = vpop.f32.mrb[33].mxu1 }
 0xd10   : > { %v7660_v47 = vld [vmem:[%s16087_s10 + $0x80] sm:$0xff] }
 0xd12   : > { %v15380_v9 = vpop.f32.mrb[34].mxu0  ;;  %v7141_v4 = vpop.f32.mrb[34].mxu1 }
 0xd13   : > { %v7028_v43 = vpop.f32.mrb[35].mxu0  ;;  %7252 = vrot.lane.b32.xlu0 %v7141_v4, %s16600_s14  ;;  %v7143_v18 = vpop.f32.mrb[35].mxu1  ;;  %v7661_v4 = vld [vmem:[%s16087_s10 + $0x88] sm:$0xff] }
 0xd14   : > { %v7644_v43 = vld [vmem:[%s16087_s10] sm:$0xff]  ;;  %v8836_v18 = vpack.c.bf16 %v7661_v4, %v7660_v47 }
 0xd16   : > { %v15383_v55 = vpop.f32.mrb[36].mxu0  ;;  %v7146_v17 = vpop.f32.mrb[36].mxu1  ;;  %8837 = vmatprep.subr.bf16.mxu1 %v8836_v18  ;;  %v7675_v18 = vld [vmem:[%s16087_s10 + $0xf8] sm:$0xff] }
 0xd17   : > { %v7033_v6 = vpop.f32.mrb[37].mxu0  ;;  %v7148_v10 = vpop.f32.mrb[37].mxu1  ;;  %7254 = vrot.lane.b32.xlu1 %v7146_v17, %s16600_s14  ;;  %v7662_v17 = vld [vmem:[%s16087_s10 + $0x90] sm:$0xff] }
 0xd18   : > { %v7663_v6 = vld [vmem:[%s16087_s10 + $0x98] sm:$0xff] }
 0xd1a   : > { %v15386_v56 = vpop.f32.mrb[38].mxu0  ;;  %v7151_v1 = vpop.f32.mrb[38].mxu1 }
 0xd1b   : > { %v7038_v62 = vpop.f32.mrb[39].mxu0  ;;  %7256 = vrot.lane.b32.xlu0 %v7151_v1, %s16600_s14  ;;  %v7153_v25 = vpop.f32.mrb[39].mxu1  ;;  %v8840_v1 = vpack.c.bf16 %v7663_v6, %v7662_v17  ;;  %v7659_v17 = vld [vmem:[%s16087_s10 + $0x78] sm:$0xff] }
 0xd1c   : > { %v7646_v62 = vld [vmem:[%s16087_s10 + $0x10] sm:$0xff]  ;;  %v7647_v25 = vld [vmem:[%s16087_s10 + $0x18] sm:$0xff] }
 0xd1e   : > { %v15389_v26 = vpop.f32.mrb[40].mxu0  ;;  %v7156_v0 = vpop.f32.mrb[40].mxu1 }
 0xd1f   : > { %v7043_v40 = vpop.f32.mrb[41].mxu0  ;;  %7258 = vrot.lane.b32.xlu1 %v7156_v0, %s16600_s14  ;;  %v7158_v58 = vpop.f32.mrb[41].mxu1  ;;  %v7664_v0 = vld [vmem:[%s16087_s10 + $0xa0] sm:$0xff] }
 0xd20   : > { %v7665_v40 = vld [vmem:[%s16087_s10 + $0xa8] sm:$0xff]  ;;  %v8842_v58 = vpack.c.bf16 %v7647_v25, %v7646_v62 }
 0xd21   : > { %v7338_v62 = vld [vmem:[#allocation4 + $0x1] sm:$0xff] }
 0xd22   : > { %v15392_v39 = vpop.f32.mrb[42].mxu0  ;;  %v7161_v2 = vpop.f32.mrb[42].mxu1 }
 0xd23   : > { %v7048_v59 = vpop.f32.mrb[43].mxu0  ;;  %v7163_v60 = vpop.f32.mrb[43].mxu1 }
 0xd24   : > { %v7648_v59 = vld [vmem:[%s16087_s10 + $0x20] sm:$0xff]  ;;  %v7649_v60 = vld [vmem:[%s16087_s10 + $0x28] sm:$0xff] }
 0xd26   : > { %v15394_v42 = vpop.f32.mrb[44].mxu0  ;;  %v7166_v34 = vpop.f32.mrb[44].mxu1 }
 0xd27   : > { %v7053_v44 = vpop.f32.mrb[45].mxu0  ;;  %v7168_v7 = vpop.f32.mrb[45].mxu1 }
 0xd28   : > { %v7667_v44 = vld [vmem:[%s16087_s10 + $0xb8] sm:$0xff]  ;;  %v8846_v7 = vpack.c.bf16 %v7649_v60, %v7648_v59 }
 0xd2a   : > { %v15396_v41 = vpop.f32.mrb[46].mxu0  ;;  %v7171_v14 = vpop.f32.mrb[46].mxu1 }
 0xd2b   : > { %v7058_v38 = vpop.f32.mrb[47].mxu0  ;;  %v7173_v46 = vpop.f32.mrb[47].mxu1 }
 0xd2c   : > { %v7650_v38 = vld [vmem:[%s16087_s10 + $0x30] sm:$0xff]  ;;  %v7651_v46 = vld [vmem:[%s16087_s10 + $0x38] sm:$0xff] }
 0xd2e   : > { %v7061_v24 = vpop.f32.mrb[48].mxu0  ;;  %v7176_v36 = vpop.f32.mrb[48].mxu1 }
 0xd2f   : > { %7188 = vrot.lane.b32.xlu0 %v7061_v24, %s16406_s25  ;;  %v7063_v30 = vpop.f32.mrb[49].mxu0  ;;  %v7178_v50 = vpop.f32.mrb[49].mxu1  ;;  %v7668_v24 = vld [vmem:[%s16087_s10 + $0xc0] sm:$0xff] }
 0xd30   : > { %v8850_v30 = vpack.c.bf16 %v7651_v46, %v7650_v38 }
 0xd32   : > { %v7066_v13 = vpop.f32.mrb[50].mxu0 }
 0xd33   : > { %7190 = vrot.lane.b32.xlu1 %v7066_v13, %s16406_s25  ;;  %v7068_v16 = vpop.f32.mrb[51].mxu0  ;;  %v7653_v13 = vld [vmem:[%s16087_s10 + $0x48] sm:$0xff] }
 0xd34   : > { %v7670_v16 = vld [vmem:[%s16087_s10 + $0xd0] sm:$0xff] }
 0xd36   : > { %v7071_v8 = vpop.f32.mrb[52].mxu0 }
 0xd37   : > { %7192 = vrot.lane.b32.xlu0 %v7071_v8, %s16406_s25  ;;  %v7073_v22 = vpop.f32.mrb[53].mxu0  ;;  %v7671_v8 = vld [vmem:[%s16087_s10 + $0xd8] sm:$0xff] }
 0xd38   : > { %v8854_v22 = vpack.c.bf16 %v7653_v13, %v7652_v5 }
 0xd3a   : > { %v7076_v32 = vpop.f32.mrb[54].mxu0 }
 0xd3b   : > { %7194 = vrot.lane.b32.xlu1 %v7076_v32, %s16406_s25  ;;  %v7078_v11 = vpop.f32.mrb[55].mxu0  ;;  %v8856_v32 = vpack.c.bf16 %v7671_v8, %v7670_v16 }
 0xd3c   : > { %v7654_v11 = vld [vmem:[%s16087_s10 + $0x50] sm:$0xff] }
 0xd3e   : > { %v7081_v12 = vpop.f32.mrb[56].mxu0 }
 0xd3f   : > { %v7083_v23 = vpop.f32.mrb[57].mxu0 }
 0xd42   : > { %v7086_v35 = vpop.f32.mrb[58].mxu0 }
 0xd43   : > { %v7088_v19 = vpop.f32.mrb[59].mxu0 }
 0xd46   : > { %v7091_v49 = vpop.f32.mrb[60].mxu0 }
 0xd47   : > { %v7093_v54 = vpop.f32.mrb[61].mxu0 }
 0xd4a   : > { %v7096_v29 = vpop.f32.mrb[62].mxu0 }
 0xd4b   : > { %v7098_v61 = vpop.f32.mrb[63].mxu0 }
 0xd4e   : > { %v7101_v52 = vpop.f32.mrb[64].mxu0 }
 0xd4f   : > { %7220 = vrot.lane.b32.xlu0 %v7101_v52, %s16403_s27  ;;  %v7103_v33 = vpop.f32.mrb[65].mxu0 }
 0xd52   : > { %v7106_v48 = vpop.f32.mrb[66].mxu0 }
 0xd53   : > { %7196 = vrot.lane.b32.xlu0 %v7081_v12, %s16406_s25  ;;  %7222 = vrot.lane.b32.xlu1 %v7106_v48, %s16403_s27  ;;  %v7108_v51 = vpop.f32.mrb[67].mxu0  ;;  %v7655_v12 = vld [vmem:[%s16087_s10 + $0x58] sm:$0xff] }
 0xd54   : > { %v8858_v23 = vpack.c.bf16 %v7655_v12, %v7654_v11 }
 0xd56   : > { %v7111_v45 = vpop.f32.mrb[68].mxu0 }
 0xd57   : > { %7260 = vrot.lane.b32.xlu0 %v7161_v2, %s16600_s14  ;;  %7224 = vrot.lane.b32.xlu1 %v7111_v45, %s16403_s27  ;;  %v7113_v27 = vpop.f32.mrb[69].mxu0  ;;  %v8844_v2 = vpack.c.bf16 %v7665_v40, %v7664_v0 }
 0xd5a   : > { %v7116_v20 = vpop.f32.mrb[70].mxu0 }
 0xd5b   : > { %7198 = vrot.lane.b32.xlu1 %v7086_v35, %s16406_s25  ;;  %7226 = vrot.lane.b32.xlu0 %v7116_v20, %s16403_s27  ;;  %v7118_v63 = vpop.f32.mrb[71].mxu0  ;;  %v7672_v20 = vld [vmem:[%s16087_s10 + $0xe0] sm:$0xff] }
 0xd5c   : > { %v7673_v63 = vld [vmem:[%s16087_s10 + $0xe8] sm:$0xff] }
 0xd5e   : > { %v7121_v37 = vpop.f32.mrb[72].mxu0 }
 0xd5f   : > { %7200 = vrot.lane.b32.xlu0 %v7091_v49, %s16406_s25  ;;  %7228 = vrot.lane.b32.xlu1 %v7121_v37, %s16403_s27  ;;  %v7123_v57 = vpop.f32.mrb[73].mxu0  ;;  %v7656_v37 = vld [vmem:[%s16087_s10 + $0x60] sm:$0xff] }
 0xd60   : > { %v7657_v57 = vld [vmem:[%s16087_s10 + $0x68] sm:$0xff] }
 0xd62   : > { %v7126_v31 = vpop.f32.mrb[74].mxu0 }
 0xd63   : > { %7262 = vrot.lane.b32.xlu1 %v7166_v34, %s16600_s14  ;;  %7230 = vrot.lane.b32.xlu0 %v7126_v31, %s16403_s27  ;;  %v7128_v15 = vpop.f32.mrb[75].mxu0  ;;  %v7666_v34 = vld [vmem:[%s16087_s10 + $0xb0] sm:$0xff] }
 0xd66   : > { %v7131_v21 = vpop.f32.mrb[76].mxu0 }
 0xd67   : > { %7264 = vrot.lane.b32.xlu0 %v7171_v14, %s16600_s14  ;;  %7232 = vrot.lane.b32.xlu1 %v7131_v21, %s16403_s27  ;;  %v7133_v3 = vpop.f32.mrb[77].mxu0  ;;  %v8848_v14 = vpack.c.bf16 %v7667_v44, %v7666_v34 }
 0xd68   : > { %v8862_v3 = vpack.c.bf16 %v7657_v57, %v7656_v37 }
 0xd6b   : > { %7234 = vrot.lane.b32.xlu0 %v15378_v53, %s16403_s27  ;;  %7202 = vrot.lane.b32.xlu1 %v7096_v29, %s16406_s25  ;;  %v7645_v53 = vld [vmem:[%s16087_s10 + $0x8] sm:$0xff] }
 0xd6c   : > { %v8838_v10 = vpack.c.bf16 %v7645_v53, %v7644_v43  ;;  %v7674_v43 = vld [vmem:[%s16087_s10 + $0xf0] sm:$0xff] }
 0xd6d   : > { %v8864_v53 = vpack.c.bf16 %v7675_v18, %v7674_v43 }
 0xd6e   : > { %8839 = vmatpush3.bf16.msra.mxu1 %v8838_v10 }
 0xd6f   : > { %7266 = vrot.lane.b32.xlu1 %v7176_v36, %s16600_s14  ;;  %8841 = vmatprep.subr.bf16.mxu1 %v8840_v1  ;;  %v7669_v36 = vld [vmem:[%s16087_s10 + $0xc8] sm:$0xff] }
 0xd70   : > { %v8852_v50 = vpack.c.bf16 %v7669_v36, %v7668_v24 }
 0xd72   : > { %8843 = vmatpush3.bf16.msra.mxu1 %v8842_v58 }
 0xd73   : > { %8845 = vmatprep.subr.bf16.mxu1 %v8844_v2 }
 0xd76   : > { %8847 = vmatpush3.bf16.msra.mxu1 %v8846_v7 }
 0xd77   : > { %8849 = vmatprep.subr.bf16.mxu1 %v8848_v14 }
 0xd7a   : > { %8851 = vmatpush3.bf16.msra.mxu1 %v8850_v30 }
 0xd7b   : > { %8853 = vmatprep.subr.bf16.mxu1 %v8852_v50 }
 0xd7e   : > { %8855 = vmatpush3.bf16.msra.mxu1 %v8854_v22 }
 0xd7f   : > { %8857 = vmatprep.subr.bf16.mxu1 %v8856_v32 }
 0xd82   : > { %8859 = vmatpush3.bf16.msra.mxu1 %v8858_v23 }
 0xd85   : > { %v7253_v35 = vpop.permute.xlu0 %7252 }
 0xd89   : > { %v7255_v19 = vpop.permute.xlu1 %7254 }
 0xd8d   : > { %v7257_v49 = vpop.permute.xlu0 %7256 }
 0xd91   : > { %v7259_v54 = vpop.permute.xlu1 %7258 }
 0xda1   : > { %v7189_v29 = vpop.permute.xlu0 %7188 }
 0xda2   : > { %v7276_v33 = vsel %vm17355_vm0, %v15376_v28, %v7189_v29  ;;  %v8860_v28 = vpack.c.bf16 %v7673_v63, %v7672_v20  ;;  %vm17370_vm0 = vmmov %vm17358_vm2 }
 0xda4   : > { %8861 = vmatprep.subr.bf16.mxu1 %v8860_v28 }
 0xda5   : > { %v7191_v61 = vpop.permute.xlu1 %7190  ;;  %8863 = vmatpush3.bf16.msra.mxu1 %v8862_v3 }
 0xda6   : > { %v7277_v31 = vsel %vm17359_vm6, %v15380_v9, %v7191_v61  ;;  %v7658_v9 = vld [vmem:[%s16087_s10 + $0x70] sm:$0xff]  ;;  %8865 = vmatprep.subr.bf16.mxu1 %v8864_v53  ;;  %vm17375_vm6 = vmmov %vm17370_vm0 }
 0xda7   : > { %v8866_v25 = vpack.c.bf16 %v7659_v17, %v7658_v9 }
 0xda9   : > { %v7193_v52 = vpop.permute.xlu0 %7192  ;;  %8867 = vmatpush3.bf16.msra.mxu1 %v8866_v25 }
 0xdaa   : > { %v7278_v6 = vsel %vm17363_vm10, %v15383_v55, %v7193_v52  ;;  %v7346_v55 = vld [vmem:[#allocation4 + $0x2] sm:$0xff]  ;;  %vm17379_vm10 = vmmov %vm17370_vm0 }
 0xdad   : > { %v7195_v48 = vpop.permute.xlu1 %7194 }
 0xdae   : > { %v7279_v59 = vsel %vm17367_vm1, %v15386_v56, %v7195_v48 }
 0xdc1   : > { %v7221_v51 = vpop.permute.xlu0 %7220 }
 0xdc2   : > { %v7284_v45 = vsel %vm17356_vm12, %v7276_v33, %v7221_v51  ;;  %vm17371_vm12 = vmmov %vm17367_vm1 }
 0xdc3   : > { %v7292_v27 = vsel %vm17357_vm15, %v7284_v45, %v7253_v35  ;;  %vm17372_vm15 = vmmov %vm17368_vm3  ;;  %v7676_v45 = vld [vmem:[%s16087_s10 + $0x100] sm:$0xff] }
 0xdc4   : > { %7322 = vst.msk [vmem:[#allocation4 + $0x11] sm:$0xff] %vm17358_vm2, %v7292_v27  ;;  %vm17374_vm2 = vmmov %vm17369_vm5  ;;  %v7677_v27 = vld [vmem:[%s16087_s10 + $0x108] sm:$0xff] }
 0xdc5   : > { %v7197_v15 = vpop.permute.xlu0 %7196  ;;  %v7223_v21 = vpop.permute.xlu1 %7222  ;;  %v15601_v63 = vpack.c.bf16 %v7677_v27, %v7676_v45  ;;  %v7679_v45 = vld [vmem:[%s16087_s10 + $0x118] sm:$0xff] }
 0xdc6   : > { %v7285_v47 = vsel %vm17360_vm4, %v7277_v31, %v7223_v21  ;;  %v7280_v36 = vsel %vm17371_vm12, %v15389_v26, %v7197_v15  ;;  %vm17376_vm4 = vmmov %vm17367_vm1 }
 0xdc7   : > { %v7293_v4 = vsel %vm17361_vm7, %v7285_v47, %v7255_v19  ;;  %vm17377_vm7 = vmmov %vm17368_vm3  ;;  %8869 = vmatprep.subr.bf16.mxu1 %v15601_v63 }
 0xdc8   : > { %7323 = vst.msk [vmem:[#allocation4 + $0x21] sm:$0xff] %vm17362_vm9, %v7293_v4  ;;  %vm17378_vm9 = vmmov %vm17374_vm2 }
 0xdc9   : > { %v7261_v10 = vpop.permute.xlu0 %7260  ;;  %v7225_v1 = vpop.permute.xlu1 %7224 }
 0xdca   : > { %v7286_v0 = vsel %vm17364_vm11, %v7278_v6, %v7225_v1  ;;  %vm17380_vm11 = vmmov %vm17367_vm1 }
 0xdcb   : > { %v7294_v40 = vsel %vm17365_vm13, %v7286_v0, %v7257_v49  ;;  %v7370_v58 = vld [vmem:[#allocation4 + $0x12] sm:$0xff]  ;;  %vm17381_vm13 = vmmov %vm17368_vm3 }
 0xdcc   : > { %7324 = vst.msk [vmem:[#allocation4 + $0x31] sm:$0xff] %vm17366_vm14, %v7294_v40  ;;  %v9001_v2 = vpack.i.bf16 %v7338_v62, %v7370_v58  ;;  %v15545_v14 = vld [vmem:[#allocation4 + $0x10] sm:$0xff]  ;;  %vm17382_vm14 = vmmov %vm17374_vm2 }
 0xdcd   : > { %v7199_v60 = vpop.permute.xlu1 %7198  ;;  %v7227_v34 = vpop.permute.xlu0 %7226  ;;  %v15565_v22 = vld [vmem:[#allocation4 + $0x11] sm:$0xff]  ;;  %vm17383_vm1 = vmmov %vm17370_vm0 }
 0xdce   : > { %v7287_v44 = vsel %vm17368_vm3, %v7279_v59, %v7227_v34  ;;  %9002 = vrot.lane.b32.xlu0 %v9001_v2, %s16605_s29  ;;  %v7281_v11 = vsel %vm17376_vm4, %v15392_v39, %v7199_v60  ;;  %vm17384_vm3 = vmmov %vm17376_vm4 }
 0xdcf   : > { %v7295_v7 = vsel %vm17369_vm5, %v7287_v44, %v7259_v54  ;;  %v15547_v38 = vld [vmem:[#allocation4 + $0x21] sm:$0xff]  ;;  %vm17385_vm5 = vmmov %vm17377_vm7 }
 0xdd0   : > { %v15549_v46 = vld [vmem:[#allocation4 + $0x20] sm:$0xff]  ;;  %7325 = vst.msk [vmem:[#allocation4 + $0x41] sm:$0xff] %vm17370_vm0, %v7295_v7  ;;  %v9011_v56 = vpack.i.bf16 %v15545_v14, %v15547_v38  ;;  %vm17386_vm0 = vmmov %vm17374_vm2 }
 0xdd1   : > { %v9006_v24 = vpack.i.bf16 %v7346_v55, %v15549_v46  ;;  %v7201_v30 = vpop.permute.xlu0 %7200  ;;  %v7229_v50 = vpop.permute.xlu1 %7228  ;;  %v15557_v5 = vld [vmem:[#allocation4 + $0x22] sm:$0xff]  ;;  %vm17387_vm12 = vmmov %vm17383_vm1 }
 0xdd2   : > { %v7288_v13 = vsel %vm17372_vm15, %v7280_v36, %v7229_v50  ;;  %9012 = vrot.lane.b32.xlu0 %v9011_v56, %s9501_s16  ;;  %v9016_v32 = vpack.i.bf16 %v15565_v22, %v15557_v5  ;;  %v7282_v52 = vsel %vm17380_vm11, %v15394_v42, %v7201_v30  ;;  %v7386_v36 = vld [vmem:[#allocation4 + $0x90] sm:$0xff]  ;;  %vm7611_vm15 = vcmask 785408   ;;  %vm17390_vm4 = vmmov %vm17383_vm1 }
 0xdd3   : > { %9007 = vrot.lane.b32.xlu1 %v9006_v24, %s17373_s20  ;;  %v7296_v16 = vsel %vm17374_vm2, %v7288_v13, %v7261_v10  ;;  %v15563_v8 = vld [vmem:[#allocation4 + $0x30] sm:$0xff]  ;;  %vm17388_vm2 = vmmov %vm17383_vm1 }
 0xdd4   : > { %7326 = vst.msk [vmem:[#allocation4 + $0x51] sm:$0xff] %vm17375_vm6, %v7296_v16  ;;  %v9021_v26 = vpack.i.bf16 %v7370_v58, %v15563_v8  ;;  %v15573_v35 = vld [vmem:[#allocation4 + $0x32] sm:$0xff]  ;;  %vm17389_vm6 = vmmov %vm17383_vm1 }
 0xdd5   : > { %v7263_v12 = vpop.permute.xlu1 %7262  ;;  %v7231_v23 = vpop.permute.xlu0 %7230  ;;  %v15575_v19 = vld [vmem:[#allocation4 + $0x31] sm:$0xff]  ;;  %v9031_v29 = vpack.i.bf16 %v15547_v38, %v15573_v35  ;;  %vm17394_vm11 = vmmov %vm17383_vm1 }
 0xdd6   : > { %v7289_v49 = vsel %vm17377_vm7, %v7281_v11, %v7231_v23  ;;  %9022 = vrot.lane.b32.xlu0 %v9021_v26, %s17373_s20  ;;  %v9026_v39 = vpack.i.bf16 %v15549_v46, %v15575_v19  ;;  %v7394_v16 = vld [vmem:[#allocation4 + $0x91] sm:$0xff]  ;;  %v7330_v23 = vld [vmem:[#allocation4] sm:$0xff]  ;;  %vm17391_vm7 = vmmov %vm17383_vm1 }
 0xdd7   : > { %9017 = vrot.lane.b32.xlu1 %v9016_v32, %s16605_s29  ;;  %v7297_v54 = vsel %vm17378_vm9, %v7289_v49, %v7263_v12  ;;  %v15586_v61 = vld [vmem:[#allocation4 + $0x41] sm:$0xff]  ;;  %vm17392_vm9 = vmmov %vm17383_vm1 }
 0xdd8   : > { %7327 = vst.msk [vmem:[#allocation4 + $0x61] sm:$0xff] %vm17379_vm10, %v7297_v54  ;;  %v15590_v51 = vld [vmem:[#allocation4 + $0x40] sm:$0xff]  ;;  %v9041_v37 = vpack.i.bf16 %v15563_v8, %v15586_v61  ;;  %vm17393_vm10 = vmmov %vm17383_vm1 }
 0xdd9   : > { %v7265_v33 = vpop.permute.xlu0 %7264  ;;  %v7233_v48 = vpop.permute.xlu1 %7232  ;;  %v9036_v28 = vpack.i.bf16 %v15557_v5, %v15590_v51  ;;  %v15612_v15 = vld [vmem:[#allocation4 + $0x42] sm:$0xff] }
 0xdda   : > { %v7290_v20 = vsel %vm17381_vm13, %v7282_v52, %v7233_v48  ;;  %9032 = vrot.lane.b32.xlu0 %v9031_v29, %s16605_s29  ;;  %v9046_v4 = vpack.i.bf16 %v15575_v19, %v15612_v15  ;;  %v7678_v48 = vld [vmem:[%s16087_s10 + $0x110] sm:$0xff]  ;;  %vm17395_vm13 = vmmov %vm17383_vm1 }
 0xddb   : > { %9027 = vrot.lane.b32.xlu1 %v9026_v39, %s9501_s16  ;;  %v7298_v42 = vsel %vm17382_vm14, %v7290_v20, %v7265_v33  ;;  %v15610_v31 = vld [vmem:[#allocation4 + $0x50] sm:$0xff]  ;;  %vm17396_vm14 = vmmov %vm17383_vm1 }
 0xddc   : > { %7328 = vst.msk [vmem:[#allocation4 + $0x71] sm:$0xff] %vm17383_vm1, %v7298_v42  ;;  %v9051_v47 = vpack.i.bf16 %v15573_v35, %v15610_v31  ;;  %v15623_v9 = vld [vmem:[#allocation4 + $0x52] sm:$0xff] }
 0xddd   : > { %v7203_v57 = vpop.permute.xlu1 %7202  ;;  %v7235_v21 = vpop.permute.xlu0 %7234  ;;  %v15625_v53 = vld [vmem:[#allocation4 + $0x51] sm:$0xff] }
 0xdde   : > { %v7283_v3 = vsel %vm17384_vm3, %v15396_v41, %v7203_v57  ;;  %9042 = vrot.lane.b32.xlu0 %v9041_v37, %s9501_s16  ;;  %v9061_v41 = vpack.i.bf16 %v15586_v61, %v15623_v9  ;;  %v9056_v6 = vpack.i.bf16 %v15590_v51, %v15625_v53  ;;  %vm17397_vm3 = vmmov %vm17383_vm1 }
 0xddf   : > { %9037 = vrot.lane.b32.xlu1 %v9036_v28, %s17373_s20  ;;  %v7291_v43 = vsel %vm17385_vm5, %v7283_v3, %v7235_v21  ;;  %v15635_v10 = vld [vmem:[#allocation4 + $0x61] sm:$0xff]  ;;  %vm17398_vm5 = vmmov %vm17383_vm1 }
 0xde0   : > { %v15637_v1 = vld [vmem:[#allocation4 + $0x60] sm:$0xff]  ;;  %v9071_v62 = vpack.i.bf16 %v15610_v31, %v15635_v10 }
 0xde1   : > { %v7267_v18 = vpop.permute.xlu1 %7266  ;;  %v9066_v25 = vpack.i.bf16 %v15612_v15, %v15637_v1  ;;  %v15645_v0 = vld [vmem:[#allocation4 + $0x62] sm:$0xff] }
 0xde2   : > { %v7299_v17 = vsel %vm17386_vm0, %v7291_v43, %v7267_v18  ;;  %9052 = vrot.lane.b32.xlu0 %v9051_v47, %s17373_s20  ;;  %v9076_v58 = vpack.i.bf16 %v15625_v53, %v15645_v0  ;;  %v8872_v47 = vpack.c.bf16 %v7679_v45, %v7678_v48  ;;  %vm17399_vm0 = vmmov %vm17383_vm1 }
 0xde3   : > { %9047 = vrot.lane.b32.xlu1 %v9046_v4, %s16605_s29  ;;  %7329 = vst.msk [vmem:[#allocation4 + $0x81] sm:$0xff] %vm17387_vm12, %v7299_v17  ;;  %v15647_v40 = vld [vmem:[#allocation4 + $0x70] sm:$0xff]  ;;  %vm17400_vm12 = vmmov %vm17399_vm0 }
 0xde4   : > { %v9086_v2 = vpack.i.bf16 %v15623_v9, %v15647_v40  ;;  %v15655_v59 = vld [vmem:[#allocation4 + $0x72] sm:$0xff] }
 0xde5   : > { %v9096_v34 = vpack.i.bf16 %v15635_v10, %v15655_v59  ;;  %v15664_v7 = vld [vmem:[#allocation4 + $0x71] sm:$0xff]  ;;  %v9111_v50 = vpack.i.bf16 %v15655_v59, %v7386_v36 }
 0xde6   : > { %9062 = vrot.lane.b32.xlu0 %v9061_v41, %s16605_s29  ;;  %v9091_v24 = vpack.i.bf16 %v15637_v1, %v15664_v7 }
 0xde7   : > { %9057 = vrot.lane.b32.xlu1 %v9056_v6, %s9501_s16 }
 0xdea   : > { %9072 = vrot.lane.b32.xlu0 %v9071_v62, %s9501_s16  ;;  %v7385_v60 = vld [vmem:[#allocation4 + $0x80] sm:$0xff] }
 0xdeb   : > { %9067 = vrot.lane.b32.xlu1 %v9066_v25, %s17373_s20  ;;  %v9081_v55 = vpack.i.bf16 %v15645_v0, %v7385_v60  ;;  %v15662_v44 = vld [vmem:[#allocation4 + $0x81] sm:$0xff]  ;;  %v9116_v26 = vpack.i.bf16 %v7385_v60, %v7394_v16 }
 0xdec   : > { %v9101_v56 = vpack.i.bf16 %v15647_v40, %v15662_v44  ;;  %v15672_v30 = vld [vmem:[#allocation4 + $0x82] sm:$0xff] }
 0xded   : > { %v9106_v13 = vpack.i.bf16 %v15664_v7, %v15672_v30 }
 0xdee   : > { %9087 = vrot.lane.b32.xlu0 %v9086_v2, %s17373_s20 }
 0xdef   : > { %9077 = vrot.lane.b32.xlu1 %v9076_v58, %s16605_s29 }
 0xdf2   : > { %9097 = vrot.lane.b32.xlu0 %v9096_v34, %s16605_s29 }
 0xdf3   : > { %9082 = vrot.lane.b32.xlu1 %v9081_v55, %s17373_s20 }
 0xdf6   : > { %9102 = vrot.lane.b32.xlu0 %v9101_v56, %s9501_s16 }
 0xdf7   : > { %9092 = vrot.lane.b32.xlu1 %v9091_v24, %s9501_s16 }
 0xdfa   : > { %9112 = vrot.lane.b32.xlu0 %v9111_v50, %s17373_s20 }
 0xdfb   : > { %9107 = vrot.lane.b32.xlu1 %v9106_v13, %s16605_s29 }
 0xdff   : > { %9117 = vrot.lane.b32.xlu1 %v9116_v26, %s9501_s16 }
 0xe40   : > { %v9003_v32 = vpop.permute.xlu0 %9002 }
 0xe41   : > { %v9005_v11 = vunpack.i.h.bf16 %v9003_v32  ;;  %v9004_v12 = vunpack.i.l.bf16 %v9003_v32 }
 0xe43   : > { %v7595_v27 = vsel %vm17388_vm2, %v7330_v23, %v9005_v11  ;;  %v7620_v20 = vsel %vm17389_vm6, %v15565_v22, %v9004_v12  ;;  %vm17401_vm2 = vmmov %vm17399_vm0 }
 0xe44   : > { %v9013_v49 = vpop.permute.xlu0 %9012  ;;  %vm17402_vm6 = vmmov %vm17399_vm0 }
 0xe45   : > { %v9008_v54 = vpop.permute.xlu1 %9007  ;;  %v9015_v29 = vunpack.i.h.bf16 %v9013_v49  ;;  %v9014_v39 = vunpack.i.l.bf16 %v9013_v49 }
 0xe46   : > { %v9010_v52 = vunpack.i.h.bf16 %v9008_v54  ;;  %v9009_v33 = vunpack.i.l.bf16 %v9008_v54 }
 0xe48   : > { %v7603_v42 = vsel %vm5325_vm8, %v7595_v27, %v9010_v52  ;;  %v7628_v37 = vsel %vm5325_vm8, %v7620_v20, %v9009_v33  ;;  %v9023_v28 = vpop.permute.xlu0 %9022 }
 0xe49   : > { %v9018_v57 = vpop.permute.xlu1 %9017  ;;  %v7636_v21 = vsel %vm7611_vm15, %v7628_v37, %v9014_v39  ;;  %v7612_v3 = vsel %vm7611_vm15, %v7603_v42, %v9015_v29  ;;  %v9025_v18 = vunpack.i.h.bf16 %v9023_v28  ;;  %v9024_v17 = vunpack.i.l.bf16 %v9023_v28 }
 0xe4a   : > { %v9020_v4 = vunpack.i.h.bf16 %v9018_v57  ;;  %v9019_v43 = vunpack.i.l.bf16 %v9018_v57  ;;  %7775 = vmatprep.mubr.f32.mxu1 %v7636_v21 }
 0xe4b   : > { %7776 = vmatmul.mubr.f32.vlgmr.msra.gmra.mrb[50].mxu1 %v7612_v3 }
 0xe4c   : > { %v7621_v22 = vsel %vm17390_vm4, %v15547_v38, %v9019_v43  ;;  %v7596_v41 = vsel %vm17391_vm7, %v15545_v14, %v9020_v4  ;;  %8871 = vmatpush3.bf16.msra.mxu1 %v15601_v63  ;;  %v9033_v6 = vpop.permute.xlu0 %9032  ;;  %vm17403_vm4 = vmmov %vm17399_vm0 }
 0xe4d   : > { %v9028_v62 = vpop.permute.xlu1 %9027  ;;  %8873 = vmatprep.subr.bf16.mxu1 %v8872_v47  ;;  %v9035_v2 = vunpack.i.h.bf16 %v9033_v6  ;;  %v9034_v60 = vunpack.i.l.bf16 %v9033_v6  ;;  %v7629_v34 = vsel %vm5325_vm8, %v7621_v22, %v9024_v17  ;;  %v7604_v55 = vsel %vm5325_vm8, %v7596_v41, %v9025_v18  ;;  %vm17404_vm7 = vmmov %vm17399_vm0 }
 0xe4e   : > { %v9030_v25 = vunpack.i.h.bf16 %v9028_v62  ;;  %v9029_v58 = vunpack.i.l.bf16 %v9028_v62 }
 0xe4f   : > { %v7622_v16 = vsel %vm17392_vm9, %v15575_v19, %v9034_v60  ;;  %v7597_v26 = vsel %vm17393_vm10, %v15549_v46, %v9035_v2  ;;  %vm17405_vm9 = vmmov %vm17399_vm0 }
 0xe50   : > { %v7637_v56 = vsel %vm7611_vm15, %v7629_v34, %v9029_v58  ;;  %v7613_v38 = vsel %vm7611_vm15, %v7604_v55, %v9030_v25  ;;  %8875 = vmatpush3.bf16.msra.mxu1 %v8872_v47  ;;  %v9043_v24 = vpop.permute.xlu0 %9042  ;;  %vm17406_vm10 = vmmov %vm17399_vm0 }
 0xe51   : > { %v9038_v14 = vpop.permute.xlu1 %9037  ;;  %7780 = vmatprep.mubr.f32.mxu1 %v7637_v56  ;;  %v9045_v63 = vunpack.i.h.bf16 %v9043_v24  ;;  %v9044_v36 = vunpack.i.l.bf16 %v9043_v24 }
 0xe52   : > { %v9040_v50 = vunpack.i.h.bf16 %v9038_v14  ;;  %v9039_v13 = vunpack.i.l.bf16 %v9038_v14  ;;  %7781 = vmatmul.mubr.f32.gmra.mrb[52].mxu1 %v7613_v38 }
 0xe54   : > { %v7630_v32 = vsel %vm5325_vm8, %v7622_v16, %v9039_v13  ;;  %v7605_v11 = vsel %vm5325_vm8, %v7597_v26, %v9040_v50  ;;  %v9053_v12 = vpop.permute.xlu0 %9052 }
 0xe55   : > { %v9048_v23 = vpop.permute.xlu1 %9047  ;;  %v7638_v49 = vsel %vm7611_vm15, %v7630_v32, %v9044_v36  ;;  %v7614_v54 = vsel %vm7611_vm15, %v7605_v11, %v9045_v63  ;;  %v9055_v52 = vunpack.i.h.bf16 %v9053_v12  ;;  %v9054_v33 = vunpack.i.l.bf16 %v9053_v12 }
 0xe56   : > { %v9050_v29 = vunpack.i.h.bf16 %v9048_v23  ;;  %v9049_v39 = vunpack.i.l.bf16 %v9048_v23  ;;  %7785 = vmatprep.mubr.f32.mxu1 %v7638_v49 }
 0xe57   : > { %7786 = vmatmul.mubr.f32.gmra.mrb[54].mxu1 %v7614_v54 }
 0xe58   : > { %v7623_v19 = vsel %vm17394_vm11, %v15586_v61, %v9049_v39  ;;  %v7598_v46 = vsel %vm17395_vm13, %v15563_v8, %v9050_v29  ;;  %v9063_v48 = vpop.permute.xlu0 %9062  ;;  %vm17408_vm11 = vmmov %vm17399_vm0 }
 0xe59   : > { %v9058_v45 = vpop.permute.xlu1 %9057  ;;  %v9065_v42 = vunpack.i.h.bf16 %v9063_v48  ;;  %v9064_v37 = vunpack.i.l.bf16 %v9063_v48  ;;  %v7631_v28 = vsel %vm5325_vm8, %v7623_v19, %v9054_v33  ;;  %v7606_v57 = vsel %vm5325_vm8, %v7598_v46, %v9055_v52  ;;  %vm17410_vm13 = vmmov %vm17399_vm0 }
 0xe5a   : > { %v9060_v27 = vunpack.i.h.bf16 %v9058_v45  ;;  %v9059_v20 = vunpack.i.l.bf16 %v9058_v45 }
 0xe5b   : > { %v7624_v17 = vsel %vm17396_vm14, %v15625_v53, %v9064_v37  ;;  %v7599_v22 = vsel %vm17383_vm1, %v15590_v51, %v9065_v42  ;;  %vm17411_vm14 = vcmask 64512  }
 0xe5c   : > { %v7639_v21 = vsel %vm7611_vm15, %v7631_v28, %v9059_v20  ;;  %v7615_v3 = vsel %vm7611_vm15, %v7606_v57, %v9060_v27  ;;  %v9073_v47 = vpop.permute.xlu0 %9072  ;;  %vm17412_vm1 = vmmov %vm17411_vm14 }
 0xe5d   : > { %v9068_v4 = vpop.permute.xlu1 %9067  ;;  %7790 = vmatprep.mubr.f32.mxu1 %v7639_v21  ;;  %v9075_v61 = vunpack.i.h.bf16 %v9073_v47  ;;  %v9074_v43 = vunpack.i.l.bf16 %v9073_v47 }
 0xe5e   : > { %v9070_v8 = vunpack.i.h.bf16 %v9068_v4  ;;  %v9069_v18 = vunpack.i.l.bf16 %v9068_v4  ;;  %7791 = vmatmul.mubr.f32.gmra.mrb[56].mxu1 %v7615_v3 }
 0xe60   : > { %v7632_v41 = vsel %vm5325_vm8, %v7624_v17, %v9069_v18  ;;  %v7607_v6 = vsel %vm5325_vm8, %v7599_v22, %v9070_v8  ;;  %v9088_v62 = vpop.permute.xlu0 %9087 }
 0xe61   : > { %v9078_v25 = vpop.permute.xlu1 %9077  ;;  %v7640_v58 = vsel %vm7611_vm15, %v7632_v41, %v9074_v43  ;;  %v7616_v2 = vsel %vm7611_vm15, %v7607_v6, %v9075_v61  ;;  %v9090_v38 = vunpack.i.h.bf16 %v9088_v62  ;;  %v9089_v24 = vunpack.i.l.bf16 %v9088_v62 }
 0xe62   : > { %7795 = vmatprep.mubr.f32.mxu1 %v7640_v58  ;;  %v9080_v60 = vunpack.i.h.bf16 %v9078_v25  ;;  %v9079_v34 = vunpack.i.l.bf16 %v9078_v25 }
 0xe63   : > { %7796 = vmatmul.mubr.f32.gmra.mrb[58].mxu1 %v7616_v2 }
 0xe64   : > { %v9098_v55 = vpop.permute.xlu0 %9097  ;;  %v7625_v51 = vsel %vm17397_vm3, %v15635_v10, %v9079_v34  ;;  %v7600_v14 = vsel %vm17398_vm5, %v15610_v31, %v9080_v60  ;;  %vm17413_vm3 = vmmov %vm17412_vm1 }
 0xe65   : > { %v9083_v56 = vpop.permute.xlu1 %9082  ;;  %v9099_v53 = vunpack.i.l.bf16 %v9098_v55  ;;  %v9100_v63 = vunpack.i.h.bf16 %v9098_v55  ;;  %v7633_v12 = vsel %vm5325_vm8, %v7625_v51, %v9089_v24  ;;  %v7608_v23 = vsel %vm5325_vm8, %v7600_v14, %v9090_v38  ;;  %vm17414_vm5 = vmmov %vm17412_vm1 }
 0xe66   : > { %v9084_v36 = vunpack.i.l.bf16 %v9083_v56  ;;  %v9085_v49 = vunpack.i.h.bf16 %v9083_v56  ;;  %v8458_v56 = vld [vmem:[%s16088_s11] ss:$0 sm:$0xff] }
 0xe67   : > { %v7626_v11 = vsel %vm17399_vm0, %v15664_v7, %v9099_v53  ;;  %v7601_v33 = vsel %vm17400_vm12, %v15637_v1, %v9100_v63 }
 0xe68   : > { %v9103_v50 = vpop.permute.xlu0 %9102  ;;  %v7634_v52 = vsel %vm5325_vm8, %v7626_v11, %v9084_v36  ;;  %v7609_v27 = vsel %vm5325_vm8, %v7601_v33, %v9085_v49 }
 0xe69   : > { %v9093_v13 = vpop.permute.xlu1 %9092  ;;  %v9104_v16 = vunpack.i.l.bf16 %v9103_v50  ;;  %v9105_v31 = vunpack.i.h.bf16 %v9103_v50 }
 0xe6a   : > { %v9095_v26 = vunpack.i.h.bf16 %v9093_v13  ;;  %v9094_v32 = vunpack.i.l.bf16 %v9093_v13 }
 0xe6b   : > { %v7642_v46 = vsel %vm7611_vm15, %v7634_v52, %v9104_v16  ;;  %v7618_v28 = vsel %vm7611_vm15, %v7609_v27, %v9105_v31 }
 0xe6c   : > { %v7641_v10 = vsel %vm7611_vm15, %v7633_v12, %v9094_v32  ;;  %v7617_v54 = vsel %vm7611_vm15, %v7608_v23, %v9095_v26  ;;  %v9113_v29 = vpop.permute.xlu0 %9112 }
 0xe6d   : > { %v9108_v39 = vpop.permute.xlu1 %9107  ;;  %7800 = vmatprep.mubr.f32.mxu1 %v7641_v10  ;;  %v9115_v48 = vunpack.i.h.bf16 %v9113_v29  ;;  %v9114_v45 = vunpack.i.l.bf16 %v9113_v29 }
 0xe6e   : > { %v9110_v19 = vunpack.i.h.bf16 %v9108_v39  ;;  %v9109_v7 = vunpack.i.l.bf16 %v9108_v39  ;;  %7801 = vmatmul.mubr.f32.gmra.mrb[60].mxu1 %v7617_v54 }
 0xe6f   : > { %7805 = vmatprep.mubr.f32.mxu1 %v7642_v46 }
 0xe70   : > { %v7627_v20 = vsel %vm17401_vm2, %v15662_v44, %v9109_v7  ;;  %v7602_v42 = vsel %vm17402_vm6, %v15647_v40, %v9110_v19  ;;  %v7402_v40 = vld [vmem:[#allocation4 + $0x92] sm:$0xff] }
 0xe71   : > { %v9118_v37 = vpop.permute.xlu1 %9117  ;;  %v7635_v21 = vsel %vm5325_vm8, %v7627_v20, %v9114_v45  ;;  %v7610_v3 = vsel %vm5325_vm8, %v7602_v42, %v9115_v48  ;;  %vm17407_vm8 = vmmov %vm17399_vm0 }
 0xe72   : > { %v9120_v1 = vunpack.i.h.bf16 %v9118_v37  ;;  %v9119_v57 = vunpack.i.l.bf16 %v9118_v37  ;;  %7806 = vmatmul.mubr.f32.gmra.mrb[62].mxu1 %v7618_v28 }
 0xe74   : > { %v7643_v47 = vsel %vm7611_vm15, %v7635_v21, %v9119_v57  ;;  %v7619_v4 = vsel %vm7611_vm15, %v7610_v3, %v9120_v1  ;;  %vm17409_vm15 = vmmov %vm17399_vm0 }
 0xe75   : > { %7810 = vmatprep.mubr.f32.mxu1 %v7643_v47  ;;  %vm17415_vm0 = vmmov %vm17412_vm1 }
 0xe76   : > { %7811 = vmatmul.mubr.f32.gmra.mrb[64].mxu1 %v7619_v4  ;;  %vm17416_vm12 = vmmov %vm17415_vm0 }
 0xe77   : > { %8752 = vmatprep.mubr.msk.f32.mxu1 %vm17403_vm4, %v15557_v5  ;;  %vm17417_vm2 = vmmov %vm17415_vm0 }
 0xe78   : > { %vm17418_vm6 = vmmov %vm17415_vm0 }
 0xe79   : > { %vm17419_vm4 = vmmov %vm17415_vm0 }
 0xe7a   : > { %8753 = vmatmul.mubr.msk.f32.vlgmr.msra.gmra.mrb[66].mxu1 %vm17404_vm7, %v15573_v35  ;;  %vm17420_vm7 = vmmov %vm17415_vm0 }
 0xe7b   : > { %8755 = vmatprep.mubr.msk.f32.mxu1 %vm17405_vm9, %v15612_v15  ;;  %vm17421_vm9 = vmmov %vm17415_vm0 }
 0xe7e   : > { %8756 = vmatmul.mubr.msk.f32.gmra.mrb[68].mxu1 %vm17406_vm10, %v15623_v9  ;;  %vm17422_vm10 = vmmov %vm17415_vm0 }
 0xe7f   : > { %8758 = vmatprep.mubr.msk.f32.mxu1 %vm17407_vm8, %v15645_v0  ;;  %vm17423_vm8 = vmmov %vm17415_vm0 }
 0xe82   : > { %8759 = vmatmul.mubr.msk.f32.gmra.mrb[70].mxu1 %vm17408_vm11, %v15655_v59  ;;  %vm17424_vm11 = vmmov %vm17415_vm0 }
 0xe83   : > { %8761 = vmatprep.mubr.msk.f32.mxu1 %vm17409_vm15, %v15672_v30  ;;  %vm17425_vm15 = vmmov %vm17415_vm0 }
 0xe86   : > { %8762 = vmatmul.mubr.msk.f32.gmra.mrb[72].mxu1 %vm17410_vm13, %v7402_v40  ;;  %vm17426_vm13 = vmmov %vm17415_vm0 }
 0xf1e   : > { %v8584_v5 = vpop.f32.mrb[50].mxu1 }
 0xf1f   : > { %v8585_v35 = vpop.f32.mrb[51].mxu1 }
 0xf20   : > { %v8586_v44 = vadd.f32 %v8585_v35, %v8584_v5 }
 0xf22   : > { %v7778_v51 = vadd.f32 %v8586_v44, %v8458_v56 }
 0xf25   : > { %v8587_v61 = vpop.f32.mrb[52].mxu1 }
 0xf26   : > { %v8588_v15 = vpop.f32.mrb[53].mxu1 }
 0xf27   : > { %v8589_v43 = vadd.f32 %v8588_v15, %v8587_v61 }
 0xf29   : > { %v7783_v38 = vadd.f32 %v8589_v43, %v8458_v56 }
 0xf2a   : > { %v8590_v8 = vpop.f32.mrb[54].mxu1 }
 0xf2b   : > { %v8591_v9 = vpop.f32.mrb[55].mxu1 }
 0xf2c   : > { %v8592_v18 = vadd.f32 %v8591_v9, %v8590_v8 }
 0xf2e   : > { %v7788_v12 = vadd.f32 %v8592_v18, %v8458_v56 }
 0xf31   : > { %v8593_v17 = vpop.f32.mrb[56].mxu1 }
 0xf32   : > { %v8594_v0 = vpop.f32.mrb[57].mxu1 }
 0xf33   : > { %v8595_v22 = vadd.f32 %v8594_v0, %v8593_v17 }
 0xf35   : > { %v7793_v13 = vadd.f32 %v8595_v22, %v8458_v56 }
 0xf36   : > { %v8596_v41 = vpop.f32.mrb[58].mxu1 }
 0xf37   : > { %v8597_v59 = vpop.f32.mrb[59].mxu1 }
 0xf38   : > { %v8598_v6 = vadd.f32 %v8597_v59, %v8596_v41 }
 0xf3a   : > { %v7798_v46 = vadd.f32 %v8598_v6, %v8458_v56 }
 0xf41   : > { %v8599_v62 = vpop.f32.mrb[60].mxu1 }
 0xf42   : > { %v8600_v30 = vpop.f32.mrb[61].mxu1 }
 0xf43   : > { %v8601_v25 = vadd.f32 %v8600_v30, %v8599_v62 }
 0xf45   : > { %v8602_v58 = vpop.f32.mrb[62].mxu1  ;;  %v7803_v39 = vadd.f32 %v8601_v25, %v8458_v56 }
 0xf46   : > { %v8603_v2 = vpop.f32.mrb[63].mxu1 }
 0xf47   : > { %v8604_v60 = vadd.f32 %v8603_v2, %v8602_v58 }
 0xf49   : > { %v8605_v34 = vpop.f32.mrb[64].mxu1  ;;  %v7808_v3 = vadd.f32 %v8604_v60, %v8458_v56 }
 0xf4a   : > { %v8606_v55 = vpop.f32.mrb[65].mxu1 }
 0xf4b   : > { %v8607_v53 = vadd.f32 %v8606_v55, %v8605_v34 }
 0xf4d   : > { %v8754_v24 = vpop.f32.mrb[66].mxu1  ;;  %v7813_v21 = vadd.f32 %v8607_v53, %v8458_v56 }
 0xf4e   : > { %v15770_v14 = vadd.f32 %v8754_v24, %v7783_v38  ;;  %v7882_v63 = vpop.f32.mrb[67].mxu1 }
 0xf4f   : > { %v15772_v36 = vadd.f32 %v7882_v63, %v7778_v51 }
 0xf50   : > { %v7945_v50 = vmul.f32 %v15770_v14, %v15770_v14  ;;  %v7924_v16 = vsel %vm17411_vm14, %v15770_v14, 0.0  ;;  %vm17427_vm14 = vcmask 24576  }
 0xf51   : > { %v7923_v26 = vsel %vm17412_vm1, %v15772_v36, 0.0  ;;  %v7944_v32 = vmul.f32 %v15772_v36, %v15772_v36  ;;  %v8757_v11 = vpop.f32.mrb[68].mxu1  ;;  %vm17428_vm1 = vmmov %vm17427_vm14 }
 0xf52   : > { %v15782_v23 = vadd.f32 %v8757_v11, %v7793_v13  ;;  %v7892_v49 = vpop.f32.mrb[69].mxu1  ;;  %v7953_v10 = vsel %vm17413_vm3, %v7945_v50, 0.0  ;;  %v7925_v29 = vadd.f32 %v7924_v16, %v7923_v26  ;;  %vm17429_vm3 = vmmov %vm17428_vm1 }
 0xf53   : > { %v7952_v54 = vsel %vm17414_vm5, %v7944_v32, 0.0  ;;  %v15786_v31 = vadd.f32 %v7892_v49, %v7788_v12  ;;  %vm17430_vm5 = vmmov %vm17428_vm1 }
 0xf54   : > { %v7947_v52 = vmul.f32 %v15782_v23, %v15782_v23  ;;  %v7954_v48 = vadd.f32 %v7953_v10, %v7952_v54  ;;  %v7928_v42 = vsel %vm17416_vm12, %v15782_v23, 0.0 }
 0xf55   : > { %v7926_v33 = vsel %vm17415_vm0, %v15786_v31, 0.0  ;;  %v7946_v19 = vmul.f32 %v15786_v31, %v15786_v31  ;;  %v8760_v7 = vpop.f32.mrb[70].mxu1  ;;  %vm17431_vm0 = vcmask 31744  }
 0xf56   : > { %v7927_v45 = vadd.f32 %v7926_v33, %v7925_v29  ;;  %v15794_v27 = vadd.f32 %v8760_v7, %v7803_v39  ;;  %v7902_v20 = vpop.f32.mrb[71].mxu1  ;;  %v7957_v47 = vsel %vm17418_vm6, %v7947_v52, 0.0  ;;  %vm17432_vm12 = vmmov %vm17431_vm0 }
 0xf57   : > { %v7955_v37 = vsel %vm17417_vm2, %v7946_v19, 0.0  ;;  %v15799_v28 = vadd.f32 %v7902_v20, %v7798_v46 }
 0xf58   : > { %v7956_v1 = vadd.f32 %v7955_v37, %v7954_v48  ;;  %v7929_v57 = vadd.f32 %v7928_v42, %v7927_v45  ;;  %v7949_v4 = vmul.f32 %v15794_v27, %v15794_v27  ;;  %v7932_v8 = vsel %vm17420_vm7, %v15794_v27, 0.0 }
 0xf59   : > { %v7930_v40 = vsel %vm17419_vm4, %v15799_v28, 0.0  ;;  %v7948_v5 = vmul.f32 %v15799_v28, %v15799_v28  ;;  %v8763_v35 = vpop.f32.mrb[72].mxu1 }
 0xf5a   : > { %v7931_v44 = vadd.f32 %v7930_v40, %v7929_v57  ;;  %v7958_v61 = vadd.f32 %v7957_v47, %v7956_v1  ;;  %v15808_v15 = vadd.f32 %v8763_v35, %v7813_v21  ;;  %v7912_v43 = vpop.f32.mrb[73].mxu1  ;;  %v7961_v22 = vsel %vm17422_vm10, %v7949_v4, 0.0 }
 0xf5b   : > { %v7959_v9 = vsel %vm17421_vm9, %v7948_v5, 0.0  ;;  %v15813_v18 = vadd.f32 %v7912_v43, %v7808_v3 }
 0xf5c   : > { %v7960_v17 = vadd.f32 %v7959_v9, %v7958_v61  ;;  %v7933_v0 = vadd.f32 %v7932_v8, %v7931_v44  ;;  %v7951_v41 = vmul.f32 %v15808_v15, %v15808_v15  ;;  %v7936_v25 = vsel %vm17424_vm11, %v15808_v15, 0.0 }
 0xf5d   : > { %v7934_v59 = vsel %vm17423_vm8, %v15813_v18, 0.0  ;;  %v7950_v6 = vmul.f32 %v15813_v18, %v15813_v18 }
 0xf5e   : > { %v7935_v62 = vadd.f32 %v7934_v59, %v7933_v0  ;;  %v7962_v30 = vadd.f32 %v7961_v22, %v7960_v17  ;;  %v7965_v34 = vsel %vm17426_vm13, %v7951_v41, 0.0 }
 0xf5f   : > { %v7963_v58 = vsel %vm17425_vm15, %v7950_v6, 0.0  ;;  %vm17434_vm15 = vmmov %vm17426_vm13 }
 0xf60   : > { %v7937_v2 = vadd.f32 %v7936_v25, %v7935_v62  ;;  %v7964_v60 = vadd.f32 %v7963_v58, %v7962_v30  ;;  %v7921_v25 = vld [vmem:[%s16089_s12] sm:$0x1] }
 0xf62   : > { %v7938_v55 = vrot.slane %v7937_v2, 4  ;;  %v7966_v56 = vadd.f32 %v7965_v34, %v7964_v60 }
 0xf64   : > { %v7939_v53 = vadd.f32 %v7938_v55, %v7937_v2  ;;  %v7967_v38 = vrot.slane %v7966_v56, 4 }
 0xf66   : > { %v7940_v24 = vrot.slane %v7939_v53, 2  ;;  %v7968_v51 = vadd.f32 %v7967_v38, %v7966_v56 }
 0xf68   : > { %v7941_v63 = vadd.f32 %v7940_v24, %v7939_v53  ;;  %v7969_v50 = vrot.slane %v7968_v51, 2  ;;  %v7922_v53 = vld [vmem:[%s16090_s13] sm:$0x1] }
 0xf6a   : > { %v7942_v13 = vrot.slane %v7941_v63, 1  ;;  %v7970_v16 = vadd.f32 %v7969_v50, %v7968_v51  ;;  %v17433_v51 = vld [vmem:[#allocation14_spill] sm:$0xff] }
 0xf6c   : > { %v7943_v26 = vadd.f32 %v7942_v13, %v7941_v63  ;;  %v7971_v32 = vrot.slane %v7970_v16, 1 }
 0xf6e   : > { %v7973_v11 = vsel %vm17427_vm14, %v7943_v26, 0.0  ;;  %v7972_v12 = vadd.f32 %v7971_v32, %v7970_v16  ;;  %vm17435_vm14 = vmmov %vm17426_vm13 }
 0xf6f   : > { %7974 = vadd.xlane.f32.xlu0 %v7973_v11 }
 0xf70   : > { %v7986_v49 = vsel %vm17428_vm1, %v7972_v12, 0.0  ;;  %vm17436_vm1 = vmmov %vm17426_vm13 }
 0xf71   : > { %7987 = vadd.xlane.f32.xlu1 %v7986_v49 }
 0xf82   : > { %8028 = vrot.lane.b32.xlu1 %v7972_v12, %s17112_s15 }
 0xf85   : > { %8011 = vrot.lane.b32.xlu0 %v7943_v26, %s17112_s15 }
 0xffc   : > { %v7975_v10 = vpop.xlane.xlu0 %7974 }
 0xffd   : > { %v7976_v54 = vrot.slane %v7975_v10, 4 }
 0xffe   : > { %v7988_v29 = vpop.xlane.xlu1 %7987 }
 0xfff   : > { %v7977_v39 = vadd.f32 %v7976_v54, %v7975_v10  ;;  %v7989_v52 = vrot.slane %v7988_v29, 4 }
0x1000   : > { %v8012_v33 = vpop.permute.xlu0 %8011 }
0x1001   : > { %v7978_v19 = vrot.slane %v7977_v39, 2  ;;  %v7990_v7 = vadd.f32 %v7989_v52, %v7988_v29  ;;  %v8014_v46 = vsel %vm17429_vm3, %v8012_v33, 0.0  ;;  %vm17437_vm3 = vmmov %vm17436_vm1 }
0x1002   : > { %v8029_v48 = vpop.permute.xlu1 %8028  ;;  %8015 = vadd.xlane.f32.xlu0 %v8014_v46 }
0x1003   : > { %v7991_v45 = vrot.slane %v7990_v7, 2  ;;  %v8031_v20 = vsel %vm17430_vm5, %v8029_v48, 0.0  ;;  %v7979_v42 = vadd.f32 %v7978_v19, %v7977_v39  ;;  %vm17439_vm5 = vmmov %vm17436_vm1 }
0x1004   : > { %8032 = vadd.xlane.f32.xlu1 %v8031_v20 }
0x1005   : > { %v7980_v37 = vrot.slane %v7979_v42, 1  ;;  %v7992_v1 = vadd.f32 %v7991_v45, %v7990_v7 }
0x1007   : > { %v7981_v57 = vadd.f32 %v7980_v37, %v7979_v42  ;;  %v7993_v21 = vrot.slane %v7992_v1, 1 }
0x1009   : > { %8932 = vpush %v7981_v57  ;;  %v7994_v3 = vadd.f32 %v7993_v21, %v7992_v1 }
0x100b   : > { %8934 = vpush %v7994_v3 }
0x103a   : > { %s8933_s15 = spop %8932 }
0x103b   : > { %s15832_s4 = smul.f32 0.00390625, %s8933_s15 }
0x103c   : > { %s8935_s27 = spop %8934 }
0x103d   : > { %s7999_s7 = smul.f32 %s15832_s4, %s15832_s4  ;;  %s8007_s5 = ssub.f32 0.0, %s15832_s4 }
0x103e   : > { %s7998_s14 = smul.f32 0.00390625, %s8935_s27  ;;  %s458_s4 = sand.u32 1, %s9475_s30  }
0x1040   : > { %s8000_s2 = ssub.f32 %s7998_s14, %s7999_s7 }
0x1042   : > { %s8001_s26 = smax.f32 %s9495_s22, %s8000_s2 }
0x1043   : > { %s8002_s16 = sadd.f32 1e-05, %s8001_s26 }
0x1045   : > { %v8003_v47 = vstv %s8002_s16  ;;  %s8388_s16 = sshll.u32 %s458_s4, 6 }
0x1046   : > { %9385 = vrsqrt.f32 %v8003_v47 }
0x1050   : > { %v9386_v4 = vpop.eup %9385 }
0x1051   : > { %8936 = vpush %v9386_v4 }
0x1082   : > { %s8937_s20 = spop %8936 }
0x1083   : > { %s8008_s6 = smul.f32 %s8937_s20, %s8007_s5  ;;  %v8006_v58 = vstv %s8937_s20  ;;  %s8473_s20 = sshll.u32 %s9600_s17, 10 }
0x1085   : > { %v8009_v34 = vstv %s8008_s6 }
0x108f   : > { %v8016_v40 = vpop.xlane.xlu0 %8015 }
0x1090   : > { %v8017_v5 = vrot.slane %v8016_v40, 4 }
0x1091   : > { %v8033_v35 = vpop.xlane.xlu1 %8032 }
0x1092   : > { %v8018_v44 = vadd.f32 %v8017_v5, %v8016_v40  ;;  %v8034_v61 = vrot.slane %v8033_v35, 4 }
0x1094   : > { %v8019_v43 = vrot.slane %v8018_v44, 2  ;;  %v8035_v8 = vadd.f32 %v8034_v61, %v8033_v35 }
0x1096   : > { %v8020_v9 = vadd.f32 %v8019_v43, %v8018_v44  ;;  %v8036_v17 = vrot.slane %v8035_v8, 2 }
0x1098   : > { %v8037_v0 = vadd.f32 %v8036_v17, %v8035_v8  ;;  %v8021_v22 = vrot.slane %v8020_v9, 1 }
0x109a   : > { %v8022_v41 = vadd.f32 %v8021_v22, %v8020_v9  ;;  %v8038_v59 = vrot.slane %v8037_v0, 1 }
0x109c   : > { %8938 = vpush %v8022_v41  ;;  %v8039_v6 = vadd.f32 %v8038_v59, %v8037_v0 }
0x109e   : > { %8940 = vpush %v8039_v6 }
0x10cd   : > { %s8939_s21 = spop %8938 }
0x10ce   : > { %s8026_s3 = smul.f32 0.00390625, %s8939_s21  ;;  %s460_s21 = scalar_lea.vmem [#allocation5], %s8388_s16 }
0x10cf   : > { %s8941_s19 = spop %8940 }
0x10d0   : > { %s8044_s0 = smul.f32 %s8026_s3, %s8026_s3  ;;  %s8052_s15 = ssub.f32 0.0, %s8026_s3 }
0x10d1   : > { %s8043_s18 = smul.f32 0.00390625, %s8941_s19  ;;  %s8322_s3 = sshll.u32 %s460_s21, 4  ;;  %s16029_s3 = int_to_ptr.vmem [resolvable:$true] %s8322_s3 }
0x10d3   : > { %s8045_s24 = ssub.f32 %s8043_s18, %s8044_s0  ;;  %s17438_s0 = sld [smem:[#allocation130_spill]] }
0x10d5   : > { %s8046_s28 = smax.f32 %s9495_s22, %s8045_s24  ;;  %s16035_s24 = scalar_lea.sflag [#allocation6], %s458_s4 }
0x10d6   : > { %s8047_s29 = sadd.f32 1e-05, %s8046_s28  ;;  %s9421_s28 = scalar_lea.vmem %s16029_s3, 1024 }
0x10d7   : > { %p9422_p11 = scmp.ne.s32.totalorder %s16029_s3, %s9421_s28 }
0x10d8   : > { %v8048_v62 = vstv %s8047_s29  ;;  %s9502_s29 = smov [#allocation5]  }
0x10d9   : > { %9387 = vrsqrt.f32 %v8048_v62  ;;  %s16026_s18 = scalar_lea.hbm %s17438_s0, %s8473_s20  ;;  %p9423_p12 = pnand %p9422_p11, %p9617_p5 }
0x10da   : > { %s9425_s5 = sshll.u32 %s9502_s29, 4  ;;  %s9426_s5 = int_to_ptr.vmem [resolvable:$false] %s9425_s5 }
0x10db   : > { %p9424_p13 = pneg %p9423_p12  ;;  %s9427_s6 = scalar_lea.vmem %s9426_s5, 2048 }
0x10dc   : > { %p9428_p0 = scmp.lt.s32.totalorder %s16029_s3, %s9426_s5  ;;  %p9429_p1 = scmp.lt.s32.totalorder %s9427_s6, %s9421_s28 }
0x10de   : > { %p9430_p2 = por %p9429_p1, %p9428_p0 }
0x10e0   : > { %p9431_p3 = pnand %p9430_p2, %p9424_p13 }
0x10e3   : > { %v9388_v30 = vpop.eup %9387 }
0x10e4   : > { %8942 = vpush %v9388_v30 }
0x1115   : > { %s8943_s14 = spop %8942 }
0x1116   : > { %v8051_v2 = vstv %s8943_s14  ;;  %s8053_s2 = smul.f32 %s8943_s14, %s8052_s15 }
0x1117   : > { %v8055_v60 = vsel %vm17431_vm0, %v8006_v58, %v8051_v2  ;;  %vm17440_vm0 = vmmov %vm17436_vm1 }
0x1118   : > { %v8054_v55 = vstv %s8053_s2  ;;  %v8056_v56 = vmul.f32 %v8055_v60, %v7921_v25 }
0x1119   : > { %v8057_v38 = vsel %vm17432_vm12, %v8009_v34, %v8054_v55  ;;  %vm17441_vm12 = vmmov %vm17440_vm0 }
0x111a   : > { %v8058_v24 = vmul.f32 %v8057_v38, %v7921_v25  ;;  %v8063_v63 = vrot.slane %v8056_v56, %v17433_v51 }
0x111c   : > { %v8059_v50 = vadd.f32 %v8058_v24, %v7922_v53  ;;  %v8064_v13 = vmul.f32 %v8063_v63, %v15772_v36  ;;  %v8065_v16 = vmul.f32 %v8063_v63, %v15770_v14  ;;  %v8066_v26 = vmul.f32 %v8063_v63, %v15786_v31 }
0x111d   : > { %v8067_v11 = vmul.f32 %v8063_v63, %v15782_v23  ;;  %v8068_v12 = vmul.f32 %v8063_v63, %v15799_v28  ;;  %v8069_v49 = vmul.f32 %v8063_v63, %v15794_v27  ;;  %v8070_v10 = vmul.f32 %v8063_v63, %v15813_v18 }
0x111e   : > { %v8075_v32 = vrot.slane %v8059_v50, %v17433_v51  ;;  %v8071_v54 = vmul.f32 %v8063_v63, %v15808_v15 }
0x1120   : > { %v15857_v29 = vadd.f32 %v8075_v32, %v8064_v13  ;;  %v15859_v39 = vadd.f32 %v8075_v32, %v8065_v16  ;;  %v15861_v36 = vadd.f32 %v8075_v32, %v8066_v26  ;;  %v15863_v14 = vadd.f32 %v8075_v32, %v8067_v11 }
0x1121   : > { %v15865_v31 = vadd.f32 %v8075_v32, %v8068_v12  ;;  %v15867_v52 = vadd.f32 %v8075_v32, %v8069_v49  ;;  %v15869_v23 = vadd.f32 %v8075_v32, %v8070_v10  ;;  %v15871_v28 = vadd.f32 %v8075_v32, %v8071_v54 }
0x1122   : > { %v15874_v27 = vmul.f32 0.70710677, %v15857_v29  ;;  %v15877_v15 = vmul.f32 0.70710677, %v15859_v39  ;;  %v15880_v18 = vmul.f32 0.70710677, %v15861_v36 }
0x1123   : > { %v15883_v33 = vmul.f32 0.70710677, %v15863_v14  ;;  %v15886_v19 = vmul.f32 0.70710677, %v15865_v31  ;;  %v15889_v7 = vmul.f32 0.70710677, %v15867_v52 }
0x1124   : > { %v15892_v46 = vmul.f32 0.70710677, %v15869_v23  ;;  %v15895_v48 = vmul.f32 0.70710677, %v15871_v28  ;;  %v8100_v45 = vand.u32 2147483647, %v15874_v27 }
0x1125   : > { %v8101_v20 = vand.u32 2147483647, %v15877_v15  ;;  %v8102_v42 = vand.u32 2147483647, %v15880_v18  ;;  %v8103_v37 = vand.u32 2147483647, %v15883_v33 }
0x1126   : > { %v8104_v1 = vand.u32 2147483647, %v15886_v19  ;;  %v8105_v57 = vand.u32 2147483647, %v15889_v7  ;;  %v8106_v21 = vand.u32 2147483647, %v15892_v46 }
0x1127   : > { %v8107_v3 = vand.u32 2147483647, %v15895_v48  ;;  %v8108_v47 = vmul.f32 0.3275911, %v8100_v45  ;;  %v8109_v4 = vmul.f32 0.3275911, %v8101_v20 }
0x1128   : > { %v8110_v40 = vmul.f32 0.3275911, %v8102_v42  ;;  %v8111_v5 = vmul.f32 0.3275911, %v8103_v37  ;;  %v8112_v35 = vmul.f32 0.3275911, %v8104_v1 }
0x1129   : > { %v8113_v44 = vmul.f32 0.3275911, %v8105_v57  ;;  %v8114_v61 = vmul.f32 0.3275911, %v8106_v21  ;;  %v8115_v43 = vmul.f32 0.3275911, %v8107_v3 }
0x112a   : > { %v8116_v8 = vadd.f32 1.0, %v8108_v47  ;;  %v8117_v9 = vadd.f32 1.0, %v8109_v4  ;;  %v8118_v17 = vadd.f32 1.0, %v8110_v40  ;;  %v8119_v0 = vadd.f32 1.0, %v8111_v5 }
0x112b   : > { %v8120_v22 = vadd.f32 1.0, %v8112_v35  ;;  %v8121_v41 = vadd.f32 1.0, %v8113_v44  ;;  %v8212_v59 = vsub.f32 0.0, %v8100_v45  ;;  %v8213_v6 = vsub.f32 0.0, %v8101_v20 }
0x112c   : > { %9389 = vrcp.f32 %v8116_v8  ;;  %v8214_v62 = vsub.f32 0.0, %v8102_v42  ;;  %v8122_v30 = vadd.f32 1.0, %v8114_v61  ;;  %v8215_v25 = vsub.f32 0.0, %v8103_v37 }
0x112d   : > { %9391 = vrcp.f32 %v8117_v9  ;;  %v8216_v58 = vsub.f32 0.0, %v8104_v1  ;;  %v8123_v2 = vadd.f32 1.0, %v8115_v43  ;;  %v8217_v60 = vsub.f32 0.0, %v8105_v57 }
0x112e   : > { %9393 = vrcp.f32 %v8118_v17  ;;  %v8220_v34 = vmul.f32 %v8212_v59, %v8100_v45  ;;  %v8218_v55 = vsub.f32 0.0, %v8106_v21  ;;  %v8221_v56 = vmul.f32 %v8213_v6, %v8101_v20 }
0x112f   : > { %9395 = vrcp.f32 %v8119_v0  ;;  %v8222_v53 = vmul.f32 %v8214_v62, %v8102_v42  ;;  %v8219_v38 = vsub.f32 0.0, %v8107_v3  ;;  %v8223_v24 = vmul.f32 %v8215_v25, %v8103_v37 }
0x1130   : > { %9397 = vrcp.f32 %v8120_v22  ;;  %v8224_v51 = vmul.f32 %v8216_v58, %v8104_v1  ;;  %v8228_v63 = vmul.f32 1.442695, %v8220_v34  ;;  %v8225_v50 = vmul.f32 %v8217_v60, %v8105_v57 }
0x1131   : > { %9399 = vrcp.f32 %v8121_v41  ;;  %v8230_v13 = vmul.f32 1.442695, %v8221_v56  ;;  %v8226_v16 = vmul.f32 %v8218_v55, %v8106_v21  ;;  %v8232_v26 = vmul.f32 1.442695, %v8222_v53 }
0x1132   : > { %9401 = vrcp.f32 %v8122_v30  ;;  %v8227_v32 = vmul.f32 %v8219_v38, %v8107_v3  ;;  %v8234_v11 = vmul.f32 1.442695, %v8223_v24  ;;  %v15906_v12 = vmul.f32 0.5, %v15857_v29 }
0x1133   : > { %9403 = vrcp.f32 %v8123_v2  ;;  %v8236_v49 = vmul.f32 1.442695, %v8224_v51  ;;  %v15911_v54 = vmul.f32 0.5, %v15859_v39  ;;  %v15914_v45 = vmul.f32 0.5, %v15861_v36 }
0x1134   : > { %9405 = vpow2.f32 %v8228_v63  ;;  %v8238_v20 = vmul.f32 1.442695, %v8225_v50  ;;  %v15919_v37 = vmul.f32 0.5, %v15863_v14  ;;  %v8240_v1 = vmul.f32 1.442695, %v8226_v16 }
0x1135   : > { %9407 = vpow2.f32 %v8230_v13  ;;  %v15925_v21 = vmul.f32 0.5, %v15865_v31  ;;  %v8242_v36 = vmul.f32 1.442695, %v8227_v32  ;;  %v15931_v47 = vmul.f32 0.5, %v15867_v52 }
0x1136   : > { %v15908_v10 = vpop.eup %9389  ;;  %9409 = vpow2.f32 %v8232_v26  ;;  %v15937_v5 = vmul.f32 0.5, %v15869_v23  ;;  %vm8260_vm2 = vcmp.ge.f32.partialorder %v15874_v27, 0.0  ;;  %vm8261_vm6 = vcmp.ge.f32.partialorder %v15877_v15, 0.0 }
0x1137   : > { %v15916_v42 = vpop.eup %9391  ;;  %v8140_v29 = vmul.f32 1.0614054, %v15908_v10  ;;  %9411 = vpow2.f32 %v8234_v11  ;;  %vm8262_vm4 = vcmp.ge.f32.partialorder %v15880_v18, 0.0  ;;  %vm8263_vm7 = vcmp.ge.f32.partialorder %v15883_v33, 0.0 }
0x1138   : > { %v15922_v57 = vpop.eup %9393  ;;  %v8141_v39 = vmul.f32 1.0614054, %v15916_v42  ;;  %9413 = vpow2.f32 %v8236_v49  ;;  %vm8264_vm9 = vcmp.ge.f32.partialorder %v15886_v19, 0.0  ;;  %vm8265_vm10 = vcmp.ge.f32.partialorder %v15889_v7, 0.0 }
0x1139   : > { %v15928_v3 = vpop.eup %9395  ;;  %v8142_v14 = vmul.f32 1.0614054, %v15922_v57  ;;  %v8148_v4 = vadd.f32 -1.4531521, %v8140_v29  ;;  %9415 = vpow2.f32 %v8238_v20  ;;  %vm8266_vm8 = vcmp.ge.f32.partialorder %v15892_v46, 0.0 }
0x113a   : > { %v15934_v40 = vpop.eup %9397  ;;  %v8143_v31 = vmul.f32 1.0614054, %v15928_v3  ;;  %v8149_v35 = vadd.f32 -1.4531521, %v8141_v39  ;;  %9417 = vpow2.f32 %v8240_v1  ;;  %vm8267_vm11 = vcmp.ge.f32.partialorder %v15895_v48, 0.0 }
0x113b   : > { %v15940_v44 = vpop.eup %9399  ;;  %v8144_v61 = vmul.f32 1.0614054, %v15934_v40  ;;  %v8150_v43 = vadd.f32 -1.4531521, %v8142_v14  ;;  %v8156_v52 = vmul.f32 %v15908_v10, %v8148_v4  ;;  %9419 = vpow2.f32 %v8242_v36 }
0x113c   : > { %v15944_v8 = vpop.eup %9401  ;;  %v8145_v9 = vmul.f32 1.0614054, %v15940_v44  ;;  %v8151_v17 = vadd.f32 -1.4531521, %v8143_v31  ;;  %v8157_v23 = vmul.f32 %v15916_v42, %v8149_v35  ;;  %v8091_v46 = vmul.f32 0.5, %v15871_v28 }
0x113d   : > { %v15948_v0 = vpop.eup %9403  ;;  %v8146_v22 = vmul.f32 1.0614054, %v15944_v8  ;;  %v8152_v41 = vadd.f32 -1.4531521, %v8144_v61  ;;  %v8158_v59 = vmul.f32 %v15922_v57, %v8150_v43  ;;  %v8164_v6 = vadd.f32 1.4214138, %v8156_v52 }
0x113e   : > { %v8147_v62 = vmul.f32 1.0614054, %v15948_v0  ;;  %v8153_v30 = vadd.f32 -1.4531521, %v8145_v9  ;;  %v8159_v25 = vmul.f32 %v15928_v3, %v8151_v17  ;;  %v8165_v58 = vadd.f32 1.4214138, %v8157_v23  ;;  %v9406_v2 = vpop.eup %9405 }
0x113f   : > { %v8154_v60 = vadd.f32 -1.4531521, %v8146_v22  ;;  %v8160_v34 = vmul.f32 %v15934_v40, %v8152_v41  ;;  %v8166_v55 = vadd.f32 1.4214138, %v8158_v59  ;;  %v8172_v56 = vmul.f32 %v15908_v10, %v8164_v6  ;;  %v9408_v53 = vpop.eup %9407 }
0x1140   : > { %v8155_v38 = vadd.f32 -1.4531521, %v8147_v62  ;;  %v8161_v24 = vmul.f32 %v15940_v44, %v8153_v30  ;;  %v8167_v51 = vadd.f32 1.4214138, %v8159_v25  ;;  %v8173_v63 = vmul.f32 %v15916_v42, %v8165_v58  ;;  %v9410_v50 = vpop.eup %9409 }
0x1141   : > { %v8162_v13 = vmul.f32 %v15944_v8, %v8154_v60  ;;  %v8168_v16 = vadd.f32 1.4214138, %v8160_v34  ;;  %v8174_v26 = vmul.f32 %v15922_v57, %v8166_v55  ;;  %v8180_v32 = vadd.f32 -0.28449672, %v8172_v56  ;;  %v9412_v11 = vpop.eup %9411 }
0x1142   : > { %v8163_v49 = vmul.f32 %v15948_v0, %v8155_v38  ;;  %v8169_v20 = vadd.f32 1.4214138, %v8161_v24  ;;  %v8175_v29 = vmul.f32 %v15928_v3, %v8167_v51  ;;  %v8181_v1 = vadd.f32 -0.28449672, %v8173_v63  ;;  %v9414_v39 = vpop.eup %9413 }
0x1143   : > { %v8170_v36 = vadd.f32 1.4214138, %v8162_v13  ;;  %v8176_v14 = vmul.f32 %v15934_v40, %v8168_v16  ;;  %v8182_v4 = vadd.f32 -0.28449672, %v8174_v26  ;;  %v8188_v31 = vmul.f32 %v15908_v10, %v8180_v32  ;;  %v9416_v35 = vpop.eup %9415 }
0x1144   : > { %v8171_v61 = vadd.f32 1.4214138, %v8163_v49  ;;  %v8177_v43 = vmul.f32 %v15940_v44, %v8169_v20  ;;  %v8183_v52 = vadd.f32 -0.28449672, %v8175_v29  ;;  %v8189_v9 = vmul.f32 %v15916_v42, %v8181_v1  ;;  %v9418_v17 = vpop.eup %9417 }
0x1145   : > { %v8178_v23 = vmul.f32 %v15944_v8, %v8170_v36  ;;  %v8184_v22 = vadd.f32 -0.28449672, %v8176_v14  ;;  %v8190_v41 = vmul.f32 %v15922_v57, %v8182_v4  ;;  %v8196_v59 = vadd.f32 0.2548296, %v8188_v31  ;;  %v9420_v6 = vpop.eup %9419 }
0x1146   : > { %v8179_v62 = vmul.f32 %v15948_v0, %v8171_v61  ;;  %v8185_v30 = vadd.f32 -0.28449672, %v8177_v43  ;;  %v8191_v25 = vmul.f32 %v15928_v3, %v8183_v52  ;;  %v8197_v58 = vadd.f32 0.2548296, %v8189_v9 }
0x1147   : > { %v8186_v60 = vadd.f32 -0.28449672, %v8178_v23  ;;  %v8192_v34 = vmul.f32 %v15934_v40, %v8184_v22  ;;  %v8198_v55 = vadd.f32 0.2548296, %v8190_v41  ;;  %v8204_v56 = vmul.f32 %v15908_v10, %v8196_v59 }
0x1148   : > { %v8187_v38 = vadd.f32 -0.28449672, %v8179_v62  ;;  %v8193_v24 = vmul.f32 %v15940_v44, %v8185_v30  ;;  %v8199_v51 = vadd.f32 0.2548296, %v8191_v25  ;;  %v8205_v63 = vmul.f32 %v15916_v42, %v8197_v58 }
0x1149   : > { %v8194_v13 = vmul.f32 %v15944_v8, %v8186_v60  ;;  %v8200_v16 = vadd.f32 0.2548296, %v8192_v34  ;;  %v8206_v26 = vmul.f32 %v15922_v57, %v8198_v55  ;;  %v8244_v32 = vmul.f32 %v9406_v2, %v8204_v56 }
0x114a   : > { %v8195_v10 = vmul.f32 %v15948_v0, %v8187_v38  ;;  %v8201_v49 = vadd.f32 0.2548296, %v8193_v24  ;;  %v8207_v20 = vmul.f32 %v15928_v3, %v8199_v51  ;;  %v8245_v29 = vmul.f32 %v9408_v53, %v8205_v63 }
0x114b   : > { %v8202_v42 = vadd.f32 0.2548296, %v8194_v13  ;;  %v8208_v1 = vmul.f32 %v15934_v40, %v8200_v16  ;;  %v8246_v36 = vmul.f32 %v9410_v50, %v8206_v26  ;;  %v8252_v14 = vsub.f32 1.0, %v8244_v32 }
0x114c   : > { %v8203_v57 = vadd.f32 0.2548296, %v8195_v10  ;;  %v8209_v2 = vmul.f32 %v15940_v44, %v8201_v49  ;;  %v8247_v4 = vmul.f32 %v9412_v11, %v8207_v20  ;;  %v8253_v31 = vsub.f32 1.0, %v8245_v29 }
0x114d   : > { %v8210_v3 = vmul.f32 %v15944_v8, %v8202_v42  ;;  %v8248_v53 = vmul.f32 %v9414_v39, %v8208_v1  ;;  %v8254_v61 = vsub.f32 1.0, %v8246_v36  ;;  %v8268_v43 = vsub.f32 0.0, %v8252_v14 }
0x114e   : > { %v8211_v40 = vmul.f32 %v15948_v0, %v8203_v57  ;;  %v8249_v50 = vmul.f32 %v9416_v35, %v8209_v2  ;;  %v8255_v52 = vsub.f32 1.0, %v8247_v4  ;;  %v8269_v9 = vsub.f32 0.0, %v8253_v31 }
0x114f   : > { %v8250_v23 = vmul.f32 %v9418_v17, %v8210_v3  ;;  %v8256_v44 = vsub.f32 1.0, %v8248_v53  ;;  %v8270_v11 = vsub.f32 0.0, %v8254_v61  ;;  %v8276_v22 = vsel %vm8260_vm2, %v8252_v14, %v8268_v43 }
0x1150   : > { %v8251_v41 = vmul.f32 %v9420_v6, %v8211_v40  ;;  %v8257_v8 = vsub.f32 1.0, %v8249_v50  ;;  %v8271_v39 = vsub.f32 0.0, %v8255_v52  ;;  %v8277_v59 = vsel %vm8261_vm6, %v8253_v31, %v8269_v9 }
0x1151   : > { %v8258_v62 = vsub.f32 1.0, %v8250_v23  ;;  %v8272_v30 = vsub.f32 0.0, %v8256_v44  ;;  %v8278_v0 = vsel %vm8262_vm4, %v8254_v61, %v8270_v11  ;;  %v8284_v35 = vadd.f32 1.0, %v8276_v22 }
0x1152   : > { %v8259_v17 = vsub.f32 1.0, %v8251_v41  ;;  %v8273_v25 = vsub.f32 0.0, %v8257_v8  ;;  %v8279_v27 = vsel %vm8263_vm7, %v8255_v52, %v8271_v39  ;;  %v8285_v6 = vadd.f32 1.0, %v8277_v59 }
0x1153   : > { %v8274_v58 = vsub.f32 0.0, %v8258_v62  ;;  %v8280_v15 = vsel %vm8264_vm9, %v8256_v44, %v8272_v30  ;;  %v8286_v60 = vadd.f32 1.0, %v8278_v0  ;;  %v8287_v34 = vadd.f32 1.0, %v8279_v27 }
0x1154   : > { %v8275_v55 = vsub.f32 0.0, %v8259_v17  ;;  %v8281_v56 = vsel %vm8265_vm10, %v8257_v8, %v8273_v25  ;;  %v8288_v18 = vadd.f32 1.0, %v8280_v15  ;;  %v8292_v38 = vmul.f32 %v8284_v35, %v15906_v12 }
0x1155   : > { %v8282_v24 = vsel %vm8266_vm8, %v8258_v62, %v8274_v58  ;;  %v8289_v51 = vadd.f32 1.0, %v8281_v56  ;;  %v8293_v33 = vmul.f32 %v8285_v6, %v15911_v54  ;;  %v8294_v63 = vmul.f32 %v8286_v60, %v15914_v45 }
0x1156   : > { %v8283_v19 = vsel %vm8267_vm11, %v8259_v17, %v8275_v55  ;;  %v8290_v13 = vadd.f32 1.0, %v8282_v24  ;;  %v8295_v16 = vmul.f32 %v8287_v34, %v15919_v37  ;;  %v8296_v7 = vmul.f32 %v8288_v18, %v15925_v21  ;;  %8300 = vst.msk [vmem:[%s460_s21] sm:$0xff] %vm17434_vm15, %v8292_v38 }
0x1157   : > { %v8291_v12 = vadd.f32 1.0, %v8283_v19  ;;  %v8297_v54 = vmul.f32 %v8289_v51, %v15931_v47  ;;  %8301 = vst.msk [vmem:[%s460_s21 + $0x8] sm:$0xff] %vm17426_vm13, %v8293_v33 }
0x1158   : > { %8302 = vst.msk [vmem:[%s460_s21 + $0x10] sm:$0xff] %vm17435_vm14, %v8294_v63  ;;  %v8298_v48 = vmul.f32 %v8290_v13, %v15937_v5 }
0x1159   : > { %8303 = vst.msk [vmem:[%s460_s21 + $0x18] sm:$0xff] %vm17436_vm1, %v8295_v16  ;;  %v8299_v28 = vmul.f32 %v8291_v12, %v8091_v46 }
0x115a   : > { %8304 = vst.msk [vmem:[%s460_s21 + $0x20] sm:$0xff] %vm17437_vm3, %v8296_v7 }
0x115b   : > { %8305 = vst.msk [vmem:[%s460_s21 + $0x28] sm:$0xff] %vm17439_vm5, %v8297_v54 }
0x115c   : > { %8306 = vst.msk [vmem:[%s460_s21 + $0x30] sm:$0xff] %vm17440_vm0, %v8298_v48 }
0x115d   : > { %8307 = vst.msk [vmem:[%s460_s21 + $0x38] sm:$0xff] %vm17441_vm12, %v8299_v28 }
0x115e   : > { %9434 = shalt.err (!%p9431_p3)
}
0x115f   : > { %s9435_s15 = scalar_lea.hbm %s16026_s18, 1024  ;;  %s9439_s14 = scalar_lea.hbm %s17438_s0, 2048 }
0x1160   : > { %p9436_p4 = scmp.ne.s32.totalorder %s16026_s18, %s9435_s15  ;;  %p9440_p9 = scmp.lt.u32.totalorder %s16026_s18, %s17438_s0 }
0x1161   : > { %p9441_p10 = scmp.lt.u32.totalorder %s9439_s14, %s9435_s15  ;;  %p9443_p12 = scmp.lt.u32.totalorder %s9435_s15, %s16026_s18 }
0x1162   : > { %p9437_p7 = pnand %p9436_p4, %p9617_p5 }
0x1163   : > { %p9442_p11 = por %p9441_p10, %p9440_p9 }
0x1164   : > { %p9438_p8 = pneg %p9437_p7 }
0x1165   : > { %p9444_p13 = por %p9443_p12, %p9442_p11 }
0x1167   : > { %p9445_p0 = pnand %p9444_p13, %p9438_p8 }
0x1169   : > { %9448 = shalt.err (!%p9445_p0)
}
0x116a   : > { %s9503_s26 = smov 128  }
0x116b   : > { %8944 = dma.vmem_to_hbm [thread:$0]  (%p9617_p5), %s16029_s3, 1024, %s16026_s18, %s16035_s24, %s9503_s26, %s9503_s26, %s16406_s25  }
0x116c PF: > { %s17442_s4 = sld [smem:[#allocation10_spill]]  ;;  %s17443_s16 = sld [smem:[#allocation8_spill]] }
0x1172   : > { %p8950_p1 = scmp.ge.s32.totalorder %s17442_s4, 2  ;;  %s8337_s21 = sand.u32 1, %s17443_s16  }
0x1173   : > { %s8338_s17 = scalar_lea.sflag [#allocation6], %s8337_s21 }
0x1174   : > { %p8947_p2 = pnand %p8950_p1, %p9621_p6 }
0x1176   : > { %9466 = dma.done.wait (!%p8947_p2), %s8338_s17, 1024  }
0x1177   : > { %9468 = vsyncadd (!%p8947_p2), %s8338_s17, 4294966272  ;;  %s17445_s16 = sld [smem:[#allocation11_spill]]  ;;  %s17446_s19 = sld [smem:[#allocation9_spill]] }
0x1178   : > { %s17447_s15 = sld [smem:[#allocation12_spill]]  ;;  %s17448_s29 = smov %s9475_s30 }
0x117d   : > { %p24_p3 = scmp.ge.s32.totalorder %s17445_s16, 4   ;;  %s17449_s30 = smov %s17446_s19 }
0x117f   :  { %26 = sbr.rel (!%p24_p3) target bundleno = 12 (0xc), region = 117 }
0x1186   :  { %8343 = vsyncpa [#allocation6], 1 }
0x1187   :  { %8345 = vsyncpa [#allocation6 + $0x1], 1 }

</bundles_post_ra>
